<compile_context>
chip_gen: v7x
topology: tpu7x:2x2x1
jax: 0.10.0
libtpu: 0.0.40
codegen_flags: <defaults>
</compile_context>

<pallas_src>
import jax
import jax.numpy as jnp
from jax.experimental import pallas as pl
from jax.experimental.pallas import tpu as pltpu

IN_FEATURES = 256 * 4 * 7       # 7168
H1, H2, H3, OUT = 512, 128, 32, 10
OUT_PAD = 128                   # pad fc4 output to a full 128-lane vreg
K_TILE = 3584                   # 7168 / 3584 = 2 grid steps
LEAKY_SLOPE = 0.01              # F.leaky_relu default negative_slope


def _mlp_kernel(x_ref, w1_ref, b1_ref, w2_ref, b2_ref, w3_ref, b3_ref,
                w4_ref, b4_ref, out_ref, acc_ref):
    k = pl.program_id(0)

    @pl.when(k == 0)
    def _():
        acc_ref[...] = jnp.zeros_like(acc_ref)

    # fc1 partial product for this K tile.  x stays resident in VMEM; slice
    # the current K window out of it (lane-aligned, start multiple of K_TILE).
    start = pl.multiple_of(k * K_TILE, K_TILE)
    x_tile = x_ref[:, pl.ds(start, K_TILE)]
    acc_ref[...] += jnp.dot(x_tile.astype(w1_ref.dtype), w1_ref[...],
                            preferred_element_type=jnp.float32)

    @pl.when(k == pl.num_programs(0) - 1)
    def _():
        h1 = jnp.maximum(acc_ref[...] + b1_ref[...], 0.0)                  # relu
        z2 = jnp.dot(h1, w2_ref[...],
                     preferred_element_type=jnp.float32) + b2_ref[...]
        h2 = jnp.maximum(z2, 0.0)                                           # relu
        z3 = jnp.dot(h2, w3_ref[...],
                     preferred_element_type=jnp.float32) + b3_ref[...]
        h3 = jnp.where(z3 > 0, z3, LEAKY_SLOPE * z3)                        # leaky_relu
        z4 = jnp.dot(h3, w4_ref[...],
                     preferred_element_type=jnp.float32) + b4_ref[...]
        out_ref[...] = z4.astype(out_ref.dtype)


@jax.jit
def _forward_impl(x, w1, b1, w2, b2, w3, b3, w4p, b4p):
    b = x.shape[0]
    x2 = x.reshape(-1, IN_FEATURES)                 # x.view(-1, 256*4*7)

    # Pad batch to a multiple of 16 (clean bf16/f32 sublane tiling).
    bp = max(16, -(-b // 16) * 16)
    x2 = jnp.pad(x2, ((0, bp - b), (0, 0)))

    k_tiles = IN_FEATURES // K_TILE
    const = lambda k: (0, 0)                        # full-array block, no motion

    flops = 2 * bp * (IN_FEATURES * H1 + H1 * H2 + H2 * H3 + H3 * OUT_PAD)
    bytes_accessed = (
        x2.size * x2.dtype.itemsize
        + w1.size * w1.dtype.itemsize               # cached dtype (bf16 or f32)
        + (w2.size + w3.size + w4p.size
           + b1.size + b2.size + b3.size + b4p.size) * 4
        + bp * OUT_PAD * 4)

    out = pl.pallas_call(
        _mlp_kernel,
        out_shape=jax.ShapeDtypeStruct((bp, OUT_PAD), jnp.float32),
        grid_spec=pltpu.PrefetchScalarGridSpec(
            num_scalar_prefetch=0,
            grid=(k_tiles,),
            in_specs=[
                pl.BlockSpec((bp, IN_FEATURES), const),            # x (resident)
                pl.BlockSpec((K_TILE, H1), lambda k: (k, 0)),      # w1 (streamed)
                pl.BlockSpec((1, H1), const),                      # b1
                pl.BlockSpec((H1, H2), const),                     # w2
                pl.BlockSpec((1, H2), const),                      # b2
                pl.BlockSpec((H2, H3), const),                     # w3
                pl.BlockSpec((1, H3), const),                      # b3
                pl.BlockSpec((H3, OUT_PAD), const),                # w4 (pre-padded)
                pl.BlockSpec((1, OUT_PAD), const),                 # b4 (pre-padded)
            ],
            out_specs=pl.BlockSpec((bp, OUT_PAD), const),
            scratch_shapes=[pltpu.VMEM((bp, H1), jnp.float32)],
        ),
        compiler_params=pltpu.CompilerParams(
            dimension_semantics=("arbitrary",),
            vmem_limit_bytes=32 << 20,      # f32 parity path needs < 20 MiB
        ),
        cost_estimate=pl.CostEstimate(flops=flops, transcendentals=0,
                                      bytes_accessed=bytes_accessed),
    )(x2, w1, b1, w2, b2, w3, b3, w4p, b4p)

    return out[:b, :OUT]


def prepare_params(params, *, w1_dtype=jnp.bfloat16):
    """One-time parameter prep (do this at load time, not per forward call).

    Casts W1 to `w1_dtype` (bf16 default: halves the dominant HBM stream, f32
    accumulation on the MXU; pass jnp.float32 for exact-f32 parity) and pads
    fc4 weight/bias to a full 128-lane output block.
    """
    w1, b1, w2, b2, w3, b3, w4, b4 = params
    w1p = w1.astype(w1_dtype)
    w4p = jnp.pad(w4, ((0, 0), (0, OUT_PAD - OUT)))
    b4p = jnp.pad(b4, ((0, 0), (0, OUT_PAD - OUT)))
    return (w1p, b1, w2, b2, w3, b3, w4p, b4p)


def ann_classifier_v5_forward(x, prepped_params):
    """x: (B, 256, 4, 7) float32, prepped_params from prepare_params -> (B, 10)."""
    return _forward_impl(x, *prepped_params)


def init_params(key):
    """Deterministic synthetic weights (PyTorch-style uniform fan-in init)."""
    dims = [(IN_FEATURES, H1), (H1, H2), (H2, H3), (H3, OUT)]
    params = []
    for fan_in, fan_out in dims:
        kw, kb, key = jax.random.split(key, 3)
        bound = 1.0 / jnp.sqrt(fan_in)
        w = jax.random.uniform(kw, (fan_in, fan_out), jnp.float32, -bound, bound)
        b = jax.random.uniform(kb, (1, fan_out), jnp.float32, -bound, bound)
        params += [w, b]
    return tuple(params)


def _reference_forward(x, params):
    w1, b1, w2, b2, w3, b3, w4, b4 = params
    h = x.reshape(-1, IN_FEATURES)
    h = jnp.maximum(h @ w1 + b1, 0.0)
    h = jnp.maximum(h @ w2 + b2, 0.0)
    z = h @ w3 + b3
    h = jnp.where(z > 0, z, LEAKY_SLOPE * z)
    return h @ w4 + b4


if __name__ == "__main__":
    key = jax.random.PRNGKey(0)
    kx, kp = jax.random.split(key)
    # Shape implied by x.view(-1, 256*4*7): (B, 256, 4, 7), small batch.
    x = jax.random.normal(kx, (2, 256, 4, 7), jnp.float32)
    params = init_params(kp)

    ref = _reference_forward(x, params)

    # Exact-f32 parity path: tight tolerance against the pure-JAX reference.
    params_f32 = prepare_params(params, w1_dtype=jnp.float32)
    out_f32 = jax.block_until_ready(ann_classifier_v5_forward(x, params_f32))
    assert out_f32.shape == (2, 10)
    assert jnp.allclose(out_f32, ref, atol=1e-4, rtol=1e-4)

    # Default fast path: W1 cached as bf16 once at prep time (numerics-affecting).
    params_fast = prepare_params(params)
    out_fast = jax.block_until_ready(ann_classifier_v5_forward(x, params_fast))
    assert out_fast.shape == (2, 10)
    assert jnp.allclose(out_fast, ref, atol=5e-2, rtol=5e-2)

    print("KERNEL_OK")
</pallas_src>

<mosaic_0001>
module attributes {stable_mosaic.version = 11 : i64} {
  func.func @_mlp_kernel(%arg0: i32, %arg1: memref<16x7168xf32, #tpu.memory_space<vmem>>, %arg2: memref<3584x512xf32, #tpu.memory_space<vmem>>, %arg3: memref<1x512xf32, #tpu.memory_space<vmem>>, %arg4: memref<512x128xf32, #tpu.memory_space<vmem>>, %arg5: memref<1x128xf32, #tpu.memory_space<vmem>>, %arg6: memref<128x32xf32, #tpu.memory_space<vmem>>, %arg7: memref<1x32xf32, #tpu.memory_space<vmem>>, %arg8: memref<32x128xf32, #tpu.memory_space<vmem>>, %arg9: memref<1x128xf32, #tpu.memory_space<vmem>>, %arg10: memref<16x128xf32, #tpu.memory_space<vmem>>, %arg11: memref<16x512xf32, #tpu.memory_space<vmem>>) attributes {dimension_semantics = [#tpu.dimension_semantics<arbitrary>], iteration_bounds = array<i64: 2>, scalar_prefetch = 0 : i64, scratch_operands = 1 : i64, tpu.core_type = #tpu.core_type<tc>, window_params = [{pipeline_mode = #tpu.pipeline_mode<synchronous>, transform_indices = @transform_0, window_bounds = array<i64: 16, 7168>}, {transform_indices = @transform_1, window_bounds = array<i64: 3584, 512>}, {pipeline_mode = #tpu.pipeline_mode<synchronous>, transform_indices = @transform_2, window_bounds = array<i64: 1, 512>}, {pipeline_mode = #tpu.pipeline_mode<synchronous>, transform_indices = @transform_3, window_bounds = array<i64: 512, 128>}, {pipeline_mode = #tpu.pipeline_mode<synchronous>, transform_indices = @transform_4, window_bounds = array<i64: 1, 128>}, {pipeline_mode = #tpu.pipeline_mode<synchronous>, transform_indices = @transform_5, window_bounds = array<i64: 128, 32>}, {pipeline_mode = #tpu.pipeline_mode<synchronous>, transform_indices = @transform_6, window_bounds = array<i64: 1, 32>}, {pipeline_mode = #tpu.pipeline_mode<synchronous>, transform_indices = @transform_7, window_bounds = array<i64: 32, 128>}, {pipeline_mode = #tpu.pipeline_mode<synchronous>, transform_indices = @transform_8, window_bounds = array<i64: 1, 128>}, {pipeline_mode = #tpu.pipeline_mode<synchronous>, transform_indices = @transform_9, window_bounds = array<i64: 16, 128>}]} {
    %c0_i32 = arith.constant 0 : i32
    %0 = arith.cmpi eq, %arg0, %c0_i32 : i32
    %1 = arith.extui %0 : i1 to i32
    %c0_i32_0 = arith.constant 0 : i32
    %2 = arith.cmpi ne, %1, %c0_i32_0 : i32
    scf.if %2 {
      %cst_8 = arith.constant 0.000000e+00 : f32
      %15 = vector.broadcast %cst_8 : f32 to vector<16x512xf32>
      %c0_9 = arith.constant 0 : index
      %c0_10 = arith.constant 0 : index
      %16 = vector.load %arg11[%c0_9, %c0_10] : memref<16x512xf32, #tpu.memory_space<vmem>>, vector<16x512xf32>
      tpu.vector_store %arg11[%c0_9, %c0_10], %15 {strides = array<i32>} : memref<16x512xf32, #tpu.memory_space<vmem>>, vector<16x512xf32>,
    } else {
    }
    %c3584_i32 = arith.constant 3584 : i32
    %3 = arith.muli %arg0, %c3584_i32 : i32
    %4 = tpu.assume_multiple %3, 3584 : i32
    %c0 = arith.constant 0 : index
    %5 = arith.index_cast %4 : i32 to index
    %6 = vector.load %arg1[%c0, %5] : memref<16x7168xf32, #tpu.memory_space<vmem>>, vector<16x3584xf32>
    %c0_1 = arith.constant 0 : index
    %c0_2 = arith.constant 0 : index
    %7 = vector.load %arg11[%c0_1, %c0_2] : memref<16x512xf32, #tpu.memory_space<vmem>>, vector<16x512xf32>
    %c0_3 = arith.constant 0 : index
    %c0_4 = arith.constant 0 : index
    %8 = vector.load %arg2[%c0_3, %c0_4] : memref<3584x512xf32, #tpu.memory_space<vmem>>, vector<3584x512xf32>
    %cst = arith.constant dense<0.000000e+00> : vector<16x512xf32>
    %9 = tpu.matmul %6, %8, %cst {dimension_numbers = #tpu.dot_dimension_numbers<[1], [0], [0], [1], [0, 0, 1, 1], [], []>} : vector<16x3584xf32>, vector<3584x512xf32>, vector<16x512xf32> -> vector<16x512xf32>
    %10 = arith.addf %7, %9 : vector<16x512xf32>
    %c0_5 = arith.constant 0 : index
    %c0_6 = arith.constant 0 : index
    %11 = vector.load %arg11[%c0_5, %c0_6] : memref<16x512xf32, #tpu.memory_space<vmem>>, vector<16x512xf32>
    tpu.vector_store %arg11[%c0_5, %c0_6], %10 {strides = array<i32>} : memref<16x512xf32, #tpu.memory_space<vmem>>, vector<16x512xf32>,
    %c1_i32 = arith.constant 1 : i32
    %12 = arith.cmpi eq, %arg0, %c1_i32 : i32
    %13 = arith.extui %12 : i1 to i32
    %c0_i32_7 = arith.constant 0 : i32
    %14 = arith.cmpi ne, %13, %c0_i32_7 : i32
    scf.if %14 {
      %c0_8 = arith.constant 0 : index
      %c0_9 = arith.constant 0 : index
      %15 = vector.load %arg11[%c0_8, %c0_9] : memref<16x512xf32, #tpu.memory_space<vmem>>, vector<16x512xf32>
      %c0_10 = arith.constant 0 : index
      %c0_11 = arith.constant 0 : index
      %16 = vector.load %arg3[%c0_10, %c0_11] : memref<1x512xf32, #tpu.memory_space<vmem>>, vector<1x512xf32>
      %17 = vector.broadcast %16 : vector<1x512xf32> to vector<16x512xf32>
      %18 = arith.addf %15, %17 : vector<16x512xf32>
      %cst_12 = arith.constant 0.000000e+00 : f32
      %19 = vector.broadcast %cst_12 : f32 to vector<16x512xf32>
      %20 = arith.maximumf %18, %19 : vector<16x512xf32>
      %c0_13 = arith.constant 0 : index
      %c0_14 = arith.constant 0 : index
      %21 = vector.load %arg4[%c0_13, %c0_14] : memref<512x128xf32, #tpu.memory_space<vmem>>, vector<512x128xf32>
      %cst_15 = arith.constant dense<0.000000e+00> : vector<16x128xf32>
      %22 = tpu.matmul %20, %21, %cst_15 {dimension_numbers = #tpu.dot_dimension_numbers<[1], [0], [0], [1], [0, 0, 1, 1], [], []>} : vector<16x512xf32>, vector<512x128xf32>, vector<16x128xf32> -> vector<16x128xf32>
      %c0_16 = arith.constant 0 : index
      %c0_17 = arith.constant 0 : index
      %23 = vector.load %arg5[%c0_16, %c0_17] : memref<1x128xf32, #tpu.memory_space<vmem>>, vector<1x128xf32>
      %24 = vector.broadcast %23 : vector<1x128xf32> to vector<16x128xf32>
      %25 = arith.addf %22, %24 : vector<16x128xf32>
      %cst_18 = arith.constant 0.000000e+00 : f32
      %26 = vector.broadcast %cst_18 : f32 to vector<16x128xf32>
      %27 = arith.maximumf %25, %26 : vector<16x128xf32>
      %c0_19 = arith.constant 0 : index
      %c0_20 = arith.constant 0 : index
      %28 = vector.load %arg6[%c0_19, %c0_20] : memref<128x32xf32, #tpu.memory_space<vmem>>, vector<128x32xf32>
      %cst_21 = arith.constant dense<0.000000e+00> : vector<16x32xf32>
      %29 = tpu.matmul %27, %28, %cst_21 {dimension_numbers = #tpu.dot_dimension_numbers<[1], [0], [0], [1], [0, 0, 1, 1], [], []>} : vector<16x128xf32>, vector<128x32xf32>, vector<16x32xf32> -> vector<16x32xf32>
      %c0_22 = arith.constant 0 : index
      %c0_23 = arith.constant 0 : index
      %30 = vector.load %arg7[%c0_22, %c0_23] : memref<1x32xf32, #tpu.memory_space<vmem>>, vector<1x32xf32>
      %31 = vector.broadcast %30 : vector<1x32xf32> to vector<16x32xf32>
      %32 = arith.addf %29, %31 : vector<16x32xf32>
      %cst_24 = arith.constant 0.000000e+00 : f32
      %33 = vector.broadcast %cst_24 : f32 to vector<16x32xf32>
      %34 = arith.cmpf ogt, %32, %33 : vector<16x32xf32>
      %cst_25 = arith.constant 0.00999999977 : f32
      %35 = vector.broadcast %cst_25 : f32 to vector<16x32xf32>
      %36 = arith.mulf %35, %32 : vector<16x32xf32>
      %37 = arith.select %34, %32, %36 : vector<16x32xi1>, vector<16x32xf32>
      %c0_26 = arith.constant 0 : index
      %c0_27 = arith.constant 0 : index
      %38 = vector.load %arg8[%c0_26, %c0_27] : memref<32x128xf32, #tpu.memory_space<vmem>>, vector<32x128xf32>
      %cst_28 = arith.constant dense<0.000000e+00> : vector<16x128xf32>
      %39 = tpu.matmul %37, %38, %cst_28 {dimension_numbers = #tpu.dot_dimension_numbers<[1], [0], [0], [1], [0, 0, 1, 1], [], []>} : vector<16x32xf32>, vector<32x128xf32>, vector<16x128xf32> -> vector<16x128xf32>
      %c0_29 = arith.constant 0 : index
      %c0_30 = arith.constant 0 : index
      %40 = vector.load %arg9[%c0_29, %c0_30] : memref<1x128xf32, #tpu.memory_space<vmem>>, vector<1x128xf32>
      %41 = vector.broadcast %40 : vector<1x128xf32> to vector<16x128xf32>
      %42 = arith.addf %39, %41 : vector<16x128xf32>
      %c0_31 = arith.constant 0 : index
      %c0_32 = arith.constant 0 : index
      %43 = vector.load %arg10[%c0_31, %c0_32] : memref<16x128xf32, #tpu.memory_space<vmem>>, vector<16x128xf32>
      tpu.vector_store %arg10[%c0_31, %c0_32], %42 {strides = array<i32>} : memref<16x128xf32, #tpu.memory_space<vmem>>, vector<16x128xf32>,
    } else {
    }
    return
  }
  func.func @transform_0(%arg0: i32) -> (i32, i32) {
    %c0_i32 = arith.constant 0 : i32
    %c0_i32_0 = arith.constant 0 : i32
    %c0_i32_1 = arith.constant 0 : i32
    return %c0_i32, %c0_i32_0 : i32, i32
  }
  func.func @transform_1(%arg0: i32) -> (i32, i32) {
    %c0_i32 = arith.constant 0 : i32
    %c0_i32_0 = arith.constant 0 : i32
    return %arg0, %c0_i32 : i32, i32
  }
  func.func @transform_2(%arg0: i32) -> (i32, i32) {
    %c0_i32 = arith.constant 0 : i32
    %c0_i32_0 = arith.constant 0 : i32
    %c0_i32_1 = arith.constant 0 : i32
    return %c0_i32, %c0_i32_0 : i32, i32
  }
  func.func @transform_3(%arg0: i32) -> (i32, i32) {
    %c0_i32 = arith.constant 0 : i32
    %c0_i32_0 = arith.constant 0 : i32
    %c0_i32_1 = arith.constant 0 : i32
    return %c0_i32, %c0_i32_0 : i32, i32
  }
  func.func @transform_4(%arg0: i32) -> (i32, i32) {
    %c0_i32 = arith.constant 0 : i32
    %c0_i32_0 = arith.constant 0 : i32
    %c0_i32_1 = arith.constant 0 : i32
    return %c0_i32, %c0_i32_0 : i32, i32
  }
  func.func @transform_5(%arg0: i32) -> (i32, i32) {
    %c0_i32 = arith.constant 0 : i32
    %c0_i32_0 = arith.constant 0 : i32
    %c0_i32_1 = arith.constant 0 : i32
    return %c0_i32, %c0_i32_0 : i32, i32
  }
  func.func @transform_6(%arg0: i32) -> (i32, i32) {
    %c0_i32 = arith.constant 0 : i32
    %c0_i32_0 = arith.constant 0 : i32
    %c0_i32_1 = arith.constant 0 : i32
    return %c0_i32, %c0_i32_0 : i32, i32
  }
  func.func @transform_7(%arg0: i32) -> (i32, i32) {
    %c0_i32 = arith.constant 0 : i32
    %c0_i32_0 = arith.constant 0 : i32
    %c0_i32_1 = arith.constant 0 : i32
    return %c0_i32, %c0_i32_0 : i32, i32
  }
  func.func @transform_8(%arg0: i32) -> (i32, i32) {
    %c0_i32 = arith.constant 0 : i32
    %c0_i32_0 = arith.constant 0 : i32
    %c0_i32_1 = arith.constant 0 : i32
    return %c0_i32, %c0_i32_0 : i32, i32
  }
  func.func @transform_9(%arg0: i32) -> (i32, i32) {
    %c0_i32 = arith.constant 0 : i32
    %c0_i32_0 = arith.constant 0 : i32
    %c0_i32_1 = arith.constant 0 : i32
    return %c0_i32, %c0_i32_0 : i32, i32
  }
}

</mosaic_0001>

<bundles_post_ra>
// kernel: _forward_impl.1
= control target key start
LH: loop header
LB: loop body
LE: loop exit
PB: predicated region body
PF: predicated region fallthrough
CT: control target
= control target key end

     0   :  { %s9801_s0 = inlined_call_operand.vmem [shape: f32[16,7168], index: 0, kind: input, shape index: {}]   ;;  %s9802_s1 = inlined_call_operand.hbm [shape: f32[7168,512], index: 1, kind: input, shape index: {}]   ;;  %s9803_s2 = inlined_call_operand.hbm [shape: f32[1,512], index: 2, kind: input, shape index: {}]   ;;  %s9804_s3 = inlined_call_operand.hbm [shape: f32[512,128], index: 3, kind: input, shape index: {}]   ;;  %s9805_s4 = inlined_call_operand.hbm [shape: f32[1,128], index: 4, kind: input, shape index: {}]   ;;  %s9806_s5 = inlined_call_operand.vmem [shape: f32[128,32], index: 5, kind: input, shape index: {}]   ;;  %s9807_s6 = inlined_call_operand.hbm [shape: f32[1,32], index: 6, kind: input, shape index: {}]   ;;  %s9808_s7 = inlined_call_operand.hbm [shape: f32[32,128], index: 7, kind: input, shape index: {}]   ;;  %s9809_s8 = inlined_call_operand.hbm [shape: f32[1,128], index: 8, kind: input, shape index: {}]   ;;  %s9810_s9 = inlined_call_operand.vmem [shape: f32[16,128], index: 9, kind: output, shape index: {}]  }
   0x1   :  { %9814 = sst [smem:[#allocation18_spill]] %s9803_s2 }
   0x2   :  { %9815 = sst [smem:[#allocation19_spill]] %s9805_s4 }
   0x3   :  { %9816 = sst [smem:[#allocation20_spill]] %s9810_s9 }
   0x4   :  { %14 = vsyncpa [#allocation4], 0 }
   0x5   :  { %16 = vsyncpa [#allocation4 + $0x1], 0 }
   0x6   :  { %17 = vsyncpa [#allocation6], 0 }
   0x7   :  { %18 = vsyncpa [#allocation9], 0 }
   0x8   :  { %19 = vsyncpa [#allocation12], 0  ;;  %s7626_s30 = smov 0   ;;  %s7628_s10 = smov 0  }
   0x9   :  { %s7630_s11 = smov 0   ;;  %s7632_s12 = smov 0  }
   0xa LB: > { %s7564_s13 = smov [#allocation5]   ;;  %s7647_s15 = sadd.s32 4294967295, %s7562_s12   ;;  %s7562_s12 = sphi %s7632_s12, %s9837_s12   ;;  %s7558_s11 = sphi %s7630_s11, %s9836_s11   ;;  %s7554_s10 = sphi %s7628_s10, %s9835_s10   ;;  %s7550_s30 = sphi %s7626_s30, %s9834_s30  }
   0xb   : > { %s261_s14 = sshll.u32 %s7564_s13, 4  ;;  %p5035_p0 = scmp.ge.s32.totalorder %s7562_s12, 1  ;;  %s262_s14 = int_to_ptr.vmem [resolvable:$true] %s261_s14 }
   0xc   : > { %p9811_p1 = scmp.eq.s32.totalorder %s7647_s15, 0  ;;  %p245_p2 = scmp.lt.s32.totalorder %s7562_s12, 3 }
   0xd   : > { %s7565_s17 = smov [#allocation8]   ;;  %s7566_s20 = smov [#allocation11]  }
   0xe   : > { %p7653_p4 = pnand %p5035_p0, %p245_p2  ;;  %s285_s18 = sshll.u32 %s7565_s17, 4  ;;  %s7659_s18 = int_to_ptr.vmem [resolvable:$true] %s285_s18 }
   0xf   : > { %s309_s21 = sshll.u32 %s7566_s20, 4  ;;  %s9819_s2 = sld [smem:[#allocation18_spill]]  ;;  %s7667_s21 = int_to_ptr.vmem [resolvable:$true] %s309_s21 }
  0x10   : > { %s9817_s16 = scalar_select %p7653_p4, 1, 0 }
  0x11   : > { %p7239_p5 = pneg %p7653_p4 }
  0x13   : > { %p7663_p6 = pnand %p7239_p5, %p9811_p1 }
  0x15   : > { %s7318_s24 = scalar_lea.hbm %s9819_s2, 64  ;;  %p7677_p8 = pneg %p7663_p6 }
  0x16   : > { %p7319_p7 = scmp.ne.s32.totalorder %s9819_s2, %s7318_s24  ;;  %p7325_p11 = scmp.lt.u32.totalorder %s7318_s24, %s9819_s2 }
  0x18   : > { %p7321_p9 = pnand %p7677_p8, %p7319_p7 }
  0x1a   : > { %p7322_p10 = pneg %p7321_p9 }
  0x1c   : > { %p7327_p12 = pnand %p7325_p11, %p7322_p10 }
  0x1e   : > { %7330 = shalt.err (!%p7327_p12)
}
  0x1f   : > { %s7331_s13 = scalar_lea.vmem %s262_s14, 64  ;;  %p7339_p5 = scmp.lt.s32.totalorder %s262_s14, %s262_s14 }
  0x20   : > { %p7332_p13 = scmp.ne.s32.totalorder %s262_s14, %s7331_s13  ;;  %p7340_p3 = scmp.lt.s32.totalorder %s7331_s13, %s7331_s13 }
  0x22   : > { %p7334_p0 = pnand %p7332_p13, %p7677_p8  ;;  %p7341_p1 = por %p7340_p3, %p7339_p5 }
  0x24   : > { %p7335_p2 = pneg %p7334_p0 }
  0x26   : > { %p7342_p4 = pnand %p7341_p1, %p7335_p2 }
  0x28   : > { %7345 = shalt.err (!%p7342_p4)
}
  0x29   : > { %7242 = dma.hbm_to_vmem [thread:$0]  (!%p7663_p6), %s9819_s2, 64, %s262_s14, [#allocation6]  }
  0x2a   : > { %s9821_s4 = sld [smem:[#allocation19_spill]] }
  0x30   : > { %s7346_s24 = scalar_lea.hbm %s9821_s4, 16 }
  0x31   : > { %p7347_p7 = scmp.ne.s32.totalorder %s9821_s4, %s7346_s24  ;;  %p7353_p1 = scmp.lt.u32.totalorder %s7346_s24, %s9821_s4 }
  0x33   : > { %p7349_p9 = pnand %p7347_p7, %p7677_p8 }
  0x35   : > { %p7350_p3 = pneg %p7349_p9 }
  0x37   : > { %p7355_p4 = pnand %p7353_p1, %p7350_p3 }
  0x39   : > { %7358 = shalt.err (!%p7355_p4)
}
  0x3a   : > { %s7359_s14 = scalar_lea.vmem %s7659_s18, 16  ;;  %s7366_s13 = scalar_lea.vmem %s7659_s18, 32 }
  0x3b   : > { %p7360_p10 = scmp.ne.s32.totalorder %s7659_s18, %s7359_s14  ;;  %p7367_p13 = scmp.lt.s32.totalorder %s7659_s18, %s7659_s18 }
  0x3c   : > { %p7368_p0 = scmp.lt.s32.totalorder %s7366_s13, %s7359_s14 }
  0x3d   : > { %p7362_p11 = pnand %p7360_p10, %p7677_p8 }
  0x3e   : > { %p7369_p2 = por %p7368_p0, %p7367_p13 }
  0x3f   : > { %p7363_p12 = pneg %p7362_p11 }
  0x41   : > { %p7370_p5 = pnand %p7369_p2, %p7363_p12 }
  0x43   : > { %7373 = shalt.err (!%p7370_p5)
}
  0x44   : > { %7248 = dma.hbm_to_vmem [thread:$0]  (!%p7663_p6), %s9821_s4, 16, %s7659_s18, [#allocation9]  }
  0x45   : > { %s7374_s24 = scalar_lea.hbm %s9808_s7, 512 }
  0x46   : > { %p7375_p7 = scmp.ne.s32.totalorder %s9808_s7, %s7374_s24  ;;  %p7381_p1 = scmp.lt.u32.totalorder %s7374_s24, %s9808_s7 }
  0x48   : > { %p7377_p9 = pnand %p7375_p7, %p7677_p8 }
  0x4a   : > { %p7378_p3 = pneg %p7377_p9 }
  0x4c   : > { %p7383_p4 = pnand %p7381_p1, %p7378_p3 }
  0x4e   : > { %7386 = shalt.err (!%p7383_p4)
}
  0x4f   : > { %s7387_s18 = scalar_lea.vmem %s7667_s21, 512  ;;  %p7395_p13 = scmp.lt.s32.totalorder %s7667_s21, %s7667_s21 }
  0x50   : > { %p7388_p10 = scmp.ne.s32.totalorder %s7667_s21, %s7387_s18  ;;  %p7396_p0 = scmp.lt.s32.totalorder %s7387_s18, %s7387_s18 }
  0x52   : > { %p7390_p11 = pnand %p7388_p10, %p7677_p8  ;;  %p7397_p2 = por %p7396_p0, %p7395_p13 }
  0x54   : > { %p7391_p12 = pneg %p7390_p11 }
  0x56   : > { %p7398_p5 = pnand %p7397_p2, %p7391_p12 }
  0x58   : > { %7401 = shalt.err (!%p7398_p5)
}
  0x59   : > { %s7567_s14 = smov 128   ;;  %s7568_s13 = smov 8  }
  0x5a   : > { %7254 = dma.hbm_to_vmem [thread:$0]  (!%p7663_p6), %s9808_s7, 512, %s7667_s21, [#allocation12], %s7567_s14, %s7567_s14, %s7568_s13  }
  0x5b   : > { %s7569_s22 = smov [#allocation7]   ;;  %s7570_s24 = smov [#allocation10]  }
  0x5c   : > { %s271_s23 = sshll.u32 %s7569_s22, 4  ;;  %s299_s25 = sshll.u32 %s7570_s24, 4  ;;  %s272_s23 = int_to_ptr.vmem [resolvable:$true] %s271_s23  ;;  %s300_s25 = int_to_ptr.vmem [resolvable:$true] %s299_s25 }
  0x5d   : > { %s7402_s29 = scalar_lea.hbm %s9804_s3, 8192 }
  0x5e   : > { %p7403_p7 = scmp.ne.s32.totalorder %s9804_s3, %s7402_s29  ;;  %p7409_p1 = scmp.lt.u32.totalorder %s7402_s29, %s9804_s3 }
  0x60   : > { %p7405_p9 = pnand %p7403_p7, %p7677_p8 }
  0x62   : > { %p7406_p3 = pneg %p7405_p9 }
  0x64   : > { %p7411_p4 = pnand %p7409_p1, %p7406_p3 }
  0x66   : > { %7414 = shalt.err (!%p7411_p4)
}
  0x67   : > { %s7415_s21 = scalar_lea.vmem %s272_s23, 8192  ;;  %p7423_p13 = scmp.lt.s32.totalorder %s272_s23, %s272_s23 }
  0x68   : > { %p7416_p10 = scmp.ne.s32.totalorder %s272_s23, %s7415_s21  ;;  %p7424_p0 = scmp.lt.s32.totalorder %s7415_s21, %s7415_s21 }
  0x6a   : > { %p7418_p11 = pnand %p7416_p10, %p7677_p8  ;;  %p7425_p2 = por %p7424_p0, %p7423_p13 }
  0x6c   : > { %p7419_p12 = pneg %p7418_p11 }
  0x6e   : > { %p7426_p5 = pnand %p7425_p2, %p7419_p12 }
  0x70   : > { %7429 = shalt.err (!%p7426_p5)
}
  0x71   : > { %7245 = dma.hbm_to_vmem [thread:$0]  (!%p7663_p6), %s9804_s3, 8192, %s272_s23, [#allocation6], %s7567_s14, %s7567_s14, %s7568_s13  }
  0x72   : > { %s7430_s20 = scalar_lea.hbm %s9807_s6, 16 }
  0x73   : > { %p7431_p7 = scmp.ne.s32.totalorder %s9807_s6, %s7430_s20  ;;  %p7437_p1 = scmp.lt.u32.totalorder %s7430_s20, %s9807_s6 }
  0x75   : > { %p7433_p9 = pnand %p7431_p7, %p7677_p8 }
  0x77   : > { %p7434_p3 = pneg %p7433_p9 }
  0x79   : > { %p7439_p4 = pnand %p7437_p1, %p7434_p3 }
  0x7b   : > { %7442 = shalt.err (!%p7439_p4)
}
  0x7c   : > { %s7443_s29 = scalar_lea.vmem %s300_s25, 16  ;;  %s7450_s14 = scalar_lea.vmem %s300_s25, 32 }
  0x7d   : > { %p7444_p10 = scmp.ne.s32.totalorder %s300_s25, %s7443_s29  ;;  %p7451_p13 = scmp.lt.s32.totalorder %s300_s25, %s300_s25 }
  0x7e   : > { %p7452_p0 = scmp.lt.s32.totalorder %s7450_s14, %s7443_s29 }
  0x7f   : > { %p7446_p11 = pnand %p7444_p10, %p7677_p8 }
  0x80   : > { %p7453_p2 = por %p7452_p0, %p7451_p13 }
  0x81   : > { %p7447_p12 = pneg %p7446_p11 }
  0x83   : > { %p7454_p5 = pnand %p7453_p2, %p7447_p12 }
  0x85   : > { %7457 = shalt.err (!%p7454_p5)
}
  0x86   : > { %7251 = dma.hbm_to_vmem [thread:$0]  (!%p7663_p6), %s9807_s6, 16, %s300_s25, [#allocation9]  }
  0x87   : > { %s7571_s18 = smov [#allocation13]   ;;  %s7458_s4 = scalar_lea.hbm %s9809_s8, 16 }
  0x88   : > { %s323_s21 = sshll.u32 %s7571_s18, 4  ;;  %p7459_p7 = scmp.ne.s32.totalorder %s9809_s8, %s7458_s4  ;;  %s324_s21 = int_to_ptr.vmem [resolvable:$true] %s323_s21 }
  0x89   : > { %p7465_p1 = scmp.lt.u32.totalorder %s7458_s4, %s9809_s8 }
  0x8a   : > { %p7461_p9 = pnand %p7459_p7, %p7677_p8 }
  0x8c   : > { %p7462_p3 = pneg %p7461_p9 }
  0x8e   : > { %p7467_p4 = pnand %p7465_p1, %p7462_p3 }
  0x90   : > { %7470 = shalt.err (!%p7467_p4)
}
  0x91   : > { %s7471_s25 = scalar_lea.vmem %s324_s21, 16  ;;  %s7478_s26 = scalar_lea.vmem %s324_s21, 32 }
  0x92   : > { %p7472_p10 = scmp.ne.s32.totalorder %s324_s21, %s7471_s25  ;;  %p7479_p13 = scmp.lt.s32.totalorder %s324_s21, %s324_s21 }
  0x93   : > { %p7480_p0 = scmp.lt.s32.totalorder %s7478_s26, %s7471_s25 }
  0x94   : > { %p7474_p11 = pnand %p7472_p10, %p7677_p8 }
  0x95   : > { %p7481_p2 = por %p7480_p0, %p7479_p13 }
  0x96   : > { %p7475_p12 = pneg %p7474_p11 }
  0x98   : > { %p7482_p5 = pnand %p7481_p2, %p7475_p12 }
  0x9a   : > { %7485 = shalt.err (!%p7482_p5)
}
  0x9b   : > { %7257 = dma.hbm_to_vmem [thread:$0]  (!%p7663_p6), %s9809_s8, 16, %s324_s21, [#allocation12]  }
  0x9c   : > { %s7795_s27 = sadd.s32 1, %s7562_s12   ;;  %s53_s19 = sadd.s32 1, %s7558_s11 }
  0x9d   : > { %s50_s14 = ssub.s32 %s7562_s12, %s7795_s27  ;;  %p60_p8 = scmp.ne.s32.totalorder %s7558_s11, %s7554_s10 }
  0x9e   : > { %p51_p7 = scmp.eq.s32.totalorder %s50_s14, 0  ;;  %p61_p9 = scmp.eq.s32.totalorder %s7562_s12, 0 }
  0x9f   : > { %p66_p3 = scmp.ne.s32.totalorder %s7554_s10, %s7550_s30  ;;  %p7268_p1 = scmp.lt.s32.totalorder %s7562_s12, 2 }
  0xa0   : > { %s7807_s13 = scalar_select %p51_p7, %s7558_s11, %s53_s19  }
  0xa1   : > { %p62_p4 = por %p61_p9, %p60_p8  ;;  %p9822_p10 = scmp.eq.s32.totalorder %s7647_s15, 0 }
  0xa2   : > { %s334_s18 = sand.u32 1, %s7558_s11   ;;  %s5064_s21 = smul.u32 229376, %s7562_s12 }
  0xa3   : > { %p7811_p11 = por %p9822_p10, %p66_p3  ;;  %s7211_s2 = smul.u32 14336, %s334_s18 }
  0xa4   : > { %s7820_s9 = scalar_lea.hbm %s9802_s1, %s5064_s21  ;;  %p7822_p6 = pnand %p7268_p1, %p62_p4 }
  0xa5   : > { %s338_s20 = scalar_lea.vmem [#allocation3], %s7211_s2  ;;  %s7828_s12 = scalar_lea.sflag [#allocation4], %s334_s18 }
  0xa6   : > { %s346_s22 = sshll.u32 %s338_s20, 4  ;;  %s7486_s24 = scalar_lea.hbm %s7820_s9, 229376  ;;  %s7826_s22 = int_to_ptr.vmem [resolvable:$true] %s346_s22 }
  0xa7   : > { %p7487_p12 = scmp.ne.s32.totalorder %s7820_s9, %s7486_s24  ;;  %p7488_p13 = pneg %p7822_p6 }
  0xa8   : > { %s7491_s28 = scalar_lea.hbm %s9802_s1, 458752  ;;  %p7492_p5 = scmp.lt.u32.totalorder %s7820_s9, %s9802_s1 }
  0xa9   : > { %p7489_p0 = pnand %p7488_p13, %p7487_p12  ;;  %p7493_p8 = scmp.lt.u32.totalorder %s7491_s28, %s7486_s24 }
  0xaa   : > { %p7495_p9 = scmp.lt.u32.totalorder %s7486_s24, %s7820_s9 }
  0xab   : > { %p7490_p2 = pneg %p7489_p0  ;;  %p7494_p7 = por %p7493_p8, %p7492_p5 }
  0xad   : > { %p7496_p3 = por %p7495_p9, %p7494_p7 }
  0xaf   : > { %p7497_p1 = pnand %p7496_p3, %p7490_p2 }
  0xb1   : > { %7500 = shalt.err (!%p7497_p1)
}
  0xb2   : > { %s7501_s14 = scalar_lea.vmem %s7826_s22, 229376  ;;  %s7572_s18 = smov [#allocation3]  }
  0xb3   : > { %p7502_p4 = scmp.ne.s32.totalorder %s7826_s22, %s7501_s14  ;;  %s7506_s21 = sshll.u32 %s7572_s18, 4  ;;  %s7507_s21 = int_to_ptr.vmem [resolvable:$false] %s7506_s21 }
  0xb4   : > { %s7508_s2 = scalar_lea.vmem %s7507_s21, 458752  ;;  %p7509_p0 = scmp.lt.s32.totalorder %s7826_s22, %s7507_s21 }
  0xb5   : > { %p7504_p10 = pnand %p7502_p4, %p7488_p13  ;;  %p7510_p5 = scmp.lt.s32.totalorder %s7508_s2, %s7501_s14 }
  0xb7   : > { %p7505_p12 = pneg %p7504_p10  ;;  %p7511_p8 = por %p7510_p5, %p7509_p0 }
  0xb9   : > { %p7512_p7 = pnand %p7511_p8, %p7505_p12 }
  0xbb   : > { %7515 = shalt.err (!%p7512_p7)
}
  0xbc   : > { %s7573_s17 = smov 512   ;;  %s7574_s4 = smov 32  }
  0xbd   : > { %7261 = dma.hbm_to_vmem [thread:$0]  (!%p7822_p6), %s7820_s9, 229376, %s7826_s22, %s7828_s12, %s7573_s17, %s7573_s17, %s7574_s4  }
  0xbe   : > { %p9825_p13 = scmp.ne.s32.totalorder %s9817_s16, 0 }
  0xbf   : > { %s360_s20 = sand.u32 (!%p9825_p13), 1, %s7554_s10  }
  0xc0   : > { %358 = sbr.rel (%p9825_p13) target bundleno = 2014 (0x7de), region = 56  ;;  %s361_s25 = scalar_lea.sflag (!%p9825_p13), [#allocation4], %s360_s20 }
  0xc1   : > { %s7212_s24 = smul.u32 (!%p9825_p13), 14336, %s360_s20 }
  0xc3   : > { %s7859_s26 = scalar_lea.vmem (!%p9825_p13), [#allocation3], %s7212_s24 }
  0xc7   : > { %7533 = dma.done.wait (%p7811_p11), %s361_s25, 229376  }
  0xc8   : > { %7535 = vsyncadd (%p7811_p11), %s361_s25, 4294737920  ;;  %p9826_p2 = scmp.eq.s32.totalorder %s7647_s15, 0 }
  0xca   : > { %7537 = dma.done.wait (%p9826_p2), [#allocation6], 8256   ;;  %p9827_p6 = pmov %p9826_p2 }
  0xcb   : > { %p9828_p9 = pmov %p9826_p2 }
  0xcc   : > { %7539 = vsyncadd (%p9827_p6), [#allocation6], 4294959040 }
  0xcd   : > { %7541 = dma.done.wait (%p9828_p9), [#allocation9], 32   ;;  %p9829_p3 = pmov %p9826_p2 }
  0xce   : > { %p9830_p1 = pmov %p9826_p2 }
  0xcf   : > { %7543 = vsyncadd (%p9829_p3), [#allocation9], 4294967264 }
  0xd0   : > { %7545 = dma.done.wait (%p9830_p1), [#allocation12], 528   ;;  %p9831_p4 = pmov %p9830_p1 }
  0xd1   : > { %p9832_p11 = scmp.ne.s32.totalorder %s7647_s15, 0 }
  0xd2   : > { %7547 = vsyncadd (%p9831_p4), [#allocation12], 4294966768  ;;  %v7575_v0 = vmov (!%p9832_p11), 0.0  }
  0xd3   : > { %422 = sbr.rel (%p9832_p11) target bundleno = 218 (0xda), region = 88  ;;  %423 = vst [vmem:[#allocation2] sm:$0xff] (!%p9832_p11), %v7575_v0  ;;  %424 = vst [vmem:[#allocation2 + $0x8] sm:$0xff] (!%p9832_p11), %v7575_v0 }
  0xd4   : > { %425 = vst [vmem:[#allocation2 + $0x10] sm:$0xff] (!%p9832_p11), %v7575_v0  ;;  %426 = vst [vmem:[#allocation2 + $0x18] sm:$0xff] (!%p9832_p11), %v7575_v0 }
  0xd5   : > { %427 = vst [vmem:[#allocation2 + $0x20] sm:$0xff] (!%p9832_p11), %v7575_v0  ;;  %428 = vst [vmem:[#allocation2 + $0x28] sm:$0xff] (!%p9832_p11), %v7575_v0 }
  0xd6   : > { %429 = vst [vmem:[#allocation2 + $0x30] sm:$0xff] (!%p9832_p11), %v7575_v0  ;;  %430 = vst [vmem:[#allocation2 + $0x38] sm:$0xff] (!%p9832_p11), %v7575_v0 }
  0xda PF: > { %v501_v1 = vld [vmem:[%s7859_s26 + $0x8] sm:$0xff]  ;;  %v503_v3 = vld [vmem:[%s7859_s26 + $0x18] sm:$0xff]  ;;  %v500_v6 = vld [vmem:[%s7859_s26] sm:$0xff]  ;;  %s431_s16 = smul.u32 3584, %s7647_s15  ;;  %p5054_p10 = scmp.ne.s32.totalorder %s7647_s15, 1 }
  0xdb   : > { %v505_v2 = vld [vmem:[%s7859_s26 + $0x28] sm:$0xff]  ;;  %v507_v5 = vld [vmem:[%s7859_s26 + $0x38] sm:$0xff]  ;;  %v504_v7 = vld [vmem:[%s7859_s26 + $0x20] sm:$0xff]  ;;  %vm4852_vm2 = vcmask (!%p5054_p10), 261120  }
  0xdc   : > { %v5211_v4 = vpack.c.bf16 %v505_v2, %v501_v1  ;;  %v6107_v8 = vpack.c.bf16 %v507_v5, %v503_v3  ;;  %v5213_v9 = vpack.c.bf16 %v504_v7, %v500_v6  ;;  %v502_v10 = vld [vmem:[%s7859_s26 + $0x10] sm:$0xff]  ;;  %v509_v12 = vld [vmem:[%s7859_s26 + $0x48] sm:$0xff]  ;;  %v511_v15 = vld [vmem:[%s7859_s26 + $0x58] sm:$0xff]  ;;  %s432_s23 = sshra.s32 %s431_s16, 7  ;;  %s9833_s16 = sld [smem:[#allocation20_spill]] (!%p5054_p10) }
  0xdd   : > { %v506_v11 = vld [vmem:[%s7859_s26 + $0x30] sm:$0xff]  ;;  %v513_v14 = vld [vmem:[%s7859_s26 + $0x68] sm:$0xff]  ;;  %v515_v16 = vld [vmem:[%s7859_s26 + $0x78] sm:$0xff]  ;;  %s5053_s9 = sshll.u32 %s432_s23, 3 }
  0xde   : > { %5212 = vmatprep.subr.bf16.mxu0 %v5211_v4  ;;  %v6109_v13 = vpack.c.bf16 %v506_v11, %v502_v10  ;;  %6108 = vmatprep.subr.bf16.mxu1 %v6107_v8  ;;  %v5215_v17 = vpack.c.bf16 %v513_v14, %v509_v12  ;;  %v6111_v18 = vpack.c.bf16 %v515_v16, %v511_v15  ;;  %v508_v19 = vld [vmem:[%s7859_s26 + $0x40] sm:$0xff]  ;;  %v510_v21 = vld [vmem:[%s7859_s26 + $0x50] sm:$0xff]  ;;  %v517_v24 = vld [vmem:[%s7859_s26 + $0x88] sm:$0xff]  ;;  %s7975_s12 = scalar_lea.vmem %s9801_s0, %s5053_s9 }
  0xdf   : > { %5214 = vmatpush1.bf16.msra.mxu0 %v5213_v9  ;;  %v512_v20 = vld [vmem:[%s7859_s26 + $0x60] sm:$0xff]  ;;  %v514_v23 = vld [vmem:[%s7859_s26 + $0x70] sm:$0xff]  ;;  %v521_v25 = vld [vmem:[%s7859_s26 + $0xa8] sm:$0xff] }
  0xe0   : > { %6110 = vmatpush1.bf16.msra.mxu1 %v6109_v13  ;;  %v5217_v22 = vpack.c.bf16 %v512_v20, %v508_v19  ;;  %5216 = vmatprep.subr.bf16.mxu0 %v5215_v17  ;;  %v6113_v26 = vpack.c.bf16 %v514_v23, %v510_v21  ;;  %v5219_v27 = vpack.c.bf16 %v521_v25, %v517_v24  ;;  %v519_v28 = vld [vmem:[%s7859_s26 + $0x98] sm:$0xff]  ;;  %v516_v30 = vld [vmem:[%s7859_s26 + $0x80] sm:$0xff]  ;;  %v518_v33 = vld [vmem:[%s7859_s26 + $0x90] sm:$0xff] }
  0xe1   : > { %6112 = vmatprep.subr.bf16.mxu1 %v6111_v18  ;;  %v523_v29 = vld [vmem:[%s7859_s26 + $0xb8] sm:$0xff]  ;;  %v520_v32 = vld [vmem:[%s7859_s26 + $0xa0] sm:$0xff]  ;;  %v522_v34 = vld [vmem:[%s7859_s26 + $0xb0] sm:$0xff] }
  0xe2   : > { %v6115_v31 = vpack.c.bf16 %v523_v29, %v519_v28  ;;  %v5221_v35 = vpack.c.bf16 %v520_v32, %v516_v30  ;;  %v525_v36 = vld [vmem:[%s7859_s26 + $0xc8] sm:$0xff]  ;;  %v527_v38 = vld [vmem:[%s7859_s26 + $0xd8] sm:$0xff]  ;;  %v6117_v39 = vpack.c.bf16 %v522_v34, %v518_v33  ;;  %v524_v42 = vld [vmem:[%s7859_s26 + $0xc0] sm:$0xff] }
  0xe3   : > { %5218 = vmatpush1.bf16.msra.mxu0 %v5217_v22  ;;  %v529_v37 = vld [vmem:[%s7859_s26 + $0xe8] sm:$0xff]  ;;  %v531_v41 = vld [vmem:[%s7859_s26 + $0xf8] sm:$0xff]  ;;  %v528_v43 = vld [vmem:[%s7859_s26 + $0xe0] sm:$0xff] }
  0xe4   : > { %6114 = vmatpush1.bf16.msra.mxu1 %v6113_v26  ;;  %5220 = vmatprep.subr.bf16.mxu0 %v5219_v27  ;;  %v5223_v40 = vpack.c.bf16 %v529_v37, %v525_v36  ;;  %v6119_v44 = vpack.c.bf16 %v531_v41, %v527_v38  ;;  %v526_v45 = vld [vmem:[%s7859_s26 + $0xd0] sm:$0xff]  ;;  %v533_v47 = vld [vmem:[%s7859_s26 + $0x108] sm:$0xff]  ;;  %v535_v49 = vld [vmem:[%s7859_s26 + $0x118] sm:$0xff]  ;;  %v5225_v51 = vpack.c.bf16 %v528_v43, %v524_v42 }
  0xe5   : > { %6116 = vmatprep.subr.bf16.mxu1 %v6115_v31  ;;  %v530_v46 = vld [vmem:[%s7859_s26 + $0xf0] sm:$0xff]  ;;  %v537_v48 = vld [vmem:[%s7859_s26 + $0x128] sm:$0xff]  ;;  %v539_v50 = vld [vmem:[%s7859_s26 + $0x138] sm:$0xff] }
  0xe6   : > { %v6121_v52 = vpack.c.bf16 %v530_v46, %v526_v45  ;;  %v5227_v53 = vpack.c.bf16 %v537_v48, %v533_v47  ;;  %v532_v54 = vld [vmem:[%s7859_s26 + $0x100] sm:$0xff]  ;;  %v534_v56 = vld [vmem:[%s7859_s26 + $0x110] sm:$0xff]  ;;  %v6123_v57 = vpack.c.bf16 %v539_v50, %v535_v49  ;;  %v541_v59 = vld [vmem:[%s7859_s26 + $0x148] sm:$0xff] }
  0xe7   : > { %5222 = vmatpush1.bf16.msra.mxu0 %v5221_v35  ;;  %v536_v55 = vld [vmem:[%s7859_s26 + $0x120] sm:$0xff]  ;;  %v538_v58 = vld [vmem:[%s7859_s26 + $0x130] sm:$0xff]  ;;  %v545_v60 = vld [vmem:[%s7859_s26 + $0x168] sm:$0xff] }
  0xe8   : > { %6118 = vmatpush1.bf16.msra.mxu1 %v6117_v39  ;;  %5224 = vmatprep.subr.bf16.mxu0 %v5223_v40  ;;  %v543_v61 = vld [vmem:[%s7859_s26 + $0x158] sm:$0xff]  ;;  %v5229_v63 = vpack.c.bf16 %v536_v55, %v532_v54  ;;  %v6125_v0 = vpack.c.bf16 %v538_v58, %v534_v56  ;;  %v5231_v1 = vpack.c.bf16 %v545_v60, %v541_v59  ;;  %v540_v2 = vld [vmem:[%s7859_s26 + $0x140] sm:$0xff]  ;;  %v542_v4 = vld [vmem:[%s7859_s26 + $0x150] sm:$0xff] }
  0xe9   : > { %6120 = vmatprep.subr.bf16.mxu1 %v6119_v44  ;;  %v547_v62 = vld [vmem:[%s7859_s26 + $0x178] sm:$0xff]  ;;  %v544_v3 = vld [vmem:[%s7859_s26 + $0x160] sm:$0xff]  ;;  %v546_v6 = vld [vmem:[%s7859_s26 + $0x170] sm:$0xff] }
  0xea   : > { %v6127_v5 = vpack.c.bf16 %v547_v62, %v543_v61  ;;  %v549_v7 = vld [vmem:[%s7859_s26 + $0x188] sm:$0xff]  ;;  %v551_v9 = vld [vmem:[%s7859_s26 + $0x198] sm:$0xff]  ;;  %v5233_v11 = vpack.c.bf16 %v544_v3, %v540_v2  ;;  %v6129_v12 = vpack.c.bf16 %v546_v6, %v542_v4  ;;  %v548_v14 = vld [vmem:[%s7859_s26 + $0x180] sm:$0xff] }
  0xeb   : > { %5226 = vmatpush1.bf16.msra.mxu0 %v5225_v51  ;;  %v553_v8 = vld [vmem:[%s7859_s26 + $0x1a8] sm:$0xff]  ;;  %v555_v10 = vld [vmem:[%s7859_s26 + $0x1b8] sm:$0xff]  ;;  %v552_v15 = vld [vmem:[%s7859_s26 + $0x1a0] sm:$0xff] }
  0xec   : > { %6122 = vmatpush1.bf16.msra.mxu1 %v6121_v52  ;;  %5228 = vmatprep.subr.bf16.mxu0 %v5227_v53  ;;  %v5235_v13 = vpack.c.bf16 %v553_v8, %v549_v7  ;;  %v550_v16 = vld [vmem:[%s7859_s26 + $0x190] sm:$0xff]  ;;  %v6131_v17 = vpack.c.bf16 %v555_v10, %v551_v9  ;;  %v557_v19 = vld [vmem:[%s7859_s26 + $0x1c8] sm:$0xff]  ;;  %v559_v21 = vld [vmem:[%s7859_s26 + $0x1d8] sm:$0xff]  ;;  %v5237_v23 = vpack.c.bf16 %v552_v15, %v548_v14 }
  0xed   : > { %6124 = vmatprep.subr.bf16.mxu1 %v6123_v57  ;;  %v554_v18 = vld [vmem:[%s7859_s26 + $0x1b0] sm:$0xff]  ;;  %v561_v20 = vld [vmem:[%s7859_s26 + $0x1e8] sm:$0xff]  ;;  %v563_v22 = vld [vmem:[%s7859_s26 + $0x1f8] sm:$0xff] }
  0xee   : > { %v6133_v24 = vpack.c.bf16 %v554_v18, %v550_v16  ;;  %v5239_v25 = vpack.c.bf16 %v561_v20, %v557_v19  ;;  %v556_v26 = vld [vmem:[%s7859_s26 + $0x1c0] sm:$0xff]  ;;  %v558_v28 = vld [vmem:[%s7859_s26 + $0x1d0] sm:$0xff]  ;;  %v6135_v29 = vpack.c.bf16 %v563_v22, %v559_v21  ;;  %v565_v31 = vld [vmem:[%s7859_s26 + $0x208] sm:$0xff] }
  0xef   : > { %5230 = vmatpush1.bf16.msra.mxu0 %v5229_v63  ;;  %v560_v27 = vld [vmem:[%s7859_s26 + $0x1e0] sm:$0xff]  ;;  %v562_v30 = vld [vmem:[%s7859_s26 + $0x1f0] sm:$0xff]  ;;  %v569_v32 = vld [vmem:[%s7859_s26 + $0x228] sm:$0xff] }
  0xf0   : > { %6126 = vmatpush1.bf16.msra.mxu1 %v6125_v0  ;;  %5232 = vmatprep.subr.bf16.mxu0 %v5231_v1  ;;  %v567_v33 = vld [vmem:[%s7859_s26 + $0x218] sm:$0xff]  ;;  %v5241_v35 = vpack.c.bf16 %v560_v27, %v556_v26  ;;  %v6137_v36 = vpack.c.bf16 %v562_v30, %v558_v28  ;;  %v5243_v37 = vpack.c.bf16 %v569_v32, %v565_v31  ;;  %v564_v38 = vld [vmem:[%s7859_s26 + $0x200] sm:$0xff]  ;;  %v566_v40 = vld [vmem:[%s7859_s26 + $0x210] sm:$0xff] }
  0xf1   : > { %6128 = vmatprep.subr.bf16.mxu1 %v6127_v5  ;;  %v571_v34 = vld [vmem:[%s7859_s26 + $0x238] sm:$0xff]  ;;  %v568_v39 = vld [vmem:[%s7859_s26 + $0x220] sm:$0xff]  ;;  %v570_v42 = vld [vmem:[%s7859_s26 + $0x230] sm:$0xff] }
  0xf2   : > { %v6139_v41 = vpack.c.bf16 %v571_v34, %v567_v33  ;;  %v573_v43 = vld [vmem:[%s7859_s26 + $0x248] sm:$0xff]  ;;  %v575_v45 = vld [vmem:[%s7859_s26 + $0x258] sm:$0xff]  ;;  %v5245_v47 = vpack.c.bf16 %v568_v39, %v564_v38  ;;  %v6141_v48 = vpack.c.bf16 %v570_v42, %v566_v40  ;;  %v572_v50 = vld [vmem:[%s7859_s26 + $0x240] sm:$0xff] }
  0xf3   : > { %5234 = vmatpush1.bf16.msra.mxu0 %v5233_v11  ;;  %v577_v44 = vld [vmem:[%s7859_s26 + $0x268] sm:$0xff]  ;;  %v579_v46 = vld [vmem:[%s7859_s26 + $0x278] sm:$0xff]  ;;  %v576_v51 = vld [vmem:[%s7859_s26 + $0x260] sm:$0xff] }
  0xf4   : > { %6130 = vmatpush1.bf16.msra.mxu1 %v6129_v12  ;;  %5236 = vmatprep.subr.bf16.mxu0 %v5235_v13  ;;  %v5247_v49 = vpack.c.bf16 %v577_v44, %v573_v43  ;;  %v574_v52 = vld [vmem:[%s7859_s26 + $0x250] sm:$0xff]  ;;  %v6143_v53 = vpack.c.bf16 %v579_v46, %v575_v45  ;;  %v581_v55 = vld [vmem:[%s7859_s26 + $0x288] sm:$0xff]  ;;  %v583_v57 = vld [vmem:[%s7859_s26 + $0x298] sm:$0xff]  ;;  %v5249_v59 = vpack.c.bf16 %v576_v51, %v572_v50 }
  0xf5   : > { %6132 = vmatprep.subr.bf16.mxu1 %v6131_v17  ;;  %v578_v54 = vld [vmem:[%s7859_s26 + $0x270] sm:$0xff]  ;;  %v585_v56 = vld [vmem:[%s7859_s26 + $0x2a8] sm:$0xff]  ;;  %v587_v58 = vld [vmem:[%s7859_s26 + $0x2b8] sm:$0xff] }
  0xf6   : > { %v6145_v60 = vpack.c.bf16 %v578_v54, %v574_v52  ;;  %v5251_v61 = vpack.c.bf16 %v585_v56, %v581_v55  ;;  %v580_v62 = vld [vmem:[%s7859_s26 + $0x280] sm:$0xff]  ;;  %v582_v0 = vld [vmem:[%s7859_s26 + $0x290] sm:$0xff]  ;;  %v6147_v1 = vpack.c.bf16 %v587_v58, %v583_v57  ;;  %v589_v3 = vld [vmem:[%s7859_s26 + $0x2c8] sm:$0xff] }
  0xf7   : > { %5238 = vmatpush1.bf16.msra.mxu0 %v5237_v23  ;;  %v584_v63 = vld [vmem:[%s7859_s26 + $0x2a0] sm:$0xff]  ;;  %v586_v2 = vld [vmem:[%s7859_s26 + $0x2b0] sm:$0xff]  ;;  %v593_v4 = vld [vmem:[%s7859_s26 + $0x2e8] sm:$0xff] }
  0xf8   : > { %6134 = vmatpush1.bf16.msra.mxu1 %v6133_v24  ;;  %5240 = vmatprep.subr.bf16.mxu0 %v5239_v25  ;;  %v591_v5 = vld [vmem:[%s7859_s26 + $0x2d8] sm:$0xff]  ;;  %v5253_v7 = vpack.c.bf16 %v584_v63, %v580_v62  ;;  %v588_v8 = vld [vmem:[%s7859_s26 + $0x2c0] sm:$0xff]  ;;  %v6149_v9 = vpack.c.bf16 %v586_v2, %v582_v0  ;;  %v5255_v10 = vpack.c.bf16 %v593_v4, %v589_v3  ;;  %v590_v12 = vld [vmem:[%s7859_s26 + $0x2d0] sm:$0xff] }
  0xf9   : > { %6136 = vmatprep.subr.bf16.mxu1 %v6135_v29  ;;  %v595_v6 = vld [vmem:[%s7859_s26 + $0x2f8] sm:$0xff]  ;;  %v592_v11 = vld [vmem:[%s7859_s26 + $0x2e0] sm:$0xff]  ;;  %v594_v13 = vld [vmem:[%s7859_s26 + $0x2f0] sm:$0xff] }
  0xfa   : > { %v6151_v14 = vpack.c.bf16 %v595_v6, %v591_v5  ;;  %v597_v15 = vld [vmem:[%s7859_s26 + $0x308] sm:$0xff]  ;;  %v599_v18 = vld [vmem:[%s7859_s26 + $0x318] sm:$0xff]  ;;  %v5257_v20 = vpack.c.bf16 %v592_v11, %v588_v8  ;;  %v6153_v21 = vpack.c.bf16 %v594_v13, %v590_v12  ;;  %v596_v23 = vld [vmem:[%s7859_s26 + $0x300] sm:$0xff] }
  0xfb   : > { %5242 = vmatpush1.bf16.msra.mxu0 %v5241_v35  ;;  %v601_v16 = vld [vmem:[%s7859_s26 + $0x328] sm:$0xff]  ;;  %v603_v19 = vld [vmem:[%s7859_s26 + $0x338] sm:$0xff]  ;;  %v600_v24 = vld [vmem:[%s7859_s26 + $0x320] sm:$0xff] }
  0xfc   : > { %6138 = vmatpush1.bf16.msra.mxu1 %v6137_v36  ;;  %5244 = vmatprep.subr.bf16.mxu0 %v5243_v37  ;;  %v437_v17 = vld [vmem:[%s7975_s12 + $0x8] sm:$0xff]  ;;  %v5259_v22 = vpack.c.bf16 %v601_v16, %v597_v15  ;;  %v598_v25 = vld [vmem:[%s7859_s26 + $0x310] sm:$0xff]  ;;  %v6155_v26 = vpack.c.bf16 %v603_v19, %v599_v18  ;;  %v607_v30 = vld [vmem:[%s7859_s26 + $0x358] sm:$0xff]  ;;  %v5261_v32 = vpack.c.bf16 %v600_v24, %v596_v23 }
  0xfd   : > { %6140 = vmatprep.subr.bf16.mxu1 %v6139_v41  ;;  %2356 = vmatprep.mubr.f32.mxu0 %v437_v17  ;;  %v602_v27 = vld [vmem:[%s7859_s26 + $0x330] sm:$0xff]  ;;  %v605_v28 = vld [vmem:[%s7859_s26 + $0x348] sm:$0xff]  ;;  %v611_v31 = vld [vmem:[%s7859_s26 + $0x378] sm:$0xff] }
  0xfe   : > { %3434 = vmatprep.mubr.f32.mxu1 %v437_v17  ;;  %v609_v29 = vld [vmem:[%s7859_s26 + $0x368] sm:$0xff]  ;;  %v6157_v33 = vpack.c.bf16 %v602_v27, %v598_v25  ;;  %v604_v35 = vld [vmem:[%s7859_s26 + $0x340] sm:$0xff]  ;;  %v606_v37 = vld [vmem:[%s7859_s26 + $0x350] sm:$0xff]  ;;  %v6159_v38 = vpack.c.bf16 %v611_v31, %v607_v30 }
  0xff   : > { %5246 = vmatpush1.bf16.msra.mxu0 %v5245_v47  ;;  %v5263_v34 = vpack.c.bf16 %v609_v29, %v605_v28  ;;  %v608_v36 = vld [vmem:[%s7859_s26 + $0x360] sm:$0xff]  ;;  %v610_v39 = vld [vmem:[%s7859_s26 + $0x370] sm:$0xff]  ;;  %v613_v40 = vld [vmem:[%s7859_s26 + $0x388] sm:$0xff] }
 0x100   : > { %6142 = vmatpush1.bf16.msra.mxu1 %v6141_v48  ;;  %5248 = vmatprep.subr.bf16.mxu0 %v5247_v49  ;;  %v617_v41 = vld [vmem:[%s7859_s26 + $0x3a8] sm:$0xff]  ;;  %v615_v42 = vld [vmem:[%s7859_s26 + $0x398] sm:$0xff]  ;;  %v5265_v44 = vpack.c.bf16 %v608_v36, %v604_v35  ;;  %v6161_v45 = vpack.c.bf16 %v610_v39, %v606_v37  ;;  %v612_v47 = vld [vmem:[%s7859_s26 + $0x380] sm:$0xff] }
 0x101   : > { %6144 = vmatprep.subr.bf16.mxu1 %v6143_v53  ;;  %v619_v43 = vld [vmem:[%s7859_s26 + $0x3b8] sm:$0xff]  ;;  %v5267_v46 = vpack.c.bf16 %v617_v41, %v613_v40  ;;  %v616_v48 = vld [vmem:[%s7859_s26 + $0x3a0] sm:$0xff]  ;;  %v614_v49 = vld [vmem:[%s7859_s26 + $0x390] sm:$0xff] }
 0x102   : > { %v6163_v50 = vpack.c.bf16 %v619_v43, %v615_v42  ;;  %v618_v51 = vld [vmem:[%s7859_s26 + $0x3b0] sm:$0xff]  ;;  %v621_v52 = vld [vmem:[%s7859_s26 + $0x3c8] sm:$0xff]  ;;  %v623_v54 = vld [vmem:[%s7859_s26 + $0x3d8] sm:$0xff]  ;;  %v5269_v56 = vpack.c.bf16 %v616_v48, %v612_v47 }
 0x103   : > { %5250 = vmatpush1.bf16.msra.mxu0 %v5249_v59  ;;  %v625_v53 = vld [vmem:[%s7859_s26 + $0x3e8] sm:$0xff]  ;;  %v627_v55 = vld [vmem:[%s7859_s26 + $0x3f8] sm:$0xff]  ;;  %v6165_v57 = vpack.c.bf16 %v618_v51, %v614_v49  ;;  %v620_v59 = vld [vmem:[%s7859_s26 + $0x3c0] sm:$0xff] }
 0x104   : > { %6146 = vmatpush1.bf16.msra.mxu1 %v6145_v60  ;;  %5252 = vmatprep.subr.bf16.mxu0 %v5251_v61  ;;  %v5271_v58 = vpack.c.bf16 %v625_v53, %v621_v52  ;;  %v624_v60 = vld [vmem:[%s7859_s26 + $0x3e0] sm:$0xff]  ;;  %v622_v61 = vld [vmem:[%s7859_s26 + $0x3d0] sm:$0xff]  ;;  %v6167_v62 = vpack.c.bf16 %v627_v55, %v623_v54  ;;  %v629_v0 = vld [vmem:[%s7859_s26 + $0x408] sm:$0xff] }
 0x105   : > { %6148 = vmatprep.subr.bf16.mxu1 %v6147_v1  ;;  %v626_v63 = vld [vmem:[%s7859_s26 + $0x3f0] sm:$0xff]  ;;  %v633_v1 = vld [vmem:[%s7859_s26 + $0x428] sm:$0xff]  ;;  %v631_v2 = vld [vmem:[%s7859_s26 + $0x418] sm:$0xff]  ;;  %v5273_v4 = vpack.c.bf16 %v624_v60, %v620_v59 }
 0x106   : > { %v635_v3 = vld [vmem:[%s7859_s26 + $0x438] sm:$0xff]  ;;  %v6169_v5 = vpack.c.bf16 %v626_v63, %v622_v61  ;;  %v5275_v6 = vpack.c.bf16 %v633_v1, %v629_v0  ;;  %v632_v8 = vld [vmem:[%s7859_s26 + $0x420] sm:$0xff]  ;;  %v634_v11 = vld [vmem:[%s7859_s26 + $0x430] sm:$0xff] }
 0x107   : > { %5254 = vmatpush1.bf16.msra.mxu0 %v5253_v7  ;;  %v628_v7 = vld [vmem:[%s7859_s26 + $0x400] sm:$0xff]  ;;  %v637_v12 = vld [vmem:[%s7859_s26 + $0x448] sm:$0xff]  ;;  %v643_v15 = vld [vmem:[%s7859_s26 + $0x478] sm:$0xff] }
 0x108   : > { %6150 = vmatpush1.bf16.msra.mxu1 %v6149_v9  ;;  %5256 = vmatprep.subr.bf16.mxu0 %v5255_v10  ;;  %v630_v9 = vld [vmem:[%s7859_s26 + $0x410] sm:$0xff]  ;;  %v6171_v10 = vpack.c.bf16 %v635_v3, %v631_v2  ;;  %v641_v13 = vld [vmem:[%s7859_s26 + $0x468] sm:$0xff]  ;;  %v436_v16 = vld [vmem:[%s7975_s12] sm:$0xff]  ;;  %v5277_v17 = vpack.c.bf16 %v632_v8, %v628_v7 }
 0x109   : > { %6152 = vmatprep.subr.bf16.mxu1 %v6151_v14  ;;  %v639_v14 = vld [vmem:[%s7859_s26 + $0x458] sm:$0xff]  ;;  %v6173_v18 = vpack.c.bf16 %v634_v11, %v630_v9  ;;  %v5279_v19 = vpack.c.bf16 %v641_v13, %v637_v12  ;;  %v642_v24 = vld [vmem:[%s7859_s26 + $0x470] sm:$0xff]  ;;  %v645_v25 = vld [vmem:[%s7859_s26 + $0x488] sm:$0xff] }
 0x10a   : > { %v6175_v23 = vpack.c.bf16 %v643_v15, %v639_v14  ;;  %v647_v27 = vld [vmem:[%s7859_s26 + $0x498] sm:$0xff]  ;;  %v650_v36 = vld [vmem:[%s7859_s26 + $0x4b0] sm:$0xff]  ;;  %v653_v37 = vld [vmem:[%s7859_s26 + $0x4c8] sm:$0xff] }
 0x10b   : > { %5258 = vmatpush1.bf16.msra.mxu0 %v5257_v20  ;;  %v636_v20 = vld [vmem:[%s7859_s26 + $0x440] sm:$0xff]  ;;  %v651_v28 = vld [vmem:[%s7859_s26 + $0x4b8] sm:$0xff]  ;;  %v658_v48 = vld [vmem:[%s7859_s26 + $0x4f0] sm:$0xff] }
 0x10c   : > { %6154 = vmatpush1.bf16.msra.mxu1 %v6153_v21  ;;  %5260 = vmatprep.subr.bf16.mxu0 %v5259_v22  ;;  %v640_v21 = vld [vmem:[%s7859_s26 + $0x460] sm:$0xff]  ;;  %v638_v22 = vld [vmem:[%s7859_s26 + $0x450] sm:$0xff]  ;;  %v6179_v35 = vpack.c.bf16 %v651_v28, %v647_v27  ;;  %v655_v39 = vld [vmem:[%s7859_s26 + $0x4d8] sm:$0xff] }
 0x10d   : > { %6156 = vmatprep.subr.bf16.mxu1 %v6155_v26  ;;  %v649_v26 = vld [vmem:[%s7859_s26 + $0x4a8] sm:$0xff]  ;;  %v5281_v29 = vpack.c.bf16 %v640_v21, %v636_v20  ;;  %v6177_v30 = vpack.c.bf16 %v642_v24, %v638_v22  ;;  %v659_v40 = vld [vmem:[%s7859_s26 + $0x4f8] sm:$0xff]  ;;  %v666_v60 = vld [vmem:[%s7859_s26 + $0x530] sm:$0xff] }
 0x10e   : > { %v5283_v31 = vpack.c.bf16 %v649_v26, %v645_v25  ;;  %v6183_v47 = vpack.c.bf16 %v659_v40, %v655_v39  ;;  %v661_v49 = vld [vmem:[%s7859_s26 + $0x508] sm:$0xff]  ;;  %v663_v51 = vld [vmem:[%s7859_s26 + $0x518] sm:$0xff]  ;;  %v674_v8 = vld [vmem:[%s7859_s26 + $0x570] sm:$0xff] }
 0x10f   : > { %5262 = vmatpush1.bf16.msra.mxu0 %v5261_v32  ;;  %v644_v32 = vld [vmem:[%s7859_s26 + $0x480] sm:$0xff]  ;;  %v667_v52 = vld [vmem:[%s7859_s26 + $0x538] sm:$0xff]  ;;  %v669_v61 = vld [vmem:[%s7859_s26 + $0x548] sm:$0xff] }
 0x110   : > { %6158 = vmatpush1.bf16.msra.mxu1 %v6157_v33  ;;  %5264 = vmatprep.subr.bf16.mxu0 %v5263_v34  ;;  %v648_v33 = vld [vmem:[%s7859_s26 + $0x4a0] sm:$0xff]  ;;  %v646_v34 = vld [vmem:[%s7859_s26 + $0x490] sm:$0xff]  ;;  %v6187_v59 = vpack.c.bf16 %v667_v52, %v663_v51  ;;  %v671_v63 = vld [vmem:[%s7859_s26 + $0x558] sm:$0xff] }
 0x111   : > { %6160 = vmatprep.subr.bf16.mxu1 %v6159_v38  ;;  %v657_v38 = vld [vmem:[%s7859_s26 + $0x4e8] sm:$0xff]  ;;  %v5285_v41 = vpack.c.bf16 %v648_v33, %v644_v32  ;;  %v6181_v42 = vpack.c.bf16 %v650_v36, %v646_v34  ;;  %v675_v0 = vld [vmem:[%s7859_s26 + $0x578] sm:$0xff]  ;;  %v676_v15 = vld [vmem:[%s7859_s26 + $0x580] sm:$0xff] }
 0x112   : > { %v5287_v43 = vpack.c.bf16 %v657_v38, %v653_v37  ;;  %v6191_v7 = vpack.c.bf16 %v675_v0, %v671_v63  ;;  %v677_v9 = vld [vmem:[%s7859_s26 + $0x588] sm:$0xff]  ;;  %v679_v11 = vld [vmem:[%s7859_s26 + $0x598] sm:$0xff]  ;;  %v682_v20 = vld [vmem:[%s7859_s26 + $0x5b0] sm:$0xff] }
 0x113   : > { %5266 = vmatpush1.bf16.msra.mxu0 %v5265_v44  ;;  %v652_v44 = vld [vmem:[%s7859_s26 + $0x4c0] sm:$0xff]  ;;  %v683_v12 = vld [vmem:[%s7859_s26 + $0x5b8] sm:$0xff]  ;;  %v465_v13 = vld [vmem:[%s7975_s12 + $0x1c8] sm:$0xff] }
 0x114   : > { %6162 = vmatpush1.bf16.msra.mxu1 %v6161_v45  ;;  %5268 = vmatprep.subr.bf16.mxu0 %v5267_v46  ;;  %v656_v45 = vld [vmem:[%s7859_s26 + $0x4e0] sm:$0xff]  ;;  %v654_v46 = vld [vmem:[%s7859_s26 + $0x4d0] sm:$0xff]  ;;  %v6195_v22 = vpack.c.bf16 %v683_v12, %v679_v11  ;;  %v689_v24 = vld [vmem:[%s7859_s26 + $0x5e8] sm:$0xff] }
 0x115   : > { %6164 = vmatprep.subr.bf16.mxu1 %v6163_v50  ;;  %v665_v50 = vld [vmem:[%s7859_s26 + $0x528] sm:$0xff]  ;;  %v5289_v53 = vpack.c.bf16 %v656_v45, %v652_v44  ;;  %v6185_v54 = vpack.c.bf16 %v658_v48, %v654_v46  ;;  %v464_v21 = vld [vmem:[%s7975_s12 + $0x1c0] sm:$0xff]  ;;  %v439_v25 = vld [vmem:[%s7975_s12 + $0x18] sm:$0xff] }
 0x116   : > { %v5291_v55 = vpack.c.bf16 %v665_v50, %v661_v49  ;;  %v687_v26 = vld [vmem:[%s7859_s26 + $0x5d8] sm:$0xff]  ;;  %v688_v32 = vld [vmem:[%s7859_s26 + $0x5e0] sm:$0xff]  ;;  %v686_v33 = vld [vmem:[%s7859_s26 + $0x5d0] sm:$0xff] }
 0x117   : > { %5270 = vmatpush1.bf16.msra.mxu0 %v5269_v56  ;;  %v660_v56 = vld [vmem:[%s7859_s26 + $0x500] sm:$0xff]  ;;  %v691_v27 = vld [vmem:[%s7859_s26 + $0x5f8] sm:$0xff]  ;;  %v693_v36 = vld [vmem:[%s7859_s26 + $0x608] sm:$0xff] }
 0x118   : > { %6166 = vmatpush1.bf16.msra.mxu1 %v6165_v57  ;;  %5272 = vmatprep.subr.bf16.mxu0 %v5271_v58  ;;  %v664_v57 = vld [vmem:[%s7859_s26 + $0x520] sm:$0xff]  ;;  %v662_v58 = vld [vmem:[%s7859_s26 + $0x510] sm:$0xff]  ;;  %v6199_v34 = vpack.c.bf16 %v691_v27, %v687_v26  ;;  %v697_v37 = vld [vmem:[%s7859_s26 + $0x628] sm:$0xff] }
 0x119   : > { %6168 = vmatprep.subr.bf16.mxu1 %v6167_v62  ;;  %v673_v62 = vld [vmem:[%s7859_s26 + $0x568] sm:$0xff]  ;;  %v5293_v1 = vpack.c.bf16 %v664_v57, %v660_v56  ;;  %v6189_v2 = vpack.c.bf16 %v666_v60, %v662_v58  ;;  %v695_v38 = vld [vmem:[%s7859_s26 + $0x618] sm:$0xff]  ;;  %v696_v44 = vld [vmem:[%s7859_s26 + $0x620] sm:$0xff] }
 0x11a   : > { %v5295_v3 = vpack.c.bf16 %v673_v62, %v669_v61  ;;  %v699_v39 = vld [vmem:[%s7859_s26 + $0x638] sm:$0xff]  ;;  %v694_v45 = vld [vmem:[%s7859_s26 + $0x610] sm:$0xff]  ;;  %v701_v48 = vld [vmem:[%s7859_s26 + $0x648] sm:$0xff] }
 0x11b   : > { %5274 = vmatpush1.bf16.msra.mxu0 %v5273_v4  ;;  %v668_v4 = vld [vmem:[%s7859_s26 + $0x540] sm:$0xff]  ;;  %v6203_v46 = vpack.c.bf16 %v699_v39, %v695_v38  ;;  %v705_v49 = vld [vmem:[%s7859_s26 + $0x668] sm:$0xff]  ;;  %v703_v50 = vld [vmem:[%s7859_s26 + $0x658] sm:$0xff] }
 0x11c   : > { %6170 = vmatpush1.bf16.msra.mxu1 %v6169_v5  ;;  %5276 = vmatprep.subr.bf16.mxu0 %v5275_v6  ;;  %v672_v5 = vld [vmem:[%s7859_s26 + $0x560] sm:$0xff]  ;;  %v670_v6 = vld [vmem:[%s7859_s26 + $0x550] sm:$0xff]  ;;  %v707_v51 = vld [vmem:[%s7859_s26 + $0x678] sm:$0xff] }
 0x11d   : > { %6172 = vmatprep.subr.bf16.mxu1 %v6171_v10  ;;  %v681_v10 = vld [vmem:[%s7859_s26 + $0x5a8] sm:$0xff]  ;;  %v5297_v14 = vpack.c.bf16 %v672_v5, %v668_v4  ;;  %v704_v56 = vld [vmem:[%s7859_s26 + $0x660] sm:$0xff]  ;;  %v702_v57 = vld [vmem:[%s7859_s26 + $0x650] sm:$0xff]  ;;  %v6207_v58 = vpack.c.bf16 %v707_v51, %v703_v50 }
 0x11e   : > { %2357 = vmatmul.mubr.f32.vlgmr.msra.gmra.mrb[0].mxu0 %v436_v16  ;;  %v709_v60 = vld [vmem:[%s7859_s26 + $0x688] sm:$0xff]  ;;  %v711_v62 = vld [vmem:[%s7859_s26 + $0x698] sm:$0xff]  ;;  %v712_v4 = vld [vmem:[%s7859_s26 + $0x6a0] sm:$0xff] }
 0x11f   : > { %5278 = vmatpush1.bf16.msra.mxu0 %v5277_v17  ;;  %3435 = vmatmul.mubr.f32.vlgmr.msra.gmra.mrb[0].mxu1 %v436_v16  ;;  %v680_v16 = vld [vmem:[%s7859_s26 + $0x5a0] sm:$0xff]  ;;  %v6193_v17 = vpack.c.bf16 %v674_v8, %v670_v6  ;;  %v713_v61 = vld [vmem:[%s7859_s26 + $0x6a8] sm:$0xff]  ;;  %v715_v63 = vld [vmem:[%s7859_s26 + $0x6b8] sm:$0xff] }
 0x120   : > { %6174 = vmatpush1.bf16.msra.mxu1 %v6173_v18  ;;  %5280 = vmatprep.subr.bf16.mxu0 %v5279_v19  ;;  %v5299_v18 = vpack.c.bf16 %v681_v10, %v677_v9  ;;  %v678_v19 = vld [vmem:[%s7859_s26 + $0x590] sm:$0xff]  ;;  %v5301_v28 = vpack.c.bf16 %v680_v16, %v676_v15  ;;  %v6211_v6 = vpack.c.bf16 %v715_v63, %v711_v62  ;;  %v717_v8 = vld [vmem:[%s7859_s26 + $0x6c8] sm:$0xff]  ;;  %v719_v10 = vld [vmem:[%s7859_s26 + $0x6d8] sm:$0xff] }
 0x121   : > { %6176 = vmatprep.subr.bf16.mxu1 %v6175_v23  ;;  %2362 = vmatprep.mubr.f32.mxu0 %v465_v13  ;;  %v685_v23 = vld [vmem:[%s7859_s26 + $0x5c8] sm:$0xff]  ;;  %v710_v5 = vld [vmem:[%s7859_s26 + $0x690] sm:$0xff]  ;;  %v723_v11 = vld [vmem:[%s7859_s26 + $0x6f8] sm:$0xff] }
 0x122   : > { %3440 = vmatprep.mubr.f32.mxu1 %v465_v13  ;;  %2363 = vmatmul.mubr.f32.gmra.mrb[2].mxu0 %v464_v21  ;;  %v721_v9 = vld [vmem:[%s7859_s26 + $0x6e8] sm:$0xff]  ;;  %v716_v15 = vld [vmem:[%s7859_s26 + $0x6c0] sm:$0xff] }
 0x123   : > { %5282 = vmatpush1.bf16.msra.mxu0 %v5281_v29  ;;  %3441 = vmatmul.mubr.f32.gmra.mrb[2].mxu1 %v464_v21  ;;  %v6197_v29 = vpack.c.bf16 %v682_v20, %v678_v19  ;;  %v720_v16 = vld [vmem:[%s7859_s26 + $0x6e0] sm:$0xff]  ;;  %v722_v19 = vld [vmem:[%s7859_s26 + $0x6f0] sm:$0xff]  ;;  %v725_v20 = vld [vmem:[%s7859_s26 + $0x708] sm:$0xff] }
 0x124   : > { %6178 = vmatpush1.bf16.msra.mxu1 %v6177_v30  ;;  %5284 = vmatprep.subr.bf16.mxu0 %v5283_v31  ;;  %v5303_v30 = vpack.c.bf16 %v689_v24, %v685_v23  ;;  %v684_v31 = vld [vmem:[%s7859_s26 + $0x5c0] sm:$0xff]  ;;  %v729_v21 = vld [vmem:[%s7859_s26 + $0x728] sm:$0xff]  ;;  %v731_v23 = vld [vmem:[%s7859_s26 + $0x738] sm:$0xff]  ;;  %v5321_v24 = vpack.c.bf16 %v720_v16, %v716_v15 }
 0x125   : > { %6180 = vmatprep.subr.bf16.mxu1 %v6179_v35  ;;  %2433 = vmatprep.mubr.f32.mxu0 %v439_v25  ;;  %v690_v35 = vld [vmem:[%s7859_s26 + $0x5f0] sm:$0xff]  ;;  %v5305_v40 = vpack.c.bf16 %v688_v32, %v684_v31  ;;  %v5323_v26 = vpack.c.bf16 %v729_v21, %v725_v20  ;;  %v724_v27 = vld [vmem:[%s7859_s26 + $0x700] sm:$0xff]  ;;  %v733_v32 = vld [vmem:[%s7859_s26 + $0x748] sm:$0xff] }
 0x126   : > { %3511 = vmatprep.mubr.f32.mxu1 %v439_v25  ;;  %v730_v31 = vld [vmem:[%s7859_s26 + $0x730] sm:$0xff]  ;;  %v732_v39 = vld [vmem:[%s7859_s26 + $0x740] sm:$0xff]  ;;  %v765_v16 = vld [vmem:[%s7859_s26 + $0x848] sm:$0xff] }
 0x127   : > { %5286 = vmatpush1.bf16.msra.mxu0 %v5285_v41  ;;  %v6201_v41 = vpack.c.bf16 %v690_v35, %v686_v33  ;;  %v737_v33 = vld [vmem:[%s7859_s26 + $0x768] sm:$0xff]  ;;  %v739_v35 = vld [vmem:[%s7859_s26 + $0x778] sm:$0xff]  ;;  %v740_v51 = vld [vmem:[%s7859_s26 + $0x780] sm:$0xff] }
 0x128   : > { %6182 = vmatpush1.bf16.msra.mxu1 %v6181_v42  ;;  %5288 = vmatprep.subr.bf16.mxu0 %v5287_v43  ;;  %v5307_v42 = vpack.c.bf16 %v697_v37, %v693_v36  ;;  %v692_v43 = vld [vmem:[%s7859_s26 + $0x600] sm:$0xff]  ;;  %v5327_v38 = vpack.c.bf16 %v737_v33, %v733_v32  ;;  %v762_v15 = vld [vmem:[%s7859_s26 + $0x830] sm:$0xff]  ;;  %v779_v32 = vld [vmem:[%s7859_s26 + $0x8b8] sm:$0xff] }
 0x129   : > { %6184 = vmatprep.subr.bf16.mxu1 %v6183_v47  ;;  %v698_v47 = vld [vmem:[%s7859_s26 + $0x630] sm:$0xff]  ;;  %v5309_v52 = vpack.c.bf16 %v696_v44, %v692_v43  ;;  %v741_v44 = vld [vmem:[%s7859_s26 + $0x788] sm:$0xff]  ;;  %v748_v63 = vld [vmem:[%s7859_s26 + $0x7c0] sm:$0xff] }
 0x12a   : > { %v738_v43 = vld [vmem:[%s7859_s26 + $0x770] sm:$0xff]  ;;  %v467_v33 = vld [vmem:[%s7975_s12 + $0x1d8] sm:$0xff] }
 0x12b   : > { %5290 = vmatpush1.bf16.msra.mxu0 %v5289_v53  ;;  %v6205_v53 = vpack.c.bf16 %v698_v47, %v694_v45  ;;  %v745_v45 = vld [vmem:[%s7859_s26 + $0x7a8] sm:$0xff]  ;;  %v747_v47 = vld [vmem:[%s7859_s26 + $0x7b8] sm:$0xff]  ;;  %v438_v20 = vld [vmem:[%s7975_s12 + $0x10] sm:$0xff] }
 0x12c   : > { %6186 = vmatpush1.bf16.msra.mxu1 %v6185_v54  ;;  %5292 = vmatprep.subr.bf16.mxu0 %v5291_v55  ;;  %v5311_v54 = vpack.c.bf16 %v705_v49, %v701_v48  ;;  %v700_v55 = vld [vmem:[%s7859_s26 + $0x640] sm:$0xff]  ;;  %v5331_v50 = vpack.c.bf16 %v745_v45, %v741_v44  ;;  %v785_v44 = vld [vmem:[%s7859_s26 + $0x8e8] sm:$0xff]  ;;  %v783_v45 = vld [vmem:[%s7859_s26 + $0x8d8] sm:$0xff] }
 0x12d   : > { %6188 = vmatprep.subr.bf16.mxu1 %v6187_v59  ;;  %v706_v59 = vld [vmem:[%s7859_s26 + $0x670] sm:$0xff]  ;;  %v5313_v0 = vpack.c.bf16 %v704_v56, %v700_v55  ;;  %v749_v56 = vld [vmem:[%s7859_s26 + $0x7c8] sm:$0xff] }
 0x12e   : > { %v746_v55 = vld [vmem:[%s7859_s26 + $0x7b0] sm:$0xff] }
 0x12f   : > { %5294 = vmatpush1.bf16.msra.mxu0 %v5293_v1  ;;  %v6209_v1 = vpack.c.bf16 %v706_v59, %v702_v57  ;;  %v753_v57 = vld [vmem:[%s7859_s26 + $0x7e8] sm:$0xff]  ;;  %v755_v59 = vld [vmem:[%s7859_s26 + $0x7f8] sm:$0xff] }
 0x130   : > { %6190 = vmatpush1.bf16.msra.mxu1 %v6189_v2  ;;  %5296 = vmatprep.subr.bf16.mxu0 %v5295_v3  ;;  %v5315_v2 = vpack.c.bf16 %v713_v61, %v709_v60  ;;  %v708_v3 = vld [vmem:[%s7859_s26 + $0x680] sm:$0xff]  ;;  %v5335_v62 = vpack.c.bf16 %v753_v57, %v749_v56  ;;  %v789_v56 = vld [vmem:[%s7859_s26 + $0x908] sm:$0xff] }
 0x131   : > { %6192 = vmatprep.subr.bf16.mxu1 %v6191_v7  ;;  %v714_v7 = vld [vmem:[%s7859_s26 + $0x6b0] sm:$0xff]  ;;  %v5317_v12 = vpack.c.bf16 %v712_v4, %v708_v3  ;;  %v757_v4 = vld [vmem:[%s7859_s26 + $0x808] sm:$0xff] }
 0x132   : > { %v6213_v13 = vpack.c.bf16 %v714_v7, %v710_v5  ;;  %v754_v3 = vld [vmem:[%s7859_s26 + $0x7f0] sm:$0xff]  ;;  %v761_v5 = vld [vmem:[%s7859_s26 + $0x828] sm:$0xff]  ;;  %v763_v7 = vld [vmem:[%s7859_s26 + $0x838] sm:$0xff] }
 0x133   : > { %5298 = vmatpush1.bf16.msra.mxu0 %v5297_v14  ;;  %v5319_v14 = vpack.c.bf16 %v721_v9, %v717_v8  ;;  %v793_v57 = vld [vmem:[%s7859_s26 + $0x928] sm:$0xff] }
 0x134   : > { %6194 = vmatpush1.bf16.msra.mxu1 %v6193_v17  ;;  %5300 = vmatprep.subr.bf16.mxu0 %v5299_v18  ;;  %v718_v17 = vld [vmem:[%s7859_s26 + $0x6d0] sm:$0xff]  ;;  %v6215_v18 = vpack.c.bf16 %v723_v11, %v719_v10  ;;  %v5339_v10 = vpack.c.bf16 %v761_v5, %v757_v4  ;;  %v756_v11 = vld [vmem:[%s7859_s26 + $0x800] sm:$0xff]  ;;  %v797_v4 = vld [vmem:[%s7859_s26 + $0x948] sm:$0xff] }
 0x135   : > { %6196 = vmatprep.subr.bf16.mxu1 %v6195_v22  ;;  %v727_v22 = vld [vmem:[%s7859_s26 + $0x718] sm:$0xff]  ;;  %v6217_v25 = vpack.c.bf16 %v722_v19, %v718_v17  ;;  %v769_v17 = vld [vmem:[%s7859_s26 + $0x868] sm:$0xff] }
 0x136   : > { %v771_v19 = vld [vmem:[%s7859_s26 + $0x878] sm:$0xff]  ;;  %v801_v5 = vld [vmem:[%s7859_s26 + $0x968] sm:$0xff] }
 0x137   : > { %5302 = vmatpush1.bf16.msra.mxu0 %v5301_v28  ;;  %v728_v28 = vld [vmem:[%s7859_s26 + $0x720] sm:$0xff] }
 0x138   : > { %6198 = vmatpush1.bf16.msra.mxu1 %v6197_v29  ;;  %5304 = vmatprep.subr.bf16.mxu0 %v5303_v30  ;;  %v726_v29 = vld [vmem:[%s7859_s26 + $0x710] sm:$0xff]  ;;  %v6219_v30 = vpack.c.bf16 %v731_v23, %v727_v22  ;;  %v5325_v36 = vpack.c.bf16 %v728_v28, %v724_v27  ;;  %v5343_v23 = vpack.c.bf16 %v769_v17, %v765_v16  ;;  %v805_v16 = vld [vmem:[%s7859_s26 + $0x988] sm:$0xff] }
 0x139   : > { %6200 = vmatprep.subr.bf16.mxu1 %v6199_v34  ;;  %v735_v34 = vld [vmem:[%s7859_s26 + $0x758] sm:$0xff]  ;;  %v6221_v37 = vpack.c.bf16 %v730_v31, %v726_v29  ;;  %v770_v28 = vld [vmem:[%s7859_s26 + $0x870] sm:$0xff]  ;;  %v773_v29 = vld [vmem:[%s7859_s26 + $0x888] sm:$0xff] }
 0x13a   : > { %v775_v31 = vld [vmem:[%s7859_s26 + $0x898] sm:$0xff]  ;;  %v809_v17 = vld [vmem:[%s7859_s26 + $0x9a8] sm:$0xff] }
 0x13b   : > { %5306 = vmatpush1.bf16.msra.mxu0 %v5305_v40  ;;  %v736_v40 = vld [vmem:[%s7859_s26 + $0x760] sm:$0xff] }
 0x13c   : > { %6202 = vmatpush1.bf16.msra.mxu1 %v6201_v41  ;;  %5308 = vmatprep.subr.bf16.mxu0 %v5307_v42  ;;  %v734_v41 = vld [vmem:[%s7859_s26 + $0x750] sm:$0xff]  ;;  %v6223_v42 = vpack.c.bf16 %v739_v35, %v735_v34  ;;  %v5329_v48 = vpack.c.bf16 %v736_v40, %v732_v39  ;;  %v776_v39 = vld [vmem:[%s7859_s26 + $0x8a0] sm:$0xff] }
 0x13d   : > { %6204 = vmatprep.subr.bf16.mxu1 %v6203_v46  ;;  %v743_v46 = vld [vmem:[%s7859_s26 + $0x798] sm:$0xff]  ;;  %v6225_v49 = vpack.c.bf16 %v738_v43, %v734_v41  ;;  %v466_v35 = vld [vmem:[%s7975_s12 + $0x1d0] sm:$0xff]  ;;  %v6243_v41 = vpack.c.bf16 %v779_v32, %v775_v31  ;;  %v781_v43 = vld [vmem:[%s7859_s26 + $0x8c8] sm:$0xff] }
 0x13e   : > { %v774_v40 = vld [vmem:[%s7859_s26 + $0x890] sm:$0xff]  ;;  %v819_v31 = vld [vmem:[%s7859_s26 + $0x9f8] sm:$0xff] }
 0x13f   : > { %5310 = vmatpush1.bf16.msra.mxu0 %v5309_v52  ;;  %v744_v52 = vld [vmem:[%s7859_s26 + $0x7a0] sm:$0xff] }
 0x140   : > { %6206 = vmatpush1.bf16.msra.mxu1 %v6205_v53  ;;  %5312 = vmatprep.subr.bf16.mxu0 %v5311_v54  ;;  %v742_v53 = vld [vmem:[%s7859_s26 + $0x790] sm:$0xff]  ;;  %v6227_v54 = vpack.c.bf16 %v747_v47, %v743_v46  ;;  %v5333_v60 = vpack.c.bf16 %v744_v52, %v740_v51  ;;  %v787_v46 = vld [vmem:[%s7859_s26 + $0x8f8] sm:$0xff]  ;;  %v441_v47 = vld [vmem:[%s7975_s12 + $0x28] sm:$0xff] }
 0x141   : > { %6208 = vmatprep.subr.bf16.mxu1 %v6207_v58  ;;  %v751_v58 = vld [vmem:[%s7859_s26 + $0x7d8] sm:$0xff]  ;;  %v6229_v61 = vpack.c.bf16 %v746_v55, %v742_v53  ;;  %v780_v51 = vld [vmem:[%s7859_s26 + $0x8c0] sm:$0xff]  ;;  %v782_v53 = vld [vmem:[%s7859_s26 + $0x8d0] sm:$0xff] }
 0x142   : > { %v784_v52 = vld [vmem:[%s7859_s26 + $0x8e0] sm:$0xff]  ;;  %v786_v55 = vld [vmem:[%s7859_s26 + $0x8f0] sm:$0xff] }
 0x143   : > { %5314 = vmatpush1.bf16.msra.mxu0 %v5313_v0  ;;  %v752_v0 = vld [vmem:[%s7859_s26 + $0x7e0] sm:$0xff] }
 0x144   : > { %6210 = vmatpush1.bf16.msra.mxu1 %v6209_v1  ;;  %5316 = vmatprep.subr.bf16.mxu0 %v5315_v2  ;;  %v750_v1 = vld [vmem:[%s7859_s26 + $0x7d0] sm:$0xff]  ;;  %v6231_v2 = vpack.c.bf16 %v755_v59, %v751_v58  ;;  %v5337_v8 = vpack.c.bf16 %v752_v0, %v748_v63  ;;  %v791_v58 = vld [vmem:[%s7859_s26 + $0x918] sm:$0xff]  ;;  %v788_v63 = vld [vmem:[%s7859_s26 + $0x900] sm:$0xff] }
 0x145   : > { %6212 = vmatprep.subr.bf16.mxu1 %v6211_v6  ;;  %v759_v6 = vld [vmem:[%s7859_s26 + $0x818] sm:$0xff]  ;;  %v6233_v9 = vpack.c.bf16 %v754_v3, %v750_v1  ;;  %v792_v0 = vld [vmem:[%s7859_s26 + $0x920] sm:$0xff]  ;;  %v790_v1 = vld [vmem:[%s7859_s26 + $0x910] sm:$0xff] }
 0x146   : > { %v795_v59 = vld [vmem:[%s7859_s26 + $0x938] sm:$0xff]  ;;  %v794_v3 = vld [vmem:[%s7859_s26 + $0x930] sm:$0xff] }
 0x147   : > { %5318 = vmatpush1.bf16.msra.mxu0 %v5317_v12  ;;  %v760_v12 = vld [vmem:[%s7859_s26 + $0x820] sm:$0xff] }
 0x148   : > { %6214 = vmatpush1.bf16.msra.mxu1 %v6213_v13  ;;  %5320 = vmatprep.subr.bf16.mxu0 %v5319_v14  ;;  %v758_v13 = vld [vmem:[%s7859_s26 + $0x810] sm:$0xff]  ;;  %v6235_v14 = vpack.c.bf16 %v763_v7, %v759_v6  ;;  %v5341_v21 = vpack.c.bf16 %v760_v12, %v756_v11  ;;  %v799_v6 = vld [vmem:[%s7859_s26 + $0x958] sm:$0xff]  ;;  %v796_v11 = vld [vmem:[%s7859_s26 + $0x940] sm:$0xff] }
 0x149   : > { %6216 = vmatprep.subr.bf16.mxu1 %v6215_v18  ;;  %v767_v18 = vld [vmem:[%s7859_s26 + $0x858] sm:$0xff]  ;;  %v6237_v22 = vpack.c.bf16 %v762_v15, %v758_v13  ;;  %v800_v12 = vld [vmem:[%s7859_s26 + $0x960] sm:$0xff]  ;;  %v798_v13 = vld [vmem:[%s7859_s26 + $0x950] sm:$0xff] }
 0x14a   : > { %v6239_v27 = vpack.c.bf16 %v771_v19, %v767_v18  ;;  %v803_v7 = vld [vmem:[%s7859_s26 + $0x978] sm:$0xff]  ;;  %v802_v15 = vld [vmem:[%s7859_s26 + $0x970] sm:$0xff] }
 0x14b   : > { %5322 = vmatpush1.bf16.msra.mxu0 %v5321_v24  ;;  %v764_v24 = vld [vmem:[%s7859_s26 + $0x840] sm:$0xff]  ;;  %v807_v18 = vld [vmem:[%s7859_s26 + $0x998] sm:$0xff] }
 0x14c   : > { %6218 = vmatpush1.bf16.msra.mxu1 %v6217_v25  ;;  %5324 = vmatprep.subr.bf16.mxu0 %v5323_v26  ;;  %v768_v25 = vld [vmem:[%s7859_s26 + $0x860] sm:$0xff]  ;;  %v766_v26 = vld [vmem:[%s7859_s26 + $0x850] sm:$0xff]  ;;  %v811_v19 = vld [vmem:[%s7859_s26 + $0x9b8] sm:$0xff] }
 0x14d   : > { %6220 = vmatprep.subr.bf16.mxu1 %v6219_v30  ;;  %v777_v30 = vld [vmem:[%s7859_s26 + $0x8a8] sm:$0xff]  ;;  %v5345_v34 = vpack.c.bf16 %v768_v25, %v764_v24  ;;  %v808_v24 = vld [vmem:[%s7859_s26 + $0x9a0] sm:$0xff]  ;;  %v806_v25 = vld [vmem:[%s7859_s26 + $0x990] sm:$0xff] }
 0x14f   : > { %5326 = vmatpush1.bf16.msra.mxu0 %v5325_v36  ;;  %v6241_v36 = vpack.c.bf16 %v770_v28, %v766_v26  ;;  %v6259_v26 = vpack.c.bf16 %v811_v19, %v807_v18  ;;  %v813_v28 = vld [vmem:[%s7859_s26 + $0x9c8] sm:$0xff]  ;;  %v844_v19 = vld [vmem:[%s7859_s26 + $0xac0] sm:$0xff] }
 0x150   : > { %6222 = vmatpush1.bf16.msra.mxu1 %v6221_v37  ;;  %5328 = vmatprep.subr.bf16.mxu0 %v5327_v38  ;;  %v5347_v37 = vpack.c.bf16 %v777_v30, %v773_v29  ;;  %v772_v38 = vld [vmem:[%s7859_s26 + $0x880] sm:$0xff]  ;;  %v817_v29 = vld [vmem:[%s7859_s26 + $0x9e8] sm:$0xff]  ;;  %v815_v30 = vld [vmem:[%s7859_s26 + $0x9d8] sm:$0xff] }
 0x151   : > { %6224 = vmatprep.subr.bf16.mxu1 %v6223_v42  ;;  %v778_v42 = vld [vmem:[%s7859_s26 + $0x8b0] sm:$0xff] }
 0x153   : > { %5330 = vmatpush1.bf16.msra.mxu0 %v5329_v48  ;;  %v5349_v48 = vpack.c.bf16 %v776_v39, %v772_v38  ;;  %v6263_v38 = vpack.c.bf16 %v819_v31, %v815_v30  ;;  %v818_v39 = vld [vmem:[%s7859_s26 + $0x9f0] sm:$0xff]  ;;  %v852_v31 = vld [vmem:[%s7859_s26 + $0xb00] sm:$0xff] }
 0x154   : > { %6226 = vmatpush1.bf16.msra.mxu1 %v6225_v49  ;;  %5332 = vmatprep.subr.bf16.mxu0 %v5331_v50  ;;  %v6245_v49 = vpack.c.bf16 %v778_v42, %v774_v40  ;;  %v5351_v50 = vpack.c.bf16 %v785_v44, %v781_v43  ;;  %v821_v40 = vld [vmem:[%s7859_s26 + $0xa08] sm:$0xff]  ;;  %v823_v42 = vld [vmem:[%s7859_s26 + $0xa18] sm:$0xff] }
 0x155   : > { %6228 = vmatprep.subr.bf16.mxu1 %v6227_v54  ;;  %v6247_v54 = vpack.c.bf16 %v787_v46, %v783_v45  ;;  %v827_v43 = vld [vmem:[%s7859_s26 + $0xa38] sm:$0xff] }
 0x157   : > { %5334 = vmatpush1.bf16.msra.mxu0 %v5333_v60  ;;  %v5353_v60 = vpack.c.bf16 %v784_v52, %v780_v51  ;;  %v826_v51 = vld [vmem:[%s7859_s26 + $0xa30] sm:$0xff]  ;;  %v829_v52 = vld [vmem:[%s7859_s26 + $0xa48] sm:$0xff] }
 0x158   : > { %6230 = vmatpush1.bf16.msra.mxu1 %v6229_v61  ;;  %5336 = vmatprep.subr.bf16.mxu0 %v5335_v62  ;;  %v6249_v61 = vpack.c.bf16 %v786_v55, %v782_v53  ;;  %v5355_v62 = vpack.c.bf16 %v793_v57, %v789_v56  ;;  %v833_v53 = vld [vmem:[%s7859_s26 + $0xa68] sm:$0xff]  ;;  %v835_v55 = vld [vmem:[%s7859_s26 + $0xa78] sm:$0xff] }
 0x159   : > { %6232 = vmatprep.subr.bf16.mxu1 %v6231_v2  ;;  %v6251_v2 = vpack.c.bf16 %v795_v59, %v791_v58  ;;  %v5375_v58 = vpack.c.bf16 %v833_v53, %v829_v52  ;;  %v828_v59 = vld [vmem:[%s7859_s26 + $0xa40] sm:$0xff] }
 0x15b   : > { %5338 = vmatpush1.bf16.msra.mxu0 %v5337_v8  ;;  %v5357_v8 = vpack.c.bf16 %v792_v0, %v788_v63  ;;  %v834_v63 = vld [vmem:[%s7859_s26 + $0xa70] sm:$0xff]  ;;  %v837_v0 = vld [vmem:[%s7859_s26 + $0xa88] sm:$0xff] }
 0x15c   : > { %6234 = vmatpush1.bf16.msra.mxu1 %v6233_v9  ;;  %5340 = vmatprep.subr.bf16.mxu0 %v5339_v10  ;;  %v6253_v9 = vpack.c.bf16 %v794_v3, %v790_v1  ;;  %v5359_v10 = vpack.c.bf16 %v801_v5, %v797_v4  ;;  %v841_v1 = vld [vmem:[%s7859_s26 + $0xaa8] sm:$0xff]  ;;  %v843_v3 = vld [vmem:[%s7859_s26 + $0xab8] sm:$0xff] }
 0x15d   : > { %6236 = vmatprep.subr.bf16.mxu1 %v6235_v14  ;;  %v6255_v14 = vpack.c.bf16 %v803_v7, %v799_v6  ;;  %v5379_v6 = vpack.c.bf16 %v841_v1, %v837_v0  ;;  %v836_v7 = vld [vmem:[%s7859_s26 + $0xa80] sm:$0xff] }
 0x15e   : > { %2434 = vmatmul.mubr.f32.vlgmr.msra.gmra.mrb[0].mxu0 %v438_v20 }
 0x15f   : > { %5342 = vmatpush1.bf16.msra.mxu0 %v5341_v21  ;;  %3512 = vmatmul.mubr.f32.vlgmr.msra.gmra.mrb[0].mxu1 %v438_v20  ;;  %v5361_v20 = vpack.c.bf16 %v800_v12, %v796_v11  ;;  %v6257_v21 = vpack.c.bf16 %v802_v15, %v798_v13  ;;  %v842_v11 = vld [vmem:[%s7859_s26 + $0xab0] sm:$0xff]  ;;  %v845_v12 = vld [vmem:[%s7859_s26 + $0xac8] sm:$0xff]  ;;  %v851_v15 = vld [vmem:[%s7859_s26 + $0xaf8] sm:$0xff] }
 0x160   : > { %6238 = vmatpush1.bf16.msra.mxu1 %v6237_v22  ;;  %5344 = vmatprep.subr.bf16.mxu0 %v5343_v23  ;;  %v5363_v22 = vpack.c.bf16 %v809_v17, %v805_v16  ;;  %v804_v23 = vld [vmem:[%s7859_s26 + $0x980] sm:$0xff]  ;;  %v849_v13 = vld [vmem:[%s7859_s26 + $0xae8] sm:$0xff] }
 0x161   : > { %6240 = vmatprep.subr.bf16.mxu1 %v6239_v27  ;;  %2439 = vmatprep.mubr.f32.mxu0 %v467_v33  ;;  %v810_v27 = vld [vmem:[%s7859_s26 + $0x9b0] sm:$0xff]  ;;  %v5365_v32 = vpack.c.bf16 %v808_v24, %v804_v23  ;;  %v5383_v18 = vpack.c.bf16 %v849_v13, %v845_v12  ;;  %v853_v24 = vld [vmem:[%s7859_s26 + $0xb08] sm:$0xff] }
 0x162   : > { %3517 = vmatprep.mubr.f32.mxu1 %v467_v33  ;;  %2440 = vmatmul.mubr.f32.gmra.mrb[2].mxu0 %v466_v35  ;;  %v6261_v33 = vpack.c.bf16 %v810_v27, %v806_v25  ;;  %v850_v23 = vld [vmem:[%s7859_s26 + $0xaf0] sm:$0xff]  ;;  %v857_v25 = vld [vmem:[%s7859_s26 + $0xb28] sm:$0xff]  ;;  %v859_v27 = vld [vmem:[%s7859_s26 + $0xb38] sm:$0xff] }
 0x163   : > { %5346 = vmatpush1.bf16.msra.mxu0 %v5345_v34  ;;  %3518 = vmatmul.mubr.f32.gmra.mrb[2].mxu1 %v466_v35  ;;  %v5367_v34 = vpack.c.bf16 %v817_v29, %v813_v28  ;;  %v812_v35 = vld [vmem:[%s7859_s26 + $0x9c0] sm:$0xff]  ;;  %v5387_v30 = vpack.c.bf16 %v857_v25, %v853_v24 }
 0x164   : > { %6242 = vmatpush1.bf16.msra.mxu1 %v6241_v36  ;;  %5348 = vmatprep.subr.bf16.mxu0 %v5347_v37  ;;  %v816_v36 = vld [vmem:[%s7859_s26 + $0x9e0] sm:$0xff]  ;;  %v814_v37 = vld [vmem:[%s7859_s26 + $0x9d0] sm:$0xff] }
 0x165   : > { %6244 = vmatprep.subr.bf16.mxu1 %v6243_v41  ;;  %2510 = vmatprep.mubr.f32.mxu0 %v441_v47  ;;  %v825_v41 = vld [vmem:[%s7859_s26 + $0xa28] sm:$0xff]  ;;  %v5369_v44 = vpack.c.bf16 %v816_v36, %v812_v35  ;;  %v6265_v45 = vpack.c.bf16 %v818_v39, %v814_v37  ;;  %v858_v35 = vld [vmem:[%s7859_s26 + $0xb30] sm:$0xff]  ;;  %v867_v39 = vld [vmem:[%s7859_s26 + $0xb78] sm:$0xff] }
 0x166   : > { %3588 = vmatprep.mubr.f32.mxu1 %v441_v47  ;;  %v5371_v46 = vpack.c.bf16 %v825_v41, %v821_v40  ;;  %v820_v47 = vld [vmem:[%s7859_s26 + $0xa00] sm:$0xff]  ;;  %v861_v36 = vld [vmem:[%s7859_s26 + $0xb48] sm:$0xff] }
 0x167   : > { %5350 = vmatpush1.bf16.msra.mxu0 %v5349_v48  ;;  %v824_v48 = vld [vmem:[%s7859_s26 + $0xa20] sm:$0xff]  ;;  %v865_v37 = vld [vmem:[%s7859_s26 + $0xb68] sm:$0xff] }
 0x168   : > { %6246 = vmatpush1.bf16.msra.mxu1 %v6245_v49  ;;  %5352 = vmatprep.subr.bf16.mxu0 %v5351_v50  ;;  %v822_v49 = vld [vmem:[%s7859_s26 + $0xa10] sm:$0xff]  ;;  %v6267_v50 = vpack.c.bf16 %v827_v43, %v823_v42  ;;  %v5373_v56 = vpack.c.bf16 %v824_v48, %v820_v47  ;;  %v5391_v42 = vpack.c.bf16 %v865_v37, %v861_v36  ;;  %v860_v43 = vld [vmem:[%s7859_s26 + $0xb40] sm:$0xff]  ;;  %v869_v48 = vld [vmem:[%s7859_s26 + $0xb88] sm:$0xff] }
 0x169   : > { %6248 = vmatprep.subr.bf16.mxu1 %v6247_v54  ;;  %v831_v54 = vld [vmem:[%s7859_s26 + $0xa58] sm:$0xff]  ;;  %v6269_v57 = vpack.c.bf16 %v826_v51, %v822_v49  ;;  %v866_v47 = vld [vmem:[%s7859_s26 + $0xb70] sm:$0xff]  ;;  %v873_v49 = vld [vmem:[%s7859_s26 + $0xba8] sm:$0xff] }
 0x16a   : > { %v875_v51 = vld [vmem:[%s7859_s26 + $0xbb8] sm:$0xff]  ;;  %v440_v24 = vld [vmem:[%s7975_s12 + $0x20] sm:$0xff]  ;;  %v469_v37 = vld [vmem:[%s7975_s12 + $0x1e8] sm:$0xff] }
 0x16b   : > { %5354 = vmatpush1.bf16.msra.mxu0 %v5353_v60  ;;  %v832_v60 = vld [vmem:[%s7859_s26 + $0xa60] sm:$0xff]  ;;  %v907_v36 = vld [vmem:[%s7859_s26 + $0xcb8] sm:$0xff] }
 0x16c   : > { %6250 = vmatpush1.bf16.msra.mxu1 %v6249_v61  ;;  %5356 = vmatprep.subr.bf16.mxu0 %v5355_v62  ;;  %v830_v61 = vld [vmem:[%s7859_s26 + $0xa50] sm:$0xff]  ;;  %v6271_v62 = vpack.c.bf16 %v835_v55, %v831_v54  ;;  %v5377_v4 = vpack.c.bf16 %v832_v60, %v828_v59  ;;  %v5395_v54 = vpack.c.bf16 %v873_v49, %v869_v48  ;;  %v868_v55 = vld [vmem:[%s7859_s26 + $0xb80] sm:$0xff]  ;;  %v877_v60 = vld [vmem:[%s7859_s26 + $0xbc8] sm:$0xff] }
 0x16d   : > { %6252 = vmatprep.subr.bf16.mxu1 %v6251_v2  ;;  %v839_v2 = vld [vmem:[%s7859_s26 + $0xa98] sm:$0xff]  ;;  %v6273_v5 = vpack.c.bf16 %v834_v63, %v830_v61  ;;  %v874_v59 = vld [vmem:[%s7859_s26 + $0xbb0] sm:$0xff]  ;;  %v881_v61 = vld [vmem:[%s7859_s26 + $0xbe8] sm:$0xff] }
 0x16e   : > { %v883_v63 = vld [vmem:[%s7859_s26 + $0xbf8] sm:$0xff]  ;;  %v913_v48 = vld [vmem:[%s7859_s26 + $0xce8] sm:$0xff] }
 0x16f   : > { %5358 = vmatpush1.bf16.msra.mxu0 %v5357_v8  ;;  %v840_v8 = vld [vmem:[%s7859_s26 + $0xaa0] sm:$0xff]  ;;  %v911_v49 = vld [vmem:[%s7859_s26 + $0xcd8] sm:$0xff] }
 0x170   : > { %6254 = vmatpush1.bf16.msra.mxu1 %v6253_v9  ;;  %5360 = vmatprep.subr.bf16.mxu0 %v5359_v10  ;;  %v838_v9 = vld [vmem:[%s7859_s26 + $0xa90] sm:$0xff]  ;;  %v6275_v10 = vpack.c.bf16 %v843_v3, %v839_v2  ;;  %v5381_v16 = vpack.c.bf16 %v840_v8, %v836_v7  ;;  %v5399_v2 = vpack.c.bf16 %v881_v61, %v877_v60  ;;  %v876_v3 = vld [vmem:[%s7859_s26 + $0xbc0] sm:$0xff]  ;;  %v885_v8 = vld [vmem:[%s7859_s26 + $0xc08] sm:$0xff] }
 0x171   : > { %6256 = vmatprep.subr.bf16.mxu1 %v6255_v14  ;;  %v847_v14 = vld [vmem:[%s7859_s26 + $0xad8] sm:$0xff]  ;;  %v6277_v17 = vpack.c.bf16 %v842_v11, %v838_v9  ;;  %v882_v7 = vld [vmem:[%s7859_s26 + $0xbf0] sm:$0xff]  ;;  %v889_v9 = vld [vmem:[%s7859_s26 + $0xc28] sm:$0xff] }
 0x172   : > { %v891_v11 = vld [vmem:[%s7859_s26 + $0xc38] sm:$0xff]  ;;  %v917_v60 = vld [vmem:[%s7859_s26 + $0xd08] sm:$0xff] }
 0x173   : > { %5362 = vmatpush1.bf16.msra.mxu0 %v5361_v20  ;;  %v848_v20 = vld [vmem:[%s7859_s26 + $0xae0] sm:$0xff]  ;;  %v921_v61 = vld [vmem:[%s7859_s26 + $0xd28] sm:$0xff] }
 0x174   : > { %6258 = vmatpush1.bf16.msra.mxu1 %v6257_v21  ;;  %5364 = vmatprep.subr.bf16.mxu0 %v5363_v22  ;;  %v846_v21 = vld [vmem:[%s7859_s26 + $0xad0] sm:$0xff]  ;;  %v6279_v22 = vpack.c.bf16 %v851_v15, %v847_v14  ;;  %v5385_v28 = vpack.c.bf16 %v848_v20, %v844_v19  ;;  %v5403_v14 = vpack.c.bf16 %v889_v9, %v885_v8  ;;  %v884_v15 = vld [vmem:[%s7859_s26 + $0xc00] sm:$0xff]  ;;  %v893_v20 = vld [vmem:[%s7859_s26 + $0xc48] sm:$0xff] }
 0x175   : > { %6260 = vmatprep.subr.bf16.mxu1 %v6259_v26  ;;  %v855_v26 = vld [vmem:[%s7859_s26 + $0xb18] sm:$0xff]  ;;  %v6281_v29 = vpack.c.bf16 %v850_v23, %v846_v21  ;;  %v890_v19 = vld [vmem:[%s7859_s26 + $0xc30] sm:$0xff]  ;;  %v897_v21 = vld [vmem:[%s7859_s26 + $0xc68] sm:$0xff] }
 0x176   : > { %v899_v23 = vld [vmem:[%s7859_s26 + $0xc78] sm:$0xff]  ;;  %v925_v8 = vld [vmem:[%s7859_s26 + $0xd48] sm:$0xff] }
 0x177   : > { %5366 = vmatpush1.bf16.msra.mxu0 %v5365_v32  ;;  %v856_v32 = vld [vmem:[%s7859_s26 + $0xb20] sm:$0xff]  ;;  %v929_v9 = vld [vmem:[%s7859_s26 + $0xd68] sm:$0xff] }
 0x178   : > { %6262 = vmatpush1.bf16.msra.mxu1 %v6261_v33  ;;  %5368 = vmatprep.subr.bf16.mxu0 %v5367_v34  ;;  %v854_v33 = vld [vmem:[%s7859_s26 + $0xb10] sm:$0xff]  ;;  %v6283_v34 = vpack.c.bf16 %v859_v27, %v855_v26  ;;  %v5389_v40 = vpack.c.bf16 %v856_v32, %v852_v31  ;;  %v5407_v27 = vpack.c.bf16 %v897_v21, %v893_v20  ;;  %v933_v20 = vld [vmem:[%s7859_s26 + $0xd88] sm:$0xff] }
 0x179   : > { %6264 = vmatprep.subr.bf16.mxu1 %v6263_v38  ;;  %v863_v38 = vld [vmem:[%s7859_s26 + $0xb58] sm:$0xff]  ;;  %v6285_v41 = vpack.c.bf16 %v858_v35, %v854_v33  ;;  %v898_v32 = vld [vmem:[%s7859_s26 + $0xc70] sm:$0xff]  ;;  %v901_v33 = vld [vmem:[%s7859_s26 + $0xc88] sm:$0xff] }
 0x17a   : > { %v903_v35 = vld [vmem:[%s7859_s26 + $0xc98] sm:$0xff]  ;;  %v937_v21 = vld [vmem:[%s7859_s26 + $0xda8] sm:$0xff] }
 0x17b   : > { %5370 = vmatpush1.bf16.msra.mxu0 %v5369_v44  ;;  %v864_v44 = vld [vmem:[%s7859_s26 + $0xb60] sm:$0xff] }
 0x17c   : > { %6266 = vmatpush1.bf16.msra.mxu1 %v6265_v45  ;;  %5372 = vmatprep.subr.bf16.mxu0 %v5371_v46  ;;  %v862_v45 = vld [vmem:[%s7859_s26 + $0xb50] sm:$0xff]  ;;  %v6287_v46 = vpack.c.bf16 %v867_v39, %v863_v38  ;;  %v5393_v52 = vpack.c.bf16 %v864_v44, %v860_v43  ;;  %v468_v39 = vld [vmem:[%s7975_s12 + $0x1e0] sm:$0xff] }
 0x17d   : > { %6268 = vmatprep.subr.bf16.mxu1 %v6267_v50  ;;  %v871_v50 = vld [vmem:[%s7859_s26 + $0xb98] sm:$0xff]  ;;  %v6289_v53 = vpack.c.bf16 %v866_v47, %v862_v45  ;;  %v904_v43 = vld [vmem:[%s7859_s26 + $0xca0] sm:$0xff]  ;;  %v902_v44 = vld [vmem:[%s7859_s26 + $0xc90] sm:$0xff]  ;;  %v6307_v45 = vpack.c.bf16 %v907_v36, %v903_v35 }
 0x17e   : > { %v909_v47 = vld [vmem:[%s7859_s26 + $0xcc8] sm:$0xff]  ;;  %v947_v35 = vld [vmem:[%s7859_s26 + $0xdf8] sm:$0xff] }
 0x17f   : > { %5374 = vmatpush1.bf16.msra.mxu0 %v5373_v56  ;;  %v872_v56 = vld [vmem:[%s7859_s26 + $0xba0] sm:$0xff] }
 0x180   : > { %6270 = vmatpush1.bf16.msra.mxu1 %v6269_v57  ;;  %5376 = vmatprep.subr.bf16.mxu0 %v5375_v58  ;;  %v870_v57 = vld [vmem:[%s7859_s26 + $0xb90] sm:$0xff]  ;;  %v6291_v58 = vpack.c.bf16 %v875_v51, %v871_v50  ;;  %v5397_v0 = vpack.c.bf16 %v872_v56, %v868_v55  ;;  %v915_v50 = vld [vmem:[%s7859_s26 + $0xcf8] sm:$0xff]  ;;  %v908_v55 = vld [vmem:[%s7859_s26 + $0xcc0] sm:$0xff] }
 0x181   : > { %6272 = vmatprep.subr.bf16.mxu1 %v6271_v62  ;;  %v879_v62 = vld [vmem:[%s7859_s26 + $0xbd8] sm:$0xff]  ;;  %v6293_v1 = vpack.c.bf16 %v874_v59, %v870_v57  ;;  %v912_v56 = vld [vmem:[%s7859_s26 + $0xce0] sm:$0xff]  ;;  %v910_v57 = vld [vmem:[%s7859_s26 + $0xcd0] sm:$0xff] }
 0x182   : > { %v443_v51 = vld [vmem:[%s7975_s12 + $0x38] sm:$0xff]  ;;  %v914_v59 = vld [vmem:[%s7859_s26 + $0xcf0] sm:$0xff] }
 0x183   : > { %5378 = vmatpush1.bf16.msra.mxu0 %v5377_v4  ;;  %v880_v4 = vld [vmem:[%s7859_s26 + $0xbe0] sm:$0xff] }
 0x184   : > { %6274 = vmatpush1.bf16.msra.mxu1 %v6273_v5  ;;  %5380 = vmatprep.subr.bf16.mxu0 %v5379_v6  ;;  %v878_v5 = vld [vmem:[%s7859_s26 + $0xbd0] sm:$0xff]  ;;  %v6295_v6 = vpack.c.bf16 %v883_v63, %v879_v62  ;;  %v5401_v12 = vpack.c.bf16 %v880_v4, %v876_v3  ;;  %v919_v62 = vld [vmem:[%s7859_s26 + $0xd18] sm:$0xff]  ;;  %v916_v3 = vld [vmem:[%s7859_s26 + $0xd00] sm:$0xff] }
 0x185   : > { %6276 = vmatprep.subr.bf16.mxu1 %v6275_v10  ;;  %v887_v10 = vld [vmem:[%s7859_s26 + $0xc18] sm:$0xff]  ;;  %v6297_v13 = vpack.c.bf16 %v882_v7, %v878_v5  ;;  %v920_v4 = vld [vmem:[%s7859_s26 + $0xd20] sm:$0xff]  ;;  %v918_v5 = vld [vmem:[%s7859_s26 + $0xd10] sm:$0xff] }
 0x186   : > { %v923_v63 = vld [vmem:[%s7859_s26 + $0xd38] sm:$0xff]  ;;  %v922_v7 = vld [vmem:[%s7859_s26 + $0xd30] sm:$0xff] }
 0x187   : > { %5382 = vmatpush1.bf16.msra.mxu0 %v5381_v16  ;;  %v888_v16 = vld [vmem:[%s7859_s26 + $0xc20] sm:$0xff] }
 0x188   : > { %6278 = vmatpush1.bf16.msra.mxu1 %v6277_v17  ;;  %5384 = vmatprep.subr.bf16.mxu0 %v5383_v18  ;;  %v886_v17 = vld [vmem:[%s7859_s26 + $0xc10] sm:$0xff]  ;;  %v6299_v18 = vpack.c.bf16 %v891_v11, %v887_v10  ;;  %v5405_v25 = vpack.c.bf16 %v888_v16, %v884_v15  ;;  %v927_v10 = vld [vmem:[%s7859_s26 + $0xd58] sm:$0xff]  ;;  %v924_v15 = vld [vmem:[%s7859_s26 + $0xd40] sm:$0xff] }
 0x189   : > { %6280 = vmatprep.subr.bf16.mxu1 %v6279_v22  ;;  %v895_v22 = vld [vmem:[%s7859_s26 + $0xc58] sm:$0xff]  ;;  %v6301_v26 = vpack.c.bf16 %v890_v19, %v886_v17  ;;  %v928_v16 = vld [vmem:[%s7859_s26 + $0xd60] sm:$0xff]  ;;  %v926_v17 = vld [vmem:[%s7859_s26 + $0xd50] sm:$0xff] }
 0x18a   : > { %v6303_v31 = vpack.c.bf16 %v899_v23, %v895_v22  ;;  %v931_v11 = vld [vmem:[%s7859_s26 + $0xd78] sm:$0xff]  ;;  %v930_v19 = vld [vmem:[%s7859_s26 + $0xd70] sm:$0xff] }
 0x18b   : > { %5386 = vmatpush1.bf16.msra.mxu0 %v5385_v28  ;;  %v892_v28 = vld [vmem:[%s7859_s26 + $0xc40] sm:$0xff]  ;;  %v935_v22 = vld [vmem:[%s7859_s26 + $0xd98] sm:$0xff] }
 0x18c   : > { %6282 = vmatpush1.bf16.msra.mxu1 %v6281_v29  ;;  %5388 = vmatprep.subr.bf16.mxu0 %v5387_v30  ;;  %v896_v29 = vld [vmem:[%s7859_s26 + $0xc60] sm:$0xff]  ;;  %v894_v30 = vld [vmem:[%s7859_s26 + $0xc50] sm:$0xff]  ;;  %v939_v23 = vld [vmem:[%s7859_s26 + $0xdb8] sm:$0xff] }
 0x18d   : > { %6284 = vmatprep.subr.bf16.mxu1 %v6283_v34  ;;  %v905_v34 = vld [vmem:[%s7859_s26 + $0xca8] sm:$0xff]  ;;  %v5409_v38 = vpack.c.bf16 %v896_v29, %v892_v28  ;;  %v936_v28 = vld [vmem:[%s7859_s26 + $0xda0] sm:$0xff]  ;;  %v934_v29 = vld [vmem:[%s7859_s26 + $0xd90] sm:$0xff] }
 0x18f   : > { %5390 = vmatpush1.bf16.msra.mxu0 %v5389_v40  ;;  %v6305_v40 = vpack.c.bf16 %v898_v32, %v894_v30  ;;  %v6323_v30 = vpack.c.bf16 %v939_v23, %v935_v22  ;;  %v941_v32 = vld [vmem:[%s7859_s26 + $0xdc8] sm:$0xff]  ;;  %v972_v23 = vld [vmem:[%s7859_s26 + $0xec0] sm:$0xff] }
 0x190   : > { %6286 = vmatpush1.bf16.msra.mxu1 %v6285_v41  ;;  %5392 = vmatprep.subr.bf16.mxu0 %v5391_v42  ;;  %v5411_v41 = vpack.c.bf16 %v905_v34, %v901_v33  ;;  %v900_v42 = vld [vmem:[%s7859_s26 + $0xc80] sm:$0xff]  ;;  %v945_v33 = vld [vmem:[%s7859_s26 + $0xde8] sm:$0xff]  ;;  %v943_v34 = vld [vmem:[%s7859_s26 + $0xdd8] sm:$0xff] }
 0x191   : > { %6288 = vmatprep.subr.bf16.mxu1 %v6287_v46  ;;  %v906_v46 = vld [vmem:[%s7859_s26 + $0xcb0] sm:$0xff] }
 0x193   : > { %5394 = vmatpush1.bf16.msra.mxu0 %v5393_v52  ;;  %v5413_v52 = vpack.c.bf16 %v904_v43, %v900_v42  ;;  %v6327_v42 = vpack.c.bf16 %v947_v35, %v943_v34  ;;  %v946_v43 = vld [vmem:[%s7859_s26 + $0xdf0] sm:$0xff]  ;;  %v980_v35 = vld [vmem:[%s7859_s26 + $0xf00] sm:$0xff] }
 0x194   : > { %6290 = vmatpush1.bf16.msra.mxu1 %v6289_v53  ;;  %5396 = vmatprep.subr.bf16.mxu0 %v5395_v54  ;;  %v6309_v53 = vpack.c.bf16 %v906_v46, %v902_v44  ;;  %v5415_v54 = vpack.c.bf16 %v913_v48, %v909_v47  ;;  %v949_v44 = vld [vmem:[%s7859_s26 + $0xe08] sm:$0xff]  ;;  %v951_v46 = vld [vmem:[%s7859_s26 + $0xe18] sm:$0xff] }
 0x195   : > { %6292 = vmatprep.subr.bf16.mxu1 %v6291_v58  ;;  %v6311_v58 = vpack.c.bf16 %v915_v50, %v911_v49  ;;  %v955_v47 = vld [vmem:[%s7859_s26 + $0xe38] sm:$0xff] }
 0x197   : > { %5398 = vmatpush1.bf16.msra.mxu0 %v5397_v0  ;;  %v5417_v0 = vpack.c.bf16 %v912_v56, %v908_v55  ;;  %v954_v55 = vld [vmem:[%s7859_s26 + $0xe30] sm:$0xff]  ;;  %v957_v56 = vld [vmem:[%s7859_s26 + $0xe48] sm:$0xff] }
 0x198   : > { %6294 = vmatpush1.bf16.msra.mxu1 %v6293_v1  ;;  %5400 = vmatprep.subr.bf16.mxu0 %v5399_v2  ;;  %v6313_v1 = vpack.c.bf16 %v914_v59, %v910_v57  ;;  %v5419_v2 = vpack.c.bf16 %v921_v61, %v917_v60  ;;  %v961_v57 = vld [vmem:[%s7859_s26 + $0xe68] sm:$0xff]  ;;  %v963_v59 = vld [vmem:[%s7859_s26 + $0xe78] sm:$0xff] }
 0x199   : > { %6296 = vmatprep.subr.bf16.mxu1 %v6295_v6  ;;  %v6315_v6 = vpack.c.bf16 %v923_v63, %v919_v62  ;;  %v5439_v62 = vpack.c.bf16 %v961_v57, %v957_v56  ;;  %v956_v63 = vld [vmem:[%s7859_s26 + $0xe40] sm:$0xff] }
 0x19b   : > { %5402 = vmatpush1.bf16.msra.mxu0 %v5401_v12  ;;  %v5421_v12 = vpack.c.bf16 %v920_v4, %v916_v3  ;;  %v962_v3 = vld [vmem:[%s7859_s26 + $0xe70] sm:$0xff]  ;;  %v965_v4 = vld [vmem:[%s7859_s26 + $0xe88] sm:$0xff] }
 0x19c   : > { %6298 = vmatpush1.bf16.msra.mxu1 %v6297_v13  ;;  %5404 = vmatprep.subr.bf16.mxu0 %v5403_v14  ;;  %v6317_v13 = vpack.c.bf16 %v922_v7, %v918_v5  ;;  %v5423_v14 = vpack.c.bf16 %v929_v9, %v925_v8  ;;  %v969_v5 = vld [vmem:[%s7859_s26 + $0xea8] sm:$0xff]  ;;  %v971_v7 = vld [vmem:[%s7859_s26 + $0xeb8] sm:$0xff] }
 0x19d   : > { %6300 = vmatprep.subr.bf16.mxu1 %v6299_v18  ;;  %v6319_v18 = vpack.c.bf16 %v931_v11, %v927_v10  ;;  %v5443_v10 = vpack.c.bf16 %v969_v5, %v965_v4  ;;  %v964_v11 = vld [vmem:[%s7859_s26 + $0xe80] sm:$0xff] }
 0x19e   : > { %2511 = vmatmul.mubr.f32.vlgmr.msra.gmra.mrb[0].mxu0 %v440_v24 }
 0x19f   : > { %5406 = vmatpush1.bf16.msra.mxu0 %v5405_v25  ;;  %3589 = vmatmul.mubr.f32.vlgmr.msra.gmra.mrb[0].mxu1 %v440_v24  ;;  %v5425_v24 = vpack.c.bf16 %v928_v16, %v924_v15  ;;  %v6321_v25 = vpack.c.bf16 %v930_v19, %v926_v17  ;;  %v970_v15 = vld [vmem:[%s7859_s26 + $0xeb0] sm:$0xff]  ;;  %v973_v16 = vld [vmem:[%s7859_s26 + $0xec8] sm:$0xff]  ;;  %v979_v19 = vld [vmem:[%s7859_s26 + $0xef8] sm:$0xff] }
 0x1a0   : > { %6302 = vmatpush1.bf16.msra.mxu1 %v6301_v26  ;;  %5408 = vmatprep.subr.bf16.mxu0 %v5407_v27  ;;  %v5427_v26 = vpack.c.bf16 %v937_v21, %v933_v20  ;;  %v932_v27 = vld [vmem:[%s7859_s26 + $0xd80] sm:$0xff]  ;;  %v977_v17 = vld [vmem:[%s7859_s26 + $0xee8] sm:$0xff] }
 0x1a1   : > { %6304 = vmatprep.subr.bf16.mxu1 %v6303_v31  ;;  %2516 = vmatprep.mubr.f32.mxu0 %v469_v37  ;;  %v938_v31 = vld [vmem:[%s7859_s26 + $0xdb0] sm:$0xff]  ;;  %v5429_v36 = vpack.c.bf16 %v936_v28, %v932_v27  ;;  %v5447_v22 = vpack.c.bf16 %v977_v17, %v973_v16  ;;  %v981_v28 = vld [vmem:[%s7859_s26 + $0xf08] sm:$0xff] }
 0x1a2   : > { %3594 = vmatprep.mubr.f32.mxu1 %v469_v37  ;;  %2517 = vmatmul.mubr.f32.gmra.mrb[2].mxu0 %v468_v39  ;;  %v6325_v37 = vpack.c.bf16 %v938_v31, %v934_v29  ;;  %v978_v27 = vld [vmem:[%s7859_s26 + $0xef0] sm:$0xff]  ;;  %v985_v29 = vld [vmem:[%s7859_s26 + $0xf28] sm:$0xff]  ;;  %v987_v31 = vld [vmem:[%s7859_s26 + $0xf38] sm:$0xff] }
 0x1a3   : > { %5410 = vmatpush1.bf16.msra.mxu0 %v5409_v38  ;;  %3595 = vmatmul.mubr.f32.gmra.mrb[2].mxu1 %v468_v39  ;;  %v5431_v38 = vpack.c.bf16 %v945_v33, %v941_v32  ;;  %v940_v39 = vld [vmem:[%s7859_s26 + $0xdc0] sm:$0xff]  ;;  %v5451_v34 = vpack.c.bf16 %v985_v29, %v981_v28  ;;  %v442_v28 = vld [vmem:[%s7975_s12 + $0x30] sm:$0xff] }
 0x1a4   : > { %6306 = vmatpush1.bf16.msra.mxu1 %v6305_v40  ;;  %5412 = vmatprep.subr.bf16.mxu0 %v5411_v41  ;;  %v944_v40 = vld [vmem:[%s7859_s26 + $0xde0] sm:$0xff]  ;;  %v942_v41 = vld [vmem:[%s7859_s26 + $0xdd0] sm:$0xff] }
 0x1a5   : > { %6308 = vmatprep.subr.bf16.mxu1 %v6307_v45  ;;  %2587 = vmatprep.mubr.f32.mxu0 %v443_v51  ;;  %v953_v45 = vld [vmem:[%s7859_s26 + $0xe28] sm:$0xff]  ;;  %v5433_v48 = vpack.c.bf16 %v944_v40, %v940_v39  ;;  %v6329_v49 = vpack.c.bf16 %v946_v43, %v942_v41  ;;  %v986_v39 = vld [vmem:[%s7859_s26 + $0xf30] sm:$0xff]  ;;  %v995_v43 = vld [vmem:[%s7859_s26 + $0xf78] sm:$0xff] }
 0x1a6   : > { %3665 = vmatprep.mubr.f32.mxu1 %v443_v51  ;;  %v5435_v50 = vpack.c.bf16 %v953_v45, %v949_v44  ;;  %v948_v51 = vld [vmem:[%s7859_s26 + $0xe00] sm:$0xff]  ;;  %v989_v40 = vld [vmem:[%s7859_s26 + $0xf48] sm:$0xff] }
 0x1a7   : > { %5414 = vmatpush1.bf16.msra.mxu0 %v5413_v52  ;;  %v952_v52 = vld [vmem:[%s7859_s26 + $0xe20] sm:$0xff]  ;;  %v993_v41 = vld [vmem:[%s7859_s26 + $0xf68] sm:$0xff] }
 0x1a8   : > { %6310 = vmatpush1.bf16.msra.mxu1 %v6309_v53  ;;  %5416 = vmatprep.subr.bf16.mxu0 %v5415_v54  ;;  %v950_v53 = vld [vmem:[%s7859_s26 + $0xe10] sm:$0xff]  ;;  %v6331_v54 = vpack.c.bf16 %v955_v47, %v951_v46  ;;  %v5437_v60 = vpack.c.bf16 %v952_v52, %v948_v51  ;;  %v5455_v46 = vpack.c.bf16 %v993_v41, %v989_v40  ;;  %v988_v47 = vld [vmem:[%s7859_s26 + $0xf40] sm:$0xff]  ;;  %v997_v52 = vld [vmem:[%s7859_s26 + $0xf88] sm:$0xff] }
 0x1a9   : > { %6312 = vmatprep.subr.bf16.mxu1 %v6311_v58  ;;  %v959_v58 = vld [vmem:[%s7859_s26 + $0xe58] sm:$0xff]  ;;  %v6333_v61 = vpack.c.bf16 %v954_v55, %v950_v53  ;;  %v994_v51 = vld [vmem:[%s7859_s26 + $0xf70] sm:$0xff]  ;;  %v1001_v53 = vld [vmem:[%s7859_s26 + $0xfa8] sm:$0xff] }
 0x1aa   : > { %v1003_v55 = vld [vmem:[%s7859_s26 + $0xfb8] sm:$0xff] }
 0x1ab   : > { %5418 = vmatpush1.bf16.msra.mxu0 %v5417_v0  ;;  %v960_v0 = vld [vmem:[%s7859_s26 + $0xe60] sm:$0xff]  ;;  %v1035_v40 = vld [vmem:[%s7859_s26 + $0x10b8] sm:$0xff] }
 0x1ac   : > { %6314 = vmatpush1.bf16.msra.mxu1 %v6313_v1  ;;  %5420 = vmatprep.subr.bf16.mxu0 %v5419_v2  ;;  %v958_v1 = vld [vmem:[%s7859_s26 + $0xe50] sm:$0xff]  ;;  %v6335_v2 = vpack.c.bf16 %v963_v59, %v959_v58  ;;  %v5441_v8 = vpack.c.bf16 %v960_v0, %v956_v63  ;;  %v5459_v58 = vpack.c.bf16 %v1001_v53, %v997_v52  ;;  %v996_v59 = vld [vmem:[%s7859_s26 + $0xf80] sm:$0xff]  ;;  %v1005_v0 = vld [vmem:[%s7859_s26 + $0xfc8] sm:$0xff] }
 0x1ad   : > { %6316 = vmatprep.subr.bf16.mxu1 %v6315_v6  ;;  %v967_v6 = vld [vmem:[%s7859_s26 + $0xe98] sm:$0xff]  ;;  %v6337_v9 = vpack.c.bf16 %v962_v3, %v958_v1  ;;  %v1002_v63 = vld [vmem:[%s7859_s26 + $0xfb0] sm:$0xff]  ;;  %v1009_v1 = vld [vmem:[%s7859_s26 + $0xfe8] sm:$0xff] }
 0x1ae   : > { %v1011_v3 = vld [vmem:[%s7859_s26 + $0xff8] sm:$0xff]  ;;  %v1041_v52 = vld [vmem:[%s7859_s26 + $0x10e8] sm:$0xff] }
 0x1af   : > { %5422 = vmatpush1.bf16.msra.mxu0 %v5421_v12  ;;  %v968_v12 = vld [vmem:[%s7859_s26 + $0xea0] sm:$0xff]  ;;  %v471_v41 = vld [vmem:[%s7975_s12 + $0x1f8] sm:$0xff] }
 0x1b0   : > { %6318 = vmatpush1.bf16.msra.mxu1 %v6317_v13  ;;  %5424 = vmatprep.subr.bf16.mxu0 %v5423_v14  ;;  %v966_v13 = vld [vmem:[%s7859_s26 + $0xe90] sm:$0xff]  ;;  %v6339_v14 = vpack.c.bf16 %v971_v7, %v967_v6  ;;  %v5445_v20 = vpack.c.bf16 %v968_v12, %v964_v11  ;;  %v5463_v6 = vpack.c.bf16 %v1009_v1, %v1005_v0  ;;  %v1004_v7 = vld [vmem:[%s7859_s26 + $0xfc0] sm:$0xff]  ;;  %v1013_v12 = vld [vmem:[%s7859_s26 + $0x1008] sm:$0xff] }
 0x1b1   : > { %6320 = vmatprep.subr.bf16.mxu1 %v6319_v18  ;;  %v975_v18 = vld [vmem:[%s7859_s26 + $0xed8] sm:$0xff]  ;;  %v6341_v21 = vpack.c.bf16 %v970_v15, %v966_v13  ;;  %v1010_v11 = vld [vmem:[%s7859_s26 + $0xff0] sm:$0xff]  ;;  %v1017_v13 = vld [vmem:[%s7859_s26 + $0x1028] sm:$0xff] }
 0x1b2   : > { %v1019_v15 = vld [vmem:[%s7859_s26 + $0x1038] sm:$0xff]  ;;  %v1045_v0 = vld [vmem:[%s7859_s26 + $0x1108] sm:$0xff] }
 0x1b3   : > { %5426 = vmatpush1.bf16.msra.mxu0 %v5425_v24  ;;  %v976_v24 = vld [vmem:[%s7859_s26 + $0xee0] sm:$0xff]  ;;  %v1039_v53 = vld [vmem:[%s7859_s26 + $0x10d8] sm:$0xff]  ;;  %v1049_v1 = vld [vmem:[%s7859_s26 + $0x1128] sm:$0xff] }
 0x1b4   : > { %6322 = vmatpush1.bf16.msra.mxu1 %v6321_v25  ;;  %5428 = vmatprep.subr.bf16.mxu0 %v5427_v26  ;;  %v974_v25 = vld [vmem:[%s7859_s26 + $0xed0] sm:$0xff]  ;;  %v6343_v26 = vpack.c.bf16 %v979_v19, %v975_v18  ;;  %v5449_v32 = vpack.c.bf16 %v976_v24, %v972_v23  ;;  %v5467_v18 = vpack.c.bf16 %v1017_v13, %v1013_v12  ;;  %v1012_v19 = vld [vmem:[%s7859_s26 + $0x1000] sm:$0xff]  ;;  %v1021_v24 = vld [vmem:[%s7859_s26 + $0x1048] sm:$0xff] }
 0x1b5   : > { %6324 = vmatprep.subr.bf16.mxu1 %v6323_v30  ;;  %v983_v30 = vld [vmem:[%s7859_s26 + $0xf18] sm:$0xff]  ;;  %v6345_v33 = vpack.c.bf16 %v978_v27, %v974_v25  ;;  %v1018_v23 = vld [vmem:[%s7859_s26 + $0x1030] sm:$0xff]  ;;  %v1025_v25 = vld [vmem:[%s7859_s26 + $0x1068] sm:$0xff] }
 0x1b6   : > { %v1027_v27 = vld [vmem:[%s7859_s26 + $0x1078] sm:$0xff]  ;;  %v1053_v12 = vld [vmem:[%s7859_s26 + $0x1148] sm:$0xff] }
 0x1b7   : > { %5430 = vmatpush1.bf16.msra.mxu0 %v5429_v36  ;;  %v984_v36 = vld [vmem:[%s7859_s26 + $0xf20] sm:$0xff]  ;;  %v1057_v13 = vld [vmem:[%s7859_s26 + $0x1168] sm:$0xff] }
 0x1b8   : > { %6326 = vmatpush1.bf16.msra.mxu1 %v6325_v37  ;;  %5432 = vmatprep.subr.bf16.mxu0 %v5431_v38  ;;  %v982_v37 = vld [vmem:[%s7859_s26 + $0xf10] sm:$0xff]  ;;  %v6347_v38 = vpack.c.bf16 %v987_v31, %v983_v30  ;;  %v5453_v44 = vpack.c.bf16 %v984_v36, %v980_v35  ;;  %v5471_v31 = vpack.c.bf16 %v1025_v25, %v1021_v24  ;;  %v1061_v24 = vld [vmem:[%s7859_s26 + $0x1188] sm:$0xff] }
 0x1b9   : > { %6328 = vmatprep.subr.bf16.mxu1 %v6327_v42  ;;  %v991_v42 = vld [vmem:[%s7859_s26 + $0xf58] sm:$0xff]  ;;  %v6349_v45 = vpack.c.bf16 %v986_v39, %v982_v37  ;;  %v1026_v36 = vld [vmem:[%s7859_s26 + $0x1070] sm:$0xff]  ;;  %v1029_v37 = vld [vmem:[%s7859_s26 + $0x1088] sm:$0xff] }
 0x1ba   : > { %v1031_v39 = vld [vmem:[%s7859_s26 + $0x1098] sm:$0xff]  ;;  %v1065_v25 = vld [vmem:[%s7859_s26 + $0x11a8] sm:$0xff] }
 0x1bb   : > { %5434 = vmatpush1.bf16.msra.mxu0 %v5433_v48  ;;  %v992_v48 = vld [vmem:[%s7859_s26 + $0xf60] sm:$0xff] }
 0x1bc   : > { %6330 = vmatpush1.bf16.msra.mxu1 %v6329_v49  ;;  %5436 = vmatprep.subr.bf16.mxu0 %v5435_v50  ;;  %v990_v49 = vld [vmem:[%s7859_s26 + $0xf50] sm:$0xff]  ;;  %v6351_v50 = vpack.c.bf16 %v995_v43, %v991_v42  ;;  %v5457_v56 = vpack.c.bf16 %v992_v48, %v988_v47  ;;  %v1032_v47 = vld [vmem:[%s7859_s26 + $0x10a0] sm:$0xff] }
 0x1bd   : > { %6332 = vmatprep.subr.bf16.mxu1 %v6331_v54  ;;  %v999_v54 = vld [vmem:[%s7859_s26 + $0xf98] sm:$0xff]  ;;  %v6353_v57 = vpack.c.bf16 %v994_v51, %v990_v49  ;;  %v470_v43 = vld [vmem:[%s7975_s12 + $0x1f0] sm:$0xff]  ;;  %v6371_v49 = vpack.c.bf16 %v1035_v40, %v1031_v39  ;;  %v1037_v51 = vld [vmem:[%s7859_s26 + $0x10c8] sm:$0xff] }
 0x1be   : > { %v1030_v48 = vld [vmem:[%s7859_s26 + $0x1090] sm:$0xff]  ;;  %v1075_v39 = vld [vmem:[%s7859_s26 + $0x11f8] sm:$0xff] }
 0x1bf   : > { %5438 = vmatpush1.bf16.msra.mxu0 %v5437_v60  ;;  %v1000_v60 = vld [vmem:[%s7859_s26 + $0xfa0] sm:$0xff] }
 0x1c0   : > { %6334 = vmatpush1.bf16.msra.mxu1 %v6333_v61  ;;  %5440 = vmatprep.subr.bf16.mxu0 %v5439_v62  ;;  %v998_v61 = vld [vmem:[%s7859_s26 + $0xf90] sm:$0xff]  ;;  %v6355_v62 = vpack.c.bf16 %v1003_v55, %v999_v54  ;;  %v5461_v4 = vpack.c.bf16 %v1000_v60, %v996_v59  ;;  %v1043_v54 = vld [vmem:[%s7859_s26 + $0x10f8] sm:$0xff]  ;;  %v445_v55 = vld [vmem:[%s7975_s12 + $0x48] sm:$0xff] }
 0x1c1   : > { %6336 = vmatprep.subr.bf16.mxu1 %v6335_v2  ;;  %v1007_v2 = vld [vmem:[%s7859_s26 + $0xfd8] sm:$0xff]  ;;  %v6357_v5 = vpack.c.bf16 %v1002_v63, %v998_v61  ;;  %v1036_v59 = vld [vmem:[%s7859_s26 + $0x10c0] sm:$0xff]  ;;  %v1038_v61 = vld [vmem:[%s7859_s26 + $0x10d0] sm:$0xff] }
 0x1c2   : > { %v1040_v60 = vld [vmem:[%s7859_s26 + $0x10e0] sm:$0xff]  ;;  %v1042_v63 = vld [vmem:[%s7859_s26 + $0x10f0] sm:$0xff] }
 0x1c3   : > { %5442 = vmatpush1.bf16.msra.mxu0 %v5441_v8  ;;  %v1008_v8 = vld [vmem:[%s7859_s26 + $0xfe0] sm:$0xff] }
 0x1c4   : > { %6338 = vmatpush1.bf16.msra.mxu1 %v6337_v9  ;;  %5444 = vmatprep.subr.bf16.mxu0 %v5443_v10  ;;  %v1006_v9 = vld [vmem:[%s7859_s26 + $0xfd0] sm:$0xff]  ;;  %v6359_v10 = vpack.c.bf16 %v1011_v3, %v1007_v2  ;;  %v5465_v16 = vpack.c.bf16 %v1008_v8, %v1004_v7  ;;  %v1047_v2 = vld [vmem:[%s7859_s26 + $0x1118] sm:$0xff]  ;;  %v1044_v7 = vld [vmem:[%s7859_s26 + $0x1100] sm:$0xff] }
 0x1c5   : > { %6340 = vmatprep.subr.bf16.mxu1 %v6339_v14  ;;  %v1015_v14 = vld [vmem:[%s7859_s26 + $0x1018] sm:$0xff]  ;;  %v6361_v17 = vpack.c.bf16 %v1010_v11, %v1006_v9  ;;  %v1048_v8 = vld [vmem:[%s7859_s26 + $0x1120] sm:$0xff]  ;;  %v1046_v9 = vld [vmem:[%s7859_s26 + $0x1110] sm:$0xff] }
 0x1c6   : > { %v1051_v3 = vld [vmem:[%s7859_s26 + $0x1138] sm:$0xff]  ;;  %v1050_v11 = vld [vmem:[%s7859_s26 + $0x1130] sm:$0xff] }
 0x1c7   : > { %5446 = vmatpush1.bf16.msra.mxu0 %v5445_v20  ;;  %v1016_v20 = vld [vmem:[%s7859_s26 + $0x1020] sm:$0xff] }
 0x1c8   : > { %6342 = vmatpush1.bf16.msra.mxu1 %v6341_v21  ;;  %5448 = vmatprep.subr.bf16.mxu0 %v5447_v22  ;;  %v1014_v21 = vld [vmem:[%s7859_s26 + $0x1010] sm:$0xff]  ;;  %v6363_v22 = vpack.c.bf16 %v1019_v15, %v1015_v14  ;;  %v5469_v29 = vpack.c.bf16 %v1016_v20, %v1012_v19  ;;  %v1055_v14 = vld [vmem:[%s7859_s26 + $0x1158] sm:$0xff]  ;;  %v1052_v19 = vld [vmem:[%s7859_s26 + $0x1140] sm:$0xff] }
 0x1c9   : > { %6344 = vmatprep.subr.bf16.mxu1 %v6343_v26  ;;  %v1023_v26 = vld [vmem:[%s7859_s26 + $0x1058] sm:$0xff]  ;;  %v6365_v30 = vpack.c.bf16 %v1018_v23, %v1014_v21  ;;  %v1056_v20 = vld [vmem:[%s7859_s26 + $0x1160] sm:$0xff]  ;;  %v1054_v21 = vld [vmem:[%s7859_s26 + $0x1150] sm:$0xff] }
 0x1ca   : > { %v6367_v35 = vpack.c.bf16 %v1027_v27, %v1023_v26  ;;  %v1059_v15 = vld [vmem:[%s7859_s26 + $0x1178] sm:$0xff]  ;;  %v1058_v23 = vld [vmem:[%s7859_s26 + $0x1170] sm:$0xff] }
 0x1cb   : > { %5450 = vmatpush1.bf16.msra.mxu0 %v5449_v32  ;;  %v1020_v32 = vld [vmem:[%s7859_s26 + $0x1040] sm:$0xff]  ;;  %v1063_v26 = vld [vmem:[%s7859_s26 + $0x1198] sm:$0xff] }
 0x1cc   : > { %6346 = vmatpush1.bf16.msra.mxu1 %v6345_v33  ;;  %5452 = vmatprep.subr.bf16.mxu0 %v5451_v34  ;;  %v1024_v33 = vld [vmem:[%s7859_s26 + $0x1060] sm:$0xff]  ;;  %v1022_v34 = vld [vmem:[%s7859_s26 + $0x1050] sm:$0xff]  ;;  %v1067_v27 = vld [vmem:[%s7859_s26 + $0x11b8] sm:$0xff] }
 0x1cd   : > { %6348 = vmatprep.subr.bf16.mxu1 %v6347_v38  ;;  %v1033_v38 = vld [vmem:[%s7859_s26 + $0x10a8] sm:$0xff]  ;;  %v5473_v42 = vpack.c.bf16 %v1024_v33, %v1020_v32  ;;  %v1064_v32 = vld [vmem:[%s7859_s26 + $0x11a0] sm:$0xff]  ;;  %v1062_v33 = vld [vmem:[%s7859_s26 + $0x1190] sm:$0xff] }
 0x1cf   : > { %5454 = vmatpush1.bf16.msra.mxu0 %v5453_v44  ;;  %v6369_v44 = vpack.c.bf16 %v1026_v36, %v1022_v34  ;;  %v6387_v34 = vpack.c.bf16 %v1067_v27, %v1063_v26  ;;  %v1069_v36 = vld [vmem:[%s7859_s26 + $0x11c8] sm:$0xff]  ;;  %v1100_v27 = vld [vmem:[%s7859_s26 + $0x12c0] sm:$0xff] }
 0x1d0   : > { %6350 = vmatpush1.bf16.msra.mxu1 %v6349_v45  ;;  %5456 = vmatprep.subr.bf16.mxu0 %v5455_v46  ;;  %v5475_v45 = vpack.c.bf16 %v1033_v38, %v1029_v37  ;;  %v1028_v46 = vld [vmem:[%s7859_s26 + $0x1080] sm:$0xff]  ;;  %v1073_v37 = vld [vmem:[%s7859_s26 + $0x11e8] sm:$0xff]  ;;  %v1071_v38 = vld [vmem:[%s7859_s26 + $0x11d8] sm:$0xff] }
 0x1d1   : > { %6352 = vmatprep.subr.bf16.mxu1 %v6351_v50  ;;  %v1034_v50 = vld [vmem:[%s7859_s26 + $0x10b0] sm:$0xff] }
 0x1d3   : > { %5458 = vmatpush1.bf16.msra.mxu0 %v5457_v56  ;;  %v5477_v56 = vpack.c.bf16 %v1032_v47, %v1028_v46  ;;  %v6391_v46 = vpack.c.bf16 %v1075_v39, %v1071_v38  ;;  %v1074_v47 = vld [vmem:[%s7859_s26 + $0x11f0] sm:$0xff]  ;;  %v1108_v39 = vld [vmem:[%s7859_s26 + $0x1300] sm:$0xff] }
 0x1d4   : > { %6354 = vmatpush1.bf16.msra.mxu1 %v6353_v57  ;;  %5460 = vmatprep.subr.bf16.mxu0 %v5459_v58  ;;  %v6373_v57 = vpack.c.bf16 %v1034_v50, %v1030_v48  ;;  %v5479_v58 = vpack.c.bf16 %v1041_v52, %v1037_v51  ;;  %v1077_v48 = vld [vmem:[%s7859_s26 + $0x1208] sm:$0xff]  ;;  %v1079_v50 = vld [vmem:[%s7859_s26 + $0x1218] sm:$0xff] }
 0x1d5   : > { %6356 = vmatprep.subr.bf16.mxu1 %v6355_v62  ;;  %v6375_v62 = vpack.c.bf16 %v1043_v54, %v1039_v53  ;;  %v1083_v51 = vld [vmem:[%s7859_s26 + $0x1238] sm:$0xff] }
 0x1d7   : > { %5462 = vmatpush1.bf16.msra.mxu0 %v5461_v4  ;;  %v5481_v4 = vpack.c.bf16 %v1040_v60, %v1036_v59  ;;  %v1082_v59 = vld [vmem:[%s7859_s26 + $0x1230] sm:$0xff]  ;;  %v1085_v60 = vld [vmem:[%s7859_s26 + $0x1248] sm:$0xff] }
 0x1d8   : > { %6358 = vmatpush1.bf16.msra.mxu1 %v6357_v5  ;;  %5464 = vmatprep.subr.bf16.mxu0 %v5463_v6  ;;  %v6377_v5 = vpack.c.bf16 %v1042_v63, %v1038_v61  ;;  %v5483_v6 = vpack.c.bf16 %v1049_v1, %v1045_v0  ;;  %v1089_v61 = vld [vmem:[%s7859_s26 + $0x1268] sm:$0xff]  ;;  %v1091_v63 = vld [vmem:[%s7859_s26 + $0x1278] sm:$0xff] }
 0x1d9   : > { %6360 = vmatprep.subr.bf16.mxu1 %v6359_v10  ;;  %v6379_v10 = vpack.c.bf16 %v1051_v3, %v1047_v2  ;;  %v5503_v2 = vpack.c.bf16 %v1089_v61, %v1085_v60  ;;  %v1084_v3 = vld [vmem:[%s7859_s26 + $0x1240] sm:$0xff] }
 0x1db   : > { %5466 = vmatpush1.bf16.msra.mxu0 %v5465_v16  ;;  %v5485_v16 = vpack.c.bf16 %v1048_v8, %v1044_v7  ;;  %v1090_v7 = vld [vmem:[%s7859_s26 + $0x1270] sm:$0xff]  ;;  %v1093_v8 = vld [vmem:[%s7859_s26 + $0x1288] sm:$0xff] }
 0x1dc   : > { %6362 = vmatpush1.bf16.msra.mxu1 %v6361_v17  ;;  %5468 = vmatprep.subr.bf16.mxu0 %v5467_v18  ;;  %v6381_v17 = vpack.c.bf16 %v1050_v11, %v1046_v9  ;;  %v5487_v18 = vpack.c.bf16 %v1057_v13, %v1053_v12  ;;  %v1097_v9 = vld [vmem:[%s7859_s26 + $0x12a8] sm:$0xff]  ;;  %v1099_v11 = vld [vmem:[%s7859_s26 + $0x12b8] sm:$0xff] }
 0x1dd   : > { %6364 = vmatprep.subr.bf16.mxu1 %v6363_v22  ;;  %v6383_v22 = vpack.c.bf16 %v1059_v15, %v1055_v14  ;;  %v5507_v14 = vpack.c.bf16 %v1097_v9, %v1093_v8  ;;  %v1092_v15 = vld [vmem:[%s7859_s26 + $0x1280] sm:$0xff] }
 0x1de   : > { %2588 = vmatmul.mubr.f32.vlgmr.msra.gmra.mrb[0].mxu0 %v442_v28 }
 0x1df   : > { %5470 = vmatpush1.bf16.msra.mxu0 %v5469_v29  ;;  %3666 = vmatmul.mubr.f32.vlgmr.msra.gmra.mrb[0].mxu1 %v442_v28  ;;  %v5489_v28 = vpack.c.bf16 %v1056_v20, %v1052_v19  ;;  %v6385_v29 = vpack.c.bf16 %v1058_v23, %v1054_v21  ;;  %v1098_v19 = vld [vmem:[%s7859_s26 + $0x12b0] sm:$0xff]  ;;  %v1101_v20 = vld [vmem:[%s7859_s26 + $0x12c8] sm:$0xff]  ;;  %v1107_v23 = vld [vmem:[%s7859_s26 + $0x12f8] sm:$0xff] }
 0x1e0   : > { %6366 = vmatpush1.bf16.msra.mxu1 %v6365_v30  ;;  %5472 = vmatprep.subr.bf16.mxu0 %v5471_v31  ;;  %v5491_v30 = vpack.c.bf16 %v1065_v25, %v1061_v24  ;;  %v1060_v31 = vld [vmem:[%s7859_s26 + $0x1180] sm:$0xff]  ;;  %v1105_v21 = vld [vmem:[%s7859_s26 + $0x12e8] sm:$0xff] }
 0x1e1   : > { %6368 = vmatprep.subr.bf16.mxu1 %v6367_v35  ;;  %2593 = vmatprep.mubr.f32.mxu0 %v471_v41  ;;  %v1066_v35 = vld [vmem:[%s7859_s26 + $0x11b0] sm:$0xff]  ;;  %v5493_v40 = vpack.c.bf16 %v1064_v32, %v1060_v31  ;;  %v5511_v26 = vpack.c.bf16 %v1105_v21, %v1101_v20  ;;  %v1109_v32 = vld [vmem:[%s7859_s26 + $0x1308] sm:$0xff] }
 0x1e2   : > { %3671 = vmatprep.mubr.f32.mxu1 %v471_v41  ;;  %2594 = vmatmul.mubr.f32.gmra.mrb[2].mxu0 %v470_v43  ;;  %v6389_v41 = vpack.c.bf16 %v1066_v35, %v1062_v33  ;;  %v1106_v31 = vld [vmem:[%s7859_s26 + $0x12f0] sm:$0xff]  ;;  %v1113_v33 = vld [vmem:[%s7859_s26 + $0x1328] sm:$0xff]  ;;  %v1115_v35 = vld [vmem:[%s7859_s26 + $0x1338] sm:$0xff] }
 0x1e3   : > { %5474 = vmatpush1.bf16.msra.mxu0 %v5473_v42  ;;  %3672 = vmatmul.mubr.f32.gmra.mrb[2].mxu1 %v470_v43  ;;  %v5495_v42 = vpack.c.bf16 %v1073_v37, %v1069_v36  ;;  %v1068_v43 = vld [vmem:[%s7859_s26 + $0x11c0] sm:$0xff]  ;;  %v5515_v38 = vpack.c.bf16 %v1113_v33, %v1109_v32 }
 0x1e4   : > { %6370 = vmatpush1.bf16.msra.mxu1 %v6369_v44  ;;  %5476 = vmatprep.subr.bf16.mxu0 %v5475_v45  ;;  %v1072_v44 = vld [vmem:[%s7859_s26 + $0x11e0] sm:$0xff]  ;;  %v1070_v45 = vld [vmem:[%s7859_s26 + $0x11d0] sm:$0xff] }
 0x1e5   : > { %6372 = vmatprep.subr.bf16.mxu1 %v6371_v49  ;;  %2664 = vmatprep.mubr.f32.mxu0 %v445_v55  ;;  %v1081_v49 = vld [vmem:[%s7859_s26 + $0x1228] sm:$0xff]  ;;  %v5497_v52 = vpack.c.bf16 %v1072_v44, %v1068_v43  ;;  %v6393_v53 = vpack.c.bf16 %v1074_v47, %v1070_v45  ;;  %v1114_v43 = vld [vmem:[%s7859_s26 + $0x1330] sm:$0xff]  ;;  %v1123_v47 = vld [vmem:[%s7859_s26 + $0x1378] sm:$0xff] }
 0x1e6   : > { %3742 = vmatprep.mubr.f32.mxu1 %v445_v55  ;;  %v5499_v54 = vpack.c.bf16 %v1081_v49, %v1077_v48  ;;  %v1076_v55 = vld [vmem:[%s7859_s26 + $0x1200] sm:$0xff]  ;;  %v1117_v44 = vld [vmem:[%s7859_s26 + $0x1348] sm:$0xff] }
 0x1e7   : > { %5478 = vmatpush1.bf16.msra.mxu0 %v5477_v56  ;;  %v1080_v56 = vld [vmem:[%s7859_s26 + $0x1220] sm:$0xff]  ;;  %v1121_v45 = vld [vmem:[%s7859_s26 + $0x1368] sm:$0xff] }
 0x1e8   : > { %6374 = vmatpush1.bf16.msra.mxu1 %v6373_v57  ;;  %5480 = vmatprep.subr.bf16.mxu0 %v5479_v58  ;;  %v1078_v57 = vld [vmem:[%s7859_s26 + $0x1210] sm:$0xff]  ;;  %v6395_v58 = vpack.c.bf16 %v1083_v51, %v1079_v50  ;;  %v5501_v0 = vpack.c.bf16 %v1080_v56, %v1076_v55  ;;  %v5519_v50 = vpack.c.bf16 %v1121_v45, %v1117_v44  ;;  %v1116_v51 = vld [vmem:[%s7859_s26 + $0x1340] sm:$0xff]  ;;  %v1125_v56 = vld [vmem:[%s7859_s26 + $0x1388] sm:$0xff] }
 0x1e9   : > { %6376 = vmatprep.subr.bf16.mxu1 %v6375_v62  ;;  %v1087_v62 = vld [vmem:[%s7859_s26 + $0x1258] sm:$0xff]  ;;  %v6397_v1 = vpack.c.bf16 %v1082_v59, %v1078_v57  ;;  %v1122_v55 = vld [vmem:[%s7859_s26 + $0x1370] sm:$0xff]  ;;  %v1129_v57 = vld [vmem:[%s7859_s26 + $0x13a8] sm:$0xff] }
 0x1ea   : > { %v1131_v59 = vld [vmem:[%s7859_s26 + $0x13b8] sm:$0xff]  ;;  %v444_v32 = vld [vmem:[%s7975_s12 + $0x40] sm:$0xff]  ;;  %v473_v45 = vld [vmem:[%s7975_s12 + $0x208] sm:$0xff] }
 0x1eb   : > { %5482 = vmatpush1.bf16.msra.mxu0 %v5481_v4  ;;  %v1088_v4 = vld [vmem:[%s7859_s26 + $0x1260] sm:$0xff]  ;;  %v1163_v44 = vld [vmem:[%s7859_s26 + $0x14b8] sm:$0xff] }
 0x1ec   : > { %6378 = vmatpush1.bf16.msra.mxu1 %v6377_v5  ;;  %5484 = vmatprep.subr.bf16.mxu0 %v5483_v6  ;;  %v1086_v5 = vld [vmem:[%s7859_s26 + $0x1250] sm:$0xff]  ;;  %v6399_v6 = vpack.c.bf16 %v1091_v63, %v1087_v62  ;;  %v5505_v12 = vpack.c.bf16 %v1088_v4, %v1084_v3  ;;  %v5523_v62 = vpack.c.bf16 %v1129_v57, %v1125_v56  ;;  %v1124_v63 = vld [vmem:[%s7859_s26 + $0x1380] sm:$0xff]  ;;  %v1133_v4 = vld [vmem:[%s7859_s26 + $0x13c8] sm:$0xff] }
 0x1ed   : > { %6380 = vmatprep.subr.bf16.mxu1 %v6379_v10  ;;  %v1095_v10 = vld [vmem:[%s7859_s26 + $0x1298] sm:$0xff]  ;;  %v6401_v13 = vpack.c.bf16 %v1090_v7, %v1086_v5  ;;  %v1130_v3 = vld [vmem:[%s7859_s26 + $0x13b0] sm:$0xff]  ;;  %v1137_v5 = vld [vmem:[%s7859_s26 + $0x13e8] sm:$0xff] }
 0x1ee   : > { %v1139_v7 = vld [vmem:[%s7859_s26 + $0x13f8] sm:$0xff]  ;;  %v1169_v56 = vld [vmem:[%s7859_s26 + $0x14e8] sm:$0xff] }
 0x1ef   : > { %5486 = vmatpush1.bf16.msra.mxu0 %v5485_v16  ;;  %v1096_v16 = vld [vmem:[%s7859_s26 + $0x12a0] sm:$0xff]  ;;  %v1167_v57 = vld [vmem:[%s7859_s26 + $0x14d8] sm:$0xff] }
 0x1f0   : > { %6382 = vmatpush1.bf16.msra.mxu1 %v6381_v17  ;;  %5488 = vmatprep.subr.bf16.mxu0 %v5487_v18  ;;  %v1094_v17 = vld [vmem:[%s7859_s26 + $0x1290] sm:$0xff]  ;;  %v6403_v18 = vpack.c.bf16 %v1099_v11, %v1095_v10  ;;  %v5509_v24 = vpack.c.bf16 %v1096_v16, %v1092_v15  ;;  %v5527_v10 = vpack.c.bf16 %v1137_v5, %v1133_v4  ;;  %v1132_v11 = vld [vmem:[%s7859_s26 + $0x13c0] sm:$0xff]  ;;  %v1141_v16 = vld [vmem:[%s7859_s26 + $0x1408] sm:$0xff] }
 0x1f1   : > { %6384 = vmatprep.subr.bf16.mxu1 %v6383_v22  ;;  %v1103_v22 = vld [vmem:[%s7859_s26 + $0x12d8] sm:$0xff]  ;;  %v6405_v25 = vpack.c.bf16 %v1098_v19, %v1094_v17  ;;  %v1138_v15 = vld [vmem:[%s7859_s26 + $0x13f0] sm:$0xff]  ;;  %v1145_v17 = vld [vmem:[%s7859_s26 + $0x1428] sm:$0xff] }
 0x1f2   : > { %v1147_v19 = vld [vmem:[%s7859_s26 + $0x1438] sm:$0xff]  ;;  %v1173_v4 = vld [vmem:[%s7859_s26 + $0x1508] sm:$0xff] }
 0x1f3   : > { %5490 = vmatpush1.bf16.msra.mxu0 %v5489_v28  ;;  %v1104_v28 = vld [vmem:[%s7859_s26 + $0x12e0] sm:$0xff]  ;;  %v1177_v5 = vld [vmem:[%s7859_s26 + $0x1528] sm:$0xff] }
 0x1f4   : > { %6386 = vmatpush1.bf16.msra.mxu1 %v6385_v29  ;;  %5492 = vmatprep.subr.bf16.mxu0 %v5491_v30  ;;  %v1102_v29 = vld [vmem:[%s7859_s26 + $0x12d0] sm:$0xff]  ;;  %v6407_v30 = vpack.c.bf16 %v1107_v23, %v1103_v22  ;;  %v5513_v36 = vpack.c.bf16 %v1104_v28, %v1100_v27  ;;  %v5531_v22 = vpack.c.bf16 %v1145_v17, %v1141_v16  ;;  %v1140_v23 = vld [vmem:[%s7859_s26 + $0x1400] sm:$0xff]  ;;  %v1149_v28 = vld [vmem:[%s7859_s26 + $0x1448] sm:$0xff] }
 0x1f5   : > { %6388 = vmatprep.subr.bf16.mxu1 %v6387_v34  ;;  %v1111_v34 = vld [vmem:[%s7859_s26 + $0x1318] sm:$0xff]  ;;  %v6409_v37 = vpack.c.bf16 %v1106_v31, %v1102_v29  ;;  %v1146_v27 = vld [vmem:[%s7859_s26 + $0x1430] sm:$0xff]  ;;  %v1153_v29 = vld [vmem:[%s7859_s26 + $0x1468] sm:$0xff] }
 0x1f6   : > { %v1155_v31 = vld [vmem:[%s7859_s26 + $0x1478] sm:$0xff]  ;;  %v1181_v16 = vld [vmem:[%s7859_s26 + $0x1548] sm:$0xff] }
 0x1f7   : > { %5494 = vmatpush1.bf16.msra.mxu0 %v5493_v40  ;;  %v1112_v40 = vld [vmem:[%s7859_s26 + $0x1320] sm:$0xff]  ;;  %v1185_v17 = vld [vmem:[%s7859_s26 + $0x1568] sm:$0xff] }
 0x1f8   : > { %6390 = vmatpush1.bf16.msra.mxu1 %v6389_v41  ;;  %5496 = vmatprep.subr.bf16.mxu0 %v5495_v42  ;;  %v1110_v41 = vld [vmem:[%s7859_s26 + $0x1310] sm:$0xff]  ;;  %v6411_v42 = vpack.c.bf16 %v1115_v35, %v1111_v34  ;;  %v5517_v48 = vpack.c.bf16 %v1112_v40, %v1108_v39  ;;  %v5535_v35 = vpack.c.bf16 %v1153_v29, %v1149_v28  ;;  %v1189_v28 = vld [vmem:[%s7859_s26 + $0x1588] sm:$0xff] }
 0x1f9   : > { %6392 = vmatprep.subr.bf16.mxu1 %v6391_v46  ;;  %v1119_v46 = vld [vmem:[%s7859_s26 + $0x1358] sm:$0xff]  ;;  %v6413_v49 = vpack.c.bf16 %v1114_v43, %v1110_v41  ;;  %v1154_v40 = vld [vmem:[%s7859_s26 + $0x1470] sm:$0xff]  ;;  %v1157_v41 = vld [vmem:[%s7859_s26 + $0x1488] sm:$0xff] }
 0x1fa   : > { %v1159_v43 = vld [vmem:[%s7859_s26 + $0x1498] sm:$0xff]  ;;  %v1193_v29 = vld [vmem:[%s7859_s26 + $0x15a8] sm:$0xff] }
 0x1fb   : > { %5498 = vmatpush1.bf16.msra.mxu0 %v5497_v52  ;;  %v1120_v52 = vld [vmem:[%s7859_s26 + $0x1360] sm:$0xff] }
 0x1fc   : > { %6394 = vmatpush1.bf16.msra.mxu1 %v6393_v53  ;;  %5500 = vmatprep.subr.bf16.mxu0 %v5499_v54  ;;  %v1118_v53 = vld [vmem:[%s7859_s26 + $0x1350] sm:$0xff]  ;;  %v6415_v54 = vpack.c.bf16 %v1123_v47, %v1119_v46  ;;  %v5521_v60 = vpack.c.bf16 %v1120_v52, %v1116_v51  ;;  %v472_v47 = vld [vmem:[%s7975_s12 + $0x200] sm:$0xff] }
 0x1fd   : > { %6396 = vmatprep.subr.bf16.mxu1 %v6395_v58  ;;  %v1127_v58 = vld [vmem:[%s7859_s26 + $0x1398] sm:$0xff]  ;;  %v6417_v61 = vpack.c.bf16 %v1122_v55, %v1118_v53  ;;  %v1160_v51 = vld [vmem:[%s7859_s26 + $0x14a0] sm:$0xff]  ;;  %v1158_v52 = vld [vmem:[%s7859_s26 + $0x1490] sm:$0xff]  ;;  %v6435_v53 = vpack.c.bf16 %v1163_v44, %v1159_v43 }
 0x1fe   : > { %v1165_v55 = vld [vmem:[%s7859_s26 + $0x14c8] sm:$0xff]  ;;  %v1203_v43 = vld [vmem:[%s7859_s26 + $0x15f8] sm:$0xff] }
 0x1ff   : > { %5502 = vmatpush1.bf16.msra.mxu0 %v5501_v0  ;;  %v1128_v0 = vld [vmem:[%s7859_s26 + $0x13a0] sm:$0xff] }
 0x200   : > { %6398 = vmatpush1.bf16.msra.mxu1 %v6397_v1  ;;  %5504 = vmatprep.subr.bf16.mxu0 %v5503_v2  ;;  %v1126_v1 = vld [vmem:[%s7859_s26 + $0x1390] sm:$0xff]  ;;  %v6419_v2 = vpack.c.bf16 %v1131_v59, %v1127_v58  ;;  %v5525_v8 = vpack.c.bf16 %v1128_v0, %v1124_v63  ;;  %v1171_v58 = vld [vmem:[%s7859_s26 + $0x14f8] sm:$0xff]  ;;  %v1164_v63 = vld [vmem:[%s7859_s26 + $0x14c0] sm:$0xff] }
 0x201   : > { %6400 = vmatprep.subr.bf16.mxu1 %v6399_v6  ;;  %v1135_v6 = vld [vmem:[%s7859_s26 + $0x13d8] sm:$0xff]  ;;  %v6421_v9 = vpack.c.bf16 %v1130_v3, %v1126_v1  ;;  %v1168_v0 = vld [vmem:[%s7859_s26 + $0x14e0] sm:$0xff]  ;;  %v1166_v1 = vld [vmem:[%s7859_s26 + $0x14d0] sm:$0xff] }
 0x202   : > { %v447_v59 = vld [vmem:[%s7975_s12 + $0x58] sm:$0xff]  ;;  %v1170_v3 = vld [vmem:[%s7859_s26 + $0x14f0] sm:$0xff] }
 0x203   : > { %5506 = vmatpush1.bf16.msra.mxu0 %v5505_v12  ;;  %v1136_v12 = vld [vmem:[%s7859_s26 + $0x13e0] sm:$0xff] }
 0x204   : > { %6402 = vmatpush1.bf16.msra.mxu1 %v6401_v13  ;;  %5508 = vmatprep.subr.bf16.mxu0 %v5507_v14  ;;  %v1134_v13 = vld [vmem:[%s7859_s26 + $0x13d0] sm:$0xff]  ;;  %v6423_v14 = vpack.c.bf16 %v1139_v7, %v1135_v6  ;;  %v5529_v20 = vpack.c.bf16 %v1136_v12, %v1132_v11  ;;  %v1175_v6 = vld [vmem:[%s7859_s26 + $0x1518] sm:$0xff]  ;;  %v1172_v11 = vld [vmem:[%s7859_s26 + $0x1500] sm:$0xff] }
 0x205   : > { %6404 = vmatprep.subr.bf16.mxu1 %v6403_v18  ;;  %v1143_v18 = vld [vmem:[%s7859_s26 + $0x1418] sm:$0xff]  ;;  %v6425_v21 = vpack.c.bf16 %v1138_v15, %v1134_v13  ;;  %v1176_v12 = vld [vmem:[%s7859_s26 + $0x1520] sm:$0xff]  ;;  %v1174_v13 = vld [vmem:[%s7859_s26 + $0x1510] sm:$0xff] }
 0x206   : > { %v1179_v7 = vld [vmem:[%s7859_s26 + $0x1538] sm:$0xff]  ;;  %v1178_v15 = vld [vmem:[%s7859_s26 + $0x1530] sm:$0xff] }
 0x207   : > { %5510 = vmatpush1.bf16.msra.mxu0 %v5509_v24  ;;  %v1144_v24 = vld [vmem:[%s7859_s26 + $0x1420] sm:$0xff] }
 0x208   : > { %6406 = vmatpush1.bf16.msra.mxu1 %v6405_v25  ;;  %5512 = vmatprep.subr.bf16.mxu0 %v5511_v26  ;;  %v1142_v25 = vld [vmem:[%s7859_s26 + $0x1410] sm:$0xff]  ;;  %v6427_v26 = vpack.c.bf16 %v1147_v19, %v1143_v18  ;;  %v5533_v33 = vpack.c.bf16 %v1144_v24, %v1140_v23  ;;  %v1183_v18 = vld [vmem:[%s7859_s26 + $0x1558] sm:$0xff]  ;;  %v1180_v23 = vld [vmem:[%s7859_s26 + $0x1540] sm:$0xff] }
 0x209   : > { %6408 = vmatprep.subr.bf16.mxu1 %v6407_v30  ;;  %v1151_v30 = vld [vmem:[%s7859_s26 + $0x1458] sm:$0xff]  ;;  %v6429_v34 = vpack.c.bf16 %v1146_v27, %v1142_v25  ;;  %v1184_v24 = vld [vmem:[%s7859_s26 + $0x1560] sm:$0xff]  ;;  %v1182_v25 = vld [vmem:[%s7859_s26 + $0x1550] sm:$0xff] }
 0x20a   : > { %v6431_v39 = vpack.c.bf16 %v1155_v31, %v1151_v30  ;;  %v1187_v19 = vld [vmem:[%s7859_s26 + $0x1578] sm:$0xff]  ;;  %v1186_v27 = vld [vmem:[%s7859_s26 + $0x1570] sm:$0xff] }
 0x20b   : > { %5514 = vmatpush1.bf16.msra.mxu0 %v5513_v36  ;;  %v1148_v36 = vld [vmem:[%s7859_s26 + $0x1440] sm:$0xff]  ;;  %v1191_v30 = vld [vmem:[%s7859_s26 + $0x1598] sm:$0xff] }
 0x20c   : > { %6410 = vmatpush1.bf16.msra.mxu1 %v6409_v37  ;;  %5516 = vmatprep.subr.bf16.mxu0 %v5515_v38  ;;  %v1152_v37 = vld [vmem:[%s7859_s26 + $0x1460] sm:$0xff]  ;;  %v1150_v38 = vld [vmem:[%s7859_s26 + $0x1450] sm:$0xff]  ;;  %v1195_v31 = vld [vmem:[%s7859_s26 + $0x15b8] sm:$0xff] }
 0x20d   : > { %6412 = vmatprep.subr.bf16.mxu1 %v6411_v42  ;;  %v1161_v42 = vld [vmem:[%s7859_s26 + $0x14a8] sm:$0xff]  ;;  %v5537_v46 = vpack.c.bf16 %v1152_v37, %v1148_v36  ;;  %v1192_v36 = vld [vmem:[%s7859_s26 + $0x15a0] sm:$0xff]  ;;  %v1190_v37 = vld [vmem:[%s7859_s26 + $0x1590] sm:$0xff] }
 0x20f   : > { %5518 = vmatpush1.bf16.msra.mxu0 %v5517_v48  ;;  %v6433_v48 = vpack.c.bf16 %v1154_v40, %v1150_v38  ;;  %v6451_v38 = vpack.c.bf16 %v1195_v31, %v1191_v30  ;;  %v1197_v40 = vld [vmem:[%s7859_s26 + $0x15c8] sm:$0xff]  ;;  %v1228_v31 = vld [vmem:[%s7859_s26 + $0x16c0] sm:$0xff] }
 0x210   : > { %6414 = vmatpush1.bf16.msra.mxu1 %v6413_v49  ;;  %5520 = vmatprep.subr.bf16.mxu0 %v5519_v50  ;;  %v5539_v49 = vpack.c.bf16 %v1161_v42, %v1157_v41  ;;  %v1156_v50 = vld [vmem:[%s7859_s26 + $0x1480] sm:$0xff]  ;;  %v1201_v41 = vld [vmem:[%s7859_s26 + $0x15e8] sm:$0xff]  ;;  %v1199_v42 = vld [vmem:[%s7859_s26 + $0x15d8] sm:$0xff] }
 0x211   : > { %6416 = vmatprep.subr.bf16.mxu1 %v6415_v54  ;;  %v1162_v54 = vld [vmem:[%s7859_s26 + $0x14b0] sm:$0xff] }
 0x213   : > { %5522 = vmatpush1.bf16.msra.mxu0 %v5521_v60  ;;  %v5541_v60 = vpack.c.bf16 %v1160_v51, %v1156_v50  ;;  %v6455_v50 = vpack.c.bf16 %v1203_v43, %v1199_v42  ;;  %v1202_v51 = vld [vmem:[%s7859_s26 + $0x15f0] sm:$0xff]  ;;  %v1236_v43 = vld [vmem:[%s7859_s26 + $0x1700] sm:$0xff] }
 0x214   : > { %6418 = vmatpush1.bf16.msra.mxu1 %v6417_v61  ;;  %5524 = vmatprep.subr.bf16.mxu0 %v5523_v62  ;;  %v6437_v61 = vpack.c.bf16 %v1162_v54, %v1158_v52  ;;  %v5543_v62 = vpack.c.bf16 %v1169_v56, %v1165_v55  ;;  %v1205_v52 = vld [vmem:[%s7859_s26 + $0x1608] sm:$0xff]  ;;  %v1207_v54 = vld [vmem:[%s7859_s26 + $0x1618] sm:$0xff] }
 0x215   : > { %6420 = vmatprep.subr.bf16.mxu1 %v6419_v2  ;;  %v6439_v2 = vpack.c.bf16 %v1171_v58, %v1167_v57  ;;  %v1211_v55 = vld [vmem:[%s7859_s26 + $0x1638] sm:$0xff] }
 0x217   : > { %5526 = vmatpush1.bf16.msra.mxu0 %v5525_v8  ;;  %v5545_v8 = vpack.c.bf16 %v1168_v0, %v1164_v63  ;;  %v1210_v63 = vld [vmem:[%s7859_s26 + $0x1630] sm:$0xff]  ;;  %v1213_v0 = vld [vmem:[%s7859_s26 + $0x1648] sm:$0xff] }
 0x218   : > { %6422 = vmatpush1.bf16.msra.mxu1 %v6421_v9  ;;  %5528 = vmatprep.subr.bf16.mxu0 %v5527_v10  ;;  %v6441_v9 = vpack.c.bf16 %v1170_v3, %v1166_v1  ;;  %v5547_v10 = vpack.c.bf16 %v1177_v5, %v1173_v4  ;;  %v1217_v1 = vld [vmem:[%s7859_s26 + $0x1668] sm:$0xff]  ;;  %v1219_v3 = vld [vmem:[%s7859_s26 + $0x1678] sm:$0xff] }
 0x219   : > { %6424 = vmatprep.subr.bf16.mxu1 %v6423_v14  ;;  %v6443_v14 = vpack.c.bf16 %v1179_v7, %v1175_v6  ;;  %v5567_v6 = vpack.c.bf16 %v1217_v1, %v1213_v0  ;;  %v1212_v7 = vld [vmem:[%s7859_s26 + $0x1640] sm:$0xff] }
 0x21b   : > { %5530 = vmatpush1.bf16.msra.mxu0 %v5529_v20  ;;  %v5549_v20 = vpack.c.bf16 %v1176_v12, %v1172_v11  ;;  %v1218_v11 = vld [vmem:[%s7859_s26 + $0x1670] sm:$0xff]  ;;  %v1221_v12 = vld [vmem:[%s7859_s26 + $0x1688] sm:$0xff] }
 0x21c   : > { %6426 = vmatpush1.bf16.msra.mxu1 %v6425_v21  ;;  %5532 = vmatprep.subr.bf16.mxu0 %v5531_v22  ;;  %v6445_v21 = vpack.c.bf16 %v1178_v15, %v1174_v13  ;;  %v5551_v22 = vpack.c.bf16 %v1185_v17, %v1181_v16  ;;  %v1225_v13 = vld [vmem:[%s7859_s26 + $0x16a8] sm:$0xff]  ;;  %v1227_v15 = vld [vmem:[%s7859_s26 + $0x16b8] sm:$0xff] }
 0x21d   : > { %6428 = vmatprep.subr.bf16.mxu1 %v6427_v26  ;;  %v6447_v26 = vpack.c.bf16 %v1187_v19, %v1183_v18  ;;  %v5571_v18 = vpack.c.bf16 %v1225_v13, %v1221_v12  ;;  %v1220_v19 = vld [vmem:[%s7859_s26 + $0x1680] sm:$0xff] }
 0x21e   : > { %2665 = vmatmul.mubr.f32.vlgmr.msra.gmra.mrb[0].mxu0 %v444_v32 }
 0x21f   : > { %5534 = vmatpush1.bf16.msra.mxu0 %v5533_v33  ;;  %3743 = vmatmul.mubr.f32.vlgmr.msra.gmra.mrb[0].mxu1 %v444_v32  ;;  %v5553_v32 = vpack.c.bf16 %v1184_v24, %v1180_v23  ;;  %v6449_v33 = vpack.c.bf16 %v1186_v27, %v1182_v25  ;;  %v1226_v23 = vld [vmem:[%s7859_s26 + $0x16b0] sm:$0xff]  ;;  %v1229_v24 = vld [vmem:[%s7859_s26 + $0x16c8] sm:$0xff]  ;;  %v1235_v27 = vld [vmem:[%s7859_s26 + $0x16f8] sm:$0xff] }
 0x220   : > { %6430 = vmatpush1.bf16.msra.mxu1 %v6429_v34  ;;  %5536 = vmatprep.subr.bf16.mxu0 %v5535_v35  ;;  %v5555_v34 = vpack.c.bf16 %v1193_v29, %v1189_v28  ;;  %v1188_v35 = vld [vmem:[%s7859_s26 + $0x1580] sm:$0xff]  ;;  %v1233_v25 = vld [vmem:[%s7859_s26 + $0x16e8] sm:$0xff] }
 0x221   : > { %6432 = vmatprep.subr.bf16.mxu1 %v6431_v39  ;;  %2670 = vmatprep.mubr.f32.mxu0 %v473_v45  ;;  %v1194_v39 = vld [vmem:[%s7859_s26 + $0x15b0] sm:$0xff]  ;;  %v5557_v44 = vpack.c.bf16 %v1192_v36, %v1188_v35  ;;  %v5575_v30 = vpack.c.bf16 %v1233_v25, %v1229_v24  ;;  %v1237_v36 = vld [vmem:[%s7859_s26 + $0x1708] sm:$0xff] }
 0x222   : > { %3748 = vmatprep.mubr.f32.mxu1 %v473_v45  ;;  %2671 = vmatmul.mubr.f32.gmra.mrb[2].mxu0 %v472_v47  ;;  %v6453_v45 = vpack.c.bf16 %v1194_v39, %v1190_v37  ;;  %v1234_v35 = vld [vmem:[%s7859_s26 + $0x16f0] sm:$0xff]  ;;  %v1241_v37 = vld [vmem:[%s7859_s26 + $0x1728] sm:$0xff]  ;;  %v1243_v39 = vld [vmem:[%s7859_s26 + $0x1738] sm:$0xff] }
 0x223   : > { %5538 = vmatpush1.bf16.msra.mxu0 %v5537_v46  ;;  %3749 = vmatmul.mubr.f32.gmra.mrb[2].mxu1 %v472_v47  ;;  %v5559_v46 = vpack.c.bf16 %v1201_v41, %v1197_v40  ;;  %v1196_v47 = vld [vmem:[%s7859_s26 + $0x15c0] sm:$0xff]  ;;  %v5579_v42 = vpack.c.bf16 %v1241_v37, %v1237_v36  ;;  %v446_v36 = vld [vmem:[%s7975_s12 + $0x50] sm:$0xff] }
 0x224   : > { %6434 = vmatpush1.bf16.msra.mxu1 %v6433_v48  ;;  %5540 = vmatprep.subr.bf16.mxu0 %v5539_v49  ;;  %v1200_v48 = vld [vmem:[%s7859_s26 + $0x15e0] sm:$0xff]  ;;  %v1198_v49 = vld [vmem:[%s7859_s26 + $0x15d0] sm:$0xff] }
 0x225   : > { %6436 = vmatprep.subr.bf16.mxu1 %v6435_v53  ;;  %2741 = vmatprep.mubr.f32.mxu0 %v447_v59  ;;  %v1209_v53 = vld [vmem:[%s7859_s26 + $0x1628] sm:$0xff]  ;;  %v5561_v56 = vpack.c.bf16 %v1200_v48, %v1196_v47  ;;  %v6457_v57 = vpack.c.bf16 %v1202_v51, %v1198_v49  ;;  %v1242_v47 = vld [vmem:[%s7859_s26 + $0x1730] sm:$0xff]  ;;  %v1251_v51 = vld [vmem:[%s7859_s26 + $0x1778] sm:$0xff] }
 0x226   : > { %3819 = vmatprep.mubr.f32.mxu1 %v447_v59  ;;  %v5563_v58 = vpack.c.bf16 %v1209_v53, %v1205_v52  ;;  %v1204_v59 = vld [vmem:[%s7859_s26 + $0x1600] sm:$0xff]  ;;  %v1245_v48 = vld [vmem:[%s7859_s26 + $0x1748] sm:$0xff] }
 0x227   : > { %5542 = vmatpush1.bf16.msra.mxu0 %v5541_v60  ;;  %v1208_v60 = vld [vmem:[%s7859_s26 + $0x1620] sm:$0xff]  ;;  %v1249_v49 = vld [vmem:[%s7859_s26 + $0x1768] sm:$0xff] }
 0x228   : > { %6438 = vmatpush1.bf16.msra.mxu1 %v6437_v61  ;;  %5544 = vmatprep.subr.bf16.mxu0 %v5543_v62  ;;  %v1206_v61 = vld [vmem:[%s7859_s26 + $0x1610] sm:$0xff]  ;;  %v6459_v62 = vpack.c.bf16 %v1211_v55, %v1207_v54  ;;  %v5565_v4 = vpack.c.bf16 %v1208_v60, %v1204_v59  ;;  %v5583_v54 = vpack.c.bf16 %v1249_v49, %v1245_v48  ;;  %v1244_v55 = vld [vmem:[%s7859_s26 + $0x1740] sm:$0xff]  ;;  %v1253_v60 = vld [vmem:[%s7859_s26 + $0x1788] sm:$0xff] }
 0x229   : > { %6440 = vmatprep.subr.bf16.mxu1 %v6439_v2  ;;  %v1215_v2 = vld [vmem:[%s7859_s26 + $0x1658] sm:$0xff]  ;;  %v6461_v5 = vpack.c.bf16 %v1210_v63, %v1206_v61  ;;  %v1250_v59 = vld [vmem:[%s7859_s26 + $0x1770] sm:$0xff]  ;;  %v1257_v61 = vld [vmem:[%s7859_s26 + $0x17a8] sm:$0xff] }
 0x22a   : > { %v1259_v63 = vld [vmem:[%s7859_s26 + $0x17b8] sm:$0xff] }
 0x22b   : > { %5546 = vmatpush1.bf16.msra.mxu0 %v5545_v8  ;;  %v1216_v8 = vld [vmem:[%s7859_s26 + $0x1660] sm:$0xff]  ;;  %v1291_v48 = vld [vmem:[%s7859_s26 + $0x18b8] sm:$0xff] }
 0x22c   : > { %6442 = vmatpush1.bf16.msra.mxu1 %v6441_v9  ;;  %5548 = vmatprep.subr.bf16.mxu0 %v5547_v10  ;;  %v1214_v9 = vld [vmem:[%s7859_s26 + $0x1650] sm:$0xff]  ;;  %v6463_v10 = vpack.c.bf16 %v1219_v3, %v1215_v2  ;;  %v5569_v16 = vpack.c.bf16 %v1216_v8, %v1212_v7  ;;  %v5587_v2 = vpack.c.bf16 %v1257_v61, %v1253_v60  ;;  %v1252_v3 = vld [vmem:[%s7859_s26 + $0x1780] sm:$0xff]  ;;  %v1261_v8 = vld [vmem:[%s7859_s26 + $0x17c8] sm:$0xff] }
 0x22d   : > { %6444 = vmatprep.subr.bf16.mxu1 %v6443_v14  ;;  %v1223_v14 = vld [vmem:[%s7859_s26 + $0x1698] sm:$0xff]  ;;  %v6465_v17 = vpack.c.bf16 %v1218_v11, %v1214_v9  ;;  %v1258_v7 = vld [vmem:[%s7859_s26 + $0x17b0] sm:$0xff]  ;;  %v1265_v9 = vld [vmem:[%s7859_s26 + $0x17e8] sm:$0xff] }
 0x22e   : > { %v1267_v11 = vld [vmem:[%s7859_s26 + $0x17f8] sm:$0xff]  ;;  %v1297_v60 = vld [vmem:[%s7859_s26 + $0x18e8] sm:$0xff] }
 0x22f   : > { %5550 = vmatpush1.bf16.msra.mxu0 %v5549_v20  ;;  %v1224_v20 = vld [vmem:[%s7859_s26 + $0x16a0] sm:$0xff]  ;;  %v475_v49 = vld [vmem:[%s7975_s12 + $0x218] sm:$0xff] }
 0x230   : > { %6446 = vmatpush1.bf16.msra.mxu1 %v6445_v21  ;;  %5552 = vmatprep.subr.bf16.mxu0 %v5551_v22  ;;  %v1222_v21 = vld [vmem:[%s7859_s26 + $0x1690] sm:$0xff]  ;;  %v6467_v22 = vpack.c.bf16 %v1227_v15, %v1223_v14  ;;  %v5573_v28 = vpack.c.bf16 %v1224_v20, %v1220_v19  ;;  %v5591_v14 = vpack.c.bf16 %v1265_v9, %v1261_v8  ;;  %v1260_v15 = vld [vmem:[%s7859_s26 + $0x17c0] sm:$0xff]  ;;  %v1269_v20 = vld [vmem:[%s7859_s26 + $0x1808] sm:$0xff] }
 0x231   : > { %6448 = vmatprep.subr.bf16.mxu1 %v6447_v26  ;;  %v1231_v26 = vld [vmem:[%s7859_s26 + $0x16d8] sm:$0xff]  ;;  %v6469_v29 = vpack.c.bf16 %v1226_v23, %v1222_v21  ;;  %v1266_v19 = vld [vmem:[%s7859_s26 + $0x17f0] sm:$0xff]  ;;  %v1273_v21 = vld [vmem:[%s7859_s26 + $0x1828] sm:$0xff] }
 0x232   : > { %v1275_v23 = vld [vmem:[%s7859_s26 + $0x1838] sm:$0xff]  ;;  %v1301_v8 = vld [vmem:[%s7859_s26 + $0x1908] sm:$0xff] }
 0x233   : > { %5554 = vmatpush1.bf16.msra.mxu0 %v5553_v32  ;;  %v1232_v32 = vld [vmem:[%s7859_s26 + $0x16e0] sm:$0xff]  ;;  %v1295_v61 = vld [vmem:[%s7859_s26 + $0x18d8] sm:$0xff]  ;;  %v1305_v9 = vld [vmem:[%s7859_s26 + $0x1928] sm:$0xff] }
 0x234   : > { %6450 = vmatpush1.bf16.msra.mxu1 %v6449_v33  ;;  %5556 = vmatprep.subr.bf16.mxu0 %v5555_v34  ;;  %v1230_v33 = vld [vmem:[%s7859_s26 + $0x16d0] sm:$0xff]  ;;  %v6471_v34 = vpack.c.bf16 %v1235_v27, %v1231_v26  ;;  %v5577_v40 = vpack.c.bf16 %v1232_v32, %v1228_v31  ;;  %v5595_v26 = vpack.c.bf16 %v1273_v21, %v1269_v20  ;;  %v1268_v27 = vld [vmem:[%s7859_s26 + $0x1800] sm:$0xff]  ;;  %v1277_v32 = vld [vmem:[%s7859_s26 + $0x1848] sm:$0xff] }
 0x235   : > { %6452 = vmatprep.subr.bf16.mxu1 %v6451_v38  ;;  %v1239_v38 = vld [vmem:[%s7859_s26 + $0x1718] sm:$0xff]  ;;  %v6473_v41 = vpack.c.bf16 %v1234_v35, %v1230_v33  ;;  %v1274_v31 = vld [vmem:[%s7859_s26 + $0x1830] sm:$0xff]  ;;  %v1281_v33 = vld [vmem:[%s7859_s26 + $0x1868] sm:$0xff] }
 0x236   : > { %v1283_v35 = vld [vmem:[%s7859_s26 + $0x1878] sm:$0xff]  ;;  %v1309_v20 = vld [vmem:[%s7859_s26 + $0x1948] sm:$0xff] }
 0x237   : > { %5558 = vmatpush1.bf16.msra.mxu0 %v5557_v44  ;;  %v1240_v44 = vld [vmem:[%s7859_s26 + $0x1720] sm:$0xff]  ;;  %v1313_v21 = vld [vmem:[%s7859_s26 + $0x1968] sm:$0xff] }
 0x238   : > { %6454 = vmatpush1.bf16.msra.mxu1 %v6453_v45  ;;  %5560 = vmatprep.subr.bf16.mxu0 %v5559_v46  ;;  %v1238_v45 = vld [vmem:[%s7859_s26 + $0x1710] sm:$0xff]  ;;  %v6475_v46 = vpack.c.bf16 %v1243_v39, %v1239_v38  ;;  %v5581_v52 = vpack.c.bf16 %v1240_v44, %v1236_v43  ;;  %v5599_v39 = vpack.c.bf16 %v1281_v33, %v1277_v32  ;;  %v1317_v32 = vld [vmem:[%s7859_s26 + $0x1988] sm:$0xff] }
 0x239   : > { %6456 = vmatprep.subr.bf16.mxu1 %v6455_v50  ;;  %v1247_v50 = vld [vmem:[%s7859_s26 + $0x1758] sm:$0xff]  ;;  %v6477_v53 = vpack.c.bf16 %v1242_v47, %v1238_v45  ;;  %v1282_v44 = vld [vmem:[%s7859_s26 + $0x1870] sm:$0xff]  ;;  %v1285_v45 = vld [vmem:[%s7859_s26 + $0x1888] sm:$0xff] }
 0x23a   : > { %v1287_v47 = vld [vmem:[%s7859_s26 + $0x1898] sm:$0xff]  ;;  %v1321_v33 = vld [vmem:[%s7859_s26 + $0x19a8] sm:$0xff] }
 0x23b   : > { %5562 = vmatpush1.bf16.msra.mxu0 %v5561_v56  ;;  %v1248_v56 = vld [vmem:[%s7859_s26 + $0x1760] sm:$0xff] }
 0x23c   : > { %6458 = vmatpush1.bf16.msra.mxu1 %v6457_v57  ;;  %5564 = vmatprep.subr.bf16.mxu0 %v5563_v58  ;;  %v1246_v57 = vld [vmem:[%s7859_s26 + $0x1750] sm:$0xff]  ;;  %v6479_v58 = vpack.c.bf16 %v1251_v51, %v1247_v50  ;;  %v5585_v0 = vpack.c.bf16 %v1248_v56, %v1244_v55  ;;  %v1288_v55 = vld [vmem:[%s7859_s26 + $0x18a0] sm:$0xff] }
 0x23d   : > { %6460 = vmatprep.subr.bf16.mxu1 %v6459_v62  ;;  %v1255_v62 = vld [vmem:[%s7859_s26 + $0x1798] sm:$0xff]  ;;  %v6481_v1 = vpack.c.bf16 %v1250_v59, %v1246_v57  ;;  %v474_v51 = vld [vmem:[%s7975_s12 + $0x210] sm:$0xff]  ;;  %v6499_v57 = vpack.c.bf16 %v1291_v48, %v1287_v47  ;;  %v1293_v59 = vld [vmem:[%s7859_s26 + $0x18c8] sm:$0xff] }
 0x23e   : > { %v1286_v56 = vld [vmem:[%s7859_s26 + $0x1890] sm:$0xff]  ;;  %v1331_v47 = vld [vmem:[%s7859_s26 + $0x19f8] sm:$0xff] }
 0x23f   : > { %5566 = vmatpush1.bf16.msra.mxu0 %v5565_v4  ;;  %v1256_v4 = vld [vmem:[%s7859_s26 + $0x17a0] sm:$0xff] }
 0x240   : > { %6462 = vmatpush1.bf16.msra.mxu1 %v6461_v5  ;;  %5568 = vmatprep.subr.bf16.mxu0 %v5567_v6  ;;  %v1254_v5 = vld [vmem:[%s7859_s26 + $0x1790] sm:$0xff]  ;;  %v6483_v6 = vpack.c.bf16 %v1259_v63, %v1255_v62  ;;  %v5589_v12 = vpack.c.bf16 %v1256_v4, %v1252_v3  ;;  %v1299_v62 = vld [vmem:[%s7859_s26 + $0x18f8] sm:$0xff]  ;;  %v449_v63 = vld [vmem:[%s7975_s12 + $0x68] sm:$0xff] }
 0x241   : > { %6464 = vmatprep.subr.bf16.mxu1 %v6463_v10  ;;  %v1263_v10 = vld [vmem:[%s7859_s26 + $0x17d8] sm:$0xff]  ;;  %v6485_v13 = vpack.c.bf16 %v1258_v7, %v1254_v5  ;;  %v1292_v3 = vld [vmem:[%s7859_s26 + $0x18c0] sm:$0xff]  ;;  %v1294_v5 = vld [vmem:[%s7859_s26 + $0x18d0] sm:$0xff] }
 0x242   : > { %v1296_v4 = vld [vmem:[%s7859_s26 + $0x18e0] sm:$0xff]  ;;  %v1298_v7 = vld [vmem:[%s7859_s26 + $0x18f0] sm:$0xff] }
 0x243   : > { %5570 = vmatpush1.bf16.msra.mxu0 %v5569_v16  ;;  %v1264_v16 = vld [vmem:[%s7859_s26 + $0x17e0] sm:$0xff] }
 0x244   : > { %6466 = vmatpush1.bf16.msra.mxu1 %v6465_v17  ;;  %5572 = vmatprep.subr.bf16.mxu0 %v5571_v18  ;;  %v1262_v17 = vld [vmem:[%s7859_s26 + $0x17d0] sm:$0xff]  ;;  %v6487_v18 = vpack.c.bf16 %v1267_v11, %v1263_v10  ;;  %v5593_v24 = vpack.c.bf16 %v1264_v16, %v1260_v15  ;;  %v1303_v10 = vld [vmem:[%s7859_s26 + $0x1918] sm:$0xff]  ;;  %v1300_v15 = vld [vmem:[%s7859_s26 + $0x1900] sm:$0xff] }
 0x245   : > { %6468 = vmatprep.subr.bf16.mxu1 %v6467_v22  ;;  %v1271_v22 = vld [vmem:[%s7859_s26 + $0x1818] sm:$0xff]  ;;  %v6489_v25 = vpack.c.bf16 %v1266_v19, %v1262_v17  ;;  %v1304_v16 = vld [vmem:[%s7859_s26 + $0x1920] sm:$0xff]  ;;  %v1302_v17 = vld [vmem:[%s7859_s26 + $0x1910] sm:$0xff] }
 0x246   : > { %v1307_v11 = vld [vmem:[%s7859_s26 + $0x1938] sm:$0xff]  ;;  %v1306_v19 = vld [vmem:[%s7859_s26 + $0x1930] sm:$0xff] }
 0x247   : > { %5574 = vmatpush1.bf16.msra.mxu0 %v5573_v28  ;;  %v1272_v28 = vld [vmem:[%s7859_s26 + $0x1820] sm:$0xff] }
 0x248   : > { %6470 = vmatpush1.bf16.msra.mxu1 %v6469_v29  ;;  %5576 = vmatprep.subr.bf16.mxu0 %v5575_v30  ;;  %v1270_v29 = vld [vmem:[%s7859_s26 + $0x1810] sm:$0xff]  ;;  %v6491_v30 = vpack.c.bf16 %v1275_v23, %v1271_v22  ;;  %v5597_v37 = vpack.c.bf16 %v1272_v28, %v1268_v27  ;;  %v1311_v22 = vld [vmem:[%s7859_s26 + $0x1958] sm:$0xff]  ;;  %v1308_v27 = vld [vmem:[%s7859_s26 + $0x1940] sm:$0xff] }
 0x249   : > { %6472 = vmatprep.subr.bf16.mxu1 %v6471_v34  ;;  %v1279_v34 = vld [vmem:[%s7859_s26 + $0x1858] sm:$0xff]  ;;  %v6493_v38 = vpack.c.bf16 %v1274_v31, %v1270_v29  ;;  %v1312_v28 = vld [vmem:[%s7859_s26 + $0x1960] sm:$0xff]  ;;  %v1310_v29 = vld [vmem:[%s7859_s26 + $0x1950] sm:$0xff] }
 0x24a   : > { %v6495_v43 = vpack.c.bf16 %v1283_v35, %v1279_v34  ;;  %v1315_v23 = vld [vmem:[%s7859_s26 + $0x1978] sm:$0xff]  ;;  %v1314_v31 = vld [vmem:[%s7859_s26 + $0x1970] sm:$0xff] }
 0x24b   : > { %5578 = vmatpush1.bf16.msra.mxu0 %v5577_v40  ;;  %v1276_v40 = vld [vmem:[%s7859_s26 + $0x1840] sm:$0xff]  ;;  %v1319_v34 = vld [vmem:[%s7859_s26 + $0x1998] sm:$0xff] }
 0x24c   : > { %6474 = vmatpush1.bf16.msra.mxu1 %v6473_v41  ;;  %5580 = vmatprep.subr.bf16.mxu0 %v5579_v42  ;;  %v1280_v41 = vld [vmem:[%s7859_s26 + $0x1860] sm:$0xff]  ;;  %v1278_v42 = vld [vmem:[%s7859_s26 + $0x1850] sm:$0xff]  ;;  %v1323_v35 = vld [vmem:[%s7859_s26 + $0x19b8] sm:$0xff] }
 0x24d   : > { %6476 = vmatprep.subr.bf16.mxu1 %v6475_v46  ;;  %v1289_v46 = vld [vmem:[%s7859_s26 + $0x18a8] sm:$0xff]  ;;  %v5601_v50 = vpack.c.bf16 %v1280_v41, %v1276_v40  ;;  %v1320_v40 = vld [vmem:[%s7859_s26 + $0x19a0] sm:$0xff]  ;;  %v1318_v41 = vld [vmem:[%s7859_s26 + $0x1990] sm:$0xff] }
 0x24f   : > { %5582 = vmatpush1.bf16.msra.mxu0 %v5581_v52  ;;  %v6497_v52 = vpack.c.bf16 %v1282_v44, %v1278_v42  ;;  %v6515_v42 = vpack.c.bf16 %v1323_v35, %v1319_v34  ;;  %v1325_v44 = vld [vmem:[%s7859_s26 + $0x19c8] sm:$0xff]  ;;  %v1356_v35 = vld [vmem:[%s7859_s26 + $0x1ac0] sm:$0xff] }
 0x250   : > { %6478 = vmatpush1.bf16.msra.mxu1 %v6477_v53  ;;  %5584 = vmatprep.subr.bf16.mxu0 %v5583_v54  ;;  %v5603_v53 = vpack.c.bf16 %v1289_v46, %v1285_v45  ;;  %v1284_v54 = vld [vmem:[%s7859_s26 + $0x1880] sm:$0xff]  ;;  %v1329_v45 = vld [vmem:[%s7859_s26 + $0x19e8] sm:$0xff]  ;;  %v1327_v46 = vld [vmem:[%s7859_s26 + $0x19d8] sm:$0xff] }
 0x251   : > { %6480 = vmatprep.subr.bf16.mxu1 %v6479_v58  ;;  %v1290_v58 = vld [vmem:[%s7859_s26 + $0x18b0] sm:$0xff] }
 0x253   : > { %5586 = vmatpush1.bf16.msra.mxu0 %v5585_v0  ;;  %v5605_v0 = vpack.c.bf16 %v1288_v55, %v1284_v54  ;;  %v6519_v54 = vpack.c.bf16 %v1331_v47, %v1327_v46  ;;  %v1330_v55 = vld [vmem:[%s7859_s26 + $0x19f0] sm:$0xff]  ;;  %v1364_v47 = vld [vmem:[%s7859_s26 + $0x1b00] sm:$0xff] }
 0x254   : > { %6482 = vmatpush1.bf16.msra.mxu1 %v6481_v1  ;;  %5588 = vmatprep.subr.bf16.mxu0 %v5587_v2  ;;  %v6501_v1 = vpack.c.bf16 %v1290_v58, %v1286_v56  ;;  %v5607_v2 = vpack.c.bf16 %v1297_v60, %v1293_v59  ;;  %v1333_v56 = vld [vmem:[%s7859_s26 + $0x1a08] sm:$0xff]  ;;  %v1335_v58 = vld [vmem:[%s7859_s26 + $0x1a18] sm:$0xff] }
 0x255   : > { %6484 = vmatprep.subr.bf16.mxu1 %v6483_v6  ;;  %v6503_v6 = vpack.c.bf16 %v1299_v62, %v1295_v61  ;;  %v1339_v59 = vld [vmem:[%s7859_s26 + $0x1a38] sm:$0xff] }
 0x257   : > { %5590 = vmatpush1.bf16.msra.mxu0 %v5589_v12  ;;  %v5609_v12 = vpack.c.bf16 %v1296_v4, %v1292_v3  ;;  %v1338_v3 = vld [vmem:[%s7859_s26 + $0x1a30] sm:$0xff]  ;;  %v1341_v4 = vld [vmem:[%s7859_s26 + $0x1a48] sm:$0xff] }
 0x258   : > { %6486 = vmatpush1.bf16.msra.mxu1 %v6485_v13  ;;  %5592 = vmatprep.subr.bf16.mxu0 %v5591_v14  ;;  %v6505_v13 = vpack.c.bf16 %v1298_v7, %v1294_v5  ;;  %v5611_v14 = vpack.c.bf16 %v1305_v9, %v1301_v8  ;;  %v1345_v5 = vld [vmem:[%s7859_s26 + $0x1a68] sm:$0xff]  ;;  %v1347_v7 = vld [vmem:[%s7859_s26 + $0x1a78] sm:$0xff] }
 0x259   : > { %6488 = vmatprep.subr.bf16.mxu1 %v6487_v18  ;;  %v6507_v18 = vpack.c.bf16 %v1307_v11, %v1303_v10  ;;  %v5631_v10 = vpack.c.bf16 %v1345_v5, %v1341_v4  ;;  %v1340_v11 = vld [vmem:[%s7859_s26 + $0x1a40] sm:$0xff] }
 0x25b   : > { %5594 = vmatpush1.bf16.msra.mxu0 %v5593_v24  ;;  %v5613_v24 = vpack.c.bf16 %v1304_v16, %v1300_v15  ;;  %v1346_v15 = vld [vmem:[%s7859_s26 + $0x1a70] sm:$0xff]  ;;  %v1349_v16 = vld [vmem:[%s7859_s26 + $0x1a88] sm:$0xff] }
 0x25c   : > { %6490 = vmatpush1.bf16.msra.mxu1 %v6489_v25  ;;  %5596 = vmatprep.subr.bf16.mxu0 %v5595_v26  ;;  %v6509_v25 = vpack.c.bf16 %v1306_v19, %v1302_v17  ;;  %v5615_v26 = vpack.c.bf16 %v1313_v21, %v1309_v20  ;;  %v1353_v17 = vld [vmem:[%s7859_s26 + $0x1aa8] sm:$0xff]  ;;  %v1355_v19 = vld [vmem:[%s7859_s26 + $0x1ab8] sm:$0xff] }
 0x25d   : > { %6492 = vmatprep.subr.bf16.mxu1 %v6491_v30  ;;  %v6511_v30 = vpack.c.bf16 %v1315_v23, %v1311_v22  ;;  %v5635_v22 = vpack.c.bf16 %v1353_v17, %v1349_v16  ;;  %v1348_v23 = vld [vmem:[%s7859_s26 + $0x1a80] sm:$0xff] }
 0x25e   : > { %2742 = vmatmul.mubr.f32.vlgmr.msra.gmra.mrb[0].mxu0 %v446_v36 }
 0x25f   : > { %5598 = vmatpush1.bf16.msra.mxu0 %v5597_v37  ;;  %3820 = vmatmul.mubr.f32.vlgmr.msra.gmra.mrb[0].mxu1 %v446_v36  ;;  %v5617_v36 = vpack.c.bf16 %v1312_v28, %v1308_v27  ;;  %v6513_v37 = vpack.c.bf16 %v1314_v31, %v1310_v29  ;;  %v1354_v27 = vld [vmem:[%s7859_s26 + $0x1ab0] sm:$0xff]  ;;  %v1357_v28 = vld [vmem:[%s7859_s26 + $0x1ac8] sm:$0xff]  ;;  %v1363_v31 = vld [vmem:[%s7859_s26 + $0x1af8] sm:$0xff] }
 0x260   : > { %6494 = vmatpush1.bf16.msra.mxu1 %v6493_v38  ;;  %5600 = vmatprep.subr.bf16.mxu0 %v5599_v39  ;;  %v5619_v38 = vpack.c.bf16 %v1321_v33, %v1317_v32  ;;  %v1316_v39 = vld [vmem:[%s7859_s26 + $0x1980] sm:$0xff]  ;;  %v1361_v29 = vld [vmem:[%s7859_s26 + $0x1ae8] sm:$0xff] }
 0x261   : > { %6496 = vmatprep.subr.bf16.mxu1 %v6495_v43  ;;  %2747 = vmatprep.mubr.f32.mxu0 %v475_v49  ;;  %v1322_v43 = vld [vmem:[%s7859_s26 + $0x19b0] sm:$0xff]  ;;  %v5621_v48 = vpack.c.bf16 %v1320_v40, %v1316_v39  ;;  %v5639_v34 = vpack.c.bf16 %v1361_v29, %v1357_v28  ;;  %v1365_v40 = vld [vmem:[%s7859_s26 + $0x1b08] sm:$0xff] }
 0x262   : > { %3825 = vmatprep.mubr.f32.mxu1 %v475_v49  ;;  %2748 = vmatmul.mubr.f32.gmra.mrb[2].mxu0 %v474_v51  ;;  %v6517_v49 = vpack.c.bf16 %v1322_v43, %v1318_v41  ;;  %v1362_v39 = vld [vmem:[%s7859_s26 + $0x1af0] sm:$0xff]  ;;  %v1369_v41 = vld [vmem:[%s7859_s26 + $0x1b28] sm:$0xff]  ;;  %v1371_v43 = vld [vmem:[%s7859_s26 + $0x1b38] sm:$0xff] }
 0x263   : > { %5602 = vmatpush1.bf16.msra.mxu0 %v5601_v50  ;;  %3826 = vmatmul.mubr.f32.gmra.mrb[2].mxu1 %v474_v51  ;;  %v5623_v50 = vpack.c.bf16 %v1329_v45, %v1325_v44  ;;  %v1324_v51 = vld [vmem:[%s7859_s26 + $0x19c0] sm:$0xff]  ;;  %v5643_v46 = vpack.c.bf16 %v1369_v41, %v1365_v40 }
 0x264   : > { %6498 = vmatpush1.bf16.msra.mxu1 %v6497_v52  ;;  %5604 = vmatprep.subr.bf16.mxu0 %v5603_v53  ;;  %v1328_v52 = vld [vmem:[%s7859_s26 + $0x19e0] sm:$0xff]  ;;  %v1326_v53 = vld [vmem:[%s7859_s26 + $0x19d0] sm:$0xff] }
 0x265   : > { %6500 = vmatprep.subr.bf16.mxu1 %v6499_v57  ;;  %2818 = vmatprep.mubr.f32.mxu0 %v449_v63  ;;  %v1337_v57 = vld [vmem:[%s7859_s26 + $0x1a28] sm:$0xff]  ;;  %v5625_v60 = vpack.c.bf16 %v1328_v52, %v1324_v51  ;;  %v6521_v61 = vpack.c.bf16 %v1330_v55, %v1326_v53  ;;  %v1370_v51 = vld [vmem:[%s7859_s26 + $0x1b30] sm:$0xff]  ;;  %v1379_v55 = vld [vmem:[%s7859_s26 + $0x1b78] sm:$0xff] }
 0x266   : > { %3896 = vmatprep.mubr.f32.mxu1 %v449_v63  ;;  %v5627_v62 = vpack.c.bf16 %v1337_v57, %v1333_v56  ;;  %v1332_v63 = vld [vmem:[%s7859_s26 + $0x1a00] sm:$0xff]  ;;  %v1373_v52 = vld [vmem:[%s7859_s26 + $0x1b48] sm:$0xff] }
 0x267   : > { %5606 = vmatpush1.bf16.msra.mxu0 %v5605_v0  ;;  %v1336_v0 = vld [vmem:[%s7859_s26 + $0x1a20] sm:$0xff]  ;;  %v1377_v53 = vld [vmem:[%s7859_s26 + $0x1b68] sm:$0xff] }
 0x268   : > { %6502 = vmatpush1.bf16.msra.mxu1 %v6501_v1  ;;  %5608 = vmatprep.subr.bf16.mxu0 %v5607_v2  ;;  %v1334_v1 = vld [vmem:[%s7859_s26 + $0x1a10] sm:$0xff]  ;;  %v6523_v2 = vpack.c.bf16 %v1339_v59, %v1335_v58  ;;  %v5629_v8 = vpack.c.bf16 %v1336_v0, %v1332_v63  ;;  %v5647_v58 = vpack.c.bf16 %v1377_v53, %v1373_v52  ;;  %v1372_v59 = vld [vmem:[%s7859_s26 + $0x1b40] sm:$0xff]  ;;  %v1381_v0 = vld [vmem:[%s7859_s26 + $0x1b88] sm:$0xff] }
 0x269   : > { %6504 = vmatprep.subr.bf16.mxu1 %v6503_v6  ;;  %v1343_v6 = vld [vmem:[%s7859_s26 + $0x1a58] sm:$0xff]  ;;  %v6525_v9 = vpack.c.bf16 %v1338_v3, %v1334_v1  ;;  %v1378_v63 = vld [vmem:[%s7859_s26 + $0x1b70] sm:$0xff]  ;;  %v1385_v1 = vld [vmem:[%s7859_s26 + $0x1ba8] sm:$0xff] }
 0x26a   : > { %v1387_v3 = vld [vmem:[%s7859_s26 + $0x1bb8] sm:$0xff]  ;;  %v448_v40 = vld [vmem:[%s7975_s12 + $0x60] sm:$0xff]  ;;  %v477_v53 = vld [vmem:[%s7975_s12 + $0x228] sm:$0xff] }
 0x26b   : > { %5610 = vmatpush1.bf16.msra.mxu0 %v5609_v12  ;;  %v1344_v12 = vld [vmem:[%s7859_s26 + $0x1a60] sm:$0xff]  ;;  %v1419_v52 = vld [vmem:[%s7859_s26 + $0x1cb8] sm:$0xff] }
 0x26c   : > { %6506 = vmatpush1.bf16.msra.mxu1 %v6505_v13  ;;  %5612 = vmatprep.subr.bf16.mxu0 %v5611_v14  ;;  %v1342_v13 = vld [vmem:[%s7859_s26 + $0x1a50] sm:$0xff]  ;;  %v6527_v14 = vpack.c.bf16 %v1347_v7, %v1343_v6  ;;  %v5633_v20 = vpack.c.bf16 %v1344_v12, %v1340_v11  ;;  %v5651_v6 = vpack.c.bf16 %v1385_v1, %v1381_v0  ;;  %v1380_v7 = vld [vmem:[%s7859_s26 + $0x1b80] sm:$0xff]  ;;  %v1389_v12 = vld [vmem:[%s7859_s26 + $0x1bc8] sm:$0xff] }
 0x26d   : > { %6508 = vmatprep.subr.bf16.mxu1 %v6507_v18  ;;  %v1351_v18 = vld [vmem:[%s7859_s26 + $0x1a98] sm:$0xff]  ;;  %v6529_v21 = vpack.c.bf16 %v1346_v15, %v1342_v13  ;;  %v1386_v11 = vld [vmem:[%s7859_s26 + $0x1bb0] sm:$0xff]  ;;  %v1393_v13 = vld [vmem:[%s7859_s26 + $0x1be8] sm:$0xff] }
 0x26e   : > { %v1395_v15 = vld [vmem:[%s7859_s26 + $0x1bf8] sm:$0xff]  ;;  %v1425_v0 = vld [vmem:[%s7859_s26 + $0x1ce8] sm:$0xff] }
 0x26f   : > { %5614 = vmatpush1.bf16.msra.mxu0 %v5613_v24  ;;  %v1352_v24 = vld [vmem:[%s7859_s26 + $0x1aa0] sm:$0xff]  ;;  %v1423_v1 = vld [vmem:[%s7859_s26 + $0x1cd8] sm:$0xff] }
 0x270   : > { %6510 = vmatpush1.bf16.msra.mxu1 %v6509_v25  ;;  %5616 = vmatprep.subr.bf16.mxu0 %v5615_v26  ;;  %v1350_v25 = vld [vmem:[%s7859_s26 + $0x1a90] sm:$0xff]  ;;  %v6531_v26 = vpack.c.bf16 %v1355_v19, %v1351_v18  ;;  %v5637_v32 = vpack.c.bf16 %v1352_v24, %v1348_v23  ;;  %v5655_v18 = vpack.c.bf16 %v1393_v13, %v1389_v12  ;;  %v1388_v19 = vld [vmem:[%s7859_s26 + $0x1bc0] sm:$0xff]  ;;  %v1397_v24 = vld [vmem:[%s7859_s26 + $0x1c08] sm:$0xff] }
 0x271   : > { %6512 = vmatprep.subr.bf16.mxu1 %v6511_v30  ;;  %v1359_v30 = vld [vmem:[%s7859_s26 + $0x1ad8] sm:$0xff]  ;;  %v6533_v33 = vpack.c.bf16 %v1354_v27, %v1350_v25  ;;  %v1394_v23 = vld [vmem:[%s7859_s26 + $0x1bf0] sm:$0xff]  ;;  %v1401_v25 = vld [vmem:[%s7859_s26 + $0x1c28] sm:$0xff] }
 0x272   : > { %v1403_v27 = vld [vmem:[%s7859_s26 + $0x1c38] sm:$0xff]  ;;  %v1429_v12 = vld [vmem:[%s7859_s26 + $0x1d08] sm:$0xff] }
 0x273   : > { %5618 = vmatpush1.bf16.msra.mxu0 %v5617_v36  ;;  %v1360_v36 = vld [vmem:[%s7859_s26 + $0x1ae0] sm:$0xff]  ;;  %v1433_v13 = vld [vmem:[%s7859_s26 + $0x1d28] sm:$0xff] }
 0x274   : > { %6514 = vmatpush1.bf16.msra.mxu1 %v6513_v37  ;;  %5620 = vmatprep.subr.bf16.mxu0 %v5619_v38  ;;  %v1358_v37 = vld [vmem:[%s7859_s26 + $0x1ad0] sm:$0xff]  ;;  %v6535_v38 = vpack.c.bf16 %v1363_v31, %v1359_v30  ;;  %v5641_v44 = vpack.c.bf16 %v1360_v36, %v1356_v35  ;;  %v5659_v30 = vpack.c.bf16 %v1401_v25, %v1397_v24  ;;  %v1396_v31 = vld [vmem:[%s7859_s26 + $0x1c00] sm:$0xff]  ;;  %v1405_v36 = vld [vmem:[%s7859_s26 + $0x1c48] sm:$0xff] }
 0x275   : > { %6516 = vmatprep.subr.bf16.mxu1 %v6515_v42  ;;  %v1367_v42 = vld [vmem:[%s7859_s26 + $0x1b18] sm:$0xff]  ;;  %v6537_v45 = vpack.c.bf16 %v1362_v39, %v1358_v37  ;;  %v1402_v35 = vld [vmem:[%s7859_s26 + $0x1c30] sm:$0xff]  ;;  %v1409_v37 = vld [vmem:[%s7859_s26 + $0x1c68] sm:$0xff] }
 0x276   : > { %v1411_v39 = vld [vmem:[%s7859_s26 + $0x1c78] sm:$0xff]  ;;  %v1437_v24 = vld [vmem:[%s7859_s26 + $0x1d48] sm:$0xff] }
 0x277   : > { %5622 = vmatpush1.bf16.msra.mxu0 %v5621_v48  ;;  %v1368_v48 = vld [vmem:[%s7859_s26 + $0x1b20] sm:$0xff]  ;;  %v1441_v25 = vld [vmem:[%s7859_s26 + $0x1d68] sm:$0xff] }
 0x278   : > { %6518 = vmatpush1.bf16.msra.mxu1 %v6517_v49  ;;  %5624 = vmatprep.subr.bf16.mxu0 %v5623_v50  ;;  %v1366_v49 = vld [vmem:[%s7859_s26 + $0x1b10] sm:$0xff]  ;;  %v6539_v50 = vpack.c.bf16 %v1371_v43, %v1367_v42  ;;  %v5645_v56 = vpack.c.bf16 %v1368_v48, %v1364_v47  ;;  %v5663_v43 = vpack.c.bf16 %v1409_v37, %v1405_v36  ;;  %v1445_v36 = vld [vmem:[%s7859_s26 + $0x1d88] sm:$0xff] }
 0x279   : > { %6520 = vmatprep.subr.bf16.mxu1 %v6519_v54  ;;  %v1375_v54 = vld [vmem:[%s7859_s26 + $0x1b58] sm:$0xff]  ;;  %v6541_v57 = vpack.c.bf16 %v1370_v51, %v1366_v49  ;;  %v1410_v48 = vld [vmem:[%s7859_s26 + $0x1c70] sm:$0xff]  ;;  %v1413_v49 = vld [vmem:[%s7859_s26 + $0x1c88] sm:$0xff] }
 0x27a   : > { %v1415_v51 = vld [vmem:[%s7859_s26 + $0x1c98] sm:$0xff]  ;;  %v1449_v37 = vld [vmem:[%s7859_s26 + $0x1da8] sm:$0xff] }
 0x27b   : > { %5626 = vmatpush1.bf16.msra.mxu0 %v5625_v60  ;;  %v1376_v60 = vld [vmem:[%s7859_s26 + $0x1b60] sm:$0xff] }
 0x27c   : > { %6522 = vmatpush1.bf16.msra.mxu1 %v6521_v61  ;;  %5628 = vmatprep.subr.bf16.mxu0 %v5627_v62  ;;  %v1374_v61 = vld [vmem:[%s7859_s26 + $0x1b50] sm:$0xff]  ;;  %v6543_v62 = vpack.c.bf16 %v1379_v55, %v1375_v54  ;;  %v5649_v4 = vpack.c.bf16 %v1376_v60, %v1372_v59  ;;  %v476_v55 = vld [vmem:[%s7975_s12 + $0x220] sm:$0xff] }
 0x27d   : > { %6524 = vmatprep.subr.bf16.mxu1 %v6523_v2  ;;  %v1383_v2 = vld [vmem:[%s7859_s26 + $0x1b98] sm:$0xff]  ;;  %v6545_v5 = vpack.c.bf16 %v1378_v63, %v1374_v61  ;;  %v1416_v59 = vld [vmem:[%s7859_s26 + $0x1ca0] sm:$0xff]  ;;  %v1414_v60 = vld [vmem:[%s7859_s26 + $0x1c90] sm:$0xff]  ;;  %v6563_v61 = vpack.c.bf16 %v1419_v52, %v1415_v51 }
 0x27e   : > { %v1421_v63 = vld [vmem:[%s7859_s26 + $0x1cc8] sm:$0xff]  ;;  %v1459_v51 = vld [vmem:[%s7859_s26 + $0x1df8] sm:$0xff] }
 0x27f   : > { %5630 = vmatpush1.bf16.msra.mxu0 %v5629_v8  ;;  %v1384_v8 = vld [vmem:[%s7859_s26 + $0x1ba0] sm:$0xff] }
 0x280   : > { %6526 = vmatpush1.bf16.msra.mxu1 %v6525_v9  ;;  %5632 = vmatprep.subr.bf16.mxu0 %v5631_v10  ;;  %v1382_v9 = vld [vmem:[%s7859_s26 + $0x1b90] sm:$0xff]  ;;  %v6547_v10 = vpack.c.bf16 %v1387_v3, %v1383_v2  ;;  %v5653_v16 = vpack.c.bf16 %v1384_v8, %v1380_v7  ;;  %v1427_v2 = vld [vmem:[%s7859_s26 + $0x1cf8] sm:$0xff]  ;;  %v1420_v7 = vld [vmem:[%s7859_s26 + $0x1cc0] sm:$0xff] }
 0x281   : > { %6528 = vmatprep.subr.bf16.mxu1 %v6527_v14  ;;  %v1391_v14 = vld [vmem:[%s7859_s26 + $0x1bd8] sm:$0xff]  ;;  %v6549_v17 = vpack.c.bf16 %v1386_v11, %v1382_v9  ;;  %v1424_v8 = vld [vmem:[%s7859_s26 + $0x1ce0] sm:$0xff]  ;;  %v1422_v9 = vld [vmem:[%s7859_s26 + $0x1cd0] sm:$0xff] }
 0x282   : > { %v451_v3 = vld [vmem:[%s7975_s12 + $0x78] sm:$0xff]  ;;  %v1426_v11 = vld [vmem:[%s7859_s26 + $0x1cf0] sm:$0xff] }
 0x283   : > { %5634 = vmatpush1.bf16.msra.mxu0 %v5633_v20  ;;  %v1392_v20 = vld [vmem:[%s7859_s26 + $0x1be0] sm:$0xff] }
 0x284   : > { %6530 = vmatpush1.bf16.msra.mxu1 %v6529_v21  ;;  %5636 = vmatprep.subr.bf16.mxu0 %v5635_v22  ;;  %v1390_v21 = vld [vmem:[%s7859_s26 + $0x1bd0] sm:$0xff]  ;;  %v6551_v22 = vpack.c.bf16 %v1395_v15, %v1391_v14  ;;  %v5657_v28 = vpack.c.bf16 %v1392_v20, %v1388_v19  ;;  %v1431_v14 = vld [vmem:[%s7859_s26 + $0x1d18] sm:$0xff]  ;;  %v1428_v19 = vld [vmem:[%s7859_s26 + $0x1d00] sm:$0xff] }
 0x285   : > { %6532 = vmatprep.subr.bf16.mxu1 %v6531_v26  ;;  %v1399_v26 = vld [vmem:[%s7859_s26 + $0x1c18] sm:$0xff]  ;;  %v6553_v29 = vpack.c.bf16 %v1394_v23, %v1390_v21  ;;  %v1432_v20 = vld [vmem:[%s7859_s26 + $0x1d20] sm:$0xff]  ;;  %v1430_v21 = vld [vmem:[%s7859_s26 + $0x1d10] sm:$0xff] }
 0x286   : > { %v1435_v15 = vld [vmem:[%s7859_s26 + $0x1d38] sm:$0xff]  ;;  %v1434_v23 = vld [vmem:[%s7859_s26 + $0x1d30] sm:$0xff] }
 0x287   : > { %5638 = vmatpush1.bf16.msra.mxu0 %v5637_v32  ;;  %v1400_v32 = vld [vmem:[%s7859_s26 + $0x1c20] sm:$0xff] }
 0x288   : > { %6534 = vmatpush1.bf16.msra.mxu1 %v6533_v33  ;;  %5640 = vmatprep.subr.bf16.mxu0 %v5639_v34  ;;  %v1398_v33 = vld [vmem:[%s7859_s26 + $0x1c10] sm:$0xff]  ;;  %v6555_v34 = vpack.c.bf16 %v1403_v27, %v1399_v26  ;;  %v5661_v41 = vpack.c.bf16 %v1400_v32, %v1396_v31  ;;  %v1439_v26 = vld [vmem:[%s7859_s26 + $0x1d58] sm:$0xff]  ;;  %v1436_v31 = vld [vmem:[%s7859_s26 + $0x1d40] sm:$0xff] }
 0x289   : > { %6536 = vmatprep.subr.bf16.mxu1 %v6535_v38  ;;  %v1407_v38 = vld [vmem:[%s7859_s26 + $0x1c58] sm:$0xff]  ;;  %v6557_v42 = vpack.c.bf16 %v1402_v35, %v1398_v33  ;;  %v1440_v32 = vld [vmem:[%s7859_s26 + $0x1d60] sm:$0xff]  ;;  %v1438_v33 = vld [vmem:[%s7859_s26 + $0x1d50] sm:$0xff] }
 0x28a   : > { %v6559_v47 = vpack.c.bf16 %v1411_v39, %v1407_v38  ;;  %v1443_v27 = vld [vmem:[%s7859_s26 + $0x1d78] sm:$0xff]  ;;  %v1442_v35 = vld [vmem:[%s7859_s26 + $0x1d70] sm:$0xff] }
 0x28b   : > { %5642 = vmatpush1.bf16.msra.mxu0 %v5641_v44  ;;  %v1404_v44 = vld [vmem:[%s7859_s26 + $0x1c40] sm:$0xff]  ;;  %v1447_v38 = vld [vmem:[%s7859_s26 + $0x1d98] sm:$0xff] }
 0x28c   : > { %6538 = vmatpush1.bf16.msra.mxu1 %v6537_v45  ;;  %5644 = vmatprep.subr.bf16.mxu0 %v5643_v46  ;;  %v1408_v45 = vld [vmem:[%s7859_s26 + $0x1c60] sm:$0xff]  ;;  %v1406_v46 = vld [vmem:[%s7859_s26 + $0x1c50] sm:$0xff]  ;;  %v1451_v39 = vld [vmem:[%s7859_s26 + $0x1db8] sm:$0xff] }
 0x28d   : > { %6540 = vmatprep.subr.bf16.mxu1 %v6539_v50  ;;  %v1417_v50 = vld [vmem:[%s7859_s26 + $0x1ca8] sm:$0xff]  ;;  %v5665_v54 = vpack.c.bf16 %v1408_v45, %v1404_v44  ;;  %v1448_v44 = vld [vmem:[%s7859_s26 + $0x1da0] sm:$0xff]  ;;  %v1446_v45 = vld [vmem:[%s7859_s26 + $0x1d90] sm:$0xff] }
 0x28f   : > { %5646 = vmatpush1.bf16.msra.mxu0 %v5645_v56  ;;  %v6561_v56 = vpack.c.bf16 %v1410_v48, %v1406_v46  ;;  %v6579_v46 = vpack.c.bf16 %v1451_v39, %v1447_v38  ;;  %v1453_v48 = vld [vmem:[%s7859_s26 + $0x1dc8] sm:$0xff]  ;;  %v1484_v39 = vld [vmem:[%s7859_s26 + $0x1ec0] sm:$0xff] }
 0x290   : > { %6542 = vmatpush1.bf16.msra.mxu1 %v6541_v57  ;;  %5648 = vmatprep.subr.bf16.mxu0 %v5647_v58  ;;  %v5667_v57 = vpack.c.bf16 %v1417_v50, %v1413_v49  ;;  %v1412_v58 = vld [vmem:[%s7859_s26 + $0x1c80] sm:$0xff]  ;;  %v1457_v49 = vld [vmem:[%s7859_s26 + $0x1de8] sm:$0xff]  ;;  %v1455_v50 = vld [vmem:[%s7859_s26 + $0x1dd8] sm:$0xff] }
 0x291   : > { %6544 = vmatprep.subr.bf16.mxu1 %v6543_v62  ;;  %v1418_v62 = vld [vmem:[%s7859_s26 + $0x1cb0] sm:$0xff] }
 0x293   : > { %5650 = vmatpush1.bf16.msra.mxu0 %v5649_v4  ;;  %v5669_v4 = vpack.c.bf16 %v1416_v59, %v1412_v58  ;;  %v6583_v58 = vpack.c.bf16 %v1459_v51, %v1455_v50  ;;  %v1458_v59 = vld [vmem:[%s7859_s26 + $0x1df0] sm:$0xff]  ;;  %v1492_v51 = vld [vmem:[%s7859_s26 + $0x1f00] sm:$0xff] }
 0x294   : > { %6546 = vmatpush1.bf16.msra.mxu1 %v6545_v5  ;;  %5652 = vmatprep.subr.bf16.mxu0 %v5651_v6  ;;  %v6565_v5 = vpack.c.bf16 %v1418_v62, %v1414_v60  ;;  %v5671_v6 = vpack.c.bf16 %v1425_v0, %v1421_v63  ;;  %v1461_v60 = vld [vmem:[%s7859_s26 + $0x1e08] sm:$0xff]  ;;  %v1463_v62 = vld [vmem:[%s7859_s26 + $0x1e18] sm:$0xff] }
 0x295   : > { %6548 = vmatprep.subr.bf16.mxu1 %v6547_v10  ;;  %v6567_v10 = vpack.c.bf16 %v1427_v2, %v1423_v1  ;;  %v1467_v63 = vld [vmem:[%s7859_s26 + $0x1e38] sm:$0xff] }
 0x297   : > { %5654 = vmatpush1.bf16.msra.mxu0 %v5653_v16  ;;  %v5673_v16 = vpack.c.bf16 %v1424_v8, %v1420_v7  ;;  %v1466_v7 = vld [vmem:[%s7859_s26 + $0x1e30] sm:$0xff]  ;;  %v1469_v8 = vld [vmem:[%s7859_s26 + $0x1e48] sm:$0xff] }
 0x298   : > { %6550 = vmatpush1.bf16.msra.mxu1 %v6549_v17  ;;  %5656 = vmatprep.subr.bf16.mxu0 %v5655_v18  ;;  %v6569_v17 = vpack.c.bf16 %v1426_v11, %v1422_v9  ;;  %v5675_v18 = vpack.c.bf16 %v1433_v13, %v1429_v12  ;;  %v1473_v9 = vld [vmem:[%s7859_s26 + $0x1e68] sm:$0xff]  ;;  %v1475_v11 = vld [vmem:[%s7859_s26 + $0x1e78] sm:$0xff] }
 0x299   : > { %6552 = vmatprep.subr.bf16.mxu1 %v6551_v22  ;;  %v6571_v22 = vpack.c.bf16 %v1435_v15, %v1431_v14  ;;  %v5695_v14 = vpack.c.bf16 %v1473_v9, %v1469_v8  ;;  %v1468_v15 = vld [vmem:[%s7859_s26 + $0x1e40] sm:$0xff] }
 0x29b   : > { %5658 = vmatpush1.bf16.msra.mxu0 %v5657_v28  ;;  %v5677_v28 = vpack.c.bf16 %v1432_v20, %v1428_v19  ;;  %v1474_v19 = vld [vmem:[%s7859_s26 + $0x1e70] sm:$0xff]  ;;  %v1477_v20 = vld [vmem:[%s7859_s26 + $0x1e88] sm:$0xff] }
 0x29c   : > { %6554 = vmatpush1.bf16.msra.mxu1 %v6553_v29  ;;  %5660 = vmatprep.subr.bf16.mxu0 %v5659_v30  ;;  %v6573_v29 = vpack.c.bf16 %v1434_v23, %v1430_v21  ;;  %v5679_v30 = vpack.c.bf16 %v1441_v25, %v1437_v24  ;;  %v1481_v21 = vld [vmem:[%s7859_s26 + $0x1ea8] sm:$0xff]  ;;  %v1483_v23 = vld [vmem:[%s7859_s26 + $0x1eb8] sm:$0xff] }
 0x29d   : > { %6556 = vmatprep.subr.bf16.mxu1 %v6555_v34  ;;  %v6575_v34 = vpack.c.bf16 %v1443_v27, %v1439_v26  ;;  %v5699_v26 = vpack.c.bf16 %v1481_v21, %v1477_v20  ;;  %v1476_v27 = vld [vmem:[%s7859_s26 + $0x1e80] sm:$0xff] }
 0x29e   : > { %2819 = vmatmul.mubr.f32.vlgmr.msra.gmra.mrb[0].mxu0 %v448_v40 }
 0x29f   : > { %5662 = vmatpush1.bf16.msra.mxu0 %v5661_v41  ;;  %3897 = vmatmul.mubr.f32.vlgmr.msra.gmra.mrb[0].mxu1 %v448_v40  ;;  %v5681_v40 = vpack.c.bf16 %v1440_v32, %v1436_v31  ;;  %v6577_v41 = vpack.c.bf16 %v1442_v35, %v1438_v33  ;;  %v1482_v31 = vld [vmem:[%s7859_s26 + $0x1eb0] sm:$0xff]  ;;  %v1485_v32 = vld [vmem:[%s7859_s26 + $0x1ec8] sm:$0xff]  ;;  %v1491_v35 = vld [vmem:[%s7859_s26 + $0x1ef8] sm:$0xff] }
 0x2a0   : > { %6558 = vmatpush1.bf16.msra.mxu1 %v6557_v42  ;;  %5664 = vmatprep.subr.bf16.mxu0 %v5663_v43  ;;  %v5683_v42 = vpack.c.bf16 %v1449_v37, %v1445_v36  ;;  %v1444_v43 = vld [vmem:[%s7859_s26 + $0x1d80] sm:$0xff]  ;;  %v1489_v33 = vld [vmem:[%s7859_s26 + $0x1ee8] sm:$0xff] }
 0x2a1   : > { %6560 = vmatprep.subr.bf16.mxu1 %v6559_v47  ;;  %2824 = vmatprep.mubr.f32.mxu0 %v477_v53  ;;  %v1450_v47 = vld [vmem:[%s7859_s26 + $0x1db0] sm:$0xff]  ;;  %v5685_v52 = vpack.c.bf16 %v1448_v44, %v1444_v43  ;;  %v5703_v38 = vpack.c.bf16 %v1489_v33, %v1485_v32  ;;  %v1493_v44 = vld [vmem:[%s7859_s26 + $0x1f08] sm:$0xff] }
 0x2a2   : > { %3902 = vmatprep.mubr.f32.mxu1 %v477_v53  ;;  %2825 = vmatmul.mubr.f32.gmra.mrb[2].mxu0 %v476_v55  ;;  %v6581_v53 = vpack.c.bf16 %v1450_v47, %v1446_v45  ;;  %v1490_v43 = vld [vmem:[%s7859_s26 + $0x1ef0] sm:$0xff]  ;;  %v1497_v45 = vld [vmem:[%s7859_s26 + $0x1f28] sm:$0xff]  ;;  %v1499_v47 = vld [vmem:[%s7859_s26 + $0x1f38] sm:$0xff] }
 0x2a3   : > { %5666 = vmatpush1.bf16.msra.mxu0 %v5665_v54  ;;  %3903 = vmatmul.mubr.f32.gmra.mrb[2].mxu1 %v476_v55  ;;  %v5687_v54 = vpack.c.bf16 %v1457_v49, %v1453_v48  ;;  %v1452_v55 = vld [vmem:[%s7859_s26 + $0x1dc0] sm:$0xff]  ;;  %v5707_v50 = vpack.c.bf16 %v1497_v45, %v1493_v44  ;;  %v450_v44 = vld [vmem:[%s7975_s12 + $0x70] sm:$0xff] }
 0x2a4   : > { %6562 = vmatpush1.bf16.msra.mxu1 %v6561_v56  ;;  %5668 = vmatprep.subr.bf16.mxu0 %v5667_v57  ;;  %v1456_v56 = vld [vmem:[%s7859_s26 + $0x1de0] sm:$0xff]  ;;  %v1454_v57 = vld [vmem:[%s7859_s26 + $0x1dd0] sm:$0xff] }
 0x2a5   : > { %6564 = vmatprep.subr.bf16.mxu1 %v6563_v61  ;;  %2895 = vmatprep.mubr.f32.mxu0 %v451_v3  ;;  %v1465_v61 = vld [vmem:[%s7859_s26 + $0x1e28] sm:$0xff]  ;;  %v5689_v0 = vpack.c.bf16 %v1456_v56, %v1452_v55  ;;  %v6585_v1 = vpack.c.bf16 %v1458_v59, %v1454_v57  ;;  %v1498_v55 = vld [vmem:[%s7859_s26 + $0x1f30] sm:$0xff]  ;;  %v1507_v59 = vld [vmem:[%s7859_s26 + $0x1f78] sm:$0xff] }
 0x2a6   : > { %3973 = vmatprep.mubr.f32.mxu1 %v451_v3  ;;  %v5691_v2 = vpack.c.bf16 %v1465_v61, %v1461_v60  ;;  %v1460_v3 = vld [vmem:[%s7859_s26 + $0x1e00] sm:$0xff]  ;;  %v1501_v56 = vld [vmem:[%s7859_s26 + $0x1f48] sm:$0xff] }
 0x2a7   : > { %5670 = vmatpush1.bf16.msra.mxu0 %v5669_v4  ;;  %v1464_v4 = vld [vmem:[%s7859_s26 + $0x1e20] sm:$0xff]  ;;  %v1505_v57 = vld [vmem:[%s7859_s26 + $0x1f68] sm:$0xff] }
 0x2a8   : > { %6566 = vmatpush1.bf16.msra.mxu1 %v6565_v5  ;;  %5672 = vmatprep.subr.bf16.mxu0 %v5671_v6  ;;  %v1462_v5 = vld [vmem:[%s7859_s26 + $0x1e10] sm:$0xff]  ;;  %v6587_v6 = vpack.c.bf16 %v1467_v63, %v1463_v62  ;;  %v5693_v12 = vpack.c.bf16 %v1464_v4, %v1460_v3  ;;  %v5711_v62 = vpack.c.bf16 %v1505_v57, %v1501_v56  ;;  %v1500_v63 = vld [vmem:[%s7859_s26 + $0x1f40] sm:$0xff]  ;;  %v1509_v4 = vld [vmem:[%s7859_s26 + $0x1f88] sm:$0xff] }
 0x2a9   : > { %6568 = vmatprep.subr.bf16.mxu1 %v6567_v10  ;;  %v1471_v10 = vld [vmem:[%s7859_s26 + $0x1e58] sm:$0xff]  ;;  %v6589_v13 = vpack.c.bf16 %v1466_v7, %v1462_v5  ;;  %v1506_v3 = vld [vmem:[%s7859_s26 + $0x1f70] sm:$0xff]  ;;  %v1513_v5 = vld [vmem:[%s7859_s26 + $0x1fa8] sm:$0xff] }
 0x2aa   : > { %v1515_v7 = vld [vmem:[%s7859_s26 + $0x1fb8] sm:$0xff] }
 0x2ab   : > { %5674 = vmatpush1.bf16.msra.mxu0 %v5673_v16  ;;  %v1472_v16 = vld [vmem:[%s7859_s26 + $0x1e60] sm:$0xff]  ;;  %v1547_v56 = vld [vmem:[%s7859_s26 + $0x20b8] sm:$0xff] }
 0x2ac   : > { %6570 = vmatpush1.bf16.msra.mxu1 %v6569_v17  ;;  %5676 = vmatprep.subr.bf16.mxu0 %v5675_v18  ;;  %v1470_v17 = vld [vmem:[%s7859_s26 + $0x1e50] sm:$0xff]  ;;  %v6591_v18 = vpack.c.bf16 %v1475_v11, %v1471_v10  ;;  %v5697_v24 = vpack.c.bf16 %v1472_v16, %v1468_v15  ;;  %v5715_v10 = vpack.c.bf16 %v1513_v5, %v1509_v4  ;;  %v1508_v11 = vld [vmem:[%s7859_s26 + $0x1f80] sm:$0xff]  ;;  %v1517_v16 = vld [vmem:[%s7859_s26 + $0x1fc8] sm:$0xff] }
 0x2ad   : > { %6572 = vmatprep.subr.bf16.mxu1 %v6571_v22  ;;  %v1479_v22 = vld [vmem:[%s7859_s26 + $0x1e98] sm:$0xff]  ;;  %v6593_v25 = vpack.c.bf16 %v1474_v19, %v1470_v17  ;;  %v1514_v15 = vld [vmem:[%s7859_s26 + $0x1fb0] sm:$0xff]  ;;  %v1521_v17 = vld [vmem:[%s7859_s26 + $0x1fe8] sm:$0xff] }
 0x2ae   : > { %v1523_v19 = vld [vmem:[%s7859_s26 + $0x1ff8] sm:$0xff]  ;;  %v1553_v4 = vld [vmem:[%s7859_s26 + $0x20e8] sm:$0xff] }
 0x2af   : > { %5678 = vmatpush1.bf16.msra.mxu0 %v5677_v28  ;;  %v1480_v28 = vld [vmem:[%s7859_s26 + $0x1ea0] sm:$0xff]  ;;  %v479_v57 = vld [vmem:[%s7975_s12 + $0x238] sm:$0xff] }
 0x2b0   : > { %6574 = vmatpush1.bf16.msra.mxu1 %v6573_v29  ;;  %5680 = vmatprep.subr.bf16.mxu0 %v5679_v30  ;;  %v1478_v29 = vld [vmem:[%s7859_s26 + $0x1e90] sm:$0xff]  ;;  %v6595_v30 = vpack.c.bf16 %v1483_v23, %v1479_v22  ;;  %v5701_v36 = vpack.c.bf16 %v1480_v28, %v1476_v27  ;;  %v5719_v22 = vpack.c.bf16 %v1521_v17, %v1517_v16  ;;  %v1516_v23 = vld [vmem:[%s7859_s26 + $0x1fc0] sm:$0xff]  ;;  %v1525_v28 = vld [vmem:[%s7859_s26 + $0x2008] sm:$0xff] }
 0x2b1   : > { %6576 = vmatprep.subr.bf16.mxu1 %v6575_v34  ;;  %v1487_v34 = vld [vmem:[%s7859_s26 + $0x1ed8] sm:$0xff]  ;;  %v6597_v37 = vpack.c.bf16 %v1482_v31, %v1478_v29  ;;  %v1522_v27 = vld [vmem:[%s7859_s26 + $0x1ff0] sm:$0xff]  ;;  %v1529_v29 = vld [vmem:[%s7859_s26 + $0x2028] sm:$0xff] }
 0x2b2   : > { %v1531_v31 = vld [vmem:[%s7859_s26 + $0x2038] sm:$0xff]  ;;  %v1557_v16 = vld [vmem:[%s7859_s26 + $0x2108] sm:$0xff] }
 0x2b3   : > { %5682 = vmatpush1.bf16.msra.mxu0 %v5681_v40  ;;  %v1488_v40 = vld [vmem:[%s7859_s26 + $0x1ee0] sm:$0xff]  ;;  %v1551_v5 = vld [vmem:[%s7859_s26 + $0x20d8] sm:$0xff]  ;;  %v1561_v17 = vld [vmem:[%s7859_s26 + $0x2128] sm:$0xff] }
 0x2b4   : > { %6578 = vmatpush1.bf16.msra.mxu1 %v6577_v41  ;;  %5684 = vmatprep.subr.bf16.mxu0 %v5683_v42  ;;  %v1486_v41 = vld [vmem:[%s7859_s26 + $0x1ed0] sm:$0xff]  ;;  %v6599_v42 = vpack.c.bf16 %v1491_v35, %v1487_v34  ;;  %v5705_v48 = vpack.c.bf16 %v1488_v40, %v1484_v39  ;;  %v5723_v34 = vpack.c.bf16 %v1529_v29, %v1525_v28  ;;  %v1524_v35 = vld [vmem:[%s7859_s26 + $0x2000] sm:$0xff]  ;;  %v1533_v40 = vld [vmem:[%s7859_s26 + $0x2048] sm:$0xff] }
 0x2b5   : > { %6580 = vmatprep.subr.bf16.mxu1 %v6579_v46  ;;  %v1495_v46 = vld [vmem:[%s7859_s26 + $0x1f18] sm:$0xff]  ;;  %v6601_v49 = vpack.c.bf16 %v1490_v43, %v1486_v41  ;;  %v1530_v39 = vld [vmem:[%s7859_s26 + $0x2030] sm:$0xff]  ;;  %v1537_v41 = vld [vmem:[%s7859_s26 + $0x2068] sm:$0xff] }
 0x2b6   : > { %v1539_v43 = vld [vmem:[%s7859_s26 + $0x2078] sm:$0xff]  ;;  %v1565_v28 = vld [vmem:[%s7859_s26 + $0x2148] sm:$0xff] }
 0x2b7   : > { %5686 = vmatpush1.bf16.msra.mxu0 %v5685_v52  ;;  %v1496_v52 = vld [vmem:[%s7859_s26 + $0x1f20] sm:$0xff]  ;;  %v1569_v29 = vld [vmem:[%s7859_s26 + $0x2168] sm:$0xff] }
 0x2b8   : > { %6582 = vmatpush1.bf16.msra.mxu1 %v6581_v53  ;;  %5688 = vmatprep.subr.bf16.mxu0 %v5687_v54  ;;  %v1494_v53 = vld [vmem:[%s7859_s26 + $0x1f10] sm:$0xff]  ;;  %v6603_v54 = vpack.c.bf16 %v1499_v47, %v1495_v46  ;;  %v5709_v60 = vpack.c.bf16 %v1496_v52, %v1492_v51  ;;  %v5727_v47 = vpack.c.bf16 %v1537_v41, %v1533_v40  ;;  %v1573_v40 = vld [vmem:[%s7859_s26 + $0x2188] sm:$0xff] }
 0x2b9   : > { %6584 = vmatprep.subr.bf16.mxu1 %v6583_v58  ;;  %v1503_v58 = vld [vmem:[%s7859_s26 + $0x1f58] sm:$0xff]  ;;  %v6605_v61 = vpack.c.bf16 %v1498_v55, %v1494_v53  ;;  %v1538_v52 = vld [vmem:[%s7859_s26 + $0x2070] sm:$0xff]  ;;  %v1541_v53 = vld [vmem:[%s7859_s26 + $0x2088] sm:$0xff] }
 0x2ba   : > { %v1543_v55 = vld [vmem:[%s7859_s26 + $0x2098] sm:$0xff]  ;;  %v1577_v41 = vld [vmem:[%s7859_s26 + $0x21a8] sm:$0xff] }
 0x2bb   : > { %5690 = vmatpush1.bf16.msra.mxu0 %v5689_v0  ;;  %v1504_v0 = vld [vmem:[%s7859_s26 + $0x1f60] sm:$0xff] }
 0x2bc   : > { %6586 = vmatpush1.bf16.msra.mxu1 %v6585_v1  ;;  %5692 = vmatprep.subr.bf16.mxu0 %v5691_v2  ;;  %v1502_v1 = vld [vmem:[%s7859_s26 + $0x1f50] sm:$0xff]  ;;  %v6607_v2 = vpack.c.bf16 %v1507_v59, %v1503_v58  ;;  %v5713_v8 = vpack.c.bf16 %v1504_v0, %v1500_v63  ;;  %v1544_v63 = vld [vmem:[%s7859_s26 + $0x20a0] sm:$0xff] }
 0x2bd   : > { %6588 = vmatprep.subr.bf16.mxu1 %v6587_v6  ;;  %v1511_v6 = vld [vmem:[%s7859_s26 + $0x1f98] sm:$0xff]  ;;  %v6609_v9 = vpack.c.bf16 %v1506_v3, %v1502_v1  ;;  %v478_v59 = vld [vmem:[%s7975_s12 + $0x230] sm:$0xff]  ;;  %v6627_v1 = vpack.c.bf16 %v1547_v56, %v1543_v55  ;;  %v1549_v3 = vld [vmem:[%s7859_s26 + $0x20c8] sm:$0xff] }
 0x2be   : > { %v1542_v0 = vld [vmem:[%s7859_s26 + $0x2090] sm:$0xff]  ;;  %v1587_v55 = vld [vmem:[%s7859_s26 + $0x21f8] sm:$0xff] }
 0x2bf   : > { %5694 = vmatpush1.bf16.msra.mxu0 %v5693_v12  ;;  %v1512_v12 = vld [vmem:[%s7859_s26 + $0x1fa0] sm:$0xff] }
 0x2c0   : > { %6590 = vmatpush1.bf16.msra.mxu1 %v6589_v13  ;;  %5696 = vmatprep.subr.bf16.mxu0 %v5695_v14  ;;  %v1510_v13 = vld [vmem:[%s7859_s26 + $0x1f90] sm:$0xff]  ;;  %v6611_v14 = vpack.c.bf16 %v1515_v7, %v1511_v6  ;;  %v5717_v20 = vpack.c.bf16 %v1512_v12, %v1508_v11  ;;  %v1555_v6 = vld [vmem:[%s7859_s26 + $0x20f8] sm:$0xff]  ;;  %v453_v7 = vld [vmem:[%s7975_s12 + $0x88] sm:$0xff] }
 0x2c1   : > { %6592 = vmatprep.subr.bf16.mxu1 %v6591_v18  ;;  %v1519_v18 = vld [vmem:[%s7859_s26 + $0x1fd8] sm:$0xff]  ;;  %v6613_v21 = vpack.c.bf16 %v1514_v15, %v1510_v13  ;;  %v1548_v11 = vld [vmem:[%s7859_s26 + $0x20c0] sm:$0xff]  ;;  %v1550_v13 = vld [vmem:[%s7859_s26 + $0x20d0] sm:$0xff] }
 0x2c2   : > { %v1552_v12 = vld [vmem:[%s7859_s26 + $0x20e0] sm:$0xff]  ;;  %v1554_v15 = vld [vmem:[%s7859_s26 + $0x20f0] sm:$0xff] }
 0x2c3   : > { %5698 = vmatpush1.bf16.msra.mxu0 %v5697_v24  ;;  %v1520_v24 = vld [vmem:[%s7859_s26 + $0x1fe0] sm:$0xff] }
 0x2c4   : > { %6594 = vmatpush1.bf16.msra.mxu1 %v6593_v25  ;;  %5700 = vmatprep.subr.bf16.mxu0 %v5699_v26  ;;  %v1518_v25 = vld [vmem:[%s7859_s26 + $0x1fd0] sm:$0xff]  ;;  %v6615_v26 = vpack.c.bf16 %v1523_v19, %v1519_v18  ;;  %v5721_v32 = vpack.c.bf16 %v1520_v24, %v1516_v23  ;;  %v1559_v18 = vld [vmem:[%s7859_s26 + $0x2118] sm:$0xff]  ;;  %v1556_v23 = vld [vmem:[%s7859_s26 + $0x2100] sm:$0xff] }
 0x2c5   : > { %6596 = vmatprep.subr.bf16.mxu1 %v6595_v30  ;;  %v1527_v30 = vld [vmem:[%s7859_s26 + $0x2018] sm:$0xff]  ;;  %v6617_v33 = vpack.c.bf16 %v1522_v27, %v1518_v25  ;;  %v1560_v24 = vld [vmem:[%s7859_s26 + $0x2120] sm:$0xff]  ;;  %v1558_v25 = vld [vmem:[%s7859_s26 + $0x2110] sm:$0xff] }
 0x2c6   : > { %v1563_v19 = vld [vmem:[%s7859_s26 + $0x2138] sm:$0xff]  ;;  %v1562_v27 = vld [vmem:[%s7859_s26 + $0x2130] sm:$0xff] }
 0x2c7   : > { %5702 = vmatpush1.bf16.msra.mxu0 %v5701_v36  ;;  %v1528_v36 = vld [vmem:[%s7859_s26 + $0x2020] sm:$0xff] }
 0x2c8   : > { %6598 = vmatpush1.bf16.msra.mxu1 %v6597_v37  ;;  %5704 = vmatprep.subr.bf16.mxu0 %v5703_v38  ;;  %v1526_v37 = vld [vmem:[%s7859_s26 + $0x2010] sm:$0xff]  ;;  %v6619_v38 = vpack.c.bf16 %v1531_v31, %v1527_v30  ;;  %v5725_v45 = vpack.c.bf16 %v1528_v36, %v1524_v35  ;;  %v1567_v30 = vld [vmem:[%s7859_s26 + $0x2158] sm:$0xff]  ;;  %v1564_v35 = vld [vmem:[%s7859_s26 + $0x2140] sm:$0xff] }
 0x2c9   : > { %6600 = vmatprep.subr.bf16.mxu1 %v6599_v42  ;;  %v1535_v42 = vld [vmem:[%s7859_s26 + $0x2058] sm:$0xff]  ;;  %v6621_v46 = vpack.c.bf16 %v1530_v39, %v1526_v37  ;;  %v1568_v36 = vld [vmem:[%s7859_s26 + $0x2160] sm:$0xff]  ;;  %v1566_v37 = vld [vmem:[%s7859_s26 + $0x2150] sm:$0xff] }
 0x2ca   : > { %v6623_v51 = vpack.c.bf16 %v1539_v43, %v1535_v42  ;;  %v1571_v31 = vld [vmem:[%s7859_s26 + $0x2178] sm:$0xff]  ;;  %v1570_v39 = vld [vmem:[%s7859_s26 + $0x2170] sm:$0xff] }
 0x2cb   : > { %5706 = vmatpush1.bf16.msra.mxu0 %v5705_v48  ;;  %v1532_v48 = vld [vmem:[%s7859_s26 + $0x2040] sm:$0xff]  ;;  %v1575_v42 = vld [vmem:[%s7859_s26 + $0x2198] sm:$0xff] }
 0x2cc   : > { %6602 = vmatpush1.bf16.msra.mxu1 %v6601_v49  ;;  %5708 = vmatprep.subr.bf16.mxu0 %v5707_v50  ;;  %v1536_v49 = vld [vmem:[%s7859_s26 + $0x2060] sm:$0xff]  ;;  %v1534_v50 = vld [vmem:[%s7859_s26 + $0x2050] sm:$0xff]  ;;  %v1579_v43 = vld [vmem:[%s7859_s26 + $0x21b8] sm:$0xff] }
 0x2cd   : > { %6604 = vmatprep.subr.bf16.mxu1 %v6603_v54  ;;  %v1545_v54 = vld [vmem:[%s7859_s26 + $0x20a8] sm:$0xff]  ;;  %v5729_v58 = vpack.c.bf16 %v1536_v49, %v1532_v48  ;;  %v1576_v48 = vld [vmem:[%s7859_s26 + $0x21a0] sm:$0xff]  ;;  %v1574_v49 = vld [vmem:[%s7859_s26 + $0x2190] sm:$0xff] }
 0x2cf   : > { %5710 = vmatpush1.bf16.msra.mxu0 %v5709_v60  ;;  %v6625_v60 = vpack.c.bf16 %v1538_v52, %v1534_v50  ;;  %v6643_v50 = vpack.c.bf16 %v1579_v43, %v1575_v42  ;;  %v1581_v52 = vld [vmem:[%s7859_s26 + $0x21c8] sm:$0xff]  ;;  %v1612_v43 = vld [vmem:[%s7859_s26 + $0x22c0] sm:$0xff] }
 0x2d0   : > { %6606 = vmatpush1.bf16.msra.mxu1 %v6605_v61  ;;  %5712 = vmatprep.subr.bf16.mxu0 %v5711_v62  ;;  %v5731_v61 = vpack.c.bf16 %v1545_v54, %v1541_v53  ;;  %v1540_v62 = vld [vmem:[%s7859_s26 + $0x2080] sm:$0xff]  ;;  %v1585_v53 = vld [vmem:[%s7859_s26 + $0x21e8] sm:$0xff]  ;;  %v1583_v54 = vld [vmem:[%s7859_s26 + $0x21d8] sm:$0xff] }
 0x2d1   : > { %6608 = vmatprep.subr.bf16.mxu1 %v6607_v2  ;;  %v1546_v2 = vld [vmem:[%s7859_s26 + $0x20b0] sm:$0xff] }
 0x2d3   : > { %5714 = vmatpush1.bf16.msra.mxu0 %v5713_v8  ;;  %v5733_v8 = vpack.c.bf16 %v1544_v63, %v1540_v62  ;;  %v6647_v62 = vpack.c.bf16 %v1587_v55, %v1583_v54  ;;  %v1586_v63 = vld [vmem:[%s7859_s26 + $0x21f0] sm:$0xff]  ;;  %v1620_v55 = vld [vmem:[%s7859_s26 + $0x2300] sm:$0xff] }
 0x2d4   : > { %6610 = vmatpush1.bf16.msra.mxu1 %v6609_v9  ;;  %5716 = vmatprep.subr.bf16.mxu0 %v5715_v10  ;;  %v6629_v9 = vpack.c.bf16 %v1546_v2, %v1542_v0  ;;  %v5735_v10 = vpack.c.bf16 %v1553_v4, %v1549_v3  ;;  %v1589_v0 = vld [vmem:[%s7859_s26 + $0x2208] sm:$0xff]  ;;  %v1591_v2 = vld [vmem:[%s7859_s26 + $0x2218] sm:$0xff] }
 0x2d5   : > { %6612 = vmatprep.subr.bf16.mxu1 %v6611_v14  ;;  %v6631_v14 = vpack.c.bf16 %v1555_v6, %v1551_v5  ;;  %v1595_v3 = vld [vmem:[%s7859_s26 + $0x2238] sm:$0xff] }
 0x2d7   : > { %5718 = vmatpush1.bf16.msra.mxu0 %v5717_v20  ;;  %v5737_v20 = vpack.c.bf16 %v1552_v12, %v1548_v11  ;;  %v1594_v11 = vld [vmem:[%s7859_s26 + $0x2230] sm:$0xff]  ;;  %v1597_v12 = vld [vmem:[%s7859_s26 + $0x2248] sm:$0xff] }
 0x2d8   : > { %6614 = vmatpush1.bf16.msra.mxu1 %v6613_v21  ;;  %5720 = vmatprep.subr.bf16.mxu0 %v5719_v22  ;;  %v6633_v21 = vpack.c.bf16 %v1554_v15, %v1550_v13  ;;  %v5739_v22 = vpack.c.bf16 %v1561_v17, %v1557_v16  ;;  %v1601_v13 = vld [vmem:[%s7859_s26 + $0x2268] sm:$0xff]  ;;  %v1603_v15 = vld [vmem:[%s7859_s26 + $0x2278] sm:$0xff] }
 0x2d9   : > { %6616 = vmatprep.subr.bf16.mxu1 %v6615_v26  ;;  %v6635_v26 = vpack.c.bf16 %v1563_v19, %v1559_v18  ;;  %v5759_v18 = vpack.c.bf16 %v1601_v13, %v1597_v12  ;;  %v1596_v19 = vld [vmem:[%s7859_s26 + $0x2240] sm:$0xff] }
 0x2db   : > { %5722 = vmatpush1.bf16.msra.mxu0 %v5721_v32  ;;  %v5741_v32 = vpack.c.bf16 %v1560_v24, %v1556_v23  ;;  %v1602_v23 = vld [vmem:[%s7859_s26 + $0x2270] sm:$0xff]  ;;  %v1605_v24 = vld [vmem:[%s7859_s26 + $0x2288] sm:$0xff] }
 0x2dc   : > { %6618 = vmatpush1.bf16.msra.mxu1 %v6617_v33  ;;  %5724 = vmatprep.subr.bf16.mxu0 %v5723_v34  ;;  %v6637_v33 = vpack.c.bf16 %v1562_v27, %v1558_v25  ;;  %v5743_v34 = vpack.c.bf16 %v1569_v29, %v1565_v28  ;;  %v1609_v25 = vld [vmem:[%s7859_s26 + $0x22a8] sm:$0xff]  ;;  %v1611_v27 = vld [vmem:[%s7859_s26 + $0x22b8] sm:$0xff] }
 0x2dd   : > { %6620 = vmatprep.subr.bf16.mxu1 %v6619_v38  ;;  %v6639_v38 = vpack.c.bf16 %v1571_v31, %v1567_v30  ;;  %v5763_v30 = vpack.c.bf16 %v1609_v25, %v1605_v24  ;;  %v1604_v31 = vld [vmem:[%s7859_s26 + $0x2280] sm:$0xff] }
 0x2de   : > { %2896 = vmatmul.mubr.f32.vlgmr.msra.gmra.mrb[0].mxu0 %v450_v44 }
 0x2df   : > { %5726 = vmatpush1.bf16.msra.mxu0 %v5725_v45  ;;  %3974 = vmatmul.mubr.f32.vlgmr.msra.gmra.mrb[0].mxu1 %v450_v44  ;;  %v5745_v44 = vpack.c.bf16 %v1568_v36, %v1564_v35  ;;  %v6641_v45 = vpack.c.bf16 %v1570_v39, %v1566_v37  ;;  %v1610_v35 = vld [vmem:[%s7859_s26 + $0x22b0] sm:$0xff]  ;;  %v1613_v36 = vld [vmem:[%s7859_s26 + $0x22c8] sm:$0xff]  ;;  %v1619_v39 = vld [vmem:[%s7859_s26 + $0x22f8] sm:$0xff] }
 0x2e0   : > { %6622 = vmatpush1.bf16.msra.mxu1 %v6621_v46  ;;  %5728 = vmatprep.subr.bf16.mxu0 %v5727_v47  ;;  %v5747_v46 = vpack.c.bf16 %v1577_v41, %v1573_v40  ;;  %v1572_v47 = vld [vmem:[%s7859_s26 + $0x2180] sm:$0xff]  ;;  %v1617_v37 = vld [vmem:[%s7859_s26 + $0x22e8] sm:$0xff] }
 0x2e1   : > { %6624 = vmatprep.subr.bf16.mxu1 %v6623_v51  ;;  %2901 = vmatprep.mubr.f32.mxu0 %v479_v57  ;;  %v1578_v51 = vld [vmem:[%s7859_s26 + $0x21b0] sm:$0xff]  ;;  %v5749_v56 = vpack.c.bf16 %v1576_v48, %v1572_v47  ;;  %v5767_v42 = vpack.c.bf16 %v1617_v37, %v1613_v36  ;;  %v1621_v48 = vld [vmem:[%s7859_s26 + $0x2308] sm:$0xff] }
 0x2e2   : > { %3979 = vmatprep.mubr.f32.mxu1 %v479_v57  ;;  %2902 = vmatmul.mubr.f32.gmra.mrb[2].mxu0 %v478_v59  ;;  %v6645_v57 = vpack.c.bf16 %v1578_v51, %v1574_v49  ;;  %v1618_v47 = vld [vmem:[%s7859_s26 + $0x22f0] sm:$0xff]  ;;  %v1625_v49 = vld [vmem:[%s7859_s26 + $0x2328] sm:$0xff]  ;;  %v1627_v51 = vld [vmem:[%s7859_s26 + $0x2338] sm:$0xff] }
 0x2e3   : > { %5730 = vmatpush1.bf16.msra.mxu0 %v5729_v58  ;;  %3980 = vmatmul.mubr.f32.gmra.mrb[2].mxu1 %v478_v59  ;;  %v5751_v58 = vpack.c.bf16 %v1585_v53, %v1581_v52  ;;  %v1580_v59 = vld [vmem:[%s7859_s26 + $0x21c0] sm:$0xff]  ;;  %v5771_v54 = vpack.c.bf16 %v1625_v49, %v1621_v48 }
 0x2e4   : > { %6626 = vmatpush1.bf16.msra.mxu1 %v6625_v60  ;;  %5732 = vmatprep.subr.bf16.mxu0 %v5731_v61  ;;  %v1584_v60 = vld [vmem:[%s7859_s26 + $0x21e0] sm:$0xff]  ;;  %v1582_v61 = vld [vmem:[%s7859_s26 + $0x21d0] sm:$0xff] }
 0x2e5   : > { %6628 = vmatprep.subr.bf16.mxu1 %v6627_v1  ;;  %2972 = vmatprep.mubr.f32.mxu0 %v453_v7  ;;  %v1593_v1 = vld [vmem:[%s7859_s26 + $0x2228] sm:$0xff]  ;;  %v5753_v4 = vpack.c.bf16 %v1584_v60, %v1580_v59  ;;  %v6649_v5 = vpack.c.bf16 %v1586_v63, %v1582_v61  ;;  %v1626_v59 = vld [vmem:[%s7859_s26 + $0x2330] sm:$0xff]  ;;  %v1635_v63 = vld [vmem:[%s7859_s26 + $0x2378] sm:$0xff] }
 0x2e6   : > { %4050 = vmatprep.mubr.f32.mxu1 %v453_v7  ;;  %v5755_v6 = vpack.c.bf16 %v1593_v1, %v1589_v0  ;;  %v1588_v7 = vld [vmem:[%s7859_s26 + $0x2200] sm:$0xff]  ;;  %v1629_v60 = vld [vmem:[%s7859_s26 + $0x2348] sm:$0xff] }
 0x2e7   : > { %5734 = vmatpush1.bf16.msra.mxu0 %v5733_v8  ;;  %v1592_v8 = vld [vmem:[%s7859_s26 + $0x2220] sm:$0xff]  ;;  %v1633_v61 = vld [vmem:[%s7859_s26 + $0x2368] sm:$0xff] }
 0x2e8   : > { %6630 = vmatpush1.bf16.msra.mxu1 %v6629_v9  ;;  %5736 = vmatprep.subr.bf16.mxu0 %v5735_v10  ;;  %v1590_v9 = vld [vmem:[%s7859_s26 + $0x2210] sm:$0xff]  ;;  %v6651_v10 = vpack.c.bf16 %v1595_v3, %v1591_v2  ;;  %v5757_v16 = vpack.c.bf16 %v1592_v8, %v1588_v7  ;;  %v5775_v2 = vpack.c.bf16 %v1633_v61, %v1629_v60  ;;  %v1628_v3 = vld [vmem:[%s7859_s26 + $0x2340] sm:$0xff]  ;;  %v1637_v8 = vld [vmem:[%s7859_s26 + $0x2388] sm:$0xff] }
 0x2e9   : > { %6632 = vmatprep.subr.bf16.mxu1 %v6631_v14  ;;  %v1599_v14 = vld [vmem:[%s7859_s26 + $0x2258] sm:$0xff]  ;;  %v6653_v17 = vpack.c.bf16 %v1594_v11, %v1590_v9  ;;  %v1634_v7 = vld [vmem:[%s7859_s26 + $0x2370] sm:$0xff]  ;;  %v1641_v9 = vld [vmem:[%s7859_s26 + $0x23a8] sm:$0xff] }
 0x2ea   : > { %v1643_v11 = vld [vmem:[%s7859_s26 + $0x23b8] sm:$0xff]  ;;  %v452_v48 = vld [vmem:[%s7975_s12 + $0x80] sm:$0xff]  ;;  %v481_v61 = vld [vmem:[%s7975_s12 + $0x248] sm:$0xff] }
 0x2eb   : > { %5738 = vmatpush1.bf16.msra.mxu0 %v5737_v20  ;;  %v1600_v20 = vld [vmem:[%s7859_s26 + $0x2260] sm:$0xff]  ;;  %v1675_v60 = vld [vmem:[%s7859_s26 + $0x24b8] sm:$0xff] }
 0x2ec   : > { %6634 = vmatpush1.bf16.msra.mxu1 %v6633_v21  ;;  %5740 = vmatprep.subr.bf16.mxu0 %v5739_v22  ;;  %v1598_v21 = vld [vmem:[%s7859_s26 + $0x2250] sm:$0xff]  ;;  %v6655_v22 = vpack.c.bf16 %v1603_v15, %v1599_v14  ;;  %v5761_v28 = vpack.c.bf16 %v1600_v20, %v1596_v19  ;;  %v5779_v14 = vpack.c.bf16 %v1641_v9, %v1637_v8  ;;  %v1636_v15 = vld [vmem:[%s7859_s26 + $0x2380] sm:$0xff]  ;;  %v1645_v20 = vld [vmem:[%s7859_s26 + $0x23c8] sm:$0xff] }
 0x2ed   : > { %6636 = vmatprep.subr.bf16.mxu1 %v6635_v26  ;;  %v1607_v26 = vld [vmem:[%s7859_s26 + $0x2298] sm:$0xff]  ;;  %v6657_v29 = vpack.c.bf16 %v1602_v23, %v1598_v21  ;;  %v1642_v19 = vld [vmem:[%s7859_s26 + $0x23b0] sm:$0xff]  ;;  %v1649_v21 = vld [vmem:[%s7859_s26 + $0x23e8] sm:$0xff] }
 0x2ee   : > { %v1651_v23 = vld [vmem:[%s7859_s26 + $0x23f8] sm:$0xff]  ;;  %v1681_v8 = vld [vmem:[%s7859_s26 + $0x24e8] sm:$0xff] }
 0x2ef   : > { %5742 = vmatpush1.bf16.msra.mxu0 %v5741_v32  ;;  %v1608_v32 = vld [vmem:[%s7859_s26 + $0x22a0] sm:$0xff]  ;;  %v1679_v9 = vld [vmem:[%s7859_s26 + $0x24d8] sm:$0xff] }
 0x2f0   : > { %6638 = vmatpush1.bf16.msra.mxu1 %v6637_v33  ;;  %5744 = vmatprep.subr.bf16.mxu0 %v5743_v34  ;;  %v1606_v33 = vld [vmem:[%s7859_s26 + $0x2290] sm:$0xff]  ;;  %v6659_v34 = vpack.c.bf16 %v1611_v27, %v1607_v26  ;;  %v5765_v40 = vpack.c.bf16 %v1608_v32, %v1604_v31  ;;  %v5783_v26 = vpack.c.bf16 %v1649_v21, %v1645_v20  ;;  %v1644_v27 = vld [vmem:[%s7859_s26 + $0x23c0] sm:$0xff]  ;;  %v1653_v32 = vld [vmem:[%s7859_s26 + $0x2408] sm:$0xff] }
 0x2f1   : > { %6640 = vmatprep.subr.bf16.mxu1 %v6639_v38  ;;  %v1615_v38 = vld [vmem:[%s7859_s26 + $0x22d8] sm:$0xff]  ;;  %v6661_v41 = vpack.c.bf16 %v1610_v35, %v1606_v33  ;;  %v1650_v31 = vld [vmem:[%s7859_s26 + $0x23f0] sm:$0xff]  ;;  %v1657_v33 = vld [vmem:[%s7859_s26 + $0x2428] sm:$0xff] }
 0x2f2   : > { %v1659_v35 = vld [vmem:[%s7859_s26 + $0x2438] sm:$0xff]  ;;  %v1685_v20 = vld [vmem:[%s7859_s26 + $0x2508] sm:$0xff] }
 0x2f3   : > { %5746 = vmatpush1.bf16.msra.mxu0 %v5745_v44  ;;  %v1616_v44 = vld [vmem:[%s7859_s26 + $0x22e0] sm:$0xff]  ;;  %v1689_v21 = vld [vmem:[%s7859_s26 + $0x2528] sm:$0xff] }
 0x2f4   : > { %6642 = vmatpush1.bf16.msra.mxu1 %v6641_v45  ;;  %5748 = vmatprep.subr.bf16.mxu0 %v5747_v46  ;;  %v1614_v45 = vld [vmem:[%s7859_s26 + $0x22d0] sm:$0xff]  ;;  %v6663_v46 = vpack.c.bf16 %v1619_v39, %v1615_v38  ;;  %v5769_v52 = vpack.c.bf16 %v1616_v44, %v1612_v43  ;;  %v5787_v38 = vpack.c.bf16 %v1657_v33, %v1653_v32  ;;  %v1652_v39 = vld [vmem:[%s7859_s26 + $0x2400] sm:$0xff]  ;;  %v1661_v44 = vld [vmem:[%s7859_s26 + $0x2448] sm:$0xff] }
 0x2f5   : > { %6644 = vmatprep.subr.bf16.mxu1 %v6643_v50  ;;  %v1623_v50 = vld [vmem:[%s7859_s26 + $0x2318] sm:$0xff]  ;;  %v6665_v53 = vpack.c.bf16 %v1618_v47, %v1614_v45  ;;  %v1658_v43 = vld [vmem:[%s7859_s26 + $0x2430] sm:$0xff]  ;;  %v1665_v45 = vld [vmem:[%s7859_s26 + $0x2468] sm:$0xff] }
 0x2f6   : > { %v1667_v47 = vld [vmem:[%s7859_s26 + $0x2478] sm:$0xff]  ;;  %v1693_v32 = vld [vmem:[%s7859_s26 + $0x2548] sm:$0xff] }
 0x2f7   : > { %5750 = vmatpush1.bf16.msra.mxu0 %v5749_v56  ;;  %v1624_v56 = vld [vmem:[%s7859_s26 + $0x2320] sm:$0xff]  ;;  %v1697_v33 = vld [vmem:[%s7859_s26 + $0x2568] sm:$0xff] }
 0x2f8   : > { %6646 = vmatpush1.bf16.msra.mxu1 %v6645_v57  ;;  %5752 = vmatprep.subr.bf16.mxu0 %v5751_v58  ;;  %v1622_v57 = vld [vmem:[%s7859_s26 + $0x2310] sm:$0xff]  ;;  %v6667_v58 = vpack.c.bf16 %v1627_v51, %v1623_v50  ;;  %v5773_v0 = vpack.c.bf16 %v1624_v56, %v1620_v55  ;;  %v5791_v51 = vpack.c.bf16 %v1665_v45, %v1661_v44  ;;  %v1701_v44 = vld [vmem:[%s7859_s26 + $0x2588] sm:$0xff] }
 0x2f9   : > { %6648 = vmatprep.subr.bf16.mxu1 %v6647_v62  ;;  %v1631_v62 = vld [vmem:[%s7859_s26 + $0x2358] sm:$0xff]  ;;  %v6669_v1 = vpack.c.bf16 %v1626_v59, %v1622_v57  ;;  %v1666_v56 = vld [vmem:[%s7859_s26 + $0x2470] sm:$0xff]  ;;  %v1669_v57 = vld [vmem:[%s7859_s26 + $0x2488] sm:$0xff] }
 0x2fa   : > { %v1671_v59 = vld [vmem:[%s7859_s26 + $0x2498] sm:$0xff]  ;;  %v1705_v45 = vld [vmem:[%s7859_s26 + $0x25a8] sm:$0xff] }
 0x2fb   : > { %5754 = vmatpush1.bf16.msra.mxu0 %v5753_v4  ;;  %v1632_v4 = vld [vmem:[%s7859_s26 + $0x2360] sm:$0xff] }
 0x2fc   : > { %6650 = vmatpush1.bf16.msra.mxu1 %v6649_v5  ;;  %5756 = vmatprep.subr.bf16.mxu0 %v5755_v6  ;;  %v1630_v5 = vld [vmem:[%s7859_s26 + $0x2350] sm:$0xff]  ;;  %v6671_v6 = vpack.c.bf16 %v1635_v63, %v1631_v62  ;;  %v5777_v12 = vpack.c.bf16 %v1632_v4, %v1628_v3  ;;  %v480_v63 = vld [vmem:[%s7975_s12 + $0x240] sm:$0xff] }
 0x2fd   : > { %6652 = vmatprep.subr.bf16.mxu1 %v6651_v10  ;;  %v1639_v10 = vld [vmem:[%s7859_s26 + $0x2398] sm:$0xff]  ;;  %v6673_v13 = vpack.c.bf16 %v1634_v7, %v1630_v5  ;;  %v1672_v3 = vld [vmem:[%s7859_s26 + $0x24a0] sm:$0xff]  ;;  %v1670_v4 = vld [vmem:[%s7859_s26 + $0x2490] sm:$0xff]  ;;  %v6691_v5 = vpack.c.bf16 %v1675_v60, %v1671_v59 }
 0x2fe   : > { %v1677_v7 = vld [vmem:[%s7859_s26 + $0x24c8] sm:$0xff]  ;;  %v1715_v59 = vld [vmem:[%s7859_s26 + $0x25f8] sm:$0xff] }
 0x2ff   : > { %5758 = vmatpush1.bf16.msra.mxu0 %v5757_v16  ;;  %v1640_v16 = vld [vmem:[%s7859_s26 + $0x23a0] sm:$0xff] }
 0x300   : > { %6654 = vmatpush1.bf16.msra.mxu1 %v6653_v17  ;;  %5760 = vmatprep.subr.bf16.mxu0 %v5759_v18  ;;  %v1638_v17 = vld [vmem:[%s7859_s26 + $0x2390] sm:$0xff]  ;;  %v6675_v18 = vpack.c.bf16 %v1643_v11, %v1639_v10  ;;  %v5781_v24 = vpack.c.bf16 %v1640_v16, %v1636_v15  ;;  %v1683_v10 = vld [vmem:[%s7859_s26 + $0x24f8] sm:$0xff]  ;;  %v1676_v15 = vld [vmem:[%s7859_s26 + $0x24c0] sm:$0xff] }
 0x301   : > { %6656 = vmatprep.subr.bf16.mxu1 %v6655_v22  ;;  %v1647_v22 = vld [vmem:[%s7859_s26 + $0x23d8] sm:$0xff]  ;;  %v6677_v25 = vpack.c.bf16 %v1642_v19, %v1638_v17  ;;  %v1680_v16 = vld [vmem:[%s7859_s26 + $0x24e0] sm:$0xff]  ;;  %v1678_v17 = vld [vmem:[%s7859_s26 + $0x24d0] sm:$0xff] }
 0x302   : > { %v455_v11 = vld [vmem:[%s7975_s12 + $0x98] sm:$0xff]  ;;  %v1682_v19 = vld [vmem:[%s7859_s26 + $0x24f0] sm:$0xff] }
 0x303   : > { %5762 = vmatpush1.bf16.msra.mxu0 %v5761_v28  ;;  %v1648_v28 = vld [vmem:[%s7859_s26 + $0x23e0] sm:$0xff] }
 0x304   : > { %6658 = vmatpush1.bf16.msra.mxu1 %v6657_v29  ;;  %5764 = vmatprep.subr.bf16.mxu0 %v5763_v30  ;;  %v1646_v29 = vld [vmem:[%s7859_s26 + $0x23d0] sm:$0xff]  ;;  %v6679_v30 = vpack.c.bf16 %v1651_v23, %v1647_v22  ;;  %v5785_v36 = vpack.c.bf16 %v1648_v28, %v1644_v27  ;;  %v1687_v22 = vld [vmem:[%s7859_s26 + $0x2518] sm:$0xff]  ;;  %v1684_v27 = vld [vmem:[%s7859_s26 + $0x2500] sm:$0xff] }
 0x305   : > { %6660 = vmatprep.subr.bf16.mxu1 %v6659_v34  ;;  %v1655_v34 = vld [vmem:[%s7859_s26 + $0x2418] sm:$0xff]  ;;  %v6681_v37 = vpack.c.bf16 %v1650_v31, %v1646_v29  ;;  %v1688_v28 = vld [vmem:[%s7859_s26 + $0x2520] sm:$0xff]  ;;  %v1686_v29 = vld [vmem:[%s7859_s26 + $0x2510] sm:$0xff] }
 0x306   : > { %v1691_v23 = vld [vmem:[%s7859_s26 + $0x2538] sm:$0xff]  ;;  %v1690_v31 = vld [vmem:[%s7859_s26 + $0x2530] sm:$0xff] }
 0x307   : > { %5766 = vmatpush1.bf16.msra.mxu0 %v5765_v40  ;;  %v1656_v40 = vld [vmem:[%s7859_s26 + $0x2420] sm:$0xff] }
 0x308   : > { %6662 = vmatpush1.bf16.msra.mxu1 %v6661_v41  ;;  %5768 = vmatprep.subr.bf16.mxu0 %v5767_v42  ;;  %v1654_v41 = vld [vmem:[%s7859_s26 + $0x2410] sm:$0xff]  ;;  %v6683_v42 = vpack.c.bf16 %v1659_v35, %v1655_v34  ;;  %v5789_v49 = vpack.c.bf16 %v1656_v40, %v1652_v39  ;;  %v1695_v34 = vld [vmem:[%s7859_s26 + $0x2558] sm:$0xff]  ;;  %v1692_v39 = vld [vmem:[%s7859_s26 + $0x2540] sm:$0xff] }
 0x309   : > { %6664 = vmatprep.subr.bf16.mxu1 %v6663_v46  ;;  %v1663_v46 = vld [vmem:[%s7859_s26 + $0x2458] sm:$0xff]  ;;  %v6685_v50 = vpack.c.bf16 %v1658_v43, %v1654_v41  ;;  %v1696_v40 = vld [vmem:[%s7859_s26 + $0x2560] sm:$0xff]  ;;  %v1694_v41 = vld [vmem:[%s7859_s26 + $0x2550] sm:$0xff] }
 0x30a   : > { %v6687_v55 = vpack.c.bf16 %v1667_v47, %v1663_v46  ;;  %v1699_v35 = vld [vmem:[%s7859_s26 + $0x2578] sm:$0xff]  ;;  %v1698_v43 = vld [vmem:[%s7859_s26 + $0x2570] sm:$0xff] }
 0x30b   : > { %5770 = vmatpush1.bf16.msra.mxu0 %v5769_v52  ;;  %v1660_v52 = vld [vmem:[%s7859_s26 + $0x2440] sm:$0xff]  ;;  %v1703_v46 = vld [vmem:[%s7859_s26 + $0x2598] sm:$0xff] }
 0x30c   : > { %6666 = vmatpush1.bf16.msra.mxu1 %v6665_v53  ;;  %5772 = vmatprep.subr.bf16.mxu0 %v5771_v54  ;;  %v1664_v53 = vld [vmem:[%s7859_s26 + $0x2460] sm:$0xff]  ;;  %v1662_v54 = vld [vmem:[%s7859_s26 + $0x2450] sm:$0xff]  ;;  %v1707_v47 = vld [vmem:[%s7859_s26 + $0x25b8] sm:$0xff] }
 0x30d   : > { %6668 = vmatprep.subr.bf16.mxu1 %v6667_v58  ;;  %v1673_v58 = vld [vmem:[%s7859_s26 + $0x24a8] sm:$0xff]  ;;  %v5793_v62 = vpack.c.bf16 %v1664_v53, %v1660_v52  ;;  %v1704_v52 = vld [vmem:[%s7859_s26 + $0x25a0] sm:$0xff]  ;;  %v1702_v53 = vld [vmem:[%s7859_s26 + $0x2590] sm:$0xff] }
 0x30f   : > { %5774 = vmatpush1.bf16.msra.mxu0 %v5773_v0  ;;  %v6689_v0 = vpack.c.bf16 %v1666_v56, %v1662_v54  ;;  %v6707_v54 = vpack.c.bf16 %v1707_v47, %v1703_v46  ;;  %v1709_v56 = vld [vmem:[%s7859_s26 + $0x25c8] sm:$0xff]  ;;  %v1740_v47 = vld [vmem:[%s7859_s26 + $0x26c0] sm:$0xff] }
 0x310   : > { %6670 = vmatpush1.bf16.msra.mxu1 %v6669_v1  ;;  %5776 = vmatprep.subr.bf16.mxu0 %v5775_v2  ;;  %v5795_v1 = vpack.c.bf16 %v1673_v58, %v1669_v57  ;;  %v1668_v2 = vld [vmem:[%s7859_s26 + $0x2480] sm:$0xff]  ;;  %v1713_v57 = vld [vmem:[%s7859_s26 + $0x25e8] sm:$0xff]  ;;  %v1711_v58 = vld [vmem:[%s7859_s26 + $0x25d8] sm:$0xff] }
 0x311   : > { %6672 = vmatprep.subr.bf16.mxu1 %v6671_v6  ;;  %v1674_v6 = vld [vmem:[%s7859_s26 + $0x24b0] sm:$0xff] }
 0x313   : > { %5778 = vmatpush1.bf16.msra.mxu0 %v5777_v12  ;;  %v5797_v12 = vpack.c.bf16 %v1672_v3, %v1668_v2  ;;  %v6711_v2 = vpack.c.bf16 %v1715_v59, %v1711_v58  ;;  %v1714_v3 = vld [vmem:[%s7859_s26 + $0x25f0] sm:$0xff]  ;;  %v1748_v59 = vld [vmem:[%s7859_s26 + $0x2700] sm:$0xff] }
 0x314   : > { %6674 = vmatpush1.bf16.msra.mxu1 %v6673_v13  ;;  %5780 = vmatprep.subr.bf16.mxu0 %v5779_v14  ;;  %v6693_v13 = vpack.c.bf16 %v1674_v6, %v1670_v4  ;;  %v5799_v14 = vpack.c.bf16 %v1681_v8, %v1677_v7  ;;  %v1717_v4 = vld [vmem:[%s7859_s26 + $0x2608] sm:$0xff]  ;;  %v1719_v6 = vld [vmem:[%s7859_s26 + $0x2618] sm:$0xff] }
 0x315   : > { %6676 = vmatprep.subr.bf16.mxu1 %v6675_v18  ;;  %v6695_v18 = vpack.c.bf16 %v1683_v10, %v1679_v9  ;;  %v1723_v7 = vld [vmem:[%s7859_s26 + $0x2638] sm:$0xff] }
 0x317   : > { %5782 = vmatpush1.bf16.msra.mxu0 %v5781_v24  ;;  %v5801_v24 = vpack.c.bf16 %v1680_v16, %v1676_v15  ;;  %v1722_v15 = vld [vmem:[%s7859_s26 + $0x2630] sm:$0xff]  ;;  %v1725_v16 = vld [vmem:[%s7859_s26 + $0x2648] sm:$0xff] }
 0x318   : > { %6678 = vmatpush1.bf16.msra.mxu1 %v6677_v25  ;;  %5784 = vmatprep.subr.bf16.mxu0 %v5783_v26  ;;  %v6697_v25 = vpack.c.bf16 %v1682_v19, %v1678_v17  ;;  %v5803_v26 = vpack.c.bf16 %v1689_v21, %v1685_v20  ;;  %v1729_v17 = vld [vmem:[%s7859_s26 + $0x2668] sm:$0xff]  ;;  %v1731_v19 = vld [vmem:[%s7859_s26 + $0x2678] sm:$0xff] }
 0x319   : > { %6680 = vmatprep.subr.bf16.mxu1 %v6679_v30  ;;  %v6699_v30 = vpack.c.bf16 %v1691_v23, %v1687_v22  ;;  %v5823_v22 = vpack.c.bf16 %v1729_v17, %v1725_v16  ;;  %v1724_v23 = vld [vmem:[%s7859_s26 + $0x2640] sm:$0xff] }
 0x31b   : > { %5786 = vmatpush1.bf16.msra.mxu0 %v5785_v36  ;;  %v5805_v36 = vpack.c.bf16 %v1688_v28, %v1684_v27  ;;  %v1730_v27 = vld [vmem:[%s7859_s26 + $0x2670] sm:$0xff]  ;;  %v1733_v28 = vld [vmem:[%s7859_s26 + $0x2688] sm:$0xff] }
 0x31c   : > { %6682 = vmatpush1.bf16.msra.mxu1 %v6681_v37  ;;  %5788 = vmatprep.subr.bf16.mxu0 %v5787_v38  ;;  %v6701_v37 = vpack.c.bf16 %v1690_v31, %v1686_v29  ;;  %v5807_v38 = vpack.c.bf16 %v1697_v33, %v1693_v32  ;;  %v1737_v29 = vld [vmem:[%s7859_s26 + $0x26a8] sm:$0xff]  ;;  %v1739_v31 = vld [vmem:[%s7859_s26 + $0x26b8] sm:$0xff] }
 0x31d   : > { %6684 = vmatprep.subr.bf16.mxu1 %v6683_v42  ;;  %v6703_v42 = vpack.c.bf16 %v1699_v35, %v1695_v34  ;;  %v5827_v34 = vpack.c.bf16 %v1737_v29, %v1733_v28  ;;  %v1732_v35 = vld [vmem:[%s7859_s26 + $0x2680] sm:$0xff] }
 0x31e   : > { %2973 = vmatmul.mubr.f32.vlgmr.msra.gmra.mrb[0].mxu0 %v452_v48 }
 0x31f   : > { %5790 = vmatpush1.bf16.msra.mxu0 %v5789_v49  ;;  %4051 = vmatmul.mubr.f32.vlgmr.msra.gmra.mrb[0].mxu1 %v452_v48  ;;  %v5809_v48 = vpack.c.bf16 %v1696_v40, %v1692_v39  ;;  %v6705_v49 = vpack.c.bf16 %v1698_v43, %v1694_v41  ;;  %v1738_v39 = vld [vmem:[%s7859_s26 + $0x26b0] sm:$0xff]  ;;  %v1741_v40 = vld [vmem:[%s7859_s26 + $0x26c8] sm:$0xff]  ;;  %v1747_v43 = vld [vmem:[%s7859_s26 + $0x26f8] sm:$0xff] }
 0x320   : > { %6686 = vmatpush1.bf16.msra.mxu1 %v6685_v50  ;;  %5792 = vmatprep.subr.bf16.mxu0 %v5791_v51  ;;  %v5811_v50 = vpack.c.bf16 %v1705_v45, %v1701_v44  ;;  %v1700_v51 = vld [vmem:[%s7859_s26 + $0x2580] sm:$0xff]  ;;  %v1745_v41 = vld [vmem:[%s7859_s26 + $0x26e8] sm:$0xff] }
 0x321   : > { %6688 = vmatprep.subr.bf16.mxu1 %v6687_v55  ;;  %2978 = vmatprep.mubr.f32.mxu0 %v481_v61  ;;  %v1706_v55 = vld [vmem:[%s7859_s26 + $0x25b0] sm:$0xff]  ;;  %v5813_v60 = vpack.c.bf16 %v1704_v52, %v1700_v51  ;;  %v5831_v46 = vpack.c.bf16 %v1745_v41, %v1741_v40  ;;  %v1749_v52 = vld [vmem:[%s7859_s26 + $0x2708] sm:$0xff] }
 0x322   : > { %4056 = vmatprep.mubr.f32.mxu1 %v481_v61  ;;  %2979 = vmatmul.mubr.f32.gmra.mrb[2].mxu0 %v480_v63  ;;  %v6709_v61 = vpack.c.bf16 %v1706_v55, %v1702_v53  ;;  %v1746_v51 = vld [vmem:[%s7859_s26 + $0x26f0] sm:$0xff]  ;;  %v1753_v53 = vld [vmem:[%s7859_s26 + $0x2728] sm:$0xff]  ;;  %v1755_v55 = vld [vmem:[%s7859_s26 + $0x2738] sm:$0xff] }
 0x323   : > { %5794 = vmatpush1.bf16.msra.mxu0 %v5793_v62  ;;  %4057 = vmatmul.mubr.f32.gmra.mrb[2].mxu1 %v480_v63  ;;  %v5815_v62 = vpack.c.bf16 %v1713_v57, %v1709_v56  ;;  %v1708_v63 = vld [vmem:[%s7859_s26 + $0x25c0] sm:$0xff]  ;;  %v5835_v58 = vpack.c.bf16 %v1753_v53, %v1749_v52  ;;  %v454_v52 = vld [vmem:[%s7975_s12 + $0x90] sm:$0xff] }
 0x324   : > { %6690 = vmatpush1.bf16.msra.mxu1 %v6689_v0  ;;  %5796 = vmatprep.subr.bf16.mxu0 %v5795_v1  ;;  %v1712_v0 = vld [vmem:[%s7859_s26 + $0x25e0] sm:$0xff]  ;;  %v1710_v1 = vld [vmem:[%s7859_s26 + $0x25d0] sm:$0xff] }
 0x325   : > { %6692 = vmatprep.subr.bf16.mxu1 %v6691_v5  ;;  %3049 = vmatprep.mubr.f32.mxu0 %v455_v11  ;;  %v1721_v5 = vld [vmem:[%s7859_s26 + $0x2628] sm:$0xff]  ;;  %v5817_v8 = vpack.c.bf16 %v1712_v0, %v1708_v63  ;;  %v6713_v9 = vpack.c.bf16 %v1714_v3, %v1710_v1  ;;  %v1754_v63 = vld [vmem:[%s7859_s26 + $0x2730] sm:$0xff]  ;;  %v1763_v3 = vld [vmem:[%s7859_s26 + $0x2778] sm:$0xff] }
 0x326   : > { %4127 = vmatprep.mubr.f32.mxu1 %v455_v11  ;;  %v5819_v10 = vpack.c.bf16 %v1721_v5, %v1717_v4  ;;  %v1716_v11 = vld [vmem:[%s7859_s26 + $0x2600] sm:$0xff]  ;;  %v1757_v0 = vld [vmem:[%s7859_s26 + $0x2748] sm:$0xff] }
 0x327   : > { %5798 = vmatpush1.bf16.msra.mxu0 %v5797_v12  ;;  %v1720_v12 = vld [vmem:[%s7859_s26 + $0x2620] sm:$0xff]  ;;  %v1761_v1 = vld [vmem:[%s7859_s26 + $0x2768] sm:$0xff] }
 0x328   : > { %6694 = vmatpush1.bf16.msra.mxu1 %v6693_v13  ;;  %5800 = vmatprep.subr.bf16.mxu0 %v5799_v14  ;;  %v1718_v13 = vld [vmem:[%s7859_s26 + $0x2610] sm:$0xff]  ;;  %v6715_v14 = vpack.c.bf16 %v1723_v7, %v1719_v6  ;;  %v5821_v20 = vpack.c.bf16 %v1720_v12, %v1716_v11  ;;  %v5839_v6 = vpack.c.bf16 %v1761_v1, %v1757_v0  ;;  %v1756_v7 = vld [vmem:[%s7859_s26 + $0x2740] sm:$0xff]  ;;  %v1765_v12 = vld [vmem:[%s7859_s26 + $0x2788] sm:$0xff] }
 0x329   : > { %6696 = vmatprep.subr.bf16.mxu1 %v6695_v18  ;;  %v1727_v18 = vld [vmem:[%s7859_s26 + $0x2658] sm:$0xff]  ;;  %v6717_v21 = vpack.c.bf16 %v1722_v15, %v1718_v13  ;;  %v1762_v11 = vld [vmem:[%s7859_s26 + $0x2770] sm:$0xff]  ;;  %v1769_v13 = vld [vmem:[%s7859_s26 + $0x27a8] sm:$0xff] }
 0x32a   : > { %v1771_v15 = vld [vmem:[%s7859_s26 + $0x27b8] sm:$0xff] }
 0x32b   : > { %5802 = vmatpush1.bf16.msra.mxu0 %v5801_v24  ;;  %v1728_v24 = vld [vmem:[%s7859_s26 + $0x2660] sm:$0xff]  ;;  %v1803_v0 = vld [vmem:[%s7859_s26 + $0x28b8] sm:$0xff] }
 0x32c   : > { %6698 = vmatpush1.bf16.msra.mxu1 %v6697_v25  ;;  %5804 = vmatprep.subr.bf16.mxu0 %v5803_v26  ;;  %v1726_v25 = vld [vmem:[%s7859_s26 + $0x2650] sm:$0xff]  ;;  %v6719_v26 = vpack.c.bf16 %v1731_v19, %v1727_v18  ;;  %v5825_v32 = vpack.c.bf16 %v1728_v24, %v1724_v23  ;;  %v5843_v18 = vpack.c.bf16 %v1769_v13, %v1765_v12  ;;  %v1764_v19 = vld [vmem:[%s7859_s26 + $0x2780] sm:$0xff]  ;;  %v1773_v24 = vld [vmem:[%s7859_s26 + $0x27c8] sm:$0xff] }
 0x32d   : > { %6700 = vmatprep.subr.bf16.mxu1 %v6699_v30  ;;  %v1735_v30 = vld [vmem:[%s7859_s26 + $0x2698] sm:$0xff]  ;;  %v6721_v33 = vpack.c.bf16 %v1730_v27, %v1726_v25  ;;  %v1770_v23 = vld [vmem:[%s7859_s26 + $0x27b0] sm:$0xff]  ;;  %v1777_v25 = vld [vmem:[%s7859_s26 + $0x27e8] sm:$0xff] }
 0x32e   : > { %v1779_v27 = vld [vmem:[%s7859_s26 + $0x27f8] sm:$0xff]  ;;  %v1809_v12 = vld [vmem:[%s7859_s26 + $0x28e8] sm:$0xff] }
 0x32f   : > { %5806 = vmatpush1.bf16.msra.mxu0 %v5805_v36  ;;  %v1736_v36 = vld [vmem:[%s7859_s26 + $0x26a0] sm:$0xff]  ;;  %v483_v1 = vld [vmem:[%s7975_s12 + $0x258] sm:$0xff] }
 0x330   : > { %6702 = vmatpush1.bf16.msra.mxu1 %v6701_v37  ;;  %5808 = vmatprep.subr.bf16.mxu0 %v5807_v38  ;;  %v1734_v37 = vld [vmem:[%s7859_s26 + $0x2690] sm:$0xff]  ;;  %v6723_v38 = vpack.c.bf16 %v1739_v31, %v1735_v30  ;;  %v5829_v44 = vpack.c.bf16 %v1736_v36, %v1732_v35  ;;  %v5847_v30 = vpack.c.bf16 %v1777_v25, %v1773_v24  ;;  %v1772_v31 = vld [vmem:[%s7859_s26 + $0x27c0] sm:$0xff]  ;;  %v1781_v36 = vld [vmem:[%s7859_s26 + $0x2808] sm:$0xff] }
 0x331   : > { %6704 = vmatprep.subr.bf16.mxu1 %v6703_v42  ;;  %v1743_v42 = vld [vmem:[%s7859_s26 + $0x26d8] sm:$0xff]  ;;  %v6725_v45 = vpack.c.bf16 %v1738_v39, %v1734_v37  ;;  %v1778_v35 = vld [vmem:[%s7859_s26 + $0x27f0] sm:$0xff]  ;;  %v1785_v37 = vld [vmem:[%s7859_s26 + $0x2828] sm:$0xff] }
 0x332   : > { %v1787_v39 = vld [vmem:[%s7859_s26 + $0x2838] sm:$0xff]  ;;  %v1813_v24 = vld [vmem:[%s7859_s26 + $0x2908] sm:$0xff] }
 0x333   : > { %5810 = vmatpush1.bf16.msra.mxu0 %v5809_v48  ;;  %v1744_v48 = vld [vmem:[%s7859_s26 + $0x26e0] sm:$0xff]  ;;  %v1807_v13 = vld [vmem:[%s7859_s26 + $0x28d8] sm:$0xff]  ;;  %v1817_v25 = vld [vmem:[%s7859_s26 + $0x2928] sm:$0xff] }
 0x334   : > { %6706 = vmatpush1.bf16.msra.mxu1 %v6705_v49  ;;  %5812 = vmatprep.subr.bf16.mxu0 %v5811_v50  ;;  %v1742_v49 = vld [vmem:[%s7859_s26 + $0x26d0] sm:$0xff]  ;;  %v6727_v50 = vpack.c.bf16 %v1747_v43, %v1743_v42  ;;  %v5833_v56 = vpack.c.bf16 %v1744_v48, %v1740_v47  ;;  %v5851_v42 = vpack.c.bf16 %v1785_v37, %v1781_v36  ;;  %v1780_v43 = vld [vmem:[%s7859_s26 + $0x2800] sm:$0xff]  ;;  %v1789_v48 = vld [vmem:[%s7859_s26 + $0x2848] sm:$0xff] }
 0x335   : > { %6708 = vmatprep.subr.bf16.mxu1 %v6707_v54  ;;  %v1751_v54 = vld [vmem:[%s7859_s26 + $0x2718] sm:$0xff]  ;;  %v6729_v57 = vpack.c.bf16 %v1746_v51, %v1742_v49  ;;  %v1786_v47 = vld [vmem:[%s7859_s26 + $0x2830] sm:$0xff]  ;;  %v1793_v49 = vld [vmem:[%s7859_s26 + $0x2868] sm:$0xff] }
 0x336   : > { %v1795_v51 = vld [vmem:[%s7859_s26 + $0x2878] sm:$0xff]  ;;  %v1821_v36 = vld [vmem:[%s7859_s26 + $0x2948] sm:$0xff] }
 0x337   : > { %5814 = vmatpush1.bf16.msra.mxu0 %v5813_v60  ;;  %v1752_v60 = vld [vmem:[%s7859_s26 + $0x2720] sm:$0xff]  ;;  %v1825_v37 = vld [vmem:[%s7859_s26 + $0x2968] sm:$0xff] }
 0x338   : > { %6710 = vmatpush1.bf16.msra.mxu1 %v6709_v61  ;;  %5816 = vmatprep.subr.bf16.mxu0 %v5815_v62  ;;  %v1750_v61 = vld [vmem:[%s7859_s26 + $0x2710] sm:$0xff]  ;;  %v6731_v62 = vpack.c.bf16 %v1755_v55, %v1751_v54  ;;  %v5837_v4 = vpack.c.bf16 %v1752_v60, %v1748_v59  ;;  %v5855_v55 = vpack.c.bf16 %v1793_v49, %v1789_v48  ;;  %v1829_v48 = vld [vmem:[%s7859_s26 + $0x2988] sm:$0xff] }
 0x339   : > { %6712 = vmatprep.subr.bf16.mxu1 %v6711_v2  ;;  %v1759_v2 = vld [vmem:[%s7859_s26 + $0x2758] sm:$0xff]  ;;  %v6733_v5 = vpack.c.bf16 %v1754_v63, %v1750_v61  ;;  %v1794_v60 = vld [vmem:[%s7859_s26 + $0x2870] sm:$0xff]  ;;  %v1797_v61 = vld [vmem:[%s7859_s26 + $0x2888] sm:$0xff] }
 0x33a   : > { %v1799_v63 = vld [vmem:[%s7859_s26 + $0x2898] sm:$0xff]  ;;  %v1833_v49 = vld [vmem:[%s7859_s26 + $0x29a8] sm:$0xff] }
 0x33b   : > { %5818 = vmatpush1.bf16.msra.mxu0 %v5817_v8  ;;  %v1760_v8 = vld [vmem:[%s7859_s26 + $0x2760] sm:$0xff] }
 0x33c   : > { %6714 = vmatpush1.bf16.msra.mxu1 %v6713_v9  ;;  %5820 = vmatprep.subr.bf16.mxu0 %v5819_v10  ;;  %v1758_v9 = vld [vmem:[%s7859_s26 + $0x2750] sm:$0xff]  ;;  %v6735_v10 = vpack.c.bf16 %v1763_v3, %v1759_v2  ;;  %v5841_v16 = vpack.c.bf16 %v1760_v8, %v1756_v7  ;;  %v1800_v7 = vld [vmem:[%s7859_s26 + $0x28a0] sm:$0xff] }
 0x33d   : > { %6716 = vmatprep.subr.bf16.mxu1 %v6715_v14  ;;  %v1767_v14 = vld [vmem:[%s7859_s26 + $0x2798] sm:$0xff]  ;;  %v6737_v17 = vpack.c.bf16 %v1762_v11, %v1758_v9  ;;  %v482_v3 = vld [vmem:[%s7975_s12 + $0x250] sm:$0xff]  ;;  %v6755_v9 = vpack.c.bf16 %v1803_v0, %v1799_v63  ;;  %v1805_v11 = vld [vmem:[%s7859_s26 + $0x28c8] sm:$0xff] }
 0x33e   : > { %v1798_v8 = vld [vmem:[%s7859_s26 + $0x2890] sm:$0xff]  ;;  %v1843_v63 = vld [vmem:[%s7859_s26 + $0x29f8] sm:$0xff] }
 0x33f   : > { %5822 = vmatpush1.bf16.msra.mxu0 %v5821_v20  ;;  %v1768_v20 = vld [vmem:[%s7859_s26 + $0x27a0] sm:$0xff] }
 0x340   : > { %6718 = vmatpush1.bf16.msra.mxu1 %v6717_v21  ;;  %5824 = vmatprep.subr.bf16.mxu0 %v5823_v22  ;;  %v1766_v21 = vld [vmem:[%s7859_s26 + $0x2790] sm:$0xff]  ;;  %v6739_v22 = vpack.c.bf16 %v1771_v15, %v1767_v14  ;;  %v5845_v28 = vpack.c.bf16 %v1768_v20, %v1764_v19  ;;  %v1811_v14 = vld [vmem:[%s7859_s26 + $0x28f8] sm:$0xff]  ;;  %v457_v15 = vld [vmem:[%s7975_s12 + $0xa8] sm:$0xff] }
 0x341   : > { %6720 = vmatprep.subr.bf16.mxu1 %v6719_v26  ;;  %v1775_v26 = vld [vmem:[%s7859_s26 + $0x27d8] sm:$0xff]  ;;  %v6741_v29 = vpack.c.bf16 %v1770_v23, %v1766_v21  ;;  %v1804_v19 = vld [vmem:[%s7859_s26 + $0x28c0] sm:$0xff]  ;;  %v1806_v21 = vld [vmem:[%s7859_s26 + $0x28d0] sm:$0xff] }
 0x342   : > { %v1808_v20 = vld [vmem:[%s7859_s26 + $0x28e0] sm:$0xff]  ;;  %v1810_v23 = vld [vmem:[%s7859_s26 + $0x28f0] sm:$0xff] }
 0x343   : > { %5826 = vmatpush1.bf16.msra.mxu0 %v5825_v32  ;;  %v1776_v32 = vld [vmem:[%s7859_s26 + $0x27e0] sm:$0xff] }
 0x344   : > { %6722 = vmatpush1.bf16.msra.mxu1 %v6721_v33  ;;  %5828 = vmatprep.subr.bf16.mxu0 %v5827_v34  ;;  %v1774_v33 = vld [vmem:[%s7859_s26 + $0x27d0] sm:$0xff]  ;;  %v6743_v34 = vpack.c.bf16 %v1779_v27, %v1775_v26  ;;  %v5849_v40 = vpack.c.bf16 %v1776_v32, %v1772_v31  ;;  %v1815_v26 = vld [vmem:[%s7859_s26 + $0x2918] sm:$0xff]  ;;  %v1812_v31 = vld [vmem:[%s7859_s26 + $0x2900] sm:$0xff] }
 0x345   : > { %6724 = vmatprep.subr.bf16.mxu1 %v6723_v38  ;;  %v1783_v38 = vld [vmem:[%s7859_s26 + $0x2818] sm:$0xff]  ;;  %v6745_v41 = vpack.c.bf16 %v1778_v35, %v1774_v33  ;;  %v1816_v32 = vld [vmem:[%s7859_s26 + $0x2920] sm:$0xff]  ;;  %v1814_v33 = vld [vmem:[%s7859_s26 + $0x2910] sm:$0xff] }
 0x346   : > { %v1819_v27 = vld [vmem:[%s7859_s26 + $0x2938] sm:$0xff]  ;;  %v1818_v35 = vld [vmem:[%s7859_s26 + $0x2930] sm:$0xff] }
 0x347   : > { %5830 = vmatpush1.bf16.msra.mxu0 %v5829_v44  ;;  %v1784_v44 = vld [vmem:[%s7859_s26 + $0x2820] sm:$0xff] }
 0x348   : > { %6726 = vmatpush1.bf16.msra.mxu1 %v6725_v45  ;;  %5832 = vmatprep.subr.bf16.mxu0 %v5831_v46  ;;  %v1782_v45 = vld [vmem:[%s7859_s26 + $0x2810] sm:$0xff]  ;;  %v6747_v46 = vpack.c.bf16 %v1787_v39, %v1783_v38  ;;  %v5853_v53 = vpack.c.bf16 %v1784_v44, %v1780_v43  ;;  %v1823_v38 = vld [vmem:[%s7859_s26 + $0x2958] sm:$0xff]  ;;  %v1820_v43 = vld [vmem:[%s7859_s26 + $0x2940] sm:$0xff] }
 0x349   : > { %6728 = vmatprep.subr.bf16.mxu1 %v6727_v50  ;;  %v1791_v50 = vld [vmem:[%s7859_s26 + $0x2858] sm:$0xff]  ;;  %v6749_v54 = vpack.c.bf16 %v1786_v47, %v1782_v45  ;;  %v1824_v44 = vld [vmem:[%s7859_s26 + $0x2960] sm:$0xff]  ;;  %v1822_v45 = vld [vmem:[%s7859_s26 + $0x2950] sm:$0xff] }
 0x34a   : > { %v6751_v59 = vpack.c.bf16 %v1795_v51, %v1791_v50  ;;  %v1827_v39 = vld [vmem:[%s7859_s26 + $0x2978] sm:$0xff]  ;;  %v1826_v47 = vld [vmem:[%s7859_s26 + $0x2970] sm:$0xff] }
 0x34b   : > { %5834 = vmatpush1.bf16.msra.mxu0 %v5833_v56  ;;  %v1788_v56 = vld [vmem:[%s7859_s26 + $0x2840] sm:$0xff]  ;;  %v1831_v50 = vld [vmem:[%s7859_s26 + $0x2998] sm:$0xff] }
 0x34c   : > { %6730 = vmatpush1.bf16.msra.mxu1 %v6729_v57  ;;  %5836 = vmatprep.subr.bf16.mxu0 %v5835_v58  ;;  %v1792_v57 = vld [vmem:[%s7859_s26 + $0x2860] sm:$0xff]  ;;  %v1790_v58 = vld [vmem:[%s7859_s26 + $0x2850] sm:$0xff]  ;;  %v1835_v51 = vld [vmem:[%s7859_s26 + $0x29b8] sm:$0xff] }
 0x34d   : > { %6732 = vmatprep.subr.bf16.mxu1 %v6731_v62  ;;  %v1801_v62 = vld [vmem:[%s7859_s26 + $0x28a8] sm:$0xff]  ;;  %v5857_v2 = vpack.c.bf16 %v1792_v57, %v1788_v56  ;;  %v1832_v56 = vld [vmem:[%s7859_s26 + $0x29a0] sm:$0xff]  ;;  %v1830_v57 = vld [vmem:[%s7859_s26 + $0x2990] sm:$0xff] }
 0x34f   : > { %5838 = vmatpush1.bf16.msra.mxu0 %v5837_v4  ;;  %v6753_v4 = vpack.c.bf16 %v1794_v60, %v1790_v58  ;;  %v6771_v58 = vpack.c.bf16 %v1835_v51, %v1831_v50  ;;  %v1837_v60 = vld [vmem:[%s7859_s26 + $0x29c8] sm:$0xff]  ;;  %v1868_v51 = vld [vmem:[%s7859_s26 + $0x2ac0] sm:$0xff] }
 0x350   : > { %6734 = vmatpush1.bf16.msra.mxu1 %v6733_v5  ;;  %5840 = vmatprep.subr.bf16.mxu0 %v5839_v6  ;;  %v5859_v5 = vpack.c.bf16 %v1801_v62, %v1797_v61  ;;  %v1796_v6 = vld [vmem:[%s7859_s26 + $0x2880] sm:$0xff]  ;;  %v1841_v61 = vld [vmem:[%s7859_s26 + $0x29e8] sm:$0xff]  ;;  %v1839_v62 = vld [vmem:[%s7859_s26 + $0x29d8] sm:$0xff] }
 0x351   : > { %6736 = vmatprep.subr.bf16.mxu1 %v6735_v10  ;;  %v1802_v10 = vld [vmem:[%s7859_s26 + $0x28b0] sm:$0xff] }
 0x353   : > { %5842 = vmatpush1.bf16.msra.mxu0 %v5841_v16  ;;  %v5861_v16 = vpack.c.bf16 %v1800_v7, %v1796_v6  ;;  %v6775_v6 = vpack.c.bf16 %v1843_v63, %v1839_v62  ;;  %v1842_v7 = vld [vmem:[%s7859_s26 + $0x29f0] sm:$0xff]  ;;  %v1876_v63 = vld [vmem:[%s7859_s26 + $0x2b00] sm:$0xff] }
 0x354   : > { %6738 = vmatpush1.bf16.msra.mxu1 %v6737_v17  ;;  %5844 = vmatprep.subr.bf16.mxu0 %v5843_v18  ;;  %v6757_v17 = vpack.c.bf16 %v1802_v10, %v1798_v8  ;;  %v5863_v18 = vpack.c.bf16 %v1809_v12, %v1805_v11  ;;  %v1845_v8 = vld [vmem:[%s7859_s26 + $0x2a08] sm:$0xff]  ;;  %v1847_v10 = vld [vmem:[%s7859_s26 + $0x2a18] sm:$0xff] }
 0x355   : > { %6740 = vmatprep.subr.bf16.mxu1 %v6739_v22  ;;  %v6759_v22 = vpack.c.bf16 %v1811_v14, %v1807_v13  ;;  %v1851_v11 = vld [vmem:[%s7859_s26 + $0x2a38] sm:$0xff] }
 0x357   : > { %5846 = vmatpush1.bf16.msra.mxu0 %v5845_v28  ;;  %v5865_v28 = vpack.c.bf16 %v1808_v20, %v1804_v19  ;;  %v1850_v19 = vld [vmem:[%s7859_s26 + $0x2a30] sm:$0xff]  ;;  %v1853_v20 = vld [vmem:[%s7859_s26 + $0x2a48] sm:$0xff] }
 0x358   : > { %6742 = vmatpush1.bf16.msra.mxu1 %v6741_v29  ;;  %5848 = vmatprep.subr.bf16.mxu0 %v5847_v30  ;;  %v6761_v29 = vpack.c.bf16 %v1810_v23, %v1806_v21  ;;  %v5867_v30 = vpack.c.bf16 %v1817_v25, %v1813_v24  ;;  %v1857_v21 = vld [vmem:[%s7859_s26 + $0x2a68] sm:$0xff]  ;;  %v1859_v23 = vld [vmem:[%s7859_s26 + $0x2a78] sm:$0xff] }
 0x359   : > { %6744 = vmatprep.subr.bf16.mxu1 %v6743_v34  ;;  %v6763_v34 = vpack.c.bf16 %v1819_v27, %v1815_v26  ;;  %v5887_v26 = vpack.c.bf16 %v1857_v21, %v1853_v20  ;;  %v1852_v27 = vld [vmem:[%s7859_s26 + $0x2a40] sm:$0xff] }
 0x35b   : > { %5850 = vmatpush1.bf16.msra.mxu0 %v5849_v40  ;;  %v5869_v40 = vpack.c.bf16 %v1816_v32, %v1812_v31  ;;  %v1858_v31 = vld [vmem:[%s7859_s26 + $0x2a70] sm:$0xff]  ;;  %v1861_v32 = vld [vmem:[%s7859_s26 + $0x2a88] sm:$0xff] }
 0x35c   : > { %6746 = vmatpush1.bf16.msra.mxu1 %v6745_v41  ;;  %5852 = vmatprep.subr.bf16.mxu0 %v5851_v42  ;;  %v6765_v41 = vpack.c.bf16 %v1818_v35, %v1814_v33  ;;  %v5871_v42 = vpack.c.bf16 %v1825_v37, %v1821_v36  ;;  %v1865_v33 = vld [vmem:[%s7859_s26 + $0x2aa8] sm:$0xff]  ;;  %v1867_v35 = vld [vmem:[%s7859_s26 + $0x2ab8] sm:$0xff] }
 0x35d   : > { %6748 = vmatprep.subr.bf16.mxu1 %v6747_v46  ;;  %v6767_v46 = vpack.c.bf16 %v1827_v39, %v1823_v38  ;;  %v5891_v38 = vpack.c.bf16 %v1865_v33, %v1861_v32  ;;  %v1860_v39 = vld [vmem:[%s7859_s26 + $0x2a80] sm:$0xff] }
 0x35e   : > { %3050 = vmatmul.mubr.f32.vlgmr.msra.gmra.mrb[0].mxu0 %v454_v52 }
 0x35f   : > { %5854 = vmatpush1.bf16.msra.mxu0 %v5853_v53  ;;  %4128 = vmatmul.mubr.f32.vlgmr.msra.gmra.mrb[0].mxu1 %v454_v52  ;;  %v5873_v52 = vpack.c.bf16 %v1824_v44, %v1820_v43  ;;  %v6769_v53 = vpack.c.bf16 %v1826_v47, %v1822_v45  ;;  %v1866_v43 = vld [vmem:[%s7859_s26 + $0x2ab0] sm:$0xff]  ;;  %v1869_v44 = vld [vmem:[%s7859_s26 + $0x2ac8] sm:$0xff]  ;;  %v1875_v47 = vld [vmem:[%s7859_s26 + $0x2af8] sm:$0xff] }
 0x360   : > { %6750 = vmatpush1.bf16.msra.mxu1 %v6749_v54  ;;  %5856 = vmatprep.subr.bf16.mxu0 %v5855_v55  ;;  %v5875_v54 = vpack.c.bf16 %v1833_v49, %v1829_v48  ;;  %v1828_v55 = vld [vmem:[%s7859_s26 + $0x2980] sm:$0xff]  ;;  %v1873_v45 = vld [vmem:[%s7859_s26 + $0x2ae8] sm:$0xff] }
 0x361   : > { %6752 = vmatprep.subr.bf16.mxu1 %v6751_v59  ;;  %3055 = vmatprep.mubr.f32.mxu0 %v483_v1  ;;  %v1834_v59 = vld [vmem:[%s7859_s26 + $0x29b0] sm:$0xff]  ;;  %v5877_v0 = vpack.c.bf16 %v1832_v56, %v1828_v55  ;;  %v5895_v50 = vpack.c.bf16 %v1873_v45, %v1869_v44  ;;  %v1877_v56 = vld [vmem:[%s7859_s26 + $0x2b08] sm:$0xff] }
 0x362   : > { %4133 = vmatprep.mubr.f32.mxu1 %v483_v1  ;;  %3056 = vmatmul.mubr.f32.gmra.mrb[2].mxu0 %v482_v3  ;;  %v6773_v1 = vpack.c.bf16 %v1834_v59, %v1830_v57  ;;  %v1874_v55 = vld [vmem:[%s7859_s26 + $0x2af0] sm:$0xff]  ;;  %v1881_v57 = vld [vmem:[%s7859_s26 + $0x2b28] sm:$0xff]  ;;  %v1883_v59 = vld [vmem:[%s7859_s26 + $0x2b38] sm:$0xff] }
 0x363   : > { %5858 = vmatpush1.bf16.msra.mxu0 %v5857_v2  ;;  %4134 = vmatmul.mubr.f32.gmra.mrb[2].mxu1 %v482_v3  ;;  %v5879_v2 = vpack.c.bf16 %v1841_v61, %v1837_v60  ;;  %v1836_v3 = vld [vmem:[%s7859_s26 + $0x29c0] sm:$0xff]  ;;  %v5899_v62 = vpack.c.bf16 %v1881_v57, %v1877_v56 }
 0x364   : > { %6754 = vmatpush1.bf16.msra.mxu1 %v6753_v4  ;;  %5860 = vmatprep.subr.bf16.mxu0 %v5859_v5  ;;  %v1840_v4 = vld [vmem:[%s7859_s26 + $0x29e0] sm:$0xff]  ;;  %v1838_v5 = vld [vmem:[%s7859_s26 + $0x29d0] sm:$0xff] }
 0x365   : > { %6756 = vmatprep.subr.bf16.mxu1 %v6755_v9  ;;  %3126 = vmatprep.mubr.f32.mxu0 %v457_v15  ;;  %v1849_v9 = vld [vmem:[%s7859_s26 + $0x2a28] sm:$0xff]  ;;  %v5881_v12 = vpack.c.bf16 %v1840_v4, %v1836_v3  ;;  %v6777_v13 = vpack.c.bf16 %v1842_v7, %v1838_v5  ;;  %v1882_v3 = vld [vmem:[%s7859_s26 + $0x2b30] sm:$0xff]  ;;  %v1891_v7 = vld [vmem:[%s7859_s26 + $0x2b78] sm:$0xff] }
 0x366   : > { %4204 = vmatprep.mubr.f32.mxu1 %v457_v15  ;;  %v5883_v14 = vpack.c.bf16 %v1849_v9, %v1845_v8  ;;  %v1844_v15 = vld [vmem:[%s7859_s26 + $0x2a00] sm:$0xff]  ;;  %v1885_v4 = vld [vmem:[%s7859_s26 + $0x2b48] sm:$0xff] }
 0x367   : > { %5862 = vmatpush1.bf16.msra.mxu0 %v5861_v16  ;;  %v1848_v16 = vld [vmem:[%s7859_s26 + $0x2a20] sm:$0xff]  ;;  %v1889_v5 = vld [vmem:[%s7859_s26 + $0x2b68] sm:$0xff] }
 0x368   : > { %6758 = vmatpush1.bf16.msra.mxu1 %v6757_v17  ;;  %5864 = vmatprep.subr.bf16.mxu0 %v5863_v18  ;;  %v1846_v17 = vld [vmem:[%s7859_s26 + $0x2a10] sm:$0xff]  ;;  %v6779_v18 = vpack.c.bf16 %v1851_v11, %v1847_v10  ;;  %v5885_v24 = vpack.c.bf16 %v1848_v16, %v1844_v15  ;;  %v5903_v10 = vpack.c.bf16 %v1889_v5, %v1885_v4  ;;  %v1884_v11 = vld [vmem:[%s7859_s26 + $0x2b40] sm:$0xff]  ;;  %v1893_v16 = vld [vmem:[%s7859_s26 + $0x2b88] sm:$0xff] }
 0x369   : > { %6760 = vmatprep.subr.bf16.mxu1 %v6759_v22  ;;  %v1855_v22 = vld [vmem:[%s7859_s26 + $0x2a58] sm:$0xff]  ;;  %v6781_v25 = vpack.c.bf16 %v1850_v19, %v1846_v17  ;;  %v1890_v15 = vld [vmem:[%s7859_s26 + $0x2b70] sm:$0xff]  ;;  %v1897_v17 = vld [vmem:[%s7859_s26 + $0x2ba8] sm:$0xff] }
 0x36a   : > { %v1899_v19 = vld [vmem:[%s7859_s26 + $0x2bb8] sm:$0xff]  ;;  %v456_v56 = vld [vmem:[%s7975_s12 + $0xa0] sm:$0xff]  ;;  %v485_v5 = vld [vmem:[%s7975_s12 + $0x268] sm:$0xff] }
 0x36b   : > { %5866 = vmatpush1.bf16.msra.mxu0 %v5865_v28  ;;  %v1856_v28 = vld [vmem:[%s7859_s26 + $0x2a60] sm:$0xff]  ;;  %v1931_v4 = vld [vmem:[%s7859_s26 + $0x2cb8] sm:$0xff] }
 0x36c   : > { %6762 = vmatpush1.bf16.msra.mxu1 %v6761_v29  ;;  %5868 = vmatprep.subr.bf16.mxu0 %v5867_v30  ;;  %v1854_v29 = vld [vmem:[%s7859_s26 + $0x2a50] sm:$0xff]  ;;  %v6783_v30 = vpack.c.bf16 %v1859_v23, %v1855_v22  ;;  %v5889_v36 = vpack.c.bf16 %v1856_v28, %v1852_v27  ;;  %v5907_v22 = vpack.c.bf16 %v1897_v17, %v1893_v16  ;;  %v1892_v23 = vld [vmem:[%s7859_s26 + $0x2b80] sm:$0xff]  ;;  %v1901_v28 = vld [vmem:[%s7859_s26 + $0x2bc8] sm:$0xff] }
 0x36d   : > { %6764 = vmatprep.subr.bf16.mxu1 %v6763_v34  ;;  %v1863_v34 = vld [vmem:[%s7859_s26 + $0x2a98] sm:$0xff]  ;;  %v6785_v37 = vpack.c.bf16 %v1858_v31, %v1854_v29  ;;  %v1898_v27 = vld [vmem:[%s7859_s26 + $0x2bb0] sm:$0xff]  ;;  %v1905_v29 = vld [vmem:[%s7859_s26 + $0x2be8] sm:$0xff] }
 0x36e   : > { %v1907_v31 = vld [vmem:[%s7859_s26 + $0x2bf8] sm:$0xff]  ;;  %v1937_v16 = vld [vmem:[%s7859_s26 + $0x2ce8] sm:$0xff] }
 0x36f   : > { %5870 = vmatpush1.bf16.msra.mxu0 %v5869_v40  ;;  %v1864_v40 = vld [vmem:[%s7859_s26 + $0x2aa0] sm:$0xff]  ;;  %v1935_v17 = vld [vmem:[%s7859_s26 + $0x2cd8] sm:$0xff] }
 0x370   : > { %6766 = vmatpush1.bf16.msra.mxu1 %v6765_v41  ;;  %5872 = vmatprep.subr.bf16.mxu0 %v5871_v42  ;;  %v1862_v41 = vld [vmem:[%s7859_s26 + $0x2a90] sm:$0xff]  ;;  %v6787_v42 = vpack.c.bf16 %v1867_v35, %v1863_v34  ;;  %v5893_v48 = vpack.c.bf16 %v1864_v40, %v1860_v39  ;;  %v5911_v34 = vpack.c.bf16 %v1905_v29, %v1901_v28  ;;  %v1900_v35 = vld [vmem:[%s7859_s26 + $0x2bc0] sm:$0xff]  ;;  %v1909_v40 = vld [vmem:[%s7859_s26 + $0x2c08] sm:$0xff] }
 0x371   : > { %6768 = vmatprep.subr.bf16.mxu1 %v6767_v46  ;;  %v1871_v46 = vld [vmem:[%s7859_s26 + $0x2ad8] sm:$0xff]  ;;  %v6789_v49 = vpack.c.bf16 %v1866_v43, %v1862_v41  ;;  %v1906_v39 = vld [vmem:[%s7859_s26 + $0x2bf0] sm:$0xff]  ;;  %v1913_v41 = vld [vmem:[%s7859_s26 + $0x2c28] sm:$0xff] }
 0x372   : > { %v1915_v43 = vld [vmem:[%s7859_s26 + $0x2c38] sm:$0xff]  ;;  %v1941_v28 = vld [vmem:[%s7859_s26 + $0x2d08] sm:$0xff] }
 0x373   : > { %5874 = vmatpush1.bf16.msra.mxu0 %v5873_v52  ;;  %v1872_v52 = vld [vmem:[%s7859_s26 + $0x2ae0] sm:$0xff]  ;;  %v1945_v29 = vld [vmem:[%s7859_s26 + $0x2d28] sm:$0xff] }
 0x374   : > { %6770 = vmatpush1.bf16.msra.mxu1 %v6769_v53  ;;  %5876 = vmatprep.subr.bf16.mxu0 %v5875_v54  ;;  %v1870_v53 = vld [vmem:[%s7859_s26 + $0x2ad0] sm:$0xff]  ;;  %v6791_v54 = vpack.c.bf16 %v1875_v47, %v1871_v46  ;;  %v5897_v60 = vpack.c.bf16 %v1872_v52, %v1868_v51  ;;  %v5915_v46 = vpack.c.bf16 %v1913_v41, %v1909_v40  ;;  %v1908_v47 = vld [vmem:[%s7859_s26 + $0x2c00] sm:$0xff]  ;;  %v1917_v52 = vld [vmem:[%s7859_s26 + $0x2c48] sm:$0xff] }
 0x375   : > { %6772 = vmatprep.subr.bf16.mxu1 %v6771_v58  ;;  %v1879_v58 = vld [vmem:[%s7859_s26 + $0x2b18] sm:$0xff]  ;;  %v6793_v61 = vpack.c.bf16 %v1874_v55, %v1870_v53  ;;  %v1914_v51 = vld [vmem:[%s7859_s26 + $0x2c30] sm:$0xff]  ;;  %v1921_v53 = vld [vmem:[%s7859_s26 + $0x2c68] sm:$0xff] }
 0x376   : > { %v1923_v55 = vld [vmem:[%s7859_s26 + $0x2c78] sm:$0xff]  ;;  %v1949_v40 = vld [vmem:[%s7859_s26 + $0x2d48] sm:$0xff] }
 0x377   : > { %5878 = vmatpush1.bf16.msra.mxu0 %v5877_v0  ;;  %v1880_v0 = vld [vmem:[%s7859_s26 + $0x2b20] sm:$0xff]  ;;  %v1953_v41 = vld [vmem:[%s7859_s26 + $0x2d68] sm:$0xff] }
 0x378   : > { %6774 = vmatpush1.bf16.msra.mxu1 %v6773_v1  ;;  %5880 = vmatprep.subr.bf16.mxu0 %v5879_v2  ;;  %v1878_v1 = vld [vmem:[%s7859_s26 + $0x2b10] sm:$0xff]  ;;  %v6795_v2 = vpack.c.bf16 %v1883_v59, %v1879_v58  ;;  %v5901_v8 = vpack.c.bf16 %v1880_v0, %v1876_v63  ;;  %v5919_v59 = vpack.c.bf16 %v1921_v53, %v1917_v52  ;;  %v1957_v52 = vld [vmem:[%s7859_s26 + $0x2d88] sm:$0xff] }
 0x379   : > { %6776 = vmatprep.subr.bf16.mxu1 %v6775_v6  ;;  %v1887_v6 = vld [vmem:[%s7859_s26 + $0x2b58] sm:$0xff]  ;;  %v6797_v9 = vpack.c.bf16 %v1882_v3, %v1878_v1  ;;  %v1922_v0 = vld [vmem:[%s7859_s26 + $0x2c70] sm:$0xff]  ;;  %v1925_v1 = vld [vmem:[%s7859_s26 + $0x2c88] sm:$0xff] }
 0x37a   : > { %v1927_v3 = vld [vmem:[%s7859_s26 + $0x2c98] sm:$0xff]  ;;  %v1961_v53 = vld [vmem:[%s7859_s26 + $0x2da8] sm:$0xff] }
 0x37b   : > { %5882 = vmatpush1.bf16.msra.mxu0 %v5881_v12  ;;  %v1888_v12 = vld [vmem:[%s7859_s26 + $0x2b60] sm:$0xff] }
 0x37c   : > { %6778 = vmatpush1.bf16.msra.mxu1 %v6777_v13  ;;  %5884 = vmatprep.subr.bf16.mxu0 %v5883_v14  ;;  %v1886_v13 = vld [vmem:[%s7859_s26 + $0x2b50] sm:$0xff]  ;;  %v6799_v14 = vpack.c.bf16 %v1891_v7, %v1887_v6  ;;  %v5905_v20 = vpack.c.bf16 %v1888_v12, %v1884_v11  ;;  %v484_v7 = vld [vmem:[%s7975_s12 + $0x260] sm:$0xff] }
 0x37d   : > { %6780 = vmatprep.subr.bf16.mxu1 %v6779_v18  ;;  %v1895_v18 = vld [vmem:[%s7859_s26 + $0x2b98] sm:$0xff]  ;;  %v6801_v21 = vpack.c.bf16 %v1890_v15, %v1886_v13  ;;  %v1928_v11 = vld [vmem:[%s7859_s26 + $0x2ca0] sm:$0xff]  ;;  %v1926_v12 = vld [vmem:[%s7859_s26 + $0x2c90] sm:$0xff]  ;;  %v6819_v13 = vpack.c.bf16 %v1931_v4, %v1927_v3 }
 0x37e   : > { %v1933_v15 = vld [vmem:[%s7859_s26 + $0x2cc8] sm:$0xff]  ;;  %v1971_v3 = vld [vmem:[%s7859_s26 + $0x2df8] sm:$0xff] }
 0x37f   : > { %5886 = vmatpush1.bf16.msra.mxu0 %v5885_v24  ;;  %v1896_v24 = vld [vmem:[%s7859_s26 + $0x2ba0] sm:$0xff] }
 0x380   : > { %6782 = vmatpush1.bf16.msra.mxu1 %v6781_v25  ;;  %5888 = vmatprep.subr.bf16.mxu0 %v5887_v26  ;;  %v1894_v25 = vld [vmem:[%s7859_s26 + $0x2b90] sm:$0xff]  ;;  %v6803_v26 = vpack.c.bf16 %v1899_v19, %v1895_v18  ;;  %v5909_v32 = vpack.c.bf16 %v1896_v24, %v1892_v23  ;;  %v1939_v18 = vld [vmem:[%s7859_s26 + $0x2cf8] sm:$0xff]  ;;  %v1932_v23 = vld [vmem:[%s7859_s26 + $0x2cc0] sm:$0xff] }
 0x381   : > { %6784 = vmatprep.subr.bf16.mxu1 %v6783_v30  ;;  %v1903_v30 = vld [vmem:[%s7859_s26 + $0x2bd8] sm:$0xff]  ;;  %v6805_v33 = vpack.c.bf16 %v1898_v27, %v1894_v25  ;;  %v1936_v24 = vld [vmem:[%s7859_s26 + $0x2ce0] sm:$0xff]  ;;  %v1934_v25 = vld [vmem:[%s7859_s26 + $0x2cd0] sm:$0xff] }
 0x382   : > { %v459_v19 = vld [vmem:[%s7975_s12 + $0xb8] sm:$0xff]  ;;  %v1938_v27 = vld [vmem:[%s7859_s26 + $0x2cf0] sm:$0xff] }
 0x383   : > { %5890 = vmatpush1.bf16.msra.mxu0 %v5889_v36  ;;  %v1904_v36 = vld [vmem:[%s7859_s26 + $0x2be0] sm:$0xff] }
 0x384   : > { %6786 = vmatpush1.bf16.msra.mxu1 %v6785_v37  ;;  %5892 = vmatprep.subr.bf16.mxu0 %v5891_v38  ;;  %v1902_v37 = vld [vmem:[%s7859_s26 + $0x2bd0] sm:$0xff]  ;;  %v6807_v38 = vpack.c.bf16 %v1907_v31, %v1903_v30  ;;  %v5913_v44 = vpack.c.bf16 %v1904_v36, %v1900_v35  ;;  %v1943_v30 = vld [vmem:[%s7859_s26 + $0x2d18] sm:$0xff]  ;;  %v1940_v35 = vld [vmem:[%s7859_s26 + $0x2d00] sm:$0xff] }
 0x385   : > { %6788 = vmatprep.subr.bf16.mxu1 %v6787_v42  ;;  %v1911_v42 = vld [vmem:[%s7859_s26 + $0x2c18] sm:$0xff]  ;;  %v6809_v45 = vpack.c.bf16 %v1906_v39, %v1902_v37  ;;  %v1944_v36 = vld [vmem:[%s7859_s26 + $0x2d20] sm:$0xff]  ;;  %v1942_v37 = vld [vmem:[%s7859_s26 + $0x2d10] sm:$0xff] }
 0x386   : > { %v1947_v31 = vld [vmem:[%s7859_s26 + $0x2d38] sm:$0xff]  ;;  %v1946_v39 = vld [vmem:[%s7859_s26 + $0x2d30] sm:$0xff] }
 0x387   : > { %5894 = vmatpush1.bf16.msra.mxu0 %v5893_v48  ;;  %v1912_v48 = vld [vmem:[%s7859_s26 + $0x2c20] sm:$0xff] }
 0x388   : > { %6790 = vmatpush1.bf16.msra.mxu1 %v6789_v49  ;;  %5896 = vmatprep.subr.bf16.mxu0 %v5895_v50  ;;  %v1910_v49 = vld [vmem:[%s7859_s26 + $0x2c10] sm:$0xff]  ;;  %v6811_v50 = vpack.c.bf16 %v1915_v43, %v1911_v42  ;;  %v5917_v57 = vpack.c.bf16 %v1912_v48, %v1908_v47  ;;  %v1951_v42 = vld [vmem:[%s7859_s26 + $0x2d58] sm:$0xff]  ;;  %v1948_v47 = vld [vmem:[%s7859_s26 + $0x2d40] sm:$0xff] }
 0x389   : > { %6792 = vmatprep.subr.bf16.mxu1 %v6791_v54  ;;  %v1919_v54 = vld [vmem:[%s7859_s26 + $0x2c58] sm:$0xff]  ;;  %v6813_v58 = vpack.c.bf16 %v1914_v51, %v1910_v49  ;;  %v1952_v48 = vld [vmem:[%s7859_s26 + $0x2d60] sm:$0xff]  ;;  %v1950_v49 = vld [vmem:[%s7859_s26 + $0x2d50] sm:$0xff] }
 0x38a   : > { %v6815_v63 = vpack.c.bf16 %v1923_v55, %v1919_v54  ;;  %v1955_v43 = vld [vmem:[%s7859_s26 + $0x2d78] sm:$0xff]  ;;  %v1954_v51 = vld [vmem:[%s7859_s26 + $0x2d70] sm:$0xff] }
 0x38b   : > { %5898 = vmatpush1.bf16.msra.mxu0 %v5897_v60  ;;  %v1916_v60 = vld [vmem:[%s7859_s26 + $0x2c40] sm:$0xff]  ;;  %v1959_v54 = vld [vmem:[%s7859_s26 + $0x2d98] sm:$0xff] }
 0x38c   : > { %6794 = vmatpush1.bf16.msra.mxu1 %v6793_v61  ;;  %5900 = vmatprep.subr.bf16.mxu0 %v5899_v62  ;;  %v1920_v61 = vld [vmem:[%s7859_s26 + $0x2c60] sm:$0xff]  ;;  %v1918_v62 = vld [vmem:[%s7859_s26 + $0x2c50] sm:$0xff]  ;;  %v1963_v55 = vld [vmem:[%s7859_s26 + $0x2db8] sm:$0xff] }
 0x38d   : > { %6796 = vmatprep.subr.bf16.mxu1 %v6795_v2  ;;  %v1929_v2 = vld [vmem:[%s7859_s26 + $0x2ca8] sm:$0xff]  ;;  %v5921_v6 = vpack.c.bf16 %v1920_v61, %v1916_v60  ;;  %v1960_v60 = vld [vmem:[%s7859_s26 + $0x2da0] sm:$0xff]  ;;  %v1958_v61 = vld [vmem:[%s7859_s26 + $0x2d90] sm:$0xff] }
 0x38f   : > { %5902 = vmatpush1.bf16.msra.mxu0 %v5901_v8  ;;  %v6817_v8 = vpack.c.bf16 %v1922_v0, %v1918_v62  ;;  %v6835_v62 = vpack.c.bf16 %v1963_v55, %v1959_v54  ;;  %v1965_v0 = vld [vmem:[%s7859_s26 + $0x2dc8] sm:$0xff]  ;;  %v1996_v55 = vld [vmem:[%s7859_s26 + $0x2ec0] sm:$0xff] }
 0x390   : > { %6798 = vmatpush1.bf16.msra.mxu1 %v6797_v9  ;;  %5904 = vmatprep.subr.bf16.mxu0 %v5903_v10  ;;  %v5923_v9 = vpack.c.bf16 %v1929_v2, %v1925_v1  ;;  %v1924_v10 = vld [vmem:[%s7859_s26 + $0x2c80] sm:$0xff]  ;;  %v1969_v1 = vld [vmem:[%s7859_s26 + $0x2de8] sm:$0xff]  ;;  %v1967_v2 = vld [vmem:[%s7859_s26 + $0x2dd8] sm:$0xff] }
 0x391   : > { %6800 = vmatprep.subr.bf16.mxu1 %v6799_v14  ;;  %v1930_v14 = vld [vmem:[%s7859_s26 + $0x2cb0] sm:$0xff] }
 0x393   : > { %5906 = vmatpush1.bf16.msra.mxu0 %v5905_v20  ;;  %v5925_v20 = vpack.c.bf16 %v1928_v11, %v1924_v10  ;;  %v6839_v10 = vpack.c.bf16 %v1971_v3, %v1967_v2  ;;  %v1970_v11 = vld [vmem:[%s7859_s26 + $0x2df0] sm:$0xff]  ;;  %v2004_v3 = vld [vmem:[%s7859_s26 + $0x2f00] sm:$0xff] }
 0x394   : > { %6802 = vmatpush1.bf16.msra.mxu1 %v6801_v21  ;;  %5908 = vmatprep.subr.bf16.mxu0 %v5907_v22  ;;  %v6821_v21 = vpack.c.bf16 %v1930_v14, %v1926_v12  ;;  %v5927_v22 = vpack.c.bf16 %v1937_v16, %v1933_v15  ;;  %v1973_v12 = vld [vmem:[%s7859_s26 + $0x2e08] sm:$0xff]  ;;  %v1975_v14 = vld [vmem:[%s7859_s26 + $0x2e18] sm:$0xff] }
 0x395   : > { %6804 = vmatprep.subr.bf16.mxu1 %v6803_v26  ;;  %v6823_v26 = vpack.c.bf16 %v1939_v18, %v1935_v17  ;;  %v1979_v15 = vld [vmem:[%s7859_s26 + $0x2e38] sm:$0xff] }
 0x397   : > { %5910 = vmatpush1.bf16.msra.mxu0 %v5909_v32  ;;  %v5929_v32 = vpack.c.bf16 %v1936_v24, %v1932_v23  ;;  %v1978_v23 = vld [vmem:[%s7859_s26 + $0x2e30] sm:$0xff]  ;;  %v1981_v24 = vld [vmem:[%s7859_s26 + $0x2e48] sm:$0xff] }
 0x398   : > { %6806 = vmatpush1.bf16.msra.mxu1 %v6805_v33  ;;  %5912 = vmatprep.subr.bf16.mxu0 %v5911_v34  ;;  %v6825_v33 = vpack.c.bf16 %v1938_v27, %v1934_v25  ;;  %v5931_v34 = vpack.c.bf16 %v1945_v29, %v1941_v28  ;;  %v1985_v25 = vld [vmem:[%s7859_s26 + $0x2e68] sm:$0xff]  ;;  %v1987_v27 = vld [vmem:[%s7859_s26 + $0x2e78] sm:$0xff] }
 0x399   : > { %6808 = vmatprep.subr.bf16.mxu1 %v6807_v38  ;;  %v6827_v38 = vpack.c.bf16 %v1947_v31, %v1943_v30  ;;  %v5951_v30 = vpack.c.bf16 %v1985_v25, %v1981_v24  ;;  %v1980_v31 = vld [vmem:[%s7859_s26 + $0x2e40] sm:$0xff] }
 0x39b   : > { %5914 = vmatpush1.bf16.msra.mxu0 %v5913_v44  ;;  %v5933_v44 = vpack.c.bf16 %v1944_v36, %v1940_v35  ;;  %v1986_v35 = vld [vmem:[%s7859_s26 + $0x2e70] sm:$0xff]  ;;  %v1989_v36 = vld [vmem:[%s7859_s26 + $0x2e88] sm:$0xff] }
 0x39c   : > { %6810 = vmatpush1.bf16.msra.mxu1 %v6809_v45  ;;  %5916 = vmatprep.subr.bf16.mxu0 %v5915_v46  ;;  %v6829_v45 = vpack.c.bf16 %v1946_v39, %v1942_v37  ;;  %v5935_v46 = vpack.c.bf16 %v1953_v41, %v1949_v40  ;;  %v1993_v37 = vld [vmem:[%s7859_s26 + $0x2ea8] sm:$0xff]  ;;  %v1995_v39 = vld [vmem:[%s7859_s26 + $0x2eb8] sm:$0xff] }
 0x39d   : > { %6812 = vmatprep.subr.bf16.mxu1 %v6811_v50  ;;  %v6831_v50 = vpack.c.bf16 %v1955_v43, %v1951_v42  ;;  %v5955_v42 = vpack.c.bf16 %v1993_v37, %v1989_v36  ;;  %v1988_v43 = vld [vmem:[%s7859_s26 + $0x2e80] sm:$0xff] }
 0x39e   : > { %3127 = vmatmul.mubr.f32.vlgmr.msra.gmra.mrb[0].mxu0 %v456_v56 }
 0x39f   : > { %5918 = vmatpush1.bf16.msra.mxu0 %v5917_v57  ;;  %4205 = vmatmul.mubr.f32.vlgmr.msra.gmra.mrb[0].mxu1 %v456_v56  ;;  %v5937_v56 = vpack.c.bf16 %v1952_v48, %v1948_v47  ;;  %v6833_v57 = vpack.c.bf16 %v1954_v51, %v1950_v49  ;;  %v1994_v47 = vld [vmem:[%s7859_s26 + $0x2eb0] sm:$0xff]  ;;  %v1997_v48 = vld [vmem:[%s7859_s26 + $0x2ec8] sm:$0xff]  ;;  %v2003_v51 = vld [vmem:[%s7859_s26 + $0x2ef8] sm:$0xff] }
 0x3a0   : > { %6814 = vmatpush1.bf16.msra.mxu1 %v6813_v58  ;;  %5920 = vmatprep.subr.bf16.mxu0 %v5919_v59  ;;  %v5939_v58 = vpack.c.bf16 %v1961_v53, %v1957_v52  ;;  %v1956_v59 = vld [vmem:[%s7859_s26 + $0x2d80] sm:$0xff]  ;;  %v2001_v49 = vld [vmem:[%s7859_s26 + $0x2ee8] sm:$0xff] }
 0x3a1   : > { %6816 = vmatprep.subr.bf16.mxu1 %v6815_v63  ;;  %3132 = vmatprep.mubr.f32.mxu0 %v485_v5  ;;  %v1962_v63 = vld [vmem:[%s7859_s26 + $0x2db0] sm:$0xff]  ;;  %v5941_v4 = vpack.c.bf16 %v1960_v60, %v1956_v59  ;;  %v5959_v54 = vpack.c.bf16 %v2001_v49, %v1997_v48  ;;  %v2005_v60 = vld [vmem:[%s7859_s26 + $0x2f08] sm:$0xff] }
 0x3a2   : > { %4210 = vmatprep.mubr.f32.mxu1 %v485_v5  ;;  %3133 = vmatmul.mubr.f32.gmra.mrb[2].mxu0 %v484_v7  ;;  %v6837_v5 = vpack.c.bf16 %v1962_v63, %v1958_v61  ;;  %v2002_v59 = vld [vmem:[%s7859_s26 + $0x2ef0] sm:$0xff]  ;;  %v2009_v61 = vld [vmem:[%s7859_s26 + $0x2f28] sm:$0xff]  ;;  %v2011_v63 = vld [vmem:[%s7859_s26 + $0x2f38] sm:$0xff] }
 0x3a3   : > { %5922 = vmatpush1.bf16.msra.mxu0 %v5921_v6  ;;  %4211 = vmatmul.mubr.f32.gmra.mrb[2].mxu1 %v484_v7  ;;  %v5943_v6 = vpack.c.bf16 %v1969_v1, %v1965_v0  ;;  %v1964_v7 = vld [vmem:[%s7859_s26 + $0x2dc0] sm:$0xff]  ;;  %v5963_v2 = vpack.c.bf16 %v2009_v61, %v2005_v60  ;;  %v458_v60 = vld [vmem:[%s7975_s12 + $0xb0] sm:$0xff] }
 0x3a4   : > { %6818 = vmatpush1.bf16.msra.mxu1 %v6817_v8  ;;  %5924 = vmatprep.subr.bf16.mxu0 %v5923_v9  ;;  %v1968_v8 = vld [vmem:[%s7859_s26 + $0x2de0] sm:$0xff]  ;;  %v1966_v9 = vld [vmem:[%s7859_s26 + $0x2dd0] sm:$0xff] }
 0x3a5   : > { %6820 = vmatprep.subr.bf16.mxu1 %v6819_v13  ;;  %3203 = vmatprep.mubr.f32.mxu0 %v459_v19  ;;  %v1977_v13 = vld [vmem:[%s7859_s26 + $0x2e28] sm:$0xff]  ;;  %v5945_v16 = vpack.c.bf16 %v1968_v8, %v1964_v7  ;;  %v6841_v17 = vpack.c.bf16 %v1970_v11, %v1966_v9  ;;  %v2010_v7 = vld [vmem:[%s7859_s26 + $0x2f30] sm:$0xff]  ;;  %v2019_v11 = vld [vmem:[%s7859_s26 + $0x2f78] sm:$0xff] }
 0x3a6   : > { %4281 = vmatprep.mubr.f32.mxu1 %v459_v19  ;;  %v5947_v18 = vpack.c.bf16 %v1977_v13, %v1973_v12  ;;  %v1972_v19 = vld [vmem:[%s7859_s26 + $0x2e00] sm:$0xff]  ;;  %v2013_v8 = vld [vmem:[%s7859_s26 + $0x2f48] sm:$0xff] }
 0x3a7   : > { %5926 = vmatpush1.bf16.msra.mxu0 %v5925_v20  ;;  %v1976_v20 = vld [vmem:[%s7859_s26 + $0x2e20] sm:$0xff]  ;;  %v2017_v9 = vld [vmem:[%s7859_s26 + $0x2f68] sm:$0xff] }
 0x3a8   : > { %6822 = vmatpush1.bf16.msra.mxu1 %v6821_v21  ;;  %5928 = vmatprep.subr.bf16.mxu0 %v5927_v22  ;;  %v1974_v21 = vld [vmem:[%s7859_s26 + $0x2e10] sm:$0xff]  ;;  %v6843_v22 = vpack.c.bf16 %v1979_v15, %v1975_v14  ;;  %v5949_v28 = vpack.c.bf16 %v1976_v20, %v1972_v19  ;;  %v5967_v14 = vpack.c.bf16 %v2017_v9, %v2013_v8  ;;  %v2012_v15 = vld [vmem:[%s7859_s26 + $0x2f40] sm:$0xff]  ;;  %v2021_v20 = vld [vmem:[%s7859_s26 + $0x2f88] sm:$0xff] }
 0x3a9   : > { %6824 = vmatprep.subr.bf16.mxu1 %v6823_v26  ;;  %v1983_v26 = vld [vmem:[%s7859_s26 + $0x2e58] sm:$0xff]  ;;  %v6845_v29 = vpack.c.bf16 %v1978_v23, %v1974_v21  ;;  %v2018_v19 = vld [vmem:[%s7859_s26 + $0x2f70] sm:$0xff]  ;;  %v2025_v21 = vld [vmem:[%s7859_s26 + $0x2fa8] sm:$0xff] }
 0x3aa   : > { %v2027_v23 = vld [vmem:[%s7859_s26 + $0x2fb8] sm:$0xff] }
 0x3ab   : > { %5930 = vmatpush1.bf16.msra.mxu0 %v5929_v32  ;;  %v1984_v32 = vld [vmem:[%s7859_s26 + $0x2e60] sm:$0xff]  ;;  %v2059_v8 = vld [vmem:[%s7859_s26 + $0x30b8] sm:$0xff] }
 0x3ac   : > { %6826 = vmatpush1.bf16.msra.mxu1 %v6825_v33  ;;  %5932 = vmatprep.subr.bf16.mxu0 %v5931_v34  ;;  %v1982_v33 = vld [vmem:[%s7859_s26 + $0x2e50] sm:$0xff]  ;;  %v6847_v34 = vpack.c.bf16 %v1987_v27, %v1983_v26  ;;  %v5953_v40 = vpack.c.bf16 %v1984_v32, %v1980_v31  ;;  %v5971_v26 = vpack.c.bf16 %v2025_v21, %v2021_v20  ;;  %v2020_v27 = vld [vmem:[%s7859_s26 + $0x2f80] sm:$0xff]  ;;  %v2029_v32 = vld [vmem:[%s7859_s26 + $0x2fc8] sm:$0xff] }
 0x3ad   : > { %6828 = vmatprep.subr.bf16.mxu1 %v6827_v38  ;;  %v1991_v38 = vld [vmem:[%s7859_s26 + $0x2e98] sm:$0xff]  ;;  %v6849_v41 = vpack.c.bf16 %v1986_v35, %v1982_v33  ;;  %v2026_v31 = vld [vmem:[%s7859_s26 + $0x2fb0] sm:$0xff]  ;;  %v2033_v33 = vld [vmem:[%s7859_s26 + $0x2fe8] sm:$0xff] }
 0x3ae   : > { %v2035_v35 = vld [vmem:[%s7859_s26 + $0x2ff8] sm:$0xff]  ;;  %v2065_v20 = vld [vmem:[%s7859_s26 + $0x30e8] sm:$0xff] }
 0x3af   : > { %5934 = vmatpush1.bf16.msra.mxu0 %v5933_v44  ;;  %v1992_v44 = vld [vmem:[%s7859_s26 + $0x2ea0] sm:$0xff]  ;;  %v487_v9 = vld [vmem:[%s7975_s12 + $0x278] sm:$0xff] }
 0x3b0   : > { %6830 = vmatpush1.bf16.msra.mxu1 %v6829_v45  ;;  %5936 = vmatprep.subr.bf16.mxu0 %v5935_v46  ;;  %v1990_v45 = vld [vmem:[%s7859_s26 + $0x2e90] sm:$0xff]  ;;  %v6851_v46 = vpack.c.bf16 %v1995_v39, %v1991_v38  ;;  %v5957_v52 = vpack.c.bf16 %v1992_v44, %v1988_v43  ;;  %v5975_v38 = vpack.c.bf16 %v2033_v33, %v2029_v32  ;;  %v2028_v39 = vld [vmem:[%s7859_s26 + $0x2fc0] sm:$0xff]  ;;  %v2037_v44 = vld [vmem:[%s7859_s26 + $0x3008] sm:$0xff] }
 0x3b1   : > { %6832 = vmatprep.subr.bf16.mxu1 %v6831_v50  ;;  %v1999_v50 = vld [vmem:[%s7859_s26 + $0x2ed8] sm:$0xff]  ;;  %v6853_v53 = vpack.c.bf16 %v1994_v47, %v1990_v45  ;;  %v2034_v43 = vld [vmem:[%s7859_s26 + $0x2ff0] sm:$0xff]  ;;  %v2041_v45 = vld [vmem:[%s7859_s26 + $0x3028] sm:$0xff] }
 0x3b2   : > { %v2043_v47 = vld [vmem:[%s7859_s26 + $0x3038] sm:$0xff]  ;;  %v2069_v32 = vld [vmem:[%s7859_s26 + $0x3108] sm:$0xff] }
 0x3b3   : > { %5938 = vmatpush1.bf16.msra.mxu0 %v5937_v56  ;;  %v2000_v56 = vld [vmem:[%s7859_s26 + $0x2ee0] sm:$0xff]  ;;  %v2063_v21 = vld [vmem:[%s7859_s26 + $0x30d8] sm:$0xff]  ;;  %v2073_v33 = vld [vmem:[%s7859_s26 + $0x3128] sm:$0xff] }
 0x3b4   : > { %6834 = vmatpush1.bf16.msra.mxu1 %v6833_v57  ;;  %5940 = vmatprep.subr.bf16.mxu0 %v5939_v58  ;;  %v1998_v57 = vld [vmem:[%s7859_s26 + $0x2ed0] sm:$0xff]  ;;  %v6855_v58 = vpack.c.bf16 %v2003_v51, %v1999_v50  ;;  %v5961_v0 = vpack.c.bf16 %v2000_v56, %v1996_v55  ;;  %v5979_v50 = vpack.c.bf16 %v2041_v45, %v2037_v44  ;;  %v2036_v51 = vld [vmem:[%s7859_s26 + $0x3000] sm:$0xff]  ;;  %v2045_v56 = vld [vmem:[%s7859_s26 + $0x3048] sm:$0xff] }
 0x3b5   : > { %6836 = vmatprep.subr.bf16.mxu1 %v6835_v62  ;;  %v2007_v62 = vld [vmem:[%s7859_s26 + $0x2f18] sm:$0xff]  ;;  %v6857_v1 = vpack.c.bf16 %v2002_v59, %v1998_v57  ;;  %v2042_v55 = vld [vmem:[%s7859_s26 + $0x3030] sm:$0xff]  ;;  %v2049_v57 = vld [vmem:[%s7859_s26 + $0x3068] sm:$0xff] }
 0x3b6   : > { %v2051_v59 = vld [vmem:[%s7859_s26 + $0x3078] sm:$0xff]  ;;  %v2077_v44 = vld [vmem:[%s7859_s26 + $0x3148] sm:$0xff] }
 0x3b7   : > { %5942 = vmatpush1.bf16.msra.mxu0 %v5941_v4  ;;  %v2008_v4 = vld [vmem:[%s7859_s26 + $0x2f20] sm:$0xff]  ;;  %v2081_v45 = vld [vmem:[%s7859_s26 + $0x3168] sm:$0xff] }
 0x3b8   : > { %6838 = vmatpush1.bf16.msra.mxu1 %v6837_v5  ;;  %5944 = vmatprep.subr.bf16.mxu0 %v5943_v6  ;;  %v2006_v5 = vld [vmem:[%s7859_s26 + $0x2f10] sm:$0xff]  ;;  %v6859_v6 = vpack.c.bf16 %v2011_v63, %v2007_v62  ;;  %v5965_v12 = vpack.c.bf16 %v2008_v4, %v2004_v3  ;;  %v5983_v63 = vpack.c.bf16 %v2049_v57, %v2045_v56  ;;  %v2085_v56 = vld [vmem:[%s7859_s26 + $0x3188] sm:$0xff] }
 0x3b9   : > { %6840 = vmatprep.subr.bf16.mxu1 %v6839_v10  ;;  %v2015_v10 = vld [vmem:[%s7859_s26 + $0x2f58] sm:$0xff]  ;;  %v6861_v13 = vpack.c.bf16 %v2010_v7, %v2006_v5  ;;  %v2050_v4 = vld [vmem:[%s7859_s26 + $0x3070] sm:$0xff]  ;;  %v2053_v5 = vld [vmem:[%s7859_s26 + $0x3088] sm:$0xff] }
 0x3ba   : > { %v2055_v7 = vld [vmem:[%s7859_s26 + $0x3098] sm:$0xff]  ;;  %v2089_v57 = vld [vmem:[%s7859_s26 + $0x31a8] sm:$0xff] }
 0x3bb   : > { %5946 = vmatpush1.bf16.msra.mxu0 %v5945_v16  ;;  %v2016_v16 = vld [vmem:[%s7859_s26 + $0x2f60] sm:$0xff] }
 0x3bc   : > { %6842 = vmatpush1.bf16.msra.mxu1 %v6841_v17  ;;  %5948 = vmatprep.subr.bf16.mxu0 %v5947_v18  ;;  %v2014_v17 = vld [vmem:[%s7859_s26 + $0x2f50] sm:$0xff]  ;;  %v6863_v18 = vpack.c.bf16 %v2019_v11, %v2015_v10  ;;  %v5969_v24 = vpack.c.bf16 %v2016_v16, %v2012_v15  ;;  %v2056_v15 = vld [vmem:[%s7859_s26 + $0x30a0] sm:$0xff] }
 0x3bd   : > { %6844 = vmatprep.subr.bf16.mxu1 %v6843_v22  ;;  %v2023_v22 = vld [vmem:[%s7859_s26 + $0x2f98] sm:$0xff]  ;;  %v6865_v25 = vpack.c.bf16 %v2018_v19, %v2014_v17  ;;  %v486_v11 = vld [vmem:[%s7975_s12 + $0x270] sm:$0xff]  ;;  %v6883_v17 = vpack.c.bf16 %v2059_v8, %v2055_v7  ;;  %v2061_v19 = vld [vmem:[%s7859_s26 + $0x30c8] sm:$0xff] }
 0x3be   : > { %v2054_v16 = vld [vmem:[%s7859_s26 + $0x3090] sm:$0xff]  ;;  %v2099_v7 = vld [vmem:[%s7859_s26 + $0x31f8] sm:$0xff] }
 0x3bf   : > { %5950 = vmatpush1.bf16.msra.mxu0 %v5949_v28  ;;  %v2024_v28 = vld [vmem:[%s7859_s26 + $0x2fa0] sm:$0xff] }
 0x3c0   : > { %6846 = vmatpush1.bf16.msra.mxu1 %v6845_v29  ;;  %5952 = vmatprep.subr.bf16.mxu0 %v5951_v30  ;;  %v2022_v29 = vld [vmem:[%s7859_s26 + $0x2f90] sm:$0xff]  ;;  %v6867_v30 = vpack.c.bf16 %v2027_v23, %v2023_v22  ;;  %v5973_v36 = vpack.c.bf16 %v2024_v28, %v2020_v27  ;;  %v2067_v22 = vld [vmem:[%s7859_s26 + $0x30f8] sm:$0xff]  ;;  %v461_v23 = vld [vmem:[%s7975_s12 + $0xc8] sm:$0xff] }
 0x3c1   : > { %6848 = vmatprep.subr.bf16.mxu1 %v6847_v34  ;;  %v2031_v34 = vld [vmem:[%s7859_s26 + $0x2fd8] sm:$0xff]  ;;  %v6869_v37 = vpack.c.bf16 %v2026_v31, %v2022_v29  ;;  %v2060_v27 = vld [vmem:[%s7859_s26 + $0x30c0] sm:$0xff]  ;;  %v2062_v29 = vld [vmem:[%s7859_s26 + $0x30d0] sm:$0xff] }
 0x3c2   : > { %v2064_v28 = vld [vmem:[%s7859_s26 + $0x30e0] sm:$0xff]  ;;  %v2066_v31 = vld [vmem:[%s7859_s26 + $0x30f0] sm:$0xff] }
 0x3c3   : > { %5954 = vmatpush1.bf16.msra.mxu0 %v5953_v40  ;;  %v2032_v40 = vld [vmem:[%s7859_s26 + $0x2fe0] sm:$0xff] }
 0x3c4   : > { %6850 = vmatpush1.bf16.msra.mxu1 %v6849_v41  ;;  %5956 = vmatprep.subr.bf16.mxu0 %v5955_v42  ;;  %v2030_v41 = vld [vmem:[%s7859_s26 + $0x2fd0] sm:$0xff]  ;;  %v6871_v42 = vpack.c.bf16 %v2035_v35, %v2031_v34  ;;  %v5977_v48 = vpack.c.bf16 %v2032_v40, %v2028_v39  ;;  %v2071_v34 = vld [vmem:[%s7859_s26 + $0x3118] sm:$0xff]  ;;  %v2068_v39 = vld [vmem:[%s7859_s26 + $0x3100] sm:$0xff] }
 0x3c5   : > { %6852 = vmatprep.subr.bf16.mxu1 %v6851_v46  ;;  %v2039_v46 = vld [vmem:[%s7859_s26 + $0x3018] sm:$0xff]  ;;  %v6873_v49 = vpack.c.bf16 %v2034_v43, %v2030_v41  ;;  %v2072_v40 = vld [vmem:[%s7859_s26 + $0x3120] sm:$0xff]  ;;  %v2070_v41 = vld [vmem:[%s7859_s26 + $0x3110] sm:$0xff] }
 0x3c6   : > { %v2075_v35 = vld [vmem:[%s7859_s26 + $0x3138] sm:$0xff]  ;;  %v2074_v43 = vld [vmem:[%s7859_s26 + $0x3130] sm:$0xff] }
 0x3c7   : > { %5958 = vmatpush1.bf16.msra.mxu0 %v5957_v52  ;;  %v2040_v52 = vld [vmem:[%s7859_s26 + $0x3020] sm:$0xff] }
 0x3c8   : > { %6854 = vmatpush1.bf16.msra.mxu1 %v6853_v53  ;;  %5960 = vmatprep.subr.bf16.mxu0 %v5959_v54  ;;  %v2038_v53 = vld [vmem:[%s7859_s26 + $0x3010] sm:$0xff]  ;;  %v6875_v54 = vpack.c.bf16 %v2043_v47, %v2039_v46  ;;  %v5981_v61 = vpack.c.bf16 %v2040_v52, %v2036_v51  ;;  %v2079_v46 = vld [vmem:[%s7859_s26 + $0x3158] sm:$0xff]  ;;  %v2076_v51 = vld [vmem:[%s7859_s26 + $0x3140] sm:$0xff] }
 0x3c9   : > { %6856 = vmatprep.subr.bf16.mxu1 %v6855_v58  ;;  %v2047_v58 = vld [vmem:[%s7859_s26 + $0x3058] sm:$0xff]  ;;  %v6877_v62 = vpack.c.bf16 %v2042_v55, %v2038_v53  ;;  %v2080_v52 = vld [vmem:[%s7859_s26 + $0x3160] sm:$0xff]  ;;  %v2078_v53 = vld [vmem:[%s7859_s26 + $0x3150] sm:$0xff] }
 0x3ca   : > { %v6879_v3 = vpack.c.bf16 %v2051_v59, %v2047_v58  ;;  %v2083_v47 = vld [vmem:[%s7859_s26 + $0x3178] sm:$0xff]  ;;  %v2082_v55 = vld [vmem:[%s7859_s26 + $0x3170] sm:$0xff] }
 0x3cb   : > { %5962 = vmatpush1.bf16.msra.mxu0 %v5961_v0  ;;  %v2044_v0 = vld [vmem:[%s7859_s26 + $0x3040] sm:$0xff]  ;;  %v2087_v58 = vld [vmem:[%s7859_s26 + $0x3198] sm:$0xff] }
 0x3cc   : > { %6858 = vmatpush1.bf16.msra.mxu1 %v6857_v1  ;;  %5964 = vmatprep.subr.bf16.mxu0 %v5963_v2  ;;  %v2048_v1 = vld [vmem:[%s7859_s26 + $0x3060] sm:$0xff]  ;;  %v2046_v2 = vld [vmem:[%s7859_s26 + $0x3050] sm:$0xff]  ;;  %v2091_v59 = vld [vmem:[%s7859_s26 + $0x31b8] sm:$0xff] }
 0x3cd   : > { %6860 = vmatprep.subr.bf16.mxu1 %v6859_v6  ;;  %v2057_v6 = vld [vmem:[%s7859_s26 + $0x30a8] sm:$0xff]  ;;  %v5985_v10 = vpack.c.bf16 %v2048_v1, %v2044_v0  ;;  %v2088_v0 = vld [vmem:[%s7859_s26 + $0x31a0] sm:$0xff]  ;;  %v2086_v1 = vld [vmem:[%s7859_s26 + $0x3190] sm:$0xff] }
 0x3cf   : > { %5966 = vmatpush1.bf16.msra.mxu0 %v5965_v12  ;;  %v6881_v12 = vpack.c.bf16 %v2050_v4, %v2046_v2  ;;  %v6899_v2 = vpack.c.bf16 %v2091_v59, %v2087_v58  ;;  %v2093_v4 = vld [vmem:[%s7859_s26 + $0x31c8] sm:$0xff]  ;;  %v2124_v59 = vld [vmem:[%s7859_s26 + $0x32c0] sm:$0xff] }
 0x3d0   : > { %6862 = vmatpush1.bf16.msra.mxu1 %v6861_v13  ;;  %5968 = vmatprep.subr.bf16.mxu0 %v5967_v14  ;;  %v5987_v13 = vpack.c.bf16 %v2057_v6, %v2053_v5  ;;  %v2052_v14 = vld [vmem:[%s7859_s26 + $0x3080] sm:$0xff]  ;;  %v2097_v5 = vld [vmem:[%s7859_s26 + $0x31e8] sm:$0xff]  ;;  %v2095_v6 = vld [vmem:[%s7859_s26 + $0x31d8] sm:$0xff] }
 0x3d1   : > { %6864 = vmatprep.subr.bf16.mxu1 %v6863_v18  ;;  %v2058_v18 = vld [vmem:[%s7859_s26 + $0x30b0] sm:$0xff] }
 0x3d3   : > { %5970 = vmatpush1.bf16.msra.mxu0 %v5969_v24  ;;  %v5989_v24 = vpack.c.bf16 %v2056_v15, %v2052_v14  ;;  %v6903_v14 = vpack.c.bf16 %v2099_v7, %v2095_v6  ;;  %v2098_v15 = vld [vmem:[%s7859_s26 + $0x31f0] sm:$0xff]  ;;  %v2132_v7 = vld [vmem:[%s7859_s26 + $0x3300] sm:$0xff] }
 0x3d4   : > { %6866 = vmatpush1.bf16.msra.mxu1 %v6865_v25  ;;  %5972 = vmatprep.subr.bf16.mxu0 %v5971_v26  ;;  %v6885_v25 = vpack.c.bf16 %v2058_v18, %v2054_v16  ;;  %v5991_v26 = vpack.c.bf16 %v2065_v20, %v2061_v19  ;;  %v2101_v16 = vld [vmem:[%s7859_s26 + $0x3208] sm:$0xff]  ;;  %v2103_v18 = vld [vmem:[%s7859_s26 + $0x3218] sm:$0xff] }
 0x3d5   : > { %6868 = vmatprep.subr.bf16.mxu1 %v6867_v30  ;;  %v6887_v30 = vpack.c.bf16 %v2067_v22, %v2063_v21  ;;  %v2107_v19 = vld [vmem:[%s7859_s26 + $0x3238] sm:$0xff] }
 0x3d7   : > { %5974 = vmatpush1.bf16.msra.mxu0 %v5973_v36  ;;  %v5993_v36 = vpack.c.bf16 %v2064_v28, %v2060_v27  ;;  %v2106_v27 = vld [vmem:[%s7859_s26 + $0x3230] sm:$0xff]  ;;  %v2109_v28 = vld [vmem:[%s7859_s26 + $0x3248] sm:$0xff] }
 0x3d8   : > { %6870 = vmatpush1.bf16.msra.mxu1 %v6869_v37  ;;  %5976 = vmatprep.subr.bf16.mxu0 %v5975_v38  ;;  %v6889_v37 = vpack.c.bf16 %v2066_v31, %v2062_v29  ;;  %v5995_v38 = vpack.c.bf16 %v2073_v33, %v2069_v32  ;;  %v2113_v29 = vld [vmem:[%s7859_s26 + $0x3268] sm:$0xff]  ;;  %v2115_v31 = vld [vmem:[%s7859_s26 + $0x3278] sm:$0xff] }
 0x3d9   : > { %6872 = vmatprep.subr.bf16.mxu1 %v6871_v42  ;;  %v6891_v42 = vpack.c.bf16 %v2075_v35, %v2071_v34  ;;  %v6015_v34 = vpack.c.bf16 %v2113_v29, %v2109_v28  ;;  %v2108_v35 = vld [vmem:[%s7859_s26 + $0x3240] sm:$0xff] }
 0x3db   : > { %5978 = vmatpush1.bf16.msra.mxu0 %v5977_v48  ;;  %v5997_v48 = vpack.c.bf16 %v2072_v40, %v2068_v39  ;;  %v2114_v39 = vld [vmem:[%s7859_s26 + $0x3270] sm:$0xff]  ;;  %v2117_v40 = vld [vmem:[%s7859_s26 + $0x3288] sm:$0xff] }
 0x3dc   : > { %6874 = vmatpush1.bf16.msra.mxu1 %v6873_v49  ;;  %5980 = vmatprep.subr.bf16.mxu0 %v5979_v50  ;;  %v6893_v49 = vpack.c.bf16 %v2074_v43, %v2070_v41  ;;  %v5999_v50 = vpack.c.bf16 %v2081_v45, %v2077_v44  ;;  %v2121_v41 = vld [vmem:[%s7859_s26 + $0x32a8] sm:$0xff]  ;;  %v2123_v43 = vld [vmem:[%s7859_s26 + $0x32b8] sm:$0xff] }
 0x3dd   : > { %6876 = vmatprep.subr.bf16.mxu1 %v6875_v54  ;;  %v6895_v54 = vpack.c.bf16 %v2083_v47, %v2079_v46  ;;  %v6019_v46 = vpack.c.bf16 %v2121_v41, %v2117_v40  ;;  %v2116_v47 = vld [vmem:[%s7859_s26 + $0x3280] sm:$0xff] }
 0x3de   : > { %3204 = vmatmul.mubr.f32.vlgmr.msra.gmra.mrb[0].mxu0 %v458_v60 }
 0x3df   : > { %5982 = vmatpush1.bf16.msra.mxu0 %v5981_v61  ;;  %4282 = vmatmul.mubr.f32.vlgmr.msra.gmra.mrb[0].mxu1 %v458_v60  ;;  %v6001_v60 = vpack.c.bf16 %v2080_v52, %v2076_v51  ;;  %v6897_v61 = vpack.c.bf16 %v2082_v55, %v2078_v53  ;;  %v2122_v51 = vld [vmem:[%s7859_s26 + $0x32b0] sm:$0xff]  ;;  %v2125_v52 = vld [vmem:[%s7859_s26 + $0x32c8] sm:$0xff]  ;;  %v2131_v55 = vld [vmem:[%s7859_s26 + $0x32f8] sm:$0xff] }
 0x3e0   : > { %6878 = vmatpush1.bf16.msra.mxu1 %v6877_v62  ;;  %5984 = vmatprep.subr.bf16.mxu0 %v5983_v63  ;;  %v6003_v62 = vpack.c.bf16 %v2089_v57, %v2085_v56  ;;  %v2084_v63 = vld [vmem:[%s7859_s26 + $0x3180] sm:$0xff]  ;;  %v2129_v53 = vld [vmem:[%s7859_s26 + $0x32e8] sm:$0xff] }
 0x3e1   : > { %6880 = vmatprep.subr.bf16.mxu1 %v6879_v3  ;;  %3209 = vmatprep.mubr.f32.mxu0 %v487_v9  ;;  %v2090_v3 = vld [vmem:[%s7859_s26 + $0x31b0] sm:$0xff]  ;;  %v6005_v8 = vpack.c.bf16 %v2088_v0, %v2084_v63  ;;  %v6023_v58 = vpack.c.bf16 %v2129_v53, %v2125_v52  ;;  %v2133_v0 = vld [vmem:[%s7859_s26 + $0x3308] sm:$0xff] }
 0x3e2   : > { %4287 = vmatprep.mubr.f32.mxu1 %v487_v9  ;;  %3210 = vmatmul.mubr.f32.gmra.mrb[2].mxu0 %v486_v11  ;;  %v6901_v9 = vpack.c.bf16 %v2090_v3, %v2086_v1  ;;  %v2130_v63 = vld [vmem:[%s7859_s26 + $0x32f0] sm:$0xff]  ;;  %v2137_v1 = vld [vmem:[%s7859_s26 + $0x3328] sm:$0xff]  ;;  %v2139_v3 = vld [vmem:[%s7859_s26 + $0x3338] sm:$0xff] }
 0x3e3   : > { %5986 = vmatpush1.bf16.msra.mxu0 %v5985_v10  ;;  %4288 = vmatmul.mubr.f32.gmra.mrb[2].mxu1 %v486_v11  ;;  %v6007_v10 = vpack.c.bf16 %v2097_v5, %v2093_v4  ;;  %v2092_v11 = vld [vmem:[%s7859_s26 + $0x31c0] sm:$0xff]  ;;  %v6027_v6 = vpack.c.bf16 %v2137_v1, %v2133_v0 }
 0x3e4   : > { %6882 = vmatpush1.bf16.msra.mxu1 %v6881_v12  ;;  %5988 = vmatprep.subr.bf16.mxu0 %v5987_v13  ;;  %v2096_v12 = vld [vmem:[%s7859_s26 + $0x31e0] sm:$0xff]  ;;  %v2094_v13 = vld [vmem:[%s7859_s26 + $0x31d0] sm:$0xff] }
 0x3e5   : > { %6884 = vmatprep.subr.bf16.mxu1 %v6883_v17  ;;  %3280 = vmatprep.mubr.f32.mxu0 %v461_v23  ;;  %v2105_v17 = vld [vmem:[%s7859_s26 + $0x3228] sm:$0xff]  ;;  %v6009_v20 = vpack.c.bf16 %v2096_v12, %v2092_v11  ;;  %v6905_v21 = vpack.c.bf16 %v2098_v15, %v2094_v13  ;;  %v2138_v11 = vld [vmem:[%s7859_s26 + $0x3330] sm:$0xff]  ;;  %v2147_v15 = vld [vmem:[%s7859_s26 + $0x3378] sm:$0xff] }
 0x3e6   : > { %4358 = vmatprep.mubr.f32.mxu1 %v461_v23  ;;  %v6011_v22 = vpack.c.bf16 %v2105_v17, %v2101_v16  ;;  %v2100_v23 = vld [vmem:[%s7859_s26 + $0x3200] sm:$0xff]  ;;  %v2141_v12 = vld [vmem:[%s7859_s26 + $0x3348] sm:$0xff] }
 0x3e7   : > { %5990 = vmatpush1.bf16.msra.mxu0 %v5989_v24  ;;  %v2104_v24 = vld [vmem:[%s7859_s26 + $0x3220] sm:$0xff]  ;;  %v2145_v13 = vld [vmem:[%s7859_s26 + $0x3368] sm:$0xff] }
 0x3e8   : > { %6886 = vmatpush1.bf16.msra.mxu1 %v6885_v25  ;;  %5992 = vmatprep.subr.bf16.mxu0 %v5991_v26  ;;  %v2102_v25 = vld [vmem:[%s7859_s26 + $0x3210] sm:$0xff]  ;;  %v6907_v26 = vpack.c.bf16 %v2107_v19, %v2103_v18  ;;  %v6013_v32 = vpack.c.bf16 %v2104_v24, %v2100_v23  ;;  %v6031_v18 = vpack.c.bf16 %v2145_v13, %v2141_v12  ;;  %v2140_v19 = vld [vmem:[%s7859_s26 + $0x3340] sm:$0xff]  ;;  %v2149_v24 = vld [vmem:[%s7859_s26 + $0x3388] sm:$0xff] }
 0x3e9   : > { %6888 = vmatprep.subr.bf16.mxu1 %v6887_v30  ;;  %v2111_v30 = vld [vmem:[%s7859_s26 + $0x3258] sm:$0xff]  ;;  %v6909_v33 = vpack.c.bf16 %v2106_v27, %v2102_v25  ;;  %v2146_v23 = vld [vmem:[%s7859_s26 + $0x3370] sm:$0xff]  ;;  %v2153_v25 = vld [vmem:[%s7859_s26 + $0x33a8] sm:$0xff] }
 0x3ea   : > { %v2155_v27 = vld [vmem:[%s7859_s26 + $0x33b8] sm:$0xff]  ;;  %v460_v0 = vld [vmem:[%s7975_s12 + $0xc0] sm:$0xff]  ;;  %v489_v13 = vld [vmem:[%s7975_s12 + $0x288] sm:$0xff] }
 0x3eb   : > { %5994 = vmatpush1.bf16.msra.mxu0 %v5993_v36  ;;  %v2112_v36 = vld [vmem:[%s7859_s26 + $0x3260] sm:$0xff]  ;;  %v2187_v12 = vld [vmem:[%s7859_s26 + $0x34b8] sm:$0xff] }
 0x3ec   : > { %6890 = vmatpush1.bf16.msra.mxu1 %v6889_v37  ;;  %5996 = vmatprep.subr.bf16.mxu0 %v5995_v38  ;;  %v2110_v37 = vld [vmem:[%s7859_s26 + $0x3250] sm:$0xff]  ;;  %v6911_v38 = vpack.c.bf16 %v2115_v31, %v2111_v30  ;;  %v6017_v44 = vpack.c.bf16 %v2112_v36, %v2108_v35  ;;  %v6035_v30 = vpack.c.bf16 %v2153_v25, %v2149_v24  ;;  %v2148_v31 = vld [vmem:[%s7859_s26 + $0x3380] sm:$0xff]  ;;  %v2157_v36 = vld [vmem:[%s7859_s26 + $0x33c8] sm:$0xff] }
 0x3ed   : > { %6892 = vmatprep.subr.bf16.mxu1 %v6891_v42  ;;  %v2119_v42 = vld [vmem:[%s7859_s26 + $0x3298] sm:$0xff]  ;;  %v6913_v45 = vpack.c.bf16 %v2114_v39, %v2110_v37  ;;  %v2154_v35 = vld [vmem:[%s7859_s26 + $0x33b0] sm:$0xff]  ;;  %v2161_v37 = vld [vmem:[%s7859_s26 + $0x33e8] sm:$0xff] }
 0x3ee   : > { %v2163_v39 = vld [vmem:[%s7859_s26 + $0x33f8] sm:$0xff]  ;;  %v2193_v24 = vld [vmem:[%s7859_s26 + $0x34e8] sm:$0xff] }
 0x3ef   : > { %5998 = vmatpush1.bf16.msra.mxu0 %v5997_v48  ;;  %v2120_v48 = vld [vmem:[%s7859_s26 + $0x32a0] sm:$0xff]  ;;  %v2191_v25 = vld [vmem:[%s7859_s26 + $0x34d8] sm:$0xff] }
 0x3f0   : > { %6894 = vmatpush1.bf16.msra.mxu1 %v6893_v49  ;;  %6000 = vmatprep.subr.bf16.mxu0 %v5999_v50  ;;  %v2118_v49 = vld [vmem:[%s7859_s26 + $0x3290] sm:$0xff]  ;;  %v6915_v50 = vpack.c.bf16 %v2123_v43, %v2119_v42  ;;  %v6021_v56 = vpack.c.bf16 %v2120_v48, %v2116_v47  ;;  %v6039_v42 = vpack.c.bf16 %v2161_v37, %v2157_v36  ;;  %v2156_v43 = vld [vmem:[%s7859_s26 + $0x33c0] sm:$0xff]  ;;  %v2165_v48 = vld [vmem:[%s7859_s26 + $0x3408] sm:$0xff] }
 0x3f1   : > { %6896 = vmatprep.subr.bf16.mxu1 %v6895_v54  ;;  %v2127_v54 = vld [vmem:[%s7859_s26 + $0x32d8] sm:$0xff]  ;;  %v6917_v57 = vpack.c.bf16 %v2122_v51, %v2118_v49  ;;  %v2162_v47 = vld [vmem:[%s7859_s26 + $0x33f0] sm:$0xff]  ;;  %v2169_v49 = vld [vmem:[%s7859_s26 + $0x3428] sm:$0xff] }
 0x3f2   : > { %v2171_v51 = vld [vmem:[%s7859_s26 + $0x3438] sm:$0xff]  ;;  %v2197_v36 = vld [vmem:[%s7859_s26 + $0x3508] sm:$0xff] }
 0x3f3   : > { %6002 = vmatpush1.bf16.msra.mxu0 %v6001_v60  ;;  %v2128_v60 = vld [vmem:[%s7859_s26 + $0x32e0] sm:$0xff]  ;;  %v2201_v37 = vld [vmem:[%s7859_s26 + $0x3528] sm:$0xff] }
 0x3f4   : > { %6898 = vmatpush1.bf16.msra.mxu1 %v6897_v61  ;;  %6004 = vmatprep.subr.bf16.mxu0 %v6003_v62  ;;  %v2126_v61 = vld [vmem:[%s7859_s26 + $0x32d0] sm:$0xff]  ;;  %v6919_v62 = vpack.c.bf16 %v2131_v55, %v2127_v54  ;;  %v6025_v4 = vpack.c.bf16 %v2128_v60, %v2124_v59  ;;  %v6043_v54 = vpack.c.bf16 %v2169_v49, %v2165_v48  ;;  %v2164_v55 = vld [vmem:[%s7859_s26 + $0x3400] sm:$0xff]  ;;  %v2173_v60 = vld [vmem:[%s7859_s26 + $0x3448] sm:$0xff] }
 0x3f5   : > { %6900 = vmatprep.subr.bf16.mxu1 %v6899_v2  ;;  %v2135_v2 = vld [vmem:[%s7859_s26 + $0x3318] sm:$0xff]  ;;  %v6921_v5 = vpack.c.bf16 %v2130_v63, %v2126_v61  ;;  %v2170_v59 = vld [vmem:[%s7859_s26 + $0x3430] sm:$0xff]  ;;  %v2177_v61 = vld [vmem:[%s7859_s26 + $0x3468] sm:$0xff] }
 0x3f6   : > { %v2179_v63 = vld [vmem:[%s7859_s26 + $0x3478] sm:$0xff]  ;;  %v2205_v48 = vld [vmem:[%s7859_s26 + $0x3548] sm:$0xff] }
 0x3f7   : > { %6006 = vmatpush1.bf16.msra.mxu0 %v6005_v8  ;;  %v2136_v8 = vld [vmem:[%s7859_s26 + $0x3320] sm:$0xff]  ;;  %v2209_v49 = vld [vmem:[%s7859_s26 + $0x3568] sm:$0xff] }
 0x3f8   : > { %6902 = vmatpush1.bf16.msra.mxu1 %v6901_v9  ;;  %6008 = vmatprep.subr.bf16.mxu0 %v6007_v10  ;;  %v2134_v9 = vld [vmem:[%s7859_s26 + $0x3310] sm:$0xff]  ;;  %v6923_v10 = vpack.c.bf16 %v2139_v3, %v2135_v2  ;;  %v6029_v16 = vpack.c.bf16 %v2136_v8, %v2132_v7  ;;  %v6047_v3 = vpack.c.bf16 %v2177_v61, %v2173_v60  ;;  %v2213_v60 = vld [vmem:[%s7859_s26 + $0x3588] sm:$0xff] }
 0x3f9   : > { %6904 = vmatprep.subr.bf16.mxu1 %v6903_v14  ;;  %v2143_v14 = vld [vmem:[%s7859_s26 + $0x3358] sm:$0xff]  ;;  %v6925_v17 = vpack.c.bf16 %v2138_v11, %v2134_v9  ;;  %v2178_v8 = vld [vmem:[%s7859_s26 + $0x3470] sm:$0xff]  ;;  %v2181_v9 = vld [vmem:[%s7859_s26 + $0x3488] sm:$0xff] }
 0x3fa   : > { %v2183_v11 = vld [vmem:[%s7859_s26 + $0x3498] sm:$0xff]  ;;  %v2217_v61 = vld [vmem:[%s7859_s26 + $0x35a8] sm:$0xff] }
 0x3fb   : > { %6010 = vmatpush1.bf16.msra.mxu0 %v6009_v20  ;;  %v2144_v20 = vld [vmem:[%s7859_s26 + $0x3360] sm:$0xff] }
 0x3fc   : > { %6906 = vmatpush1.bf16.msra.mxu1 %v6905_v21  ;;  %6012 = vmatprep.subr.bf16.mxu0 %v6011_v22  ;;  %v2142_v21 = vld [vmem:[%s7859_s26 + $0x3350] sm:$0xff]  ;;  %v6927_v22 = vpack.c.bf16 %v2147_v15, %v2143_v14  ;;  %v6033_v28 = vpack.c.bf16 %v2144_v20, %v2140_v19  ;;  %v488_v15 = vld [vmem:[%s7975_s12 + $0x280] sm:$0xff] }
 0x3fd   : > { %6908 = vmatprep.subr.bf16.mxu1 %v6907_v26  ;;  %v2151_v26 = vld [vmem:[%s7859_s26 + $0x3398] sm:$0xff]  ;;  %v6929_v29 = vpack.c.bf16 %v2146_v23, %v2142_v21  ;;  %v2184_v19 = vld [vmem:[%s7859_s26 + $0x34a0] sm:$0xff]  ;;  %v2182_v20 = vld [vmem:[%s7859_s26 + $0x3490] sm:$0xff]  ;;  %v6947_v21 = vpack.c.bf16 %v2187_v12, %v2183_v11 }
 0x3fe   : > { %v2189_v23 = vld [vmem:[%s7859_s26 + $0x34c8] sm:$0xff]  ;;  %v2227_v11 = vld [vmem:[%s7859_s26 + $0x35f8] sm:$0xff] }
 0x3ff   : > { %6014 = vmatpush1.bf16.msra.mxu0 %v6013_v32  ;;  %v2152_v32 = vld [vmem:[%s7859_s26 + $0x33a0] sm:$0xff] }
 0x400   : > { %6910 = vmatpush1.bf16.msra.mxu1 %v6909_v33  ;;  %6016 = vmatprep.subr.bf16.mxu0 %v6015_v34  ;;  %v2150_v33 = vld [vmem:[%s7859_s26 + $0x3390] sm:$0xff]  ;;  %v6931_v34 = vpack.c.bf16 %v2155_v27, %v2151_v26  ;;  %v6037_v40 = vpack.c.bf16 %v2152_v32, %v2148_v31  ;;  %v2195_v26 = vld [vmem:[%s7859_s26 + $0x34f8] sm:$0xff]  ;;  %v2188_v31 = vld [vmem:[%s7859_s26 + $0x34c0] sm:$0xff] }
 0x401   : > { %6912 = vmatprep.subr.bf16.mxu1 %v6911_v38  ;;  %v2159_v38 = vld [vmem:[%s7859_s26 + $0x33d8] sm:$0xff]  ;;  %v6933_v41 = vpack.c.bf16 %v2154_v35, %v2150_v33  ;;  %v2192_v32 = vld [vmem:[%s7859_s26 + $0x34e0] sm:$0xff]  ;;  %v2190_v33 = vld [vmem:[%s7859_s26 + $0x34d0] sm:$0xff] }
 0x402   : > { %v463_v27 = vld [vmem:[%s7975_s12 + $0xd8] sm:$0xff]  ;;  %v2194_v35 = vld [vmem:[%s7859_s26 + $0x34f0] sm:$0xff] }
 0x403   : > { %6018 = vmatpush1.bf16.msra.mxu0 %v6017_v44  ;;  %v2160_v44 = vld [vmem:[%s7859_s26 + $0x33e0] sm:$0xff] }
 0x404   : > { %6914 = vmatpush1.bf16.msra.mxu1 %v6913_v45  ;;  %6020 = vmatprep.subr.bf16.mxu0 %v6019_v46  ;;  %v2158_v45 = vld [vmem:[%s7859_s26 + $0x33d0] sm:$0xff]  ;;  %v6935_v46 = vpack.c.bf16 %v2163_v39, %v2159_v38  ;;  %v6041_v52 = vpack.c.bf16 %v2160_v44, %v2156_v43  ;;  %v2199_v38 = vld [vmem:[%s7859_s26 + $0x3518] sm:$0xff]  ;;  %v2196_v43 = vld [vmem:[%s7859_s26 + $0x3500] sm:$0xff] }
 0x405   : > { %6916 = vmatprep.subr.bf16.mxu1 %v6915_v50  ;;  %v2167_v50 = vld [vmem:[%s7859_s26 + $0x3418] sm:$0xff]  ;;  %v6937_v53 = vpack.c.bf16 %v2162_v47, %v2158_v45  ;;  %v2200_v44 = vld [vmem:[%s7859_s26 + $0x3520] sm:$0xff]  ;;  %v2198_v45 = vld [vmem:[%s7859_s26 + $0x3510] sm:$0xff] }
 0x406   : > { %v2203_v39 = vld [vmem:[%s7859_s26 + $0x3538] sm:$0xff]  ;;  %v2202_v47 = vld [vmem:[%s7859_s26 + $0x3530] sm:$0xff] }
 0x407   : > { %6022 = vmatpush1.bf16.msra.mxu0 %v6021_v56  ;;  %v2168_v56 = vld [vmem:[%s7859_s26 + $0x3420] sm:$0xff] }
 0x408   : > { %6918 = vmatpush1.bf16.msra.mxu1 %v6917_v57  ;;  %6024 = vmatprep.subr.bf16.mxu0 %v6023_v58  ;;  %v2166_v57 = vld [vmem:[%s7859_s26 + $0x3410] sm:$0xff]  ;;  %v6939_v58 = vpack.c.bf16 %v2171_v51, %v2167_v50  ;;  %v6045_v1 = vpack.c.bf16 %v2168_v56, %v2164_v55  ;;  %v2207_v50 = vld [vmem:[%s7859_s26 + $0x3558] sm:$0xff]  ;;  %v2204_v55 = vld [vmem:[%s7859_s26 + $0x3540] sm:$0xff] }
 0x409   : > { %6920 = vmatprep.subr.bf16.mxu1 %v6919_v62  ;;  %v2175_v62 = vld [vmem:[%s7859_s26 + $0x3458] sm:$0xff]  ;;  %v6941_v2 = vpack.c.bf16 %v2170_v59, %v2166_v57  ;;  %v2208_v56 = vld [vmem:[%s7859_s26 + $0x3560] sm:$0xff]  ;;  %v2206_v57 = vld [vmem:[%s7859_s26 + $0x3550] sm:$0xff] }
 0x40a   : > { %v6943_v7 = vpack.c.bf16 %v2179_v63, %v2175_v62  ;;  %v2211_v51 = vld [vmem:[%s7859_s26 + $0x3578] sm:$0xff]  ;;  %v2210_v59 = vld [vmem:[%s7859_s26 + $0x3570] sm:$0xff] }
 0x40b   : > { %6026 = vmatpush1.bf16.msra.mxu0 %v6025_v4  ;;  %v2172_v4 = vld [vmem:[%s7859_s26 + $0x3440] sm:$0xff]  ;;  %v2215_v62 = vld [vmem:[%s7859_s26 + $0x3598] sm:$0xff] }
 0x40c   : > { %6922 = vmatpush1.bf16.msra.mxu1 %v6921_v5  ;;  %6028 = vmatprep.subr.bf16.mxu0 %v6027_v6  ;;  %v2176_v5 = vld [vmem:[%s7859_s26 + $0x3460] sm:$0xff]  ;;  %v2174_v6 = vld [vmem:[%s7859_s26 + $0x3450] sm:$0xff]  ;;  %v2219_v63 = vld [vmem:[%s7859_s26 + $0x35b8] sm:$0xff] }
 0x40d   : > { %6924 = vmatprep.subr.bf16.mxu1 %v6923_v10  ;;  %v2185_v10 = vld [vmem:[%s7859_s26 + $0x34a8] sm:$0xff]  ;;  %v6049_v14 = vpack.c.bf16 %v2176_v5, %v2172_v4  ;;  %v2216_v4 = vld [vmem:[%s7859_s26 + $0x35a0] sm:$0xff]  ;;  %v2214_v5 = vld [vmem:[%s7859_s26 + $0x3590] sm:$0xff] }
 0x40f   : > { %6030 = vmatpush1.bf16.msra.mxu0 %v6029_v16  ;;  %v6945_v16 = vpack.c.bf16 %v2178_v8, %v2174_v6  ;;  %v6963_v6 = vpack.c.bf16 %v2219_v63, %v2215_v62  ;;  %v2221_v8 = vld [vmem:[%s7859_s26 + $0x35c8] sm:$0xff]  ;;  %v2252_v63 = vld [vmem:[%s7859_s26 + $0x36c0] sm:$0xff] }
 0x410   : > { %6926 = vmatpush1.bf16.msra.mxu1 %v6925_v17  ;;  %6032 = vmatprep.subr.bf16.mxu0 %v6031_v18  ;;  %v6051_v17 = vpack.c.bf16 %v2185_v10, %v2181_v9  ;;  %v2180_v18 = vld [vmem:[%s7859_s26 + $0x3480] sm:$0xff]  ;;  %v2225_v9 = vld [vmem:[%s7859_s26 + $0x35e8] sm:$0xff]  ;;  %v2223_v10 = vld [vmem:[%s7859_s26 + $0x35d8] sm:$0xff] }
 0x411   : > { %6928 = vmatprep.subr.bf16.mxu1 %v6927_v22  ;;  %v2186_v22 = vld [vmem:[%s7859_s26 + $0x34b0] sm:$0xff] }
 0x413   : > { %6034 = vmatpush1.bf16.msra.mxu0 %v6033_v28  ;;  %v6053_v28 = vpack.c.bf16 %v2184_v19, %v2180_v18  ;;  %v6967_v18 = vpack.c.bf16 %v2227_v11, %v2223_v10  ;;  %v2226_v19 = vld [vmem:[%s7859_s26 + $0x35f0] sm:$0xff]  ;;  %v2260_v11 = vld [vmem:[%s7859_s26 + $0x3700] sm:$0xff] }
 0x414   : > { %6930 = vmatpush1.bf16.msra.mxu1 %v6929_v29  ;;  %6036 = vmatprep.subr.bf16.mxu0 %v6035_v30  ;;  %v6949_v29 = vpack.c.bf16 %v2186_v22, %v2182_v20  ;;  %v6055_v30 = vpack.c.bf16 %v2193_v24, %v2189_v23  ;;  %v2229_v20 = vld [vmem:[%s7859_s26 + $0x3608] sm:$0xff]  ;;  %v2231_v22 = vld [vmem:[%s7859_s26 + $0x3618] sm:$0xff] }
 0x415   : > { %6932 = vmatprep.subr.bf16.mxu1 %v6931_v34  ;;  %v6951_v34 = vpack.c.bf16 %v2195_v26, %v2191_v25  ;;  %v2235_v23 = vld [vmem:[%s7859_s26 + $0x3638] sm:$0xff] }
 0x417   : > { %6038 = vmatpush1.bf16.msra.mxu0 %v6037_v40  ;;  %v6057_v40 = vpack.c.bf16 %v2192_v32, %v2188_v31  ;;  %v2234_v31 = vld [vmem:[%s7859_s26 + $0x3630] sm:$0xff]  ;;  %v2237_v32 = vld [vmem:[%s7859_s26 + $0x3648] sm:$0xff] }
 0x418   : > { %6934 = vmatpush1.bf16.msra.mxu1 %v6933_v41  ;;  %6040 = vmatprep.subr.bf16.mxu0 %v6039_v42  ;;  %v6953_v41 = vpack.c.bf16 %v2194_v35, %v2190_v33  ;;  %v6059_v42 = vpack.c.bf16 %v2201_v37, %v2197_v36  ;;  %v2241_v33 = vld [vmem:[%s7859_s26 + $0x3668] sm:$0xff]  ;;  %v2243_v35 = vld [vmem:[%s7859_s26 + $0x3678] sm:$0xff] }
 0x419   : > { %6936 = vmatprep.subr.bf16.mxu1 %v6935_v46  ;;  %v6955_v46 = vpack.c.bf16 %v2203_v39, %v2199_v38  ;;  %v6079_v38 = vpack.c.bf16 %v2241_v33, %v2237_v32  ;;  %v2236_v39 = vld [vmem:[%s7859_s26 + $0x3640] sm:$0xff] }
 0x41b   : > { %6042 = vmatpush1.bf16.msra.mxu0 %v6041_v52  ;;  %v6061_v52 = vpack.c.bf16 %v2200_v44, %v2196_v43  ;;  %v2242_v43 = vld [vmem:[%s7859_s26 + $0x3670] sm:$0xff]  ;;  %v2245_v44 = vld [vmem:[%s7859_s26 + $0x3688] sm:$0xff] }
 0x41c   : > { %6938 = vmatpush1.bf16.msra.mxu1 %v6937_v53  ;;  %6044 = vmatprep.subr.bf16.mxu0 %v6043_v54  ;;  %v6957_v53 = vpack.c.bf16 %v2202_v47, %v2198_v45  ;;  %v6063_v54 = vpack.c.bf16 %v2209_v49, %v2205_v48  ;;  %v2249_v45 = vld [vmem:[%s7859_s26 + $0x36a8] sm:$0xff]  ;;  %v2251_v47 = vld [vmem:[%s7859_s26 + $0x36b8] sm:$0xff] }
 0x41d   : > { %6940 = vmatprep.subr.bf16.mxu1 %v6939_v58  ;;  %v6959_v58 = vpack.c.bf16 %v2211_v51, %v2207_v50  ;;  %v6083_v50 = vpack.c.bf16 %v2249_v45, %v2245_v44  ;;  %v2244_v51 = vld [vmem:[%s7859_s26 + $0x3680] sm:$0xff] }
 0x41e   : > { %3281 = vmatmul.mubr.f32.vlgmr.msra.gmra.mrb[0].mxu0 %v460_v0 }
 0x41f   : > { %6046 = vmatpush1.bf16.msra.mxu0 %v6045_v1  ;;  %4359 = vmatmul.mubr.f32.vlgmr.msra.gmra.mrb[0].mxu1 %v460_v0  ;;  %v6065_v0 = vpack.c.bf16 %v2208_v56, %v2204_v55  ;;  %v6961_v1 = vpack.c.bf16 %v2210_v59, %v2206_v57  ;;  %v2250_v55 = vld [vmem:[%s7859_s26 + $0x36b0] sm:$0xff]  ;;  %v2253_v56 = vld [vmem:[%s7859_s26 + $0x36c8] sm:$0xff]  ;;  %v2259_v59 = vld [vmem:[%s7859_s26 + $0x36f8] sm:$0xff] }
 0x420   : > { %6942 = vmatpush1.bf16.msra.mxu1 %v6941_v2  ;;  %6048 = vmatprep.subr.bf16.mxu0 %v6047_v3  ;;  %v6067_v2 = vpack.c.bf16 %v2217_v61, %v2213_v60  ;;  %v2212_v3 = vld [vmem:[%s7859_s26 + $0x3580] sm:$0xff]  ;;  %v2257_v57 = vld [vmem:[%s7859_s26 + $0x36e8] sm:$0xff] }
 0x421   : > { %6944 = vmatprep.subr.bf16.mxu1 %v6943_v7  ;;  %3286 = vmatprep.mubr.f32.mxu0 %v489_v13  ;;  %v2218_v7 = vld [vmem:[%s7859_s26 + $0x35b0] sm:$0xff]  ;;  %v6069_v12 = vpack.c.bf16 %v2216_v4, %v2212_v3  ;;  %v6087_v62 = vpack.c.bf16 %v2257_v57, %v2253_v56  ;;  %v2261_v4 = vld [vmem:[%s7859_s26 + $0x3708] sm:$0xff]  ;;  %v492_v57 = vld [vmem:[#allocation2] sm:$0xff] }
 0x422   : > { %4364 = vmatprep.mubr.f32.mxu1 %v489_v13  ;;  %3287 = vmatmul.mubr.f32.gmra.mrb[2].mxu0 %v488_v15  ;;  %v6965_v13 = vpack.c.bf16 %v2218_v7, %v2214_v5  ;;  %v2258_v3 = vld [vmem:[%s7859_s26 + $0x36f0] sm:$0xff]  ;;  %v2265_v5 = vld [vmem:[%s7859_s26 + $0x3728] sm:$0xff]  ;;  %v2267_v7 = vld [vmem:[%s7859_s26 + $0x3738] sm:$0xff] }
 0x423   : > { %6050 = vmatpush1.bf16.msra.mxu0 %v6049_v14  ;;  %4365 = vmatmul.mubr.f32.gmra.mrb[2].mxu1 %v488_v15  ;;  %v6071_v14 = vpack.c.bf16 %v2225_v9, %v2221_v8  ;;  %v2220_v15 = vld [vmem:[%s7859_s26 + $0x35c0] sm:$0xff]  ;;  %v6091_v10 = vpack.c.bf16 %v2265_v5, %v2261_v4  ;;  %v490_v56 = vld [vmem:[%s7975_s12 + $0x290] sm:$0xff] }
 0x424   : > { %6946 = vmatpush1.bf16.msra.mxu1 %v6945_v16  ;;  %6052 = vmatprep.subr.bf16.mxu0 %v6051_v17  ;;  %v2224_v16 = vld [vmem:[%s7859_s26 + $0x35e0] sm:$0xff]  ;;  %v2222_v17 = vld [vmem:[%s7859_s26 + $0x35d0] sm:$0xff] }
 0x425   : > { %6948 = vmatprep.subr.bf16.mxu1 %v6947_v21  ;;  %3357 = vmatprep.mubr.f32.mxu0 %v463_v27  ;;  %v2233_v21 = vld [vmem:[%s7859_s26 + $0x3628] sm:$0xff]  ;;  %v6073_v24 = vpack.c.bf16 %v2224_v16, %v2220_v15  ;;  %v6969_v25 = vpack.c.bf16 %v2226_v19, %v2222_v17  ;;  %v2266_v15 = vld [vmem:[%s7859_s26 + $0x3730] sm:$0xff]  ;;  %v2275_v19 = vld [vmem:[%s7859_s26 + $0x3778] sm:$0xff] }
 0x426   : > { %4435 = vmatprep.mubr.f32.mxu1 %v463_v27  ;;  %v6075_v26 = vpack.c.bf16 %v2233_v21, %v2229_v20  ;;  %v2228_v27 = vld [vmem:[%s7859_s26 + $0x3600] sm:$0xff]  ;;  %v2269_v16 = vld [vmem:[%s7859_s26 + $0x3748] sm:$0xff] }
 0x427   : > { %6054 = vmatpush1.bf16.msra.mxu0 %v6053_v28  ;;  %v2232_v28 = vld [vmem:[%s7859_s26 + $0x3620] sm:$0xff]  ;;  %v2273_v17 = vld [vmem:[%s7859_s26 + $0x3768] sm:$0xff] }
 0x428   : > { %6950 = vmatpush1.bf16.msra.mxu1 %v6949_v29  ;;  %6056 = vmatprep.subr.bf16.mxu0 %v6055_v30  ;;  %v2230_v29 = vld [vmem:[%s7859_s26 + $0x3610] sm:$0xff]  ;;  %v6971_v30 = vpack.c.bf16 %v2235_v23, %v2231_v22  ;;  %v6077_v36 = vpack.c.bf16 %v2232_v28, %v2228_v27  ;;  %v6095_v22 = vpack.c.bf16 %v2273_v17, %v2269_v16  ;;  %v2268_v23 = vld [vmem:[%s7859_s26 + $0x3740] sm:$0xff]  ;;  %v2277_v28 = vld [vmem:[%s7859_s26 + $0x3788] sm:$0xff] }
 0x429   : > { %6952 = vmatprep.subr.bf16.mxu1 %v6951_v34  ;;  %v2239_v34 = vld [vmem:[%s7859_s26 + $0x3658] sm:$0xff]  ;;  %v6973_v37 = vpack.c.bf16 %v2234_v31, %v2230_v29  ;;  %v2274_v27 = vld [vmem:[%s7859_s26 + $0x3770] sm:$0xff]  ;;  %v2281_v29 = vld [vmem:[%s7859_s26 + $0x37a8] sm:$0xff] }
 0x42a   : > { %v2283_v31 = vld [vmem:[%s7859_s26 + $0x37b8] sm:$0xff]  ;;  %v496_v4 = vld [vmem:[#allocation2 + $0x20] sm:$0xff] }
 0x42b   : > { %6058 = vmatpush1.bf16.msra.mxu0 %v6057_v40  ;;  %v2240_v40 = vld [vmem:[%s7859_s26 + $0x3660] sm:$0xff] }
 0x42c   : > { %6954 = vmatpush1.bf16.msra.mxu1 %v6953_v41  ;;  %6060 = vmatprep.subr.bf16.mxu0 %v6059_v42  ;;  %v2238_v41 = vld [vmem:[%s7859_s26 + $0x3650] sm:$0xff]  ;;  %v6975_v42 = vpack.c.bf16 %v2243_v35, %v2239_v34  ;;  %v6081_v48 = vpack.c.bf16 %v2240_v40, %v2236_v39  ;;  %v6099_v34 = vpack.c.bf16 %v2281_v29, %v2277_v28  ;;  %v2276_v35 = vld [vmem:[%s7859_s26 + $0x3780] sm:$0xff]  ;;  %v2285_v40 = vld [vmem:[%s7859_s26 + $0x37c8] sm:$0xff] }
 0x42d   : > { %6956 = vmatprep.subr.bf16.mxu1 %v6955_v46  ;;  %v2247_v46 = vld [vmem:[%s7859_s26 + $0x3698] sm:$0xff]  ;;  %v6977_v49 = vpack.c.bf16 %v2242_v43, %v2238_v41  ;;  %v2282_v39 = vld [vmem:[%s7859_s26 + $0x37b0] sm:$0xff]  ;;  %v2289_v41 = vld [vmem:[%s7859_s26 + $0x37e8] sm:$0xff] }
 0x42e   : > { %v2291_v43 = vld [vmem:[%s7859_s26 + $0x37f8] sm:$0xff]  ;;  %v4530_v17 = vld [vmem:[#allocation7 + $0x80] sm:$0xff] (!%p5054_p10) }
 0x42f   : > { %6062 = vmatpush1.bf16.msra.mxu0 %v6061_v52  ;;  %v2248_v52 = vld [vmem:[%s7859_s26 + $0x36a0] sm:$0xff]  ;;  %v4532_v28 = vld [vmem:[#allocation7 + $0x90] sm:$0xff] (!%p5054_p10) }
 0x430   : > { %6958 = vmatpush1.bf16.msra.mxu1 %v6957_v53  ;;  %6064 = vmatprep.subr.bf16.mxu0 %v6063_v54  ;;  %v2246_v53 = vld [vmem:[%s7859_s26 + $0x3690] sm:$0xff]  ;;  %v6979_v54 = vpack.c.bf16 %v2251_v47, %v2247_v46  ;;  %v6085_v60 = vpack.c.bf16 %v2248_v52, %v2244_v51  ;;  %v6103_v46 = vpack.c.bf16 %v2289_v41, %v2285_v40  ;;  %v2284_v47 = vld [vmem:[%s7859_s26 + $0x37c0] sm:$0xff] }
 0x431   : > { %6960 = vmatprep.subr.bf16.mxu1 %v6959_v58  ;;  %v2255_v58 = vld [vmem:[%s7859_s26 + $0x36d8] sm:$0xff]  ;;  %v6981_v61 = vpack.c.bf16 %v2250_v55, %v2246_v53  ;;  %v2290_v51 = vld [vmem:[%s7859_s26 + $0x37f0] sm:$0xff]  ;;  %v4534_v40 = vld [vmem:[#allocation7 + $0xa0] sm:$0xff] (!%p5054_p10) }
 0x432   : > { %v491_v55 = vld [vmem:[%s7975_s12 + $0x298] sm:$0xff]  ;;  %v4535_v41 = vld [vmem:[#allocation7 + $0xa8] sm:$0xff] (!%p5054_p10) }
 0x433   : > { %6066 = vmatpush1.bf16.msra.mxu0 %v6065_v0  ;;  %v2256_v0 = vld [vmem:[%s7859_s26 + $0x36e0] sm:$0xff] }
 0x434   : > { %6962 = vmatpush1.bf16.msra.mxu1 %v6961_v1  ;;  %6068 = vmatprep.subr.bf16.mxu0 %v6067_v2  ;;  %v2254_v1 = vld [vmem:[%s7859_s26 + $0x36d0] sm:$0xff]  ;;  %v6983_v2 = vpack.c.bf16 %v2259_v59, %v2255_v58  ;;  %v6089_v8 = vpack.c.bf16 %v2256_v0, %v2252_v63  ;;  %v493_v59 = vld [vmem:[#allocation2 + $0x8] sm:$0xff] }
 0x435   : > { %6964 = vmatprep.subr.bf16.mxu1 %v6963_v6  ;;  %v2263_v6 = vld [vmem:[%s7859_s26 + $0x3718] sm:$0xff]  ;;  %v6985_v9 = vpack.c.bf16 %v2258_v3, %v2254_v1  ;;  %v494_v58 = vld [vmem:[#allocation2 + $0x10] sm:$0xff] }
 0x437   : > { %6070 = vmatpush1.bf16.msra.mxu0 %v6069_v12  ;;  %v2264_v12 = vld [vmem:[%s7859_s26 + $0x3720] sm:$0xff] }
 0x438   : > { %6966 = vmatpush1.bf16.msra.mxu1 %v6965_v13  ;;  %6072 = vmatprep.subr.bf16.mxu0 %v6071_v14  ;;  %v2262_v13 = vld [vmem:[%s7859_s26 + $0x3710] sm:$0xff]  ;;  %v6987_v14 = vpack.c.bf16 %v2267_v7, %v2263_v6  ;;  %v6093_v20 = vpack.c.bf16 %v2264_v12, %v2260_v11  ;;  %v497_v7 = vld [vmem:[#allocation2 + $0x28] sm:$0xff] }
 0x439   : > { %6968 = vmatprep.subr.bf16.mxu1 %v6967_v18  ;;  %v2271_v18 = vld [vmem:[%s7859_s26 + $0x3758] sm:$0xff]  ;;  %v6989_v21 = vpack.c.bf16 %v2266_v15, %v2262_v13  ;;  %v498_v6 = vld [vmem:[#allocation2 + $0x30] sm:$0xff] }
 0x43b   : > { %6074 = vmatpush1.bf16.msra.mxu0 %v6073_v24  ;;  %v2272_v24 = vld [vmem:[%s7859_s26 + $0x3760] sm:$0xff] }
 0x43c   : > { %6970 = vmatpush1.bf16.msra.mxu1 %v6969_v25  ;;  %6076 = vmatprep.subr.bf16.mxu0 %v6075_v26  ;;  %v2270_v25 = vld [vmem:[%s7859_s26 + $0x3750] sm:$0xff]  ;;  %v6991_v26 = vpack.c.bf16 %v2275_v19, %v2271_v18  ;;  %v6097_v32 = vpack.c.bf16 %v2272_v24, %v2268_v23  ;;  %v4514_v19 = vld [vmem:[#allocation7] sm:$0xff] (!%p5054_p10) }
 0x43d   : > { %6972 = vmatprep.subr.bf16.mxu1 %v6971_v30  ;;  %v2279_v30 = vld [vmem:[%s7859_s26 + $0x3798] sm:$0xff]  ;;  %v6993_v33 = vpack.c.bf16 %v2274_v27, %v2270_v25  ;;  %v4531_v18 = vld [vmem:[#allocation7 + $0x88] sm:$0xff] (!%p5054_p10) }
 0x43e   : > { %v4563_v23 = vld [vmem:[#allocation7 + $0x188] sm:$0xff] (!%p5054_p10) }
 0x43f   : > { %6078 = vmatpush1.bf16.msra.mxu0 %v6077_v36  ;;  %v2280_v36 = vld [vmem:[%s7859_s26 + $0x37a0] sm:$0xff]  ;;  %v4547_v27 = vld [vmem:[#allocation7 + $0x108] sm:$0xff] (!%p5054_p10) }
 0x440   : > { %6974 = vmatpush1.bf16.msra.mxu1 %v6973_v37  ;;  %6080 = vmatprep.subr.bf16.mxu0 %v6079_v38  ;;  %v2278_v37 = vld [vmem:[%s7859_s26 + $0x3790] sm:$0xff]  ;;  %v6995_v38 = vpack.c.bf16 %v2283_v31, %v2279_v30  ;;  %v6101_v44 = vpack.c.bf16 %v2280_v36, %v2276_v35  ;;  %v4533_v30 = vld [vmem:[#allocation7 + $0x98] sm:$0xff] (!%p5054_p10) }
 0x441   : > { %6976 = vmatprep.subr.bf16.mxu1 %v6975_v42  ;;  %v2287_v42 = vld [vmem:[%s7859_s26 + $0x37d8] sm:$0xff]  ;;  %v6997_v45 = vpack.c.bf16 %v2282_v39, %v2278_v37 }
 0x442   : > { %v4516_v31 = vld [vmem:[#allocation7 + $0x10] sm:$0xff] (!%p5054_p10)  ;;  %v4565_v36 = vld [vmem:[#allocation7 + $0x198] sm:$0xff] (!%p5054_p10) }
 0x443   : > { %6082 = vmatpush1.bf16.msra.mxu0 %v6081_v48  ;;  %v2288_v48 = vld [vmem:[%s7859_s26 + $0x37e0] sm:$0xff]  ;;  %v4564_v35 = vld [vmem:[#allocation7 + $0x190] sm:$0xff] (!%p5054_p10) }
 0x444   : > { %6978 = vmatpush1.bf16.msra.mxu1 %v6977_v49  ;;  %6084 = vmatprep.subr.bf16.mxu0 %v6083_v50  ;;  %v6999_v49 = vpack.c.bf16 %v2291_v43, %v2287_v42  ;;  %v2286_v50 = vld [vmem:[%s7859_s26 + $0x37d0] sm:$0xff]  ;;  %v6105_v52 = vpack.c.bf16 %v2288_v48, %v2284_v47  ;;  %v4549_v39 = vld [vmem:[#allocation7 + $0x118] sm:$0xff] (!%p5054_p10)  ;;  %v7011_v43 = vpack.c.bf16 (!%p5054_p10), %v4535_v41, %v4534_v40  ;;  %v4550_v48 = vld [vmem:[#allocation7 + $0x120] sm:$0xff] (!%p5054_p10) }
 0x445   : > { %6980 = vmatprep.subr.bf16.mxu1 %v6979_v54  ;;  %v7001_v53 = vpack.c.bf16 %v2290_v51, %v2286_v50  ;;  %v462_v54 = vld [vmem:[%s7975_s12 + $0xd0] sm:$0xff]  ;;  %v4476_v41 = vld [vmem:[#allocation5] sm:$0xf] (!%p5054_p10) }
 0x446   : > { %v4548_v37 = vld [vmem:[#allocation7 + $0x110] sm:$0xff] (!%p5054_p10)  ;;  %v4567_v47 = vld [vmem:[#allocation7 + $0x1a8] sm:$0xff] (!%p5054_p10) }
 0x447   : > { %6086 = vmatpush1.bf16.msra.mxu0 %v6085_v60  ;;  %v7041_v42 = vpack.c.bf16 (!%p5054_p10), %v4549_v39, %v4548_v37  ;;  %v4559_v39 = vld [vmem:[#allocation7 + $0x168] sm:$0xff] (!%p5054_p10) }
 0x448   : > { %6982 = vmatpush1.bf16.msra.mxu1 %v6981_v61  ;;  %6088 = vmatprep.subr.bf16.mxu0 %v6087_v62  ;;  %v495_v61 = vld [vmem:[#allocation2 + $0x18] sm:$0xff] }
 0x449   : > { %6984 = vmatprep.subr.bf16.mxu1 %v6983_v2 }
 0x44b   : > { %6090 = vmatpush1.bf16.msra.mxu0 %v6089_v8 }
 0x44c   : > { %6986 = vmatpush1.bf16.msra.mxu1 %v6985_v9  ;;  %6092 = vmatprep.subr.bf16.mxu0 %v6091_v10  ;;  %v499_v9 = vld [vmem:[#allocation2 + $0x38] sm:$0xff] }
 0x44d   : > { %6988 = vmatprep.subr.bf16.mxu1 %v6987_v14 }
 0x44f   : > { %6094 = vmatpush1.bf16.msra.mxu0 %v6093_v20  ;;  %v7003_v20 = vpack.c.bf16 (!%p5054_p10), %v4531_v18, %v4530_v17 }
 0x450   : > { %6990 = vmatpush1.bf16.msra.mxu1 %v6989_v21  ;;  %6096 = vmatprep.subr.bf16.mxu0 %v6095_v22  ;;  %v4515_v21 = vld [vmem:[#allocation7 + $0x8] sm:$0xff] (!%p5054_p10)  ;;  %v4562_v22 = vld [vmem:[#allocation7 + $0x180] sm:$0xff] (!%p5054_p10) }
 0x451   : > { %6992 = vmatprep.subr.bf16.mxu1 %v6991_v26  ;;  %v7005_v24 = vpack.c.bf16 (!%p5054_p10), %v4515_v21, %v4514_v19  ;;  %v7035_v25 = vpack.c.bf16 (!%p5054_p10), %v4563_v23, %v4562_v22  ;;  %v4546_v26 = vld [vmem:[#allocation7 + $0x100] sm:$0xff] (!%p5054_p10)  ;;  %v4525_v21 = vld [vmem:[#allocation7 + $0x58] sm:$0xff] (!%p5054_p10)  ;;  %v4556_v22 = vld [vmem:[#allocation7 + $0x150] sm:$0xff] (!%p5054_p10) }
 0x452   : > { %v7037_v29 = vpack.c.bf16 (!%p5054_p10), %v4547_v27, %v4546_v26  ;;  %v4543_v26 = vld [vmem:[#allocation7 + $0xe8] sm:$0xff] (!%p5054_p10) }
 0x453   : > { %6098 = vmatpush1.bf16.msra.mxu0 %v6097_v32  ;;  %v4517_v32 = vld [vmem:[#allocation7 + $0x18] sm:$0xff] (!%p5054_p10) }
 0x454   : > { %6994 = vmatpush1.bf16.msra.mxu1 %v6993_v33  ;;  %6100 = vmatprep.subr.bf16.mxu0 %v6099_v34  ;;  %v7007_v33 = vpack.c.bf16 (!%p5054_p10), %v4533_v30, %v4532_v28  ;;  %v7009_v34 = vpack.c.bf16 (!%p5054_p10), %v4517_v32, %v4516_v31  ;;  %v4575_v30 = vld [vmem:[#allocation7 + $0x1e8] sm:$0xff] (!%p5054_p10) }
 0x455   : > { %6996 = vmatprep.subr.bf16.mxu1 %v6995_v38  ;;  %v7039_v38 = vpack.c.bf16 (!%p5054_p10), %v4565_v36, %v4564_v35  ;;  %v4558_v35 = vld [vmem:[#allocation7 + $0x160] sm:$0xff] (!%p5054_p10) }
 0x457   : > { %6102 = vmatpush1.bf16.msra.mxu0 %v6101_v44  ;;  %v4518_v44 = vld [vmem:[#allocation7 + $0x20] sm:$0xff] (!%p5054_p10) }
 0x458   : > { %6998 = vmatpush1.bf16.msra.mxu1 %v6997_v45  ;;  %6104 = vmatprep.subr.bf16.mxu0 %v6103_v46  ;;  %v4519_v45 = vld [vmem:[#allocation7 + $0x28] sm:$0xff] (!%p5054_p10)  ;;  %v4566_v46 = vld [vmem:[#allocation7 + $0x1a0] sm:$0xff] (!%p5054_p10) }
 0x459   : > { %7000 = vmatprep.subr.bf16.mxu1 %v6999_v49  ;;  %v4551_v49 = vld [vmem:[#allocation7 + $0x128] sm:$0xff] (!%p5054_p10)  ;;  %v7013_v50 = vpack.c.bf16 (!%p5054_p10), %v4519_v45, %v4518_v44  ;;  %v7043_v51 = vpack.c.bf16 (!%p5054_p10), %v4567_v47, %v4566_v46  ;;  %v4545_v44 = vld [vmem:[#allocation7 + $0xf8] sm:$0xff] (!%p5054_p10) }
 0x45b   : > { %6106 = vmatpush1.bf16.msra.mxu0 %v6105_v52  ;;  %v4536_v52 = vld [vmem:[#allocation7 + $0xb0] sm:$0xff] (!%p5054_p10) }
 0x45c   : > { %7002 = vmatpush1.bf16.msra.mxu1 %v7001_v53  ;;  %7004 = vmatprep.subr.bf16.mxu0 (!%p5054_p10), %v7003_v20  ;;  %v4537_v53 = vld [vmem:[#allocation7 + $0xb8] sm:$0xff] (!%p5054_p10)  ;;  %v4524_v20 = vld [vmem:[#allocation7 + $0x50] sm:$0xff] (!%p5054_p10) }
 0x45d   : > { %7036 = vmatprep.subr.bf16.mxu1 (!%p5054_p10), %v7035_v25  ;;  %v4542_v25 = vld [vmem:[#allocation7 + $0xe0] sm:$0xff] (!%p5054_p10)  ;;  %v7025_v32 = vpack.c.bf16 (!%p5054_p10), %v4525_v21, %v4524_v20 }
 0x45e   : > { %3358 = vmatmul.mubr.f32.vlgmr.msra.gmra.mrb[0].mxu0 %v462_v54 }
 0x45f   : > { %4436 = vmatmul.mubr.f32.vlgmr.msra.gmra.mrb[0].mxu1 %v462_v54  ;;  %3363 = vmatprep.mubr.f32.mxu0 %v491_v55  ;;  %v4520_v54 = vld [vmem:[#allocation7 + $0x30] sm:$0xff] (!%p5054_p10) }
 0x460   : > { %4441 = vmatprep.mubr.f32.mxu1 %v491_v55  ;;  %7006 = vmatpush3.bf16.msra.mxu0 (!%p5054_p10), %v7005_v24  ;;  %v7045_v55 = vpack.c.bf16 (!%p5054_p10), %v4551_v49, %v4550_v48  ;;  %v4557_v24 = vld [vmem:[#allocation7 + $0x158] sm:$0xff] (!%p5054_p10)  ;;  %v4528_v48 = vld [vmem:[#allocation7 + $0x70] sm:$0xff] (!%p5054_p10) }
 0x461   : > { %7038 = vmatpush3.bf16.msra.mxu1 (!%p5054_p10), %v7037_v29  ;;  %7008 = vmatprep.subr.bf16.mxu0 (!%p5054_p10), %v7007_v33  ;;  %v4574_v29 = vld [vmem:[#allocation7 + $0x1e0] sm:$0xff] (!%p5054_p10)  ;;  %v7057_v37 = vpack.c.bf16 (!%p5054_p10), %v4557_v24, %v4556_v22  ;;  %v4576_v49 = vld [vmem:[#allocation7 + $0x1f0] sm:$0xff] (!%p5054_p10) }
 0x462   : > { %3364 = vmatmul.mubr.f32.gmra.mrb[2].mxu0 %v490_v56  ;;  %7040 = vmatprep.subr.bf16.mxu1 (!%p5054_p10), %v7039_v38  ;;  %v4526_v33 = vld [vmem:[#allocation7 + $0x60] sm:$0xff] (!%p5054_p10)  ;;  %v7027_v38 = vpack.c.bf16 (!%p5054_p10), %v4543_v26, %v4542_v25 }
 0x463   : > { %4442 = vmatmul.mubr.f32.gmra.mrb[2].mxu1 %v490_v56  ;;  %v7015_v56 = vpack.c.bf16 (!%p5054_p10), %v4537_v53, %v4536_v52  ;;  %v4529_v53 = vld [vmem:[#allocation7 + $0x78] sm:$0xff] (!%p5054_p10)  ;;  %v4742_v26 = vld [vmem:[%s9806_s5 + $0x28] sm:$0xff] (!%p5054_p10) }
 0x464   : > { %7010 = vmatpush3.bf16.msra.mxu0 (!%p5054_p10), %v7009_v34  ;;  %v4527_v34 = vld [vmem:[#allocation7 + $0x68] sm:$0xff] (!%p5054_p10)  ;;  %v4741_v25 = vld [vmem:[%s9806_s5 + $0x20] sm:$0xff] (!%p5054_p10) }
 0x465   : > { %7042 = vmatpush3.bf16.msra.mxu1 (!%p5054_p10), %v7041_v42  ;;  %7012 = vmatprep.subr.bf16.mxu0 (!%p5054_p10), %v7011_v43  ;;  %v7059_v42 = vpack.c.bf16 (!%p5054_p10), %v4575_v30, %v4574_v29  ;;  %v4544_v43 = vld [vmem:[#allocation7 + $0xf0] sm:$0xff] (!%p5054_p10)  ;;  %v7029_v52 = vpack.c.bf16 (!%p5054_p10), %v4527_v34, %v4526_v33  ;;  %v4746_v33 = vld [vmem:[%s9806_s5 + $0x48] sm:$0xff] (!%p5054_p10) }
 0x466   : > { %7044 = vmatprep.subr.bf16.mxu1 (!%p5054_p10), %v7043_v51  ;;  %v4743_v29 = vld [vmem:[%s9806_s5 + $0x30] sm:$0xff] (!%p5054_p10)  ;;  %v4744_v30 = vld [vmem:[%s9806_s5 + $0x38] sm:$0xff] (!%p5054_p10) }
 0x468   : > { %7014 = vmatpush3.bf16.msra.mxu0 (!%p5054_p10), %v7013_v50  ;;  %v4577_v50 = vld [vmem:[#allocation7 + $0x1f8] sm:$0xff] (!%p5054_p10) }
 0x469   : > { %7046 = vmatpush3.bf16.msra.mxu1 (!%p5054_p10), %v7045_v55  ;;  %7016 = vmatprep.subr.bf16.mxu0 (!%p5054_p10), %v7015_v56 }
 0x531   : > { %v3359_v60 = vpop.f32.mrb[0].mxu0 }
 0x532   : > { %v4448_v62 = vadd.f32 %v3359_v60, %v492_v57  ;;  %v4437_v63 = vpop.f32.mrb[0].mxu1  ;;  %v3361_v0 = vpop.f32.mrb[1].mxu0  ;;  %v4521_v57 = vld [vmem:[#allocation7 + $0x38] sm:$0xff] (!%p5054_p10) }
 0x533   : > { %v4450_v1 = vadd.f32 %v4437_v63, %v494_v58  ;;  %v4449_v2 = vadd.f32 %v3361_v0, %v493_v59  ;;  %v4439_v3 = vpop.f32.mrb[1].mxu1  ;;  %v4568_v58 = vld [vmem:[#allocation7 + $0x1b0] sm:$0xff] (!%p5054_p10)  ;;  %v4569_v59 = vld [vmem:[#allocation7 + $0x1b8] sm:$0xff] (!%p5054_p10)  ;;  %v4538_v63 = vld [vmem:[#allocation7 + $0xc0] sm:$0xff] (!%p5054_p10)  ;;  %v4478_v0 = vlaneseq (!%p5054_p10) }
 0x534   : > { %4456 = vst [vmem:[#allocation2] sm:$0xff] %v4448_v62  ;;  %v4451_v5 = vadd.f32 %v4439_v3, %v495_v61  ;;  %4467 = sbr.rel (%p5054_p10) target bundleno = 2014 (0x7de), region = 92  ;;  %v7047_v60 = vpack.c.bf16 (!%p5054_p10), %v4569_v59, %v4568_v58  ;;  %v4552_v61 = vld [vmem:[#allocation7 + $0x130] sm:$0xff] (!%p5054_p10)  ;;  %v4553_v62 = vld [vmem:[#allocation7 + $0x138] sm:$0xff] (!%p5054_p10)  ;;  %v4570_v3 = vld [vmem:[#allocation7 + $0x1c0] sm:$0xff] (!%p5054_p10)  ;;  %v7061_v59 = vpack.c.bf16 (!%p5054_p10), %v4559_v39, %v4558_v35 }
 0x535   : > { %4458 = vst [vmem:[#allocation2 + $0x10] sm:$0xff] %v4450_v1  ;;  %4457 = vst [vmem:[#allocation2 + $0x8] sm:$0xff] %v4449_v2  ;;  %v3365_v8 = vpop.f32.mrb[2].mxu0  ;;  %v4539_v1 = vld [vmem:[#allocation7 + $0xc8] sm:$0xff] (!%p5054_p10)  ;;  %v7017_v2 = vpack.c.bf16 (!%p5054_p10), %v4521_v57, %v4520_v54  ;;  %v4560_v54 = vld [vmem:[#allocation7 + $0x170] sm:$0xff] (!%p5054_p10) }
 0x536   : > { %4459 = vst [vmem:[#allocation2 + $0x18] sm:$0xff] %v4451_v5  ;;  %v4452_v10 = vadd.f32 %v3365_v8, %v496_v4  ;;  %v4443_v11 = vpop.f32.mrb[2].mxu1  ;;  %v3367_v12 = vpop.f32.mrb[3].mxu0  ;;  %v4571_v4 = vld [vmem:[#allocation7 + $0x1c8] sm:$0xff] (!%p5054_p10)  ;;  %v7049_v5 = vpack.c.bf16 (!%p5054_p10), %v4553_v62, %v4552_v61  ;;  %7048 = vmatprep.subr.bf16.mxu1 (!%p5054_p10), %v7047_v60  ;;  %v7031_v60 = vpack.c.bf16 (!%p5054_p10), %v4545_v44, %v4544_v43  ;;  %v4561_v61 = vld [vmem:[#allocation7 + $0x178] sm:$0xff] (!%p5054_p10) }
 0x537   : > { %v4454_v13 = vadd.f32 %v4443_v11, %v498_v6  ;;  %v4453_v14 = vadd.f32 %v3367_v12, %v497_v7  ;;  %v4445_v15 = vpop.f32.mrb[3].mxu1  ;;  %v7019_v6 = vpack.c.bf16 (!%p5054_p10), %v4539_v1, %v4538_v63  ;;  %v4522_v7 = vld [vmem:[#allocation7 + $0x40] sm:$0xff] (!%p5054_p10)  ;;  %v4523_v8 = vld [vmem:[#allocation7 + $0x48] sm:$0xff] (!%p5054_p10)  ;;  %v4540_v12 = vld [vmem:[#allocation7 + $0xd0] sm:$0xff] (!%p5054_p10)  ;;  %7018 = vmatpush3.bf16.msra.mxu0 (!%p5054_p10), %v7017_v2 }
 0x538   : > { %4460 = vst [vmem:[#allocation2 + $0x20] sm:$0xff] %v4452_v10  ;;  %v4455_v16 = vadd.f32 %v4445_v15, %v499_v9  ;;  %v4554_v9 = vld [vmem:[#allocation7 + $0x140] sm:$0xff] (!%p5054_p10)  ;;  %v7051_v10 = vpack.c.bf16 (!%p5054_p10), %v4571_v4, %v4570_v3  ;;  %v4555_v11 = vld [vmem:[#allocation7 + $0x148] sm:$0xff] (!%p5054_p10)  ;;  %v4572_v15 = vld [vmem:[#allocation7 + $0x1d0] sm:$0xff] (!%p5054_p10)  ;;  %v7021_v17 = vpack.c.bf16 (!%p5054_p10), %v4523_v8, %v4522_v7  ;;  %7050 = vmatpush3.bf16.msra.mxu1 (!%p5054_p10), %v7049_v5 }
 0x539   : > { %4462 = vst [vmem:[#allocation2 + $0x30] sm:$0xff] %v4454_v13  ;;  %4461 = vst [vmem:[#allocation2 + $0x28] sm:$0xff] %v4453_v14  ;;  %v4541_v13 = vld [vmem:[#allocation7 + $0xd8] sm:$0xff] (!%p5054_p10)  ;;  %v4479_v14 = vshrl.u32 (!%p5054_p10), %v4478_v0, 7  ;;  %7020 = vmatprep.subr.bf16.mxu0 (!%p5054_p10), %v7019_v6  ;;  %v7053_v18 = vpack.c.bf16 (!%p5054_p10), %v4555_v11, %v4554_v9  ;;  %v7063_v0 = vpack.c.bf16 (!%p5054_p10), %v4577_v50, %v4576_v49  ;;  %v4738_v5 = vld [vmem:[%s9806_s5 + $0x8] sm:$0xff] (!%p5054_p10) }
 0x53a   : > { %4463 = vst [vmem:[#allocation2 + $0x38] sm:$0xff] %v4455_v16  ;;  %v4573_v16 = vld [vmem:[#allocation7 + $0x1d8] sm:$0xff] (!%p5054_p10)  ;;  %v7023_v19 = vpack.c.bf16 (!%p5054_p10), %v4541_v13, %v4540_v12  ;;  %7052 = vmatprep.subr.bf16.mxu1 (!%p5054_p10), %v7051_v10  ;;  %v7033_v7 = vpack.c.bf16 (!%p5054_p10), %v4529_v53, %v4528_v48  ;;  %v7065_v11 = vpack.c.bf16 (!%p5054_p10), %v4561_v61, %v4560_v54  ;;  %v4747_v35 = vld [vmem:[%s9806_s5 + $0x50] sm:$0xff] (!%p5054_p10)  ;;  %v4750_v39 = vld [vmem:[%s9806_s5 + $0x68] sm:$0xff] (!%p5054_p10) }
 0x53b   : > { %v7055_v23 = vpack.c.bf16 %v4573_v16, %v4572_v15  ;;  %v4484_v27 = vsub.s32 1, %v4479_v14  ;;  %v4492_v28 = vsub.s32 3, %v4479_v14  ;;  %v4480_v31 = vsub.s32 0, %v4479_v14  ;;  %7022 = vmatpush3.bf16.msra.mxu0 %v7021_v17  ;;  %v4468_v56 = vld [vmem:[#allocation2] sm:$0xff]  ;;  %v4739_v17 = vld [vmem:[%s9806_s5 + $0x10] sm:$0xff]  ;;  %v4841_v44 = vld [vmem:[#allocation11] sm:$0xff] }
 0x53c   : > { %v4488_v36 = vsub.s32 2, %v4479_v14  ;;  %7054 = vmatpush3.bf16.msra.mxu1 %v7053_v18  ;;  %7024 = vmatprep.subr.bf16.mxu0 %v7023_v19  ;;  %v4469_v40 = vld [vmem:[#allocation2 + $0x8] sm:$0xff]  ;;  %v4470_v62 = vld [vmem:[#allocation2 + $0x10] sm:$0xff]  ;;  %v4737_v4 = vld [vmem:[%s9806_s5] sm:$0xff] }
 0x53d   : > { %7056 = vmatprep.subr.bf16.mxu1 %v7055_v23  ;;  %v4485_v45 = vrot.slane %v4476_v41, %v4484_v27  ;;  %v4471_v46 = vld [vmem:[#allocation2 + $0x18] sm:$0xff]  ;;  %v4493_v47 = vrot.slane %v4476_v41, %v4492_v28  ;;  %v4481_v51 = vrot.slane %v4476_v41, %v4480_v31  ;;  %v7067_v14 = vpack.c.bf16 %v4738_v5, %v4737_v4  ;;  %v5055_v48 = vld [vmem:[#allocation8] ss:$0 sm:$0xff]  ;;  %v5056_v5 = vld [vmem:[#allocation10] ss:$0 sm:$0xff] }
 0x53e   : > { %v4489_v58 = vrot.slane %v4476_v41, %v4488_v36  ;;  %v4740_v18 = vld [vmem:[%s9806_s5 + $0x18] sm:$0xff]  ;;  %v7075_v28 = vpack.c.bf16 %v4742_v26, %v4741_v25  ;;  %v7079_v31 = vpack.c.bf16 %v4744_v30, %v4743_v29  ;;  %v4751_v41 = vld [vmem:[%s9806_s5 + $0x70] sm:$0xff] }
 0x53f   : > { %7026 = vmatpush3.bf16.msra.mxu0 %v7025_v32  ;;  %v4499_v55 = vadd.f32 %v4485_v45, %v4469_v40  ;;  %v4501_v57 = vadd.f32 %v4493_v47, %v4471_v46  ;;  %v4498_v6 = vadd.f32 %v4481_v51, %v4468_v56  ;;  %v4472_v10 = vld [vmem:[#allocation2 + $0x20] sm:$0xff]  ;;  %v7071_v23 = vpack.c.bf16 %v4740_v18, %v4739_v17  ;;  %v4748_v36 = vld [vmem:[%s9806_s5 + $0x58] sm:$0xff] }
 0x540   : > { %7058 = vmatpush3.bf16.msra.mxu1 %v7057_v37  ;;  %7028 = vmatprep.subr.bf16.mxu0 %v7027_v38  ;;  %v4473_v63 = vld [vmem:[#allocation2 + $0x28] sm:$0xff]  ;;  %v4500_v8 = vadd.f32 %v4489_v58, %v4470_v62  ;;  %v4474_v13 = vld [vmem:[#allocation2 + $0x30] sm:$0xff]  ;;  %v4502_v16 = vadd.f32 %v4481_v51, %v4472_v10  ;;  %v4745_v32 = vld [vmem:[%s9806_s5 + $0x40] sm:$0xff]  ;;  %v7087_v37 = vpack.c.bf16 %v4748_v36, %v4747_v35 }
 0x541   : > { %7060 = vmatprep.subr.bf16.mxu1 %v7059_v42  ;;  %v4507_v1 = vmax.f32 %v4499_v55, 0.0  ;;  %v4509_v2 = vmax.f32 %v4501_v57, 0.0  ;;  %v4475_v3 = vld [vmem:[#allocation2 + $0x38] sm:$0xff]  ;;  %v4503_v9 = vadd.f32 %v4485_v45, %v4473_v63  ;;  %v4506_v15 = vmax.f32 %v4498_v6, 0.0  ;;  %v4749_v38 = vld [vmem:[%s9806_s5 + $0x60] sm:$0xff]  ;;  %v4842_v45 = vld [vmem:[#allocation11 + $0x8] sm:$0xff] }
 0x542   : > { %v4505_v12 = vadd.f32 %v4493_v47, %v4475_v3  ;;  %v4508_v19 = vmax.f32 %v4500_v8, 0.0  ;;  %v4504_v21 = vadd.f32 %v4489_v58, %v4474_v13  ;;  %v4510_v24 = vmax.f32 %v4502_v16, 0.0  ;;  %v4752_v42 = vld [vmem:[%s9806_s5 + $0x78] sm:$0xff]  ;;  %v4844_v3 = vld [vmem:[#allocation11 + $0x18] sm:$0xff] }
 0x543   : > { %7030 = vmatpush3.bf16.msra.mxu0 %v7029_v52  ;;  %4649 = vmatprep.mubr.f32.mxu0 %v4507_v1  ;;  %v4511_v20 = vmax.f32 %v4503_v9, 0.0  ;;  %v7083_v34 = vpack.c.bf16 %v4746_v33, %v4745_v32  ;;  %v7091_v40 = vpack.c.bf16 %v4750_v39, %v4749_v38  ;;  %v7095_v43 = vpack.c.bf16 %v4752_v42, %v4751_v41 }
 0x544   : > { %7062 = vmatpush3.bf16.msra.mxu1 %v7061_v59  ;;  %7032 = vmatprep.subr.bf16.mxu0 %v7031_v60  ;;  %v4513_v22 = vmax.f32 %v4505_v12, 0.0  ;;  %v4512_v27 = vmax.f32 %v4504_v21, 0.0  ;;  %v7099_v46 = vpack.c.bf16 %v4842_v45, %v4841_v44 }
 0x545   : > { %7064 = vmatprep.subr.bf16.mxu1 %v7063_v0  ;;  %4724 = vmatprep.mubr.f32.mxu1 %v4509_v2  ;;  %v4843_v2 = vld [vmem:[#allocation11 + $0x10] sm:$0xff] }
 0x546   : > { %v7103_v4 = vpack.c.bf16 %v4844_v3, %v4843_v2 }
 0x547   : > { %7034 = vmatpush3.bf16.msra.mxu0 %v7033_v7 }
 0x548   : > { %7066 = vmatpush3.bf16.msra.mxu1 %v7065_v11  ;;  %7068 = vmatprep.subr.bf16.mxu0 %v7067_v14 }
 0x549   : > { %7100 = vmatprep.subr.bf16.mxu1 %v7099_v46 }
 0x54a   : > { %4650 = vmatmul.mubr.f32.vlgmr.msra.gmra.mrb[0].mxu0 %v4506_v15 }
 0x54b   : > { %4725 = vmatmul.mubr.f32.vlgmr.msra.gmra.mrb[0].mxu1 %v4508_v19  ;;  %4654 = vmatprep.mubr.f32.mxu0 %v4511_v20 }
 0x54c   : > { %4729 = vmatprep.mubr.f32.mxu1 %v4513_v22  ;;  %7070 = vmatpush3.bf16.msra.mxu0 %v7067_v14  ;;  %v5057_v14 = vld [vmem:[#allocation13] ss:$0 sm:$0xff] }
 0x54d   : > { %7072 = vmatprep.subr.bf16.mxu0 %v7071_v23  ;;  %7102 = vmatpush3.bf16.msra.mxu1 %v7099_v46 }
 0x54e   : > { %4655 = vmatmul.mubr.f32.gmra.mrb[2].mxu0 %v4510_v24  ;;  %7104 = vmatprep.subr.bf16.mxu1 %v7103_v4 }
 0x54f   : > { %4730 = vmatmul.mubr.f32.gmra.mrb[2].mxu1 %v4512_v27 }
 0x550   : > { %7074 = vmatpush3.bf16.msra.mxu0 %v7071_v23 }
 0x551   : > { %7076 = vmatprep.subr.bf16.mxu0 %v7075_v28  ;;  %7106 = vmatpush3.bf16.msra.mxu1 %v7103_v4 }
 0x554   : > { %7078 = vmatpush3.bf16.msra.mxu0 %v7075_v28 }
 0x555   : > { %7080 = vmatprep.subr.bf16.mxu0 %v7079_v31 }
 0x558   : > { %7082 = vmatpush3.bf16.msra.mxu0 %v7079_v31 }
 0x559   : > { %7084 = vmatprep.subr.bf16.mxu0 %v7083_v34 }
 0x55c   : > { %7086 = vmatpush3.bf16.msra.mxu0 %v7083_v34 }
 0x55d   : > { %7088 = vmatprep.subr.bf16.mxu0 %v7087_v37 }
 0x560   : > { %7090 = vmatpush3.bf16.msra.mxu0 %v7087_v37 }
 0x561   : > { %7092 = vmatprep.subr.bf16.mxu0 %v7091_v40 }
 0x564   : > { %7094 = vmatpush3.bf16.msra.mxu0 %v7091_v40 }
 0x565   : > { %7096 = vmatprep.subr.bf16.mxu0 %v7095_v43 }
 0x568   : > { %7098 = vmatpush3.bf16.msra.mxu0 %v7095_v43 }
 0x61d   : > { %v5097_v47 = vpop.f32.mrb[0].mxu0 }
 0x61e   : > { %v5098_v49 = vpop.f32.mrb[1].mxu0  ;;  %v5135_v50 = vpop.f32.mrb[0].mxu1 }
 0x61f   : > { %v5099_v51 = vadd.f32 %v5098_v49, %v5097_v47  ;;  %v5136_v52 = vpop.f32.mrb[1].mxu1 }
 0x620   : > { %v5137_v53 = vadd.f32 %v5136_v52, %v5135_v50 }
 0x621   : > { %v4652_v54 = vadd.f32 %v5099_v51, %v5055_v48  ;;  %v5100_v55 = vpop.f32.mrb[2].mxu0 }
 0x622   : > { %v5101_v56 = vpop.f32.mrb[3].mxu0  ;;  %v5138_v57 = vpop.f32.mrb[2].mxu1 }
 0x623   : > { %v4727_v58 = vadd.f32 %v5137_v53, %v4652_v54  ;;  %v5102_v59 = vadd.f32 %v5101_v56, %v5100_v55  ;;  %v5139_v60 = vpop.f32.mrb[3].mxu1 }
 0x624   : > { %v5140_v61 = vadd.f32 %v5139_v60, %v5138_v57 }
 0x625   : > { %v4735_v62 = vmax.f32 %v4727_v58, 0.0  ;;  %v4657_v63 = vadd.f32 %v5102_v59, %v5055_v48 }
 0x627   : > { %v4732_v0 = vadd.f32 %v5140_v61, %v4657_v63  ;;  %5197 = vmatprep.mubr.f32.mxu0 %v4735_v62 }
 0x629   : > { %v4736_v1 = vmax.f32 %v4732_v0, 0.0 }
 0x62b   : > { %5198 = vmatmul.mubr.f32.vlgmr.msra.gmra.mrb[4].mxu0 %v4736_v1 }
 0x6fe   : > { %v5199_v6 = vpop.f32.mrb[4].mxu0 }
 0x6ff   : > { %v4832_v7 = vadd.f32 %v5199_v6, %v5056_v5  ;;  %v4826_v8 = vpop.f32.mrb[5].mxu0 }
 0x700   : > { %v4827_v9 = vadd.f32 %v5056_v5, %v4826_v8 }
 0x701   : > { %v4838_v10 = vmul.f32 0.01, %v4832_v7  ;;  %vm4836_vm0 = vcmp.gt.f32.partialorder %v4832_v7, 0.0 }
 0x702   : > { %vm4835_vm1 = vcmp.gt.f32.partialorder %v4827_v9, 0.0  ;;  %v4837_v11 = vmul.f32 0.01, %v4827_v9 }
 0x703   : > { %v4840_v13 = vsel %vm4836_vm0, %v4832_v7, %v4838_v10 }
 0x704   : > { %v4839_v12 = vsel %vm4835_vm1, %v4827_v9, %v4837_v11 }
 0x705   : > { %5208 = vmatprep.mubr.msk.f32.mxu1 %vm4852_vm2, %v4839_v12 }
 0x706   : > { %5209 = vmatmul.mubr.msk.f32.vlgmr.msra.gmra.mrb[4].mxu1 %vm4852_vm2, %v4840_v13 }
 0x7d9   : > { %v5210_v15 = vpop.f32.mrb[4].mxu1 }
 0x7da   : > { %v4931_v16 = vadd.f32 %v5210_v15, %v5057_v14  ;;  %v4925_v17 = vpop.f32.mrb[5].mxu1 }
 0x7db   : > { %v4926_v18 = vadd.f32 %v5057_v14, %v4925_v17 }
 0x7dc   : > { %4935 = vst [vmem:[%s9833_s16 + $0x8] sm:$0xff] %v4931_v16 }
 0x7dd   : > { %4934 = vst [vmem:[%s9833_s16] sm:$0xff] %v4926_v18 }
 0x7de PF: > { %p22_p12 = scmp.ge.s32.totalorder %s7795_s27, 4   ;;  %s9834_s30 = smov %s7554_s10 }
 0x7df   : > { %s9835_s10 = smov %s7558_s11  ;;  %s9836_s11 = smov %s7807_s13 }
 0x7e0   : > { %s9837_s12 = smov %s7795_s27  ;;  %24 = sbr.rel (!%p22_p12) target bundleno = 10 (0xa), region = 125 }
 0x7e7   :  { %4947 = vsyncpa [#allocation4], 1 }
 0x7e8   :  { %4949 = vsyncpa [#allocation4 + $0x1], 1 }
 0x7e9   :  { %4950 = vsyncpa [#allocation6], 1 }
 0x7ea   :  { %4951 = vsyncpa [#allocation9], 1 }
 0x7eb   :  { %4952 = vsyncpa [#allocation12], 1 }

</bundles_post_ra>
